<compile_context>
chip_gen: v5e
topology: v5e:2x2
jax: 0.10.0
libtpu: 0.0.40
codegen_flags: <defaults>
</compile_context>

<pallas_src>
import jax
import jax.numpy as jnp
from jax.experimental import pallas as pl
from jax.experimental.pallas import tpu as pltpu
from jax.scipy.linalg import block_diag

# ----------------------------- config ---------------------------------------
NEMB = 32                 # GraphAgent_model nemb
D = 2 * NEMB              # 64  (StateEmbeddingNet runs at 2*nemb)
DP = 128                  # lane-padded feature width (lane-dense)
NVEC = 8                  # vec_data feature dim ('v1' concatenates it)
NUM_CONV_STEPS = 3
NUM_TRUE_BLOCKS = 10      # mdp_cfg.num_true_blocks -> block embedding table (11, D)
NUM_STEM_TYPES = 5        # mdp_cfg.num_stem_types  -> bond embedding table (5, D)

N_NODES = 8               # nodes per mini-batch graph-pair
N_EDGES = 10              # edges per mini-batch
N_GRAPHS = 2              # graphs per mini-batch

NP = 8                    # node rows per mini-batch (== N_NODES)
EP = 16                   # padded edge rows per mini-batch

BS = 16                   # mini-batches stacked per grid block (sublane axis) -> M = 128
NB = 2                    # grid blocks ("parallel" axis; one per TensorCore on v7x)
# (v6e/v5e tuning knob: BS=32, NB=1 gives M=256 and a single grid step.)

NR = BS * NP              # 128 node rows per block
ER = BS * EP              # 256 edge rows per block
GR = BS * N_GRAPHS        # 32  graph rows per block

# weight-slab lane offsets (each logical block is DP=128 lanes wide)
C_B2E_W1 = 0 * DP
C_B2E_W2 = 1 * DP
C_ROOT = 2 * DP
C_WI = 3 * DP             # fused [r|z|n] input weights, 3*DP wide
C_WH = 6 * DP             # fused [r|z|n] hidden weights, 3*DP wide
C_PW1 = 9 * DP
W_LANES = 10 * DP         # 1280

BIAS_ROWS = 8
BIAS_LANES = 3 * DP       # 384


# ----------------------------- kernel ---------------------------------------
def graph_agent_kernel(node_ref, edge_ref, agg_ref, w_ref, b_ref, out_ref):
    f32 = jnp.float32
    bf = jnp.bfloat16
    lrelu = lambda v: jnp.where(v > 0, v, 0.01 * v)           # nn.LeakyReLU default slope
    # bf16 MXU path, f32 accumulation; all element-wise math stays f32.
    dotf = lambda a, b: jnp.dot(a.astype(bf), b.astype(bf), preferred_element_type=f32)

    # ---- hoisted, loop-invariant loads (all lane-dense, no sub-128 lane slices) ----
    x_in = node_ref[pl.ds(0, NR), :]                          # [NR, DP]  x_emb ++ vec_data[batch]
    pool = node_ref[pl.ds(NR, GR), :].astype(bf)              # [GR, NR]  block-diag mean pool
    e0 = edge_ref[pl.ds(0, ER), :]                            # [ER, DP]  bondemb(edge_attr[:,0])
    e1 = edge_ref[pl.ds(ER, ER), :]                           # [ER, DP]  bondemb(edge_attr[:,1])
    src_oh = edge_ref[pl.ds(2 * ER, ER), :].astype(bf)        # [ER, NR]  block-diag src one-hot
    agg = agg_ref[...].astype(bf)                             # [NR, ER]  block-diag scatter-mean

    b2e_w1 = w_ref[:, pl.ds(C_B2E_W1, DP)]                    # bf16 [DP, DP]
    b2e_w2 = w_ref[:, pl.ds(C_B2E_W2, DP)]
    root = w_ref[:, pl.ds(C_ROOT, DP)]
    wi = w_ref[:, pl.ds(C_WI, 3 * DP)]                        # fused GRU input weights  [DP, 3*DP]
    wh = w_ref[:, pl.ds(C_WH, 3 * DP)]                        # fused GRU hidden weights [DP, 3*DP]
    pw1 = w_ref[:, pl.ds(C_PW1, DP)]

    bias = b_ref[...]                                         # f32 [8, 3*DP]
    b2e_b1 = bias[0:1, 0:DP]
    b2e_b2 = bias[0:1, DP:2 * DP]
    pb1 = bias[3:4, 0:DP]                                     # lane D holds the "1" homogeneous coord
    pw2row = bias[3:4, DP:2 * DP]                             # lane D holds pb2
    # Hoisted full-size bias broadcasts (reused 3x inside the unrolled conv loop).
    cbias = jnp.broadcast_to(bias[0:1, 2 * DP:3 * DP], (NR, DP))
    bi = jnp.broadcast_to(bias[1:2, :], (NR, 3 * DP))         # fused [b_ir|b_iz|b_in]
    bh = jnp.broadcast_to(bias[2:3, :], (NR, 3 * DP))         # fused [b_hr|b_hz|b_hn]

    # ---- block2emb: Linear(D+nvec, D) -> LeakyReLU -> Linear(D, D) ----
    h1 = lrelu(dotf(x_in, b2e_w1) + b2e_b1)
    out = dotf(h1, b2e_w2) + b2e_b2                           # [NR, DP], padded lanes stay 0
    h = out                                                   # GRU hidden state (h = out.unsqueeze(0))

    for _ in range(NUM_CONV_STEPS):
        # NNConv(aggr='mean'): edge net is identity and edge_attr = outer(e0,e1).reshape(E,D*D)
        # in the reference, so W_e is rank-1 and x_j @ W_e == (x_j . e0) * e1 exactly.
        x_src = dotf(src_oh, out)                             # [ER, DP] gather of source features
        msgs = jnp.sum(x_src * e0, axis=1, keepdims=True) * e1  # [ER, DP] per-edge messages (f32 VPU)
        aggr = dotf(agg, msgs)                                # [NR, DP] mean over incoming edges
        m = lrelu(aggr + dotf(out, root) + cbias)             # + root weight + bias

        # GRU cell (PyTorch nn.GRU, seq_len=1; gate order r, z, n), fused gates:
        gi = dotf(m, wi) + bi                                 # [NR, 3*DP]
        gh = dotf(h, wh) + bh                                 # [NR, 3*DP]
        r = jax.nn.sigmoid(gi[:, 0:DP] + gh[:, 0:DP])
        z = jax.nn.sigmoid(gi[:, DP:2 * DP] + gh[:, DP:2 * DP])
        n = jnp.tanh(gi[:, 2 * DP:3 * DP] + r * gh[:, 2 * DP:3 * DP])
        h = (1.0 - z) * n + z * h
        out = h

    # ---- global_mean_pool + global2pred ----
    ge = dotf(pool, out)                                      # [GR, DP]
    p = lrelu(dotf(ge, pw1) + pb1)                            # [GR, DP], p[:, D] == 1
    # D->1 head on the VPU; pb2 rides along via the homogeneous-coordinate lane.
    mol = jnp.sum(p * pw2row, axis=1, keepdims=True)          # [GR, 1]
    out_ref[...] = jnp.broadcast_to(mol, (GR, DP))            # lane-dense (unmasked) store


# ----------------------------- wrapper ---------------------------------------
def graph_agent_forward(node_slab, edge_slab, agg_mat, weights, biases):
    nb = node_slab.shape[0]
    out = pl.pallas_call(
        graph_agent_kernel,
        out_shape=jax.ShapeDtypeStruct((nb, GR, DP), jnp.float32),
        grid=(nb,),
        in_specs=[
            pl.BlockSpec((None, NR + GR, DP), lambda b: (b, 0, 0)),     # x_in ++ pool
            pl.BlockSpec((None, 3 * ER, DP), lambda b: (b, 0, 0)),      # e0 ++ e1 ++ src_oh
            pl.BlockSpec((None, NR, ER), lambda b: (b, 0, 0)),          # block-diag scatter-mean
            pl.BlockSpec((DP, W_LANES), lambda b: (0, 0)),              # shared bf16 weight slab
            pl.BlockSpec((BIAS_ROWS, BIAS_LANES), lambda b: (0, 0)),    # shared f32 bias slab
        ],
        out_specs=pl.BlockSpec((None, GR, DP), lambda b: (b, 0, 0)),
        compiler_params=pltpu.CompilerParams(dimension_semantics=("parallel",)),
    )(node_slab, edge_slab, agg_mat, weights, biases)
    # one slice + reshape for all stacked mini-batches
    return out[:, :, 0:1].reshape(nb * BS, N_GRAPHS, 1)


# ----------------------------- glue / params ---------------------------------
def _pad2(a, rows, cols):
    a = jnp.asarray(a, jnp.float32)
    return jnp.zeros((rows, cols), jnp.float32).at[:a.shape[0], :a.shape[1]].set(a)


def _dense(key, in_dim, out_dim, scale=0.1):
    kw, kb = jax.random.split(key)
    w = jax.random.normal(kw, (in_dim, out_dim), jnp.float32) * scale   # pre-transposed [in, out]
    b = jax.random.normal(kb, (1, out_dim), jnp.float32) * scale
    return w, b


def build_model_params(key):
    ks = jax.random.split(key, 16)
    p = {}
    p["blockemb"] = jax.random.normal(ks[0], (NUM_TRUE_BLOCKS + 1, D), jnp.float32) * 0.1
    p["bondemb"] = jax.random.normal(ks[1], (NUM_STEM_TYPES, D), jnp.float32) * 0.1
    p["b2e_w1"], p["b2e_b1"] = _dense(ks[2], D + NVEC, D)      # block2emb[0]
    p["b2e_w2"], p["b2e_b2"] = _dense(ks[3], D, D)             # block2emb[2]
    p["root"] = jax.random.normal(ks[4], (D, D), jnp.float32) * 0.1   # NNConv root weight
    p["cbias"] = jax.random.normal(ks[5], (1, D), jnp.float32) * 0.1  # NNConv bias
    p["wir"], p["bir"] = _dense(ks[6], D, D)
    p["wiz"], p["biz"] = _dense(ks[7], D, D)
    p["win"], p["bin"] = _dense(ks[8], D, D)
    p["whr"], p["bhr"] = _dense(ks[9], D, D)
    p["whz"], p["bhz"] = _dense(ks[10], D, D)
    p["whn"], p["bhn"] = _dense(ks[11], D, D)
    p["pw1"], p["pb1"] = _dense(ks[12], D, D)                  # global2pred[0]
    p["pw2"], p["pb2"] = _dense(ks[13], D, 1)                  # global2pred[2]
    return p


def _assert_padding_invariants(weights, biases):
    """Zero-padding is load-bearing: padded weight rows/cols and bias lanes must be 0."""
    w = weights.astype(jnp.float32)
    blocks = [C_B2E_W1, C_B2E_W2, C_ROOT, C_WI, C_WI + DP, C_WI + 2 * DP,
              C_WH, C_WH + DP, C_WH + 2 * DP, C_PW1]
    for c in blocks:
        assert bool(jnp.all(w[:, c + D:c + DP] == 0.0)), "padded weight cols must be zero"
    assert bool(jnp.all(w[D + NVEC:, C_B2E_W1:C_B2E_W1 + DP] == 0.0)), "b2e_w1 padded rows"
    for c in blocks[1:]:
        assert bool(jnp.all(w[D:, c:c + DP] == 0.0)), "padded weight rows must be zero"
    assert bool(biases[3, D] == 1.0), "homogeneous-coordinate lane pb1[D] must equal 1"
    assert bool(jnp.all(biases[0:3].reshape(3, 3, DP)[:, :, D:] == 0.0)), "padded bias lanes"


def pack_params(p):
    """All weights -> one [128, 1280] bf16 slab; all biases -> one [8, 384] f32 slab."""
    pad = lambda a: _pad2(a, DP, DP)
    wi = jnp.concatenate([pad(p["wir"]), pad(p["wiz"]), pad(p["win"])], axis=1)   # [128, 384]
    wh = jnp.concatenate([pad(p["whr"]), pad(p["whz"]), pad(p["whn"])], axis=1)   # [128, 384]
    weights = jnp.concatenate(
        [pad(p["b2e_w1"]), pad(p["b2e_w2"]), pad(p["root"]), wi, wh, pad(p["pw1"])], axis=1)

    row = lambda a: _pad2(a, 1, DP)
    # Homogeneous-coordinate trick: force p[:, D] == 1 via pb1, put pb2 at pw2_row[D],
    # so the final bias is picked up by the VPU reduce in the kernel (head row stays f32).
    pb1_aug = row(p["pb1"]).at[0, D].set(1.0)
    pw2_aug = row(p["pw2"].T).at[0, D].set(p["pb2"][0, 0])
    bias_rows = jnp.concatenate([
        jnp.concatenate([row(p["b2e_b1"]), row(p["b2e_b2"]), row(p["cbias"])], axis=1),
        jnp.concatenate([row(p["bir"]), row(p["biz"]), row(p["bin"])], axis=1),
        jnp.concatenate([row(p["bhr"]), row(p["bhz"]), row(p["bhn"])], axis=1),
        jnp.concatenate([pb1_aug, pw2_aug, jnp.zeros((1, DP), jnp.float32)], axis=1),
    ], axis=0)
    biases = _pad2(bias_rows, BIAS_ROWS, BIAS_LANES)

    weights = weights.astype(jnp.bfloat16)            # native MXU path, half the weight DMA
    _assert_padding_invariants(weights, biases)
    return weights, biases


def build_graphs(key):
    """NB*BS independent deterministic mini-batches of N_GRAPHS small graphs."""
    edge_index = jnp.array([[0, 1, 2, 3, 0, 4, 5, 6, 7, 4],
                            [1, 2, 3, 0, 2, 5, 6, 7, 4, 6]], dtype=jnp.int32)   # within-batch ids
    batch = jnp.array([0, 0, 0, 0, 1, 1, 1, 1], dtype=jnp.int32)                # graph id per node
    graphs = []
    for kb in jax.random.split(key, NB * BS):
        k1, k2, k3 = jax.random.split(kb, 3)
        graphs.append(dict(
            x_idx=jax.random.randint(k1, (N_NODES,), 0, NUM_TRUE_BLOCKS + 1),
            edge_attr=jax.random.randint(k2, (N_EDGES, 2), 0, NUM_STEM_TYPES),
            edge_index=edge_index, batch=batch,
            vec_data=jax.random.normal(k3, (N_GRAPHS, NVEC), jnp.float32)))
    return graphs


def pack_graph_data(p, graphs):
    """Embedding gathers + block-diagonal structure matrices for BS stacked mini-batches."""
    node_slabs, edge_slabs, agg_mats = [], [], []
    for blk in range(NB):
        xs, e0s, e1s, srcs, aggs, pools = [], [], [], [], [], []
        for g in graphs[blk * BS:(blk + 1) * BS]:
            ei, bt = g["edge_index"], g["batch"]
            x_in = jnp.concatenate([p["blockemb"][g["x_idx"]], g["vec_data"][bt]], axis=1)  # [N, D+nvec]
            e = p["bondemb"][g["edge_attr"]]                                                 # [E, 2, D]
            xs.append(_pad2(x_in, NP, DP))
            e0s.append(_pad2(e[:, 0, :], EP, DP))
            e1s.append(_pad2(e[:, 1, :], EP, DP))
            srcs.append(_pad2(jax.nn.one_hot(ei[0], N_NODES, dtype=jnp.float32), EP, NP))    # [EP, NP]
            indeg = jnp.zeros((N_NODES,), jnp.float32).at[ei[1]].add(1.0)
            agg = (jax.nn.one_hot(ei[1], N_NODES, dtype=jnp.float32).T
                   * (1.0 / jnp.maximum(indeg, 1.0))[:, None])                               # [N, E]
            aggs.append(_pad2(agg, NP, EP))
            counts = jnp.zeros((N_GRAPHS,), jnp.float32).at[bt].add(1.0)
            pools.append(jax.nn.one_hot(bt, N_GRAPHS, dtype=jnp.float32).T
                         * (1.0 / jnp.maximum(counts, 1.0))[:, None])                        # [G, N]
        node_slabs.append(jnp.concatenate(
            [jnp.concatenate(xs, axis=0), block_diag(*pools)], axis=0))                      # [NR+GR, DP]
        edge_slabs.append(jnp.concatenate(
            [jnp.concatenate(e0s, axis=0), jnp.concatenate(e1s, axis=0),
             block_diag(*srcs)], axis=0))                                                    # [3*ER, DP]
        agg_mats.append(block_diag(*aggs))                                                   # [NR, ER]
    return (jnp.stack(node_slabs, axis=0),       # [NB, NR+GR, DP]
            jnp.stack(edge_slabs, axis=0),       # [NB, 3*ER, DP]
            jnp.stack(agg_mats, axis=0))         # [NB, NR, ER]


# ----------------------------- pure-JAX reference -----------------------------
def jax_reference(p, g):
    hi = jax.lax.Precision.HIGHEST
    lrelu = lambda v: jnp.where(v > 0, v, 0.01 * v)
    mm = lambda a, b: jnp.dot(a, b, precision=hi)

    src, dst, bt = g["edge_index"][0], g["edge_index"][1], g["batch"]
    x_in = jnp.concatenate([p["blockemb"][g["x_idx"]], g["vec_data"][bt]], axis=1)
    e = p["bondemb"][g["edge_attr"]]
    e0, e1 = e[:, 0, :], e[:, 1, :]

    out = mm(lrelu(mm(x_in, p["b2e_w1"]) + p["b2e_b1"]), p["b2e_w2"]) + p["b2e_b2"]
    h = out
    for _ in range(NUM_CONV_STEPS):
        msgs = jnp.sum(out[src] * e0, axis=1, keepdims=True) * e1
        s = jnp.zeros((N_NODES, D), jnp.float32).at[dst].add(msgs)
        c = jnp.zeros((N_NODES, 1), jnp.float32).at[dst].add(1.0)
        aggr = s / jnp.maximum(c, 1.0)
        m = lrelu(aggr + mm(out, p["root"]) + p["cbias"])
        r = jax.nn.sigmoid(mm(m, p["wir"]) + p["bir"] + mm(h, p["whr"]) + p["bhr"])
        z = jax.nn.sigmoid(mm(m, p["wiz"]) + p["biz"] + mm(h, p["whz"]) + p["bhz"])
        n = jnp.tanh(mm(m, p["win"]) + p["bin"] + r * (mm(h, p["whn"]) + p["bhn"]))
        h = (1.0 - z) * n + z * h
        out = h
    gs = jnp.zeros((N_GRAPHS, D), jnp.float32).at[bt].add(out)
    gc = jnp.zeros((N_GRAPHS, 1), jnp.float32).at[bt].add(1.0)
    ge = gs / gc
    pp = lrelu(mm(ge, p["pw1"]) + p["pb1"])
    return mm(pp, p["pw2"]) + p["pb2"]


if __name__ == "__main__":
    key = jax.random.PRNGKey(0)
    kp, kg = jax.random.split(key)
    params = build_model_params(kp)
    graphs = build_graphs(kg)

    weights, biases = pack_params(params)
    node_slab, edge_slab, agg_mat = pack_graph_data(params, graphs)

    mol_preds = graph_agent_forward(node_slab, edge_slab, agg_mat, weights, biases)
    mol_preds = jax.block_until_ready(mol_preds)
    assert mol_preds.shape == (NB * BS, N_GRAPHS, 1)
    assert bool(jnp.all(jnp.isfinite(mol_preds)))

    ref_fn = jax.jit(jax_reference)
    ref = jnp.stack([ref_fn(params, g) for g in graphs], axis=0)
    err = float(jnp.max(jnp.abs(mol_preds - ref)))
    assert bool(jnp.allclose(mol_preds, ref, rtol=5e-2, atol=1e-2)), f"max abs err {err}"
    print("KERNEL_OK")
</pallas_src>

<mosaic_0001>
module attributes {stable_mosaic.version = 11 : i64} {
  func.func @graph_agent_kernel(%arg0: i32, %arg1: memref<1x160x128xf32, #tpu.memory_space<vmem>>, %arg2: memref<1x768x128xf32, #tpu.memory_space<vmem>>, %arg3: memref<1x128x256xf32, #tpu.memory_space<vmem>>, %arg4: memref<128x1280xbf16, #tpu.memory_space<vmem>>, %arg5: memref<8x384xf32, #tpu.memory_space<vmem>>, %arg6: memref<1x32x128xf32, #tpu.memory_space<vmem>>) attributes {dimension_semantics = [#tpu.dimension_semantics<parallel>], iteration_bounds = array<i64: 2>, scalar_prefetch = 0 : i64, scratch_operands = 0 : i64, tpu.core_type = #tpu.core_type<tc>, window_params = [{transform_indices = @transform_0, window_bounds = array<i64: 1, 160, 128>}, {transform_indices = @transform_1, window_bounds = array<i64: 1, 768, 128>}, {transform_indices = @transform_2, window_bounds = array<i64: 1, 128, 256>}, {pipeline_mode = #tpu.pipeline_mode<synchronous>, transform_indices = @transform_3, window_bounds = array<i64: 128, 1280>}, {pipeline_mode = #tpu.pipeline_mode<synchronous>, transform_indices = @transform_4, window_bounds = array<i64: 8, 384>}, {transform_indices = @transform_5, window_bounds = array<i64: 1, 32, 128>}]} {
    %c0 = arith.constant 0 : index
    %c0_0 = arith.constant 0 : index
    %c0_1 = arith.constant 0 : index
    %0 = vector.load %arg1[%c0, %c0_0, %c0_1] : memref<1x160x128xf32, #tpu.memory_space<vmem>>, vector<1x128x128xf32>
    %1 = vector.shape_cast %0 : vector<1x128x128xf32> to vector<128x128xf32>
    %c0_2 = arith.constant 0 : index
    %c128 = arith.constant 128 : index
    %c0_3 = arith.constant 0 : index
    %2 = vector.load %arg1[%c0_2, %c128, %c0_3] : memref<1x160x128xf32, #tpu.memory_space<vmem>>, vector<1x32x128xf32>
    %3 = vector.shape_cast %2 : vector<1x32x128xf32> to vector<32x128xf32>
    %4 = arith.truncf %3 : vector<32x128xf32> to vector<32x128xbf16>
    %c0_4 = arith.constant 0 : index
    %c0_5 = arith.constant 0 : index
    %c0_6 = arith.constant 0 : index
    %5 = vector.load %arg2[%c0_4, %c0_5, %c0_6] : memref<1x768x128xf32, #tpu.memory_space<vmem>>, vector<1x256x128xf32>
    %6 = vector.shape_cast %5 : vector<1x256x128xf32> to vector<256x128xf32>
    %c0_7 = arith.constant 0 : index
    %c256 = arith.constant 256 : index
    %c0_8 = arith.constant 0 : index
    %7 = vector.load %arg2[%c0_7, %c256, %c0_8] : memref<1x768x128xf32, #tpu.memory_space<vmem>>, vector<1x256x128xf32>
    %8 = vector.shape_cast %7 : vector<1x256x128xf32> to vector<256x128xf32>
    %c0_9 = arith.constant 0 : index
    %c512 = arith.constant 512 : index
    %c0_10 = arith.constant 0 : index
    %9 = vector.load %arg2[%c0_9, %c512, %c0_10] : memref<1x768x128xf32, #tpu.memory_space<vmem>>, vector<1x256x128xf32>
    %10 = vector.shape_cast %9 : vector<1x256x128xf32> to vector<256x128xf32>
    %11 = arith.truncf %10 : vector<256x128xf32> to vector<256x128xbf16>
    %c0_11 = arith.constant 0 : index
    %c0_12 = arith.constant 0 : index
    %c0_13 = arith.constant 0 : index
    %12 = vector.load %arg3[%c0_11, %c0_12, %c0_13] : memref<1x128x256xf32, #tpu.memory_space<vmem>>, vector<1x128x256xf32>
    %13 = vector.shape_cast %12 : vector<1x128x256xf32> to vector<128x256xf32>
    %14 = arith.truncf %13 : vector<128x256xf32> to vector<128x256xbf16>
    %c0_14 = arith.constant 0 : index
    %c0_15 = arith.constant 0 : index
    %15 = vector.load %arg4[%c0_14, %c0_15] : memref<128x1280xbf16, #tpu.memory_space<vmem>>, vector<128x128xbf16>
    %c0_16 = arith.constant 0 : index
    %c128_17 = arith.constant 128 : index
    %16 = vector.load %arg4[%c0_16, %c128_17] : memref<128x1280xbf16, #tpu.memory_space<vmem>>, vector<128x128xbf16>
    %c0_18 = arith.constant 0 : index
    %c256_19 = arith.constant 256 : index
    %17 = vector.load %arg4[%c0_18, %c256_19] : memref<128x1280xbf16, #tpu.memory_space<vmem>>, vector<128x128xbf16>
    %c0_20 = arith.constant 0 : index
    %c384 = arith.constant 384 : index
    %18 = vector.load %arg4[%c0_20, %c384] : memref<128x1280xbf16, #tpu.memory_space<vmem>>, vector<128x384xbf16>
    %c0_21 = arith.constant 0 : index
    %c768 = arith.constant 768 : index
    %19 = vector.load %arg4[%c0_21, %c768] : memref<128x1280xbf16, #tpu.memory_space<vmem>>, vector<128x384xbf16>
    %c0_22 = arith.constant 0 : index
    %c1152 = arith.constant 1152 : index
    %20 = vector.load %arg4[%c0_22, %c1152] : memref<128x1280xbf16, #tpu.memory_space<vmem>>, vector<128x128xbf16>
    %c0_23 = arith.constant 0 : index
    %c0_24 = arith.constant 0 : index
    %21 = vector.load %arg5[%c0_23, %c0_24] : memref<8x384xf32, #tpu.memory_space<vmem>>, vector<8x384xf32>
    %22 = vector.extract_strided_slice %21 {offsets = [0, 0], sizes = [1, 128], strides = [1, 1]} : vector<8x384xf32> to vector<1x128xf32>
    %23 = vector.extract_strided_slice %21 {offsets = [0, 128], sizes = [1, 128], strides = [1, 1]} : vector<8x384xf32> to vector<1x128xf32>
    %24 = vector.extract_strided_slice %21 {offsets = [3, 0], sizes = [1, 128], strides = [1, 1]} : vector<8x384xf32> to vector<1x128xf32>
    %25 = vector.extract_strided_slice %21 {offsets = [3, 128], sizes = [1, 128], strides = [1, 1]} : vector<8x384xf32> to vector<1x128xf32>
    %26 = vector.extract_strided_slice %21 {offsets = [0, 256], sizes = [1, 128], strides = [1, 1]} : vector<8x384xf32> to vector<1x128xf32>
    %27 = vector.shape_cast %26 : vector<1x128xf32> to vector<1x128xf32>
    %28 = vector.broadcast %27 : vector<1x128xf32> to vector<128x128xf32>
    %29 = vector.extract_strided_slice %21 {offsets = [1, 0], sizes = [1, 384], strides = [1, 1]} : vector<8x384xf32> to vector<1x384xf32>
    %30 = vector.shape_cast %29 : vector<1x384xf32> to vector<1x384xf32>
    %31 = vector.broadcast %30 : vector<1x384xf32> to vector<128x384xf32>
    %32 = vector.extract_strided_slice %21 {offsets = [2, 0], sizes = [1, 384], strides = [1, 1]} : vector<8x384xf32> to vector<1x384xf32>
    %33 = vector.shape_cast %32 : vector<1x384xf32> to vector<1x384xf32>
    %34 = vector.broadcast %33 : vector<1x384xf32> to vector<128x384xf32>
    %35 = arith.truncf %1 : vector<128x128xf32> to vector<128x128xbf16>
    %cst = arith.constant dense<0.000000e+00> : vector<128x128xf32>
    %36 = tpu.matmul %35, %15, %cst {dimension_numbers = #tpu.dot_dimension_numbers<[1], [0], [0], [1], [0, 0, 1, 1], [], []>} : vector<128x128xbf16>, vector<128x128xbf16>, vector<128x128xf32> -> vector<128x128xf32>
    %37 = vector.broadcast %22 : vector<1x128xf32> to vector<128x128xf32>
    %38 = arith.addf %36, %37 : vector<128x128xf32>
    %cst_25 = arith.constant 0.000000e+00 : f32
    %39 = vector.broadcast %cst_25 : f32 to vector<128x128xf32>
    %40 = arith.cmpf ogt, %38, %39 : vector<128x128xf32>
    %cst_26 = arith.constant 0.00999999977 : f32
    %41 = vector.broadcast %cst_26 : f32 to vector<128x128xf32>
    %42 = arith.mulf %41, %38 : vector<128x128xf32>
    %43 = arith.select %40, %38, %42 : vector<128x128xi1>, vector<128x128xf32>
    %44 = arith.truncf %43 : vector<128x128xf32> to vector<128x128xbf16>
    %cst_27 = arith.constant dense<0.000000e+00> : vector<128x128xf32>
    %45 = tpu.matmul %44, %16, %cst_27 {dimension_numbers = #tpu.dot_dimension_numbers<[1], [0], [0], [1], [0, 0, 1, 1], [], []>} : vector<128x128xbf16>, vector<128x128xbf16>, vector<128x128xf32> -> vector<128x128xf32>
    %46 = vector.broadcast %23 : vector<1x128xf32> to vector<128x128xf32>
    %47 = arith.addf %45, %46 : vector<128x128xf32>
    %48 = arith.truncf %47 : vector<128x128xf32> to vector<128x128xbf16>
    %cst_28 = arith.constant dense<0.000000e+00> : vector<256x128xf32>
    %49 = tpu.matmul %11, %48, %cst_28 {dimension_numbers = #tpu.dot_dimension_numbers<[1], [0], [0], [1], [0, 0, 1, 1], [], []>} : vector<256x128xbf16>, vector<128x128xbf16>, vector<256x128xf32> -> vector<256x128xf32>
    %50 = arith.mulf %49, %6 : vector<256x128xf32>
    %cst_29 = arith.constant dense<0.000000e+00> : vector<256xf32>
    %51 = vector.multi_reduction <add>, %50, %cst_29 [1] : vector<256x128xf32> to vector<256xf32>
    %52 = vector.shape_cast %51 : vector<256xf32> to vector<256x1xf32>
    %53 = vector.broadcast %52 : vector<256x1xf32> to vector<256x128xf32>
    %54 = arith.mulf %53, %8 : vector<256x128xf32>
    %55 = arith.truncf %54 : vector<256x128xf32> to vector<256x128xbf16>
    %cst_30 = arith.constant dense<0.000000e+00> : vector<128x128xf32>
    %56 = tpu.matmul %14, %55, %cst_30 {dimension_numbers = #tpu.dot_dimension_numbers<[1], [0], [0], [1], [0, 0, 1, 1], [], []>} : vector<128x256xbf16>, vector<256x128xbf16>, vector<128x128xf32> -> vector<128x128xf32>
    %57 = arith.truncf %47 : vector<128x128xf32> to vector<128x128xbf16>
    %cst_31 = arith.constant dense<0.000000e+00> : vector<128x128xf32>
    %58 = tpu.matmul %57, %17, %cst_31 {dimension_numbers = #tpu.dot_dimension_numbers<[1], [0], [0], [1], [0, 0, 1, 1], [], []>} : vector<128x128xbf16>, vector<128x128xbf16>, vector<128x128xf32> -> vector<128x128xf32>
    %59 = arith.addf %56, %58 : vector<128x128xf32>
    %60 = arith.addf %59, %28 : vector<128x128xf32>
    %cst_32 = arith.constant 0.000000e+00 : f32
    %61 = vector.broadcast %cst_32 : f32 to vector<128x128xf32>
    %62 = arith.cmpf ogt, %60, %61 : vector<128x128xf32>
    %cst_33 = arith.constant 0.00999999977 : f32
    %63 = vector.broadcast %cst_33 : f32 to vector<128x128xf32>
    %64 = arith.mulf %63, %60 : vector<128x128xf32>
    %65 = arith.select %62, %60, %64 : vector<128x128xi1>, vector<128x128xf32>
    %66 = arith.truncf %65 : vector<128x128xf32> to vector<128x128xbf16>
    %cst_34 = arith.constant dense<0.000000e+00> : vector<128x384xf32>
    %67 = tpu.matmul %66, %18, %cst_34 {dimension_numbers = #tpu.dot_dimension_numbers<[1], [0], [0], [1], [0, 0, 1, 1], [], []>} : vector<128x128xbf16>, vector<128x384xbf16>, vector<128x384xf32> -> vector<128x384xf32>
    %68 = arith.addf %67, %31 : vector<128x384xf32>
    %69 = arith.truncf %47 : vector<128x128xf32> to vector<128x128xbf16>
    %cst_35 = arith.constant dense<0.000000e+00> : vector<128x384xf32>
    %70 = tpu.matmul %69, %19, %cst_35 {dimension_numbers = #tpu.dot_dimension_numbers<[1], [0], [0], [1], [0, 0, 1, 1], [], []>} : vector<128x128xbf16>, vector<128x384xbf16>, vector<128x384xf32> -> vector<128x384xf32>
    %71 = arith.addf %70, %34 : vector<128x384xf32>
    %72 = vector.extract_strided_slice %68 {offsets = [0, 0], sizes = [128, 128], strides = [1, 1]} : vector<128x384xf32> to vector<128x128xf32>
    %73 = vector.extract_strided_slice %71 {offsets = [0, 0], sizes = [128, 128], strides = [1, 1]} : vector<128x384xf32> to vector<128x128xf32>
    %74 = arith.addf %72, %73 : vector<128x128xf32>
    %75 = arith.negf %74 : vector<128x128xf32>
    %76 = math.exp %75 : vector<128x128xf32>
    %cst_36 = arith.constant 1.000000e+00 : f32
    %77 = vector.broadcast %cst_36 : f32 to vector<128x128xf32>
    %78 = arith.addf %77, %76 : vector<128x128xf32>
    %79 = arith.divf %77, %78 : vector<128x128xf32>
    %80 = vector.extract_strided_slice %68 {offsets = [0, 128], sizes = [128, 128], strides = [1, 1]} : vector<128x384xf32> to vector<128x128xf32>
    %81 = vector.extract_strided_slice %71 {offsets = [0, 128], sizes = [128, 128], strides = [1, 1]} : vector<128x384xf32> to vector<128x128xf32>
    %82 = arith.addf %80, %81 : vector<128x128xf32>
    %83 = arith.negf %82 : vector<128x128xf32>
    %84 = math.exp %83 : vector<128x128xf32>
    %cst_37 = arith.constant 1.000000e+00 : f32
    %85 = vector.broadcast %cst_37 : f32 to vector<128x128xf32>
    %86 = arith.addf %85, %84 : vector<128x128xf32>
    %87 = arith.divf %85, %86 : vector<128x128xf32>
    %88 = vector.extract_strided_slice %68 {offsets = [0, 256], sizes = [128, 128], strides = [1, 1]} : vector<128x384xf32> to vector<128x128xf32>
    %89 = vector.extract_strided_slice %71 {offsets = [0, 256], sizes = [128, 128], strides = [1, 1]} : vector<128x384xf32> to vector<128x128xf32>
    %90 = arith.mulf %79, %89 : vector<128x128xf32>
    %91 = arith.addf %88, %90 : vector<128x128xf32>
    %92 = math.tanh %91 : vector<128x128xf32>
    %cst_38 = arith.constant 1.000000e+00 : f32
    %93 = vector.broadcast %cst_38 : f32 to vector<128x128xf32>
    %94 = arith.subf %93, %87 : vector<128x128xf32>
    %95 = arith.mulf %94, %92 : vector<128x128xf32>
    %96 = arith.mulf %87, %47 : vector<128x128xf32>
    %97 = arith.addf %95, %96 : vector<128x128xf32>
    %98 = arith.truncf %97 : vector<128x128xf32> to vector<128x128xbf16>
    %cst_39 = arith.constant dense<0.000000e+00> : vector<256x128xf32>
    %99 = tpu.matmul %11, %98, %cst_39 {dimension_numbers = #tpu.dot_dimension_numbers<[1], [0], [0], [1], [0, 0, 1, 1], [], []>} : vector<256x128xbf16>, vector<128x128xbf16>, vector<256x128xf32> -> vector<256x128xf32>
    %100 = arith.mulf %99, %6 : vector<256x128xf32>
    %cst_40 = arith.constant dense<0.000000e+00> : vector<256xf32>
    %101 = vector.multi_reduction <add>, %100, %cst_40 [1] : vector<256x128xf32> to vector<256xf32>
    %102 = vector.shape_cast %101 : vector<256xf32> to vector<256x1xf32>
    %103 = vector.broadcast %102 : vector<256x1xf32> to vector<256x128xf32>
    %104 = arith.mulf %103, %8 : vector<256x128xf32>
    %105 = arith.truncf %104 : vector<256x128xf32> to vector<256x128xbf16>
    %cst_41 = arith.constant dense<0.000000e+00> : vector<128x128xf32>
    %106 = tpu.matmul %14, %105, %cst_41 {dimension_numbers = #tpu.dot_dimension_numbers<[1], [0], [0], [1], [0, 0, 1, 1], [], []>} : vector<128x256xbf16>, vector<256x128xbf16>, vector<128x128xf32> -> vector<128x128xf32>
    %107 = arith.truncf %97 : vector<128x128xf32> to vector<128x128xbf16>
    %cst_42 = arith.constant dense<0.000000e+00> : vector<128x128xf32>
    %108 = tpu.matmul %107, %17, %cst_42 {dimension_numbers = #tpu.dot_dimension_numbers<[1], [0], [0], [1], [0, 0, 1, 1], [], []>} : vector<128x128xbf16>, vector<128x128xbf16>, vector<128x128xf32> -> vector<128x128xf32>
    %109 = arith.addf %106, %108 : vector<128x128xf32>
    %110 = arith.addf %109, %28 : vector<128x128xf32>
    %cst_43 = arith.constant 0.000000e+00 : f32
    %111 = vector.broadcast %cst_43 : f32 to vector<128x128xf32>
    %112 = arith.cmpf ogt, %110, %111 : vector<128x128xf32>
    %cst_44 = arith.constant 0.00999999977 : f32
    %113 = vector.broadcast %cst_44 : f32 to vector<128x128xf32>
    %114 = arith.mulf %113, %110 : vector<128x128xf32>
    %115 = arith.select %112, %110, %114 : vector<128x128xi1>, vector<128x128xf32>
    %116 = arith.truncf %115 : vector<128x128xf32> to vector<128x128xbf16>
    %cst_45 = arith.constant dense<0.000000e+00> : vector<128x384xf32>
    %117 = tpu.matmul %116, %18, %cst_45 {dimension_numbers = #tpu.dot_dimension_numbers<[1], [0], [0], [1], [0, 0, 1, 1], [], []>} : vector<128x128xbf16>, vector<128x384xbf16>, vector<128x384xf32> -> vector<128x384xf32>
    %118 = arith.addf %117, %31 : vector<128x384xf32>
    %119 = arith.truncf %97 : vector<128x128xf32> to vector<128x128xbf16>
    %cst_46 = arith.constant dense<0.000000e+00> : vector<128x384xf32>
    %120 = tpu.matmul %119, %19, %cst_46 {dimension_numbers = #tpu.dot_dimension_numbers<[1], [0], [0], [1], [0, 0, 1, 1], [], []>} : vector<128x128xbf16>, vector<128x384xbf16>, vector<128x384xf32> -> vector<128x384xf32>
    %121 = arith.addf %120, %34 : vector<128x384xf32>
    %122 = vector.extract_strided_slice %118 {offsets = [0, 0], sizes = [128, 128], strides = [1, 1]} : vector<128x384xf32> to vector<128x128xf32>
    %123 = vector.extract_strided_slice %121 {offsets = [0, 0], sizes = [128, 128], strides = [1, 1]} : vector<128x384xf32> to vector<128x128xf32>
    %124 = arith.addf %122, %123 : vector<128x128xf32>
    %125 = arith.negf %124 : vector<128x128xf32>
    %126 = math.exp %125 : vector<128x128xf32>
    %cst_47 = arith.constant 1.000000e+00 : f32
    %127 = vector.broadcast %cst_47 : f32 to vector<128x128xf32>
    %128 = arith.addf %127, %126 : vector<128x128xf32>
    %129 = arith.divf %127, %128 : vector<128x128xf32>
    %130 = vector.extract_strided_slice %118 {offsets = [0, 128], sizes = [128, 128], strides = [1, 1]} : vector<128x384xf32> to vector<128x128xf32>
    %131 = vector.extract_strided_slice %121 {offsets = [0, 128], sizes = [128, 128], strides = [1, 1]} : vector<128x384xf32> to vector<128x128xf32>
    %132 = arith.addf %130, %131 : vector<128x128xf32>
    %133 = arith.negf %132 : vector<128x128xf32>
    %134 = math.exp %133 : vector<128x128xf32>
    %cst_48 = arith.constant 1.000000e+00 : f32
    %135 = vector.broadcast %cst_48 : f32 to vector<128x128xf32>
    %136 = arith.addf %135, %134 : vector<128x128xf32>
    %137 = arith.divf %135, %136 : vector<128x128xf32>
    %138 = vector.extract_strided_slice %118 {offsets = [0, 256], sizes = [128, 128], strides = [1, 1]} : vector<128x384xf32> to vector<128x128xf32>
    %139 = vector.extract_strided_slice %121 {offsets = [0, 256], sizes = [128, 128], strides = [1, 1]} : vector<128x384xf32> to vector<128x128xf32>
    %140 = arith.mulf %129, %139 : vector<128x128xf32>
    %141 = arith.addf %138, %140 : vector<128x128xf32>
    %142 = math.tanh %141 : vector<128x128xf32>
    %cst_49 = arith.constant 1.000000e+00 : f32
    %143 = vector.broadcast %cst_49 : f32 to vector<128x128xf32>
    %144 = arith.subf %143, %137 : vector<128x128xf32>
    %145 = arith.mulf %144, %142 : vector<128x128xf32>
    %146 = arith.mulf %137, %97 : vector<128x128xf32>
    %147 = arith.addf %145, %146 : vector<128x128xf32>
    %148 = arith.truncf %147 : vector<128x128xf32> to vector<128x128xbf16>
    %cst_50 = arith.constant dense<0.000000e+00> : vector<256x128xf32>
    %149 = tpu.matmul %11, %148, %cst_50 {dimension_numbers = #tpu.dot_dimension_numbers<[1], [0], [0], [1], [0, 0, 1, 1], [], []>} : vector<256x128xbf16>, vector<128x128xbf16>, vector<256x128xf32> -> vector<256x128xf32>
    %150 = arith.mulf %149, %6 : vector<256x128xf32>
    %cst_51 = arith.constant dense<0.000000e+00> : vector<256xf32>
    %151 = vector.multi_reduction <add>, %150, %cst_51 [1] : vector<256x128xf32> to vector<256xf32>
    %152 = vector.shape_cast %151 : vector<256xf32> to vector<256x1xf32>
    %153 = vector.broadcast %152 : vector<256x1xf32> to vector<256x128xf32>
    %154 = arith.mulf %153, %8 : vector<256x128xf32>
    %155 = arith.truncf %154 : vector<256x128xf32> to vector<256x128xbf16>
    %cst_52 = arith.constant dense<0.000000e+00> : vector<128x128xf32>
    %156 = tpu.matmul %14, %155, %cst_52 {dimension_numbers = #tpu.dot_dimension_numbers<[1], [0], [0], [1], [0, 0, 1, 1], [], []>} : vector<128x256xbf16>, vector<256x128xbf16>, vector<128x128xf32> -> vector<128x128xf32>
    %157 = arith.truncf %147 : vector<128x128xf32> to vector<128x128xbf16>
    %cst_53 = arith.constant dense<0.000000e+00> : vector<128x128xf32>
    %158 = tpu.matmul %157, %17, %cst_53 {dimension_numbers = #tpu.dot_dimension_numbers<[1], [0], [0], [1], [0, 0, 1, 1], [], []>} : vector<128x128xbf16>, vector<128x128xbf16>, vector<128x128xf32> -> vector<128x128xf32>
    %159 = arith.addf %156, %158 : vector<128x128xf32>
    %160 = arith.addf %159, %28 : vector<128x128xf32>
    %cst_54 = arith.constant 0.000000e+00 : f32
    %161 = vector.broadcast %cst_54 : f32 to vector<128x128xf32>
    %162 = arith.cmpf ogt, %160, %161 : vector<128x128xf32>
    %cst_55 = arith.constant 0.00999999977 : f32
    %163 = vector.broadcast %cst_55 : f32 to vector<128x128xf32>
    %164 = arith.mulf %163, %160 : vector<128x128xf32>
    %165 = arith.select %162, %160, %164 : vector<128x128xi1>, vector<128x128xf32>
    %166 = arith.truncf %165 : vector<128x128xf32> to vector<128x128xbf16>
    %cst_56 = arith.constant dense<0.000000e+00> : vector<128x384xf32>
    %167 = tpu.matmul %166, %18, %cst_56 {dimension_numbers = #tpu.dot_dimension_numbers<[1], [0], [0], [1], [0, 0, 1, 1], [], []>} : vector<128x128xbf16>, vector<128x384xbf16>, vector<128x384xf32> -> vector<128x384xf32>
    %168 = arith.addf %167, %31 : vector<128x384xf32>
    %169 = arith.truncf %147 : vector<128x128xf32> to vector<128x128xbf16>
    %cst_57 = arith.constant dense<0.000000e+00> : vector<128x384xf32>
    %170 = tpu.matmul %169, %19, %cst_57 {dimension_numbers = #tpu.dot_dimension_numbers<[1], [0], [0], [1], [0, 0, 1, 1], [], []>} : vector<128x128xbf16>, vector<128x384xbf16>, vector<128x384xf32> -> vector<128x384xf32>
    %171 = arith.addf %170, %34 : vector<128x384xf32>
    %172 = vector.extract_strided_slice %168 {offsets = [0, 0], sizes = [128, 128], strides = [1, 1]} : vector<128x384xf32> to vector<128x128xf32>
    %173 = vector.extract_strided_slice %171 {offsets = [0, 0], sizes = [128, 128], strides = [1, 1]} : vector<128x384xf32> to vector<128x128xf32>
    %174 = arith.addf %172, %173 : vector<128x128xf32>
    %175 = arith.negf %174 : vector<128x128xf32>
    %176 = math.exp %175 : vector<128x128xf32>
    %cst_58 = arith.constant 1.000000e+00 : f32
    %177 = vector.broadcast %cst_58 : f32 to vector<128x128xf32>
    %178 = arith.addf %177, %176 : vector<128x128xf32>
    %179 = arith.divf %177, %178 : vector<128x128xf32>
    %180 = vector.extract_strided_slice %168 {offsets = [0, 128], sizes = [128, 128], strides = [1, 1]} : vector<128x384xf32> to vector<128x128xf32>
    %181 = vector.extract_strided_slice %171 {offsets = [0, 128], sizes = [128, 128], strides = [1, 1]} : vector<128x384xf32> to vector<128x128xf32>
    %182 = arith.addf %180, %181 : vector<128x128xf32>
    %183 = arith.negf %182 : vector<128x128xf32>
    %184 = math.exp %183 : vector<128x128xf32>
    %cst_59 = arith.constant 1.000000e+00 : f32
    %185 = vector.broadcast %cst_59 : f32 to vector<128x128xf32>
    %186 = arith.addf %185, %184 : vector<128x128xf32>
    %187 = arith.divf %185, %186 : vector<128x128xf32>
    %188 = vector.extract_strided_slice %168 {offsets = [0, 256], sizes = [128, 128], strides = [1, 1]} : vector<128x384xf32> to vector<128x128xf32>
    %189 = vector.extract_strided_slice %171 {offsets = [0, 256], sizes = [128, 128], strides = [1, 1]} : vector<128x384xf32> to vector<128x128xf32>
    %190 = arith.mulf %179, %189 : vector<128x128xf32>
    %191 = arith.addf %188, %190 : vector<128x128xf32>
    %192 = math.tanh %191 : vector<128x128xf32>
    %cst_60 = arith.constant 1.000000e+00 : f32
    %193 = vector.broadcast %cst_60 : f32 to vector<128x128xf32>
    %194 = arith.subf %193, %187 : vector<128x128xf32>
    %195 = arith.mulf %194, %192 : vector<128x128xf32>
    %196 = arith.mulf %187, %147 : vector<128x128xf32>
    %197 = arith.addf %195, %196 : vector<128x128xf32>
    %198 = arith.truncf %197 : vector<128x128xf32> to vector<128x128xbf16>
    %cst_61 = arith.constant dense<0.000000e+00> : vector<32x128xf32>
    %199 = tpu.matmul %4, %198, %cst_61 {dimension_numbers = #tpu.dot_dimension_numbers<[1], [0], [0], [1], [0, 0, 1, 1], [], []>} : vector<32x128xbf16>, vector<128x128xbf16>, vector<32x128xf32> -> vector<32x128xf32>
    %200 = arith.truncf %199 : vector<32x128xf32> to vector<32x128xbf16>
    %cst_62 = arith.constant dense<0.000000e+00> : vector<32x128xf32>
    %201 = tpu.matmul %200, %20, %cst_62 {dimension_numbers = #tpu.dot_dimension_numbers<[1], [0], [0], [1], [0, 0, 1, 1], [], []>} : vector<32x128xbf16>, vector<128x128xbf16>, vector<32x128xf32> -> vector<32x128xf32>
    %202 = vector.broadcast %24 : vector<1x128xf32> to vector<32x128xf32>
    %203 = arith.addf %201, %202 : vector<32x128xf32>
    %cst_63 = arith.constant 0.000000e+00 : f32
    %204 = vector.broadcast %cst_63 : f32 to vector<32x128xf32>
    %205 = arith.cmpf ogt, %203, %204 : vector<32x128xf32>
    %cst_64 = arith.constant 0.00999999977 : f32
    %206 = vector.broadcast %cst_64 : f32 to vector<32x128xf32>
    %207 = arith.mulf %206, %203 : vector<32x128xf32>
    %208 = arith.select %205, %203, %207 : vector<32x128xi1>, vector<32x128xf32>
    %209 = vector.broadcast %25 : vector<1x128xf32> to vector<32x128xf32>
    %210 = arith.mulf %208, %209 : vector<32x128xf32>
    %cst_65 = arith.constant dense<0.000000e+00> : vector<32xf32>
    %211 = vector.multi_reduction <add>, %210, %cst_65 [1] : vector<32x128xf32> to vector<32xf32>
    %212 = vector.shape_cast %211 : vector<32xf32> to vector<32x1xf32>
    %213 = vector.shape_cast %212 : vector<32x1xf32> to vector<32x1xf32>
    %214 = vector.broadcast %213 : vector<32x1xf32> to vector<32x128xf32>
    %c0_66 = arith.constant 0 : index
    %c0_67 = arith.constant 0 : index
    %c0_68 = arith.constant 0 : index
    %215 = vector.load %arg6[%c0_66, %c0_67, %c0_68] : memref<1x32x128xf32, #tpu.memory_space<vmem>>, vector<1x32x128xf32>
    %216 = vector.shape_cast %215 : vector<1x32x128xf32> to vector<32x128xf32>
    %217 = vector.shape_cast %214 : vector<32x128xf32> to vector<1x32x128xf32>
    tpu.vector_store %arg6[%c0_66, %c0_67, %c0_68], %217 {strides = array<i32>} : memref<1x32x128xf32, #tpu.memory_space<vmem>>, vector<1x32x128xf32>,
    return
  }
  func.func @transform_0(%arg0: i32) -> (i32, i32, i32) {
    %c0_i32 = arith.constant 0 : i32
    %c0_i32_0 = arith.constant 0 : i32
    %c0_i32_1 = arith.constant 0 : i32
    return %arg0, %c0_i32, %c0_i32_0 : i32, i32, i32
  }
  func.func @transform_1(%arg0: i32) -> (i32, i32, i32) {
    %c0_i32 = arith.constant 0 : i32
    %c0_i32_0 = arith.constant 0 : i32
    %c0_i32_1 = arith.constant 0 : i32
    return %arg0, %c0_i32, %c0_i32_0 : i32, i32, i32
  }
  func.func @transform_2(%arg0: i32) -> (i32, i32, i32) {
    %c0_i32 = arith.constant 0 : i32
    %c0_i32_0 = arith.constant 0 : i32
    %c0_i32_1 = arith.constant 0 : i32
    return %arg0, %c0_i32, %c0_i32_0 : i32, i32, i32
  }
  func.func @transform_3(%arg0: i32) -> (i32, i32) {
    %c0_i32 = arith.constant 0 : i32
    %c0_i32_0 = arith.constant 0 : i32
    %c0_i32_1 = arith.constant 0 : i32
    return %c0_i32, %c0_i32_0 : i32, i32
  }
  func.func @transform_4(%arg0: i32) -> (i32, i32) {
    %c0_i32 = arith.constant 0 : i32
    %c0_i32_0 = arith.constant 0 : i32
    %c0_i32_1 = arith.constant 0 : i32
    return %c0_i32, %c0_i32_0 : i32, i32
  }
  func.func @transform_5(%arg0: i32) -> (i32, i32, i32) {
    %c0_i32 = arith.constant 0 : i32
    %c0_i32_0 = arith.constant 0 : i32
    %c0_i32_1 = arith.constant 0 : i32
    return %arg0, %c0_i32, %c0_i32_0 : i32, i32, i32
  }
}

</mosaic_0001>

<bundles_post_ra>
// kernel: tpu_custom_call.1
= control target key start
LH: loop header
LB: loop body
LE: loop exit
PB: predicated region body
PF: predicated region fallthrough
CT: control target
= control target key end

     0   :  { %s12370_s0 = inlined_call_operand.hbm [shape: f32[2,160,128], index: 0, kind: input, shape index: {}]   ;;  %s12371_s1 = inlined_call_operand.hbm [shape: f32[2,768,128], index: 1, kind: input, shape index: {}]   ;;  %s12372_s2 = inlined_call_operand.hbm [shape: f32[2,128,256], index: 2, kind: input, shape index: {}]   ;;  %s12373_s3 = inlined_call_operand.hbm [shape: bf16[128,1280], index: 3, kind: input, shape index: {}]   ;;  %s12374_s4 = inlined_call_operand.hbm [shape: f32[8,384], index: 4, kind: input, shape index: {}]   ;;  %s12375_s5 = inlined_call_operand.hbm [shape: f32[2,32,128], index: 5, kind: output, shape index: {}]  }
   0x1   :  { %12596 = sst [smem:[#allocation139_spill]] %s12371_s1 }
   0x2   :  { %12597 = sst [smem:[#allocation140_spill]] %s12373_s3 }
   0x3   :  { %12598 = sst [smem:[#allocation141_spill]] %s12374_s4 }
   0x4   :  { %10 = vsyncpa [#allocation3], 0 }
   0x5   :  { %12 = vsyncpa [#allocation3 + $0x1], 0 }
   0x6   :  { %13 = vsyncpa [#allocation6], 0 }
   0x7   :  { %15 = vsyncpa [#allocation6 + $0x1], 0 }
   0x8   :  { %16 = vsyncpa [#allocation9], 0 }
   0x9   :  { %17 = vsyncpa [#allocation4], 0 }
   0xa   :  { %19 = vsyncpa [#allocation4 + $0x1], 0  ;;  %s7524_s18 = smov 0   ;;  %s7526_s19 = smov 0  }
   0xb   :  { %s7528_s20 = smov 0   ;;  %s7530_s21 = smov 0  }
   0xc LB: > { %12599 = sst [smem:[#allocation16_spill]] %s7478_s20  ;;  %s7545_s22 = sadd.s32 4294967295, %s7482_s21   ;;  %s7482_s21 = sphi %s7530_s21, %s13242_s21   ;;  %s7478_s20 = sphi %s7528_s20, %s13244_s20   ;;  %s7474_s19 = sphi %s7526_s19, %s13246_s19   ;;  %s7470_s18 = sphi %s7524_s18, %s13245_s18  }
   0xd   : > { %s6036_s23 = sadd.s32 4294967294, %s7482_s21   ;;  %p45_p0 = scmp.ne.s32.totalorder %s7474_s19, %s7470_s18 }
   0xe   : > { %p12379_p1 = scmp.eq.s32.totalorder %s7545_s22, 0  ;;  %p163_p2 = scmp.eq.s32.totalorder %s7545_s22, 1 }
   0xf   : > { %p169_p3 = scmp.eq.s32.totalorder %s6036_s23, 1  ;;  %p6037_p5 = scmp.ge.s32.totalorder %s7482_s21, 1 }
  0x10   : > { %p7554_p4 = por %p12379_p1, %p45_p0  ;;  %p176_p7 = scmp.lt.s32.totalorder %s7482_s21, 3 }
  0x11   : > { %p7559_p6 = por %p169_p3, %p45_p0  ;;  %s12603_s3 = sld [smem:[#allocation140_spill]] }
  0x12   : > { %p7567_p8 = pnand %p6037_p5, %p176_p7  ;;  %s7484_s30 = smov [#allocation8]  }
  0x13   : > { %s12601_s25 = scalar_select %p7559_p6, 1, 0 }
  0x14   : > { %p6576_p9 = pneg %p7567_p8  ;;  %s189_s6 = sshll.u32 %s7484_s30, 4  ;;  %s190_s6 = int_to_ptr.vmem [resolvable:$true] %s189_s6 }
  0x15   : > { %12602 = sst [smem:[#allocation17_spill]] %s12601_s25  ;;  %s7581_s8 = sadd.s32 1, %s7482_s21  }
  0x16   : > { %p7575_p10 = pnand %p6576_p9, %p12379_p1  ;;  %12606 = sst [smem:[#allocation18_spill]] %s7581_s8 }
  0x17   : > { %s187_s28 = sshll.u32 %s12603_s3, 4  ;;  %s7485_s9 = smov 640   ;;  %s188_s28 = int_to_ptr.hbm [resolvable:$true] %s187_s28 }
  0x18   : > { %s7486_s10 = smov 40   ;;  %s29_s11 = ssub.s32 %s7482_s21, %s7581_s8 }
  0x19   : > { %6579 = dma.hbm_to_vmem [thread:$0]  (!%p7575_p10), %s188_s28, 10240, %s190_s6, [#allocation9], %s7485_s9, %s7485_s9, %s7486_s10  }
  0x1a   : > { %s32_s12 = sadd.s32 1, %s7478_s20  ;;  %p30_p12 = scmp.eq.s32.totalorder %s29_s11, 0 }
  0x1b   : > { %p39_p13 = scmp.ne.s32.totalorder %s7478_s20, %s7474_s19  ;;  %p40_p0 = scmp.eq.s32.totalorder %s7482_s21, 0 }
  0x1c   : > { %p6599_p3 = scmp.lt.s32.totalorder %s7482_s21, 2  ;;  %s7602_s15 = sand.u32 1, %s7478_s20  }
  0x1d   : > { %s7593_s13 = scalar_select %p30_p12, %s7478_s20, %s32_s12  }
  0x1e   : > { %p41_p5 = por %p40_p0, %p39_p13  ;;  %p7597_p7 = por %p163_p2, %p39_p13 }
  0x1f   : > { %12607 = sst [smem:[#allocation19_spill]] %s7593_s13  ;;  %s237_s17 = sand.u32 1, %s7482_s21  }
  0x20   : > { %p7604_p9 = pnand %p6599_p3, %p41_p5  ;;  %s6556_s23 = smul.u32 768, %s7602_s15 }
  0x21   : > { %s6557_s26 = smul.u32 768, %s7482_s21  ;;  %s12610_s4 = sld [smem:[#allocation141_spill]] }
  0x22   : > { %s241_s27 = scalar_lea.vmem [#allocation5], %s6556_s23  ;;  %s12611_s1 = sld [smem:[#allocation139_spill]] }
  0x23   : > { %s249_s28 = sshll.u32 %s241_s27, 4  ;;  %s7617_s13 = scalar_lea.sflag [#allocation6], %s237_s17  ;;  %s250_s28 = int_to_ptr.vmem [resolvable:$true] %s249_s28 }
  0x24   : > { %p7292_p12 = pneg %p7604_p9 }
  0x27   : > { %s202_s9 = sshll.u32 %s12610_s4, 4  ;;  %s203_s9 = int_to_ptr.hbm [resolvable:$true] %s202_s9 }
  0x28   : > { %s246_s12 = scalar_lea.hbm %s12611_s1, %s6557_s26  ;;  %s7295_s26 = scalar_lea.hbm %s12611_s1, 1536 }
  0x29   : > { %s247_s3 = sshll.u32 %s246_s12, 4  ;;  %s248_s3 = int_to_ptr.hbm [resolvable:$true] %s247_s3 }
  0x2a   : > { %s7288_s20 = sshra.s32 %s248_s3, 4  ;;  %s7289_s20 = int_to_ptr.hbm [resolvable:$true] %s7288_s20 }
  0x2b   : > { %s7290_s8 = scalar_lea.hbm %s7289_s20, 768  ;;  %p7296_p3 = scmp.lt.s32.totalorder %s7289_s20, %s12611_s1 }
  0x2c   : > { %p7291_p2 = scmp.ne.s32.totalorder %s7289_s20, %s7290_s8  ;;  %p7297_p5 = scmp.lt.s32.totalorder %s7295_s26, %s7290_s8 }
  0x2e   : > { %p7293_p13 = pnand %p7292_p12, %p7291_p2  ;;  %p7298_p11 = por %p7297_p5, %p7296_p3 }
  0x30   : > { %p7294_p0 = pneg %p7293_p13 }
  0x32   : > { %p7299_p1 = pnand %p7298_p11, %p7294_p0 }
  0x34   : > { %7302 = shalt.err (!%p7299_p1)
}
  0x35   : > { %s7487_s17 = smov 128   ;;  %s7488_s10 = smov 8  }
  0x36   : > { %6589 = dma.hbm_to_vmem [thread:$0]  (!%p7604_p9), %s248_s3, 12288, %s250_s28, %s7617_s13, %s7487_s17, %s7487_s17, %s7488_s10  }
  0x37   : > { %s7489_s20 = smov [#allocation10]   ;;  %s6554_s11 = smul.u32 160, %s7602_s15 }
  0x38   : > { %s204_s8 = sshll.u32 %s7489_s20, 4  ;;  %s6555_s12 = smul.u32 160, %s7482_s21  ;;  %s205_s8 = int_to_ptr.vmem [resolvable:$true] %s204_s8 }
  0x39   : > { %6582 = dma.hbm_to_vmem [thread:$0]  (!%p7575_p10), %s203_s9, 384, %s205_s8, [#allocation9]  }
  0x3a   : > { %s219_s23 = scalar_lea.vmem [#allocation2], %s6554_s11  ;;  %s6043_s26 = sshll.u32 %s7602_s15, 8 }
  0x3b   : > { %s227_s27 = sshll.u32 %s219_s23, 4  ;;  %s224_s1 = scalar_lea.hbm %s12370_s0, %s6555_s12  ;;  %s228_s27 = int_to_ptr.vmem [resolvable:$true] %s227_s27 }
  0x3c   : > { %s225_s4 = sshll.u32 %s224_s1, 4  ;;  %s6472_s25 = sshll.u32 %s7482_s21, 8  ;;  %s226_s4 = int_to_ptr.hbm [resolvable:$true] %s225_s4 }
  0x3d   : > { %s216_s3 = scalar_lea.sflag [#allocation3], %s7602_s15  ;;  %s7348_s28 = sshra.s32 %s226_s4, 4  ;;  %s7349_s28 = int_to_ptr.hbm [resolvable:$true] %s7348_s28 }
  0x3e   : > { %s7350_s20 = scalar_lea.hbm %s7349_s28, 160  ;;  %s7355_s8 = scalar_lea.hbm %s12370_s0, 320 }
  0x3f   : > { %p7351_p1 = scmp.ne.s32.totalorder %s7349_s28, %s7350_s20  ;;  %p7356_p2 = scmp.lt.s32.totalorder %s7349_s28, %s12370_s0 }
  0x40   : > { %p7357_p13 = scmp.lt.s32.totalorder %s7355_s8, %s7350_s20 }
  0x41   : > { %p7353_p10 = pnand %p7351_p1, %p7292_p12 }
  0x42   : > { %p7358_p0 = por %p7357_p13, %p7356_p2 }
  0x43   : > { %p7354_p11 = pneg %p7353_p10 }
  0x45   : > { %p7359_p3 = pnand %p7358_p0, %p7354_p11 }
  0x47   : > { %7362 = shalt.err (!%p7359_p3)
}
  0x48   : > { %6586 = dma.hbm_to_vmem [thread:$0]  (!%p7604_p9), %s226_s4, 2560, %s228_s27, %s216_s3, %s7487_s17, %s7487_s17, %s7488_s10  }
  0x49   : > { %s268_s12 = scalar_lea.hbm %s12372_s2, %s6472_s25  ;;  %s263_s30 = scalar_lea.vmem [#allocation7], %s6043_s26 }
  0x4a   : > { %s271_s6 = sshll.u32 %s263_s30, 4  ;;  %s269_s7 = sshll.u32 %s268_s12, 4  ;;  %s272_s6 = int_to_ptr.vmem [resolvable:$true] %s271_s6  ;;  %s270_s7 = int_to_ptr.hbm [resolvable:$true] %s269_s7 }
  0x4b   : > { %s7378_s28 = sshra.s32 %s270_s7, 4  ;;  %s7385_s4 = scalar_lea.hbm %s12372_s2, 512  ;;  %s7379_s28 = int_to_ptr.hbm [resolvable:$true] %s7378_s28 }
  0x4c   : > { %s7380_s20 = scalar_lea.hbm %s7379_s28, 256  ;;  %p7386_p11 = scmp.lt.s32.totalorder %s7379_s28, %s12372_s2 }
  0x4d   : > { %p7381_p5 = scmp.ne.s32.totalorder %s7379_s28, %s7380_s20  ;;  %p7387_p2 = scmp.lt.s32.totalorder %s7385_s4, %s7380_s20 }
  0x4f   : > { %p7383_p1 = pnand %p7381_p5, %p7292_p12  ;;  %p7388_p13 = por %p7387_p2, %p7386_p11 }
  0x51   : > { %p7384_p10 = pneg %p7383_p1 }
  0x53   : > { %p7389_p0 = pnand %p7388_p13, %p7384_p10 }
  0x55   : > { %7392 = shalt.err (!%p7389_p0)
}
  0x56   : > { %s7490_s25 = smov 256   ;;  %s7491_s27 = smov 16  }
  0x57   : > { %6592 = dma.hbm_to_vmem [thread:$0]  (!%p7604_p9), %s270_s7, 4096, %s272_s6, %s7617_s13, %s7490_s25, %s7490_s25, %s7491_s27  }
  0x58   : > { %283 = sbr.rel (%p7567_p8) target bundleno = 4370 (0x1112), region = 40 }
  0x5d   : > { %s7678_s26 = sand.u32 1, %s7474_s19  }
  0x5e   : > { %s6558_s3 = smul.u32 160, %s7678_s26  ;;  %s286_s11 = scalar_lea.sflag [#allocation3], %s7678_s26 }
  0x60   : > { %s7682_s23 = scalar_lea.vmem [#allocation2], %s6558_s3 }
  0x61   : > { %7453 = dma.done.wait (%p7554_p4), %s286_s11, 2560  }
  0x62   : > { %7455 = vsyncadd (%p7554_p4), %s286_s11, 4294964736  ;;  %s295_s29 = sand.u32 1, %s7545_s22   ;;  %s6559_s13 = smul.u32 768, %s7678_s26 }
  0x63   : > { %s296_s16 = scalar_lea.sflag [#allocation6], %s295_s29 }
  0x64   : > { %s7690_s1 = scalar_lea.vmem [#allocation5], %s6559_s13 }
  0x65   : > { %7457 = dma.done.wait (%p7554_p4), %s296_s16, 16384  }
  0x66   : > { %7459 = vsyncadd (%p7554_p4), %s296_s16, 4294950912  ;;  %s6047_s15 = sshll.u32 %s7678_s26, 8  ;;  %p12612_p8 = scmp.eq.s32.totalorder %s7545_s22, 0 }
  0x67   : > { %s7697_s12 = scalar_lea.vmem [#allocation7], %s6047_s15 }
  0x68   : > { %7461 = dma.done.wait (%p12612_p8), [#allocation9], 10624   ;;  %p12613_p9 = pmov %p12612_p8 }
  0x69   : > { %v6081_v0 = vld [vmem:[#allocation8 + $0x230] sm:$0xf]  ;;  %v6480_v1 = vld [vmem:[#allocation8 + $0x254] sm:$0xf0]  ;;  %v6077_v2 = vld [vmem:[#allocation8 + $0x1e0] sm:$0xf] }
  0x6a   : > { %7463 = vsyncadd (%p12613_p9), [#allocation9], 4294956672  ;;  %v6082_v3 = vor.u32 %v6480_v1, %v6081_v0  ;;  %v6479_v4 = vld [vmem:[#allocation8 + $0x204] sm:$0xf0]  ;;  %v6073_v6 = vld [vmem:[#allocation8 + $0x190] sm:$0xf] }
  0x6b   : > { %v6078_v5 = vor.u32 %v6479_v4, %v6077_v2  ;;  %v6478_v7 = vld [vmem:[#allocation8 + $0x1b4] sm:$0xf0]  ;;  %v6069_v9 = vld [vmem:[#allocation8 + $0x140] sm:$0xf]  ;;  %v6477_v10 = vld [vmem:[#allocation8 + $0x164] sm:$0xf0] }
  0x6c   : > { %734 = vmatpush.bf16.msra.mxu0 %v6082_v3  ;;  %v6074_v8 = vor.u32 %v6478_v7, %v6073_v6  ;;  %v6070_v11 = vor.u32 %v6477_v10, %v6069_v9  ;;  %v6065_v12 = vld [vmem:[#allocation8 + $0xf0] sm:$0xf]  ;;  %v6476_v13 = vld [vmem:[#allocation8 + $0x114] sm:$0xf0]  ;;  %v6061_v15 = vld [vmem:[#allocation8 + $0xa0] sm:$0xf] }
  0x6d   : > { %v6066_v14 = vor.u32 %v6476_v13, %v6065_v12  ;;  %v6475_v16 = vld [vmem:[#allocation8 + $0xc4] sm:$0xf0]  ;;  %v6057_v18 = vld [vmem:[#allocation8 + $0x50] sm:$0xf]  ;;  %v6474_v19 = vld [vmem:[#allocation8 + $0x74] sm:$0xf0] }
  0x6e   : > { %v6062_v17 = vor.u32 %v6475_v16, %v6061_v15  ;;  %v6058_v20 = vor.u32 %v6474_v19, %v6057_v18  ;;  %v6053_v21 = vld [vmem:[#allocation8] sm:$0xf]  ;;  %v6473_v22 = vld [vmem:[#allocation8 + $0x24] sm:$0xf0]  ;;  %v359_v27 = vld [vmem:[%s7682_s23 + $0x10] sm:$0xff]  ;;  %s6050_s24 = sshll.u32 %s7678_s26, 5 }
  0x6f   : > { %v6054_v23 = vor.u32 %v6473_v22, %v6053_v21  ;;  %v357_v24 = vld [vmem:[%s7682_s23] sm:$0xff]  ;;  %v358_v25 = vld [vmem:[%s7682_s23 + $0x8] sm:$0xff]  ;;  %v360_v28 = vld [vmem:[%s7682_s23 + $0x18] sm:$0xff]  ;;  %s356_s30 = scalar_lea.vmem [#allocation11], %s6050_s24  ;;  %s6553_s6 = sshll.u32 %s7545_s22, 5 }
  0x70   : > { %735 = vmatpush.bf16.msra.mxu0 %v6078_v5  ;;  %v677_v26 = vpack.c.bf16 %v358_v25, %v357_v24  ;;  %v678_v29 = vpack.c.bf16 %v360_v28, %v359_v27  ;;  %v361_v30 = vld [vmem:[%s7682_s23 + $0x20] sm:$0xff]  ;;  %v362_v31 = vld [vmem:[%s7682_s23 + $0x28] sm:$0xff]  ;;  %v363_v33 = vld [vmem:[%s7682_s23 + $0x30] sm:$0xff]  ;;  %s5897_s20 = scalar_lea.hbm %s12375_s5, %s6553_s6  ;;  %s5898_s9 = sshll.u32 %s356_s30, 4  ;;  %s5899_s9 = int_to_ptr.vmem [resolvable:$true] %s5898_s9 }
  0x71   : > { %v679_v32 = vpack.c.bf16 %v362_v31, %v361_v30  ;;  %v364_v34 = vld [vmem:[%s7682_s23 + $0x38] sm:$0xff]  ;;  %v365_v36 = vld [vmem:[%s7682_s23 + $0x40] sm:$0xff]  ;;  %v366_v37 = vld [vmem:[%s7682_s23 + $0x48] sm:$0xff]  ;;  %s5900_s8 = sshll.u32 %s5897_s20, 4  ;;  %s5886_s4 = scalar_lea.sflag [#allocation4], %s7678_s26  ;;  %s5901_s8 = int_to_ptr.hbm [resolvable:$true] %s5900_s8 }
  0x72   : > { %v680_v35 = vpack.c.bf16 %v364_v34, %v363_v33  ;;  %v681_v38 = vpack.c.bf16 %v366_v37, %v365_v36  ;;  %v6113_v39 = vld [vmem:[#allocation8 + $0x234] sm:$0xf]  ;;  %v6488_v40 = vld [vmem:[#allocation8 + $0x258] sm:$0xf0]  ;;  %v6109_v45 = vld [vmem:[#allocation8 + $0x1e4] sm:$0xf] }
  0x73   : > { %v6114_v41 = vor.u32 %v6488_v40, %v6113_v39  ;;  %v367_v42 = vld [vmem:[%s7682_s23 + $0x50] sm:$0xff]  ;;  %v368_v43 = vld [vmem:[%s7682_s23 + $0x58] sm:$0xff]  ;;  %v6487_v46 = vld [vmem:[#allocation8 + $0x208] sm:$0xf0]  ;;  %s7422_s17 = sshra.s32 %s5901_s8, 4  ;;  %s7428_s27 = scalar_lea.hbm %s12375_s5, 64  ;;  %s7423_s17 = int_to_ptr.hbm [resolvable:$true] %s7422_s17 }
  0x74   : > { %736 = vmatpush.bf16.msra.mxu0 %v6074_v8  ;;  %v682_v44 = vpack.c.bf16 %v368_v43, %v367_v42  ;;  %v6110_v47 = vor.u32 %v6487_v46, %v6109_v45  ;;  %v6105_v48 = vld [vmem:[#allocation8 + $0x194] sm:$0xf]  ;;  %v6486_v49 = vld [vmem:[#allocation8 + $0x1b8] sm:$0xf0]  ;;  %v6101_v51 = vld [vmem:[#allocation8 + $0x144] sm:$0xf]  ;;  %p7429_p5 = scmp.lt.s32.totalorder %s7423_s17, %s12375_s5 }
  0x75   : > { %888 = vmatpush.bf16.msra.mxu1 %v6114_v41  ;;  %v6106_v50 = vor.u32 %v6486_v49, %v6105_v48  ;;  %v6485_v52 = vld [vmem:[#allocation8 + $0x168] sm:$0xf0]  ;;  %v369_v54 = vld [vmem:[%s7682_s23 + $0x60] sm:$0xff]  ;;  %v6097_v56 = vld [vmem:[#allocation8 + $0xf4] sm:$0xf]  ;;  %s7424_s10 = scalar_lea.hbm %s7423_s17, 32 }
  0x76   : > { %v6102_v53 = vor.u32 %v6485_v52, %v6101_v51  ;;  %v370_v55 = vld [vmem:[%s7682_s23 + $0x68] sm:$0xff]  ;;  %v6484_v57 = vld [vmem:[#allocation8 + $0x118] sm:$0xf0]  ;;  %v6093_v60 = vld [vmem:[#allocation8 + $0xa4] sm:$0xf]  ;;  %p7425_p4 = scmp.ne.s32.totalorder %s7423_s17, %s7424_s10  ;;  %p7430_p1 = scmp.lt.s32.totalorder %s7428_s27, %s7424_s10 }
  0x77   : > { %v683_v58 = vpack.c.bf16 %v370_v55, %v369_v54  ;;  %v6098_v59 = vor.u32 %v6484_v57, %v6097_v56  ;;  %v6483_v61 = vld [vmem:[#allocation8 + $0xc8] sm:$0xf0]  ;;  %v6089_v63 = vld [vmem:[#allocation8 + $0x54] sm:$0xf]  ;;  %v6482_v0 = vld [vmem:[#allocation8 + $0x78] sm:$0xf0] }
  0x78   : > { %737 = vmatpush.bf16.msra.mxu0 %v6070_v11  ;;  %v6094_v62 = vor.u32 %v6483_v61, %v6093_v60  ;;  %v6090_v1 = vor.u32 %v6482_v0, %v6089_v63  ;;  %v6085_v2 = vld [vmem:[#allocation8 + $0x4] sm:$0xf]  ;;  %v6481_v3 = vld [vmem:[#allocation8 + $0x28] sm:$0xf0]  ;;  %v371_v5 = vld [vmem:[%s7682_s23 + $0x70] sm:$0xff]  ;;  %p7426_p12 = pnand %p7425_p4, %p7597_p7  ;;  %p7431_p10 = por %p7430_p1, %p7429_p5 }
  0x79   : > { %889 = vmatpush.bf16.msra.mxu1 %v6110_v47  ;;  %v6086_v4 = vor.u32 %v6481_v3, %v6085_v2  ;;  %v372_v6 = vld [vmem:[%s7682_s23 + $0x78] sm:$0xff]  ;;  %v667_v8 = vld [vmem:[#allocation10] sm:$0xff]  ;;  %v6141_v0 = vld [vmem:[#allocation8 + $0x1e8] sm:$0xf] }
  0x7a   : > { %v684_v7 = vpack.c.bf16 %v372_v6, %v371_v5  ;;  %v7719_v10 = vperm.slane %v667_v8, 0  ;;  %v6494_v8 = vld [vmem:[#allocation8 + $0x1bc] sm:$0xf0]  ;;  %p7427_p3 = pneg %p7426_p12 }
  0x7c   : > { %738 = vmatpush.bf16.msra.mxu0 %v6066_v14  ;;  %p7432_p11 = pnand %p7431_p10, %p7427_p3 }
  0x7d   : > { %890 = vmatpush.bf16.msra.mxu1 %v6106_v50 }
  0x80   : > { %739 = vmatpush.bf16.msra.mxu0 %v6062_v17 }
  0x81   : > { %891 = vmatpush.bf16.msra.mxu1 %v6102_v53 }
  0x84   : > { %740 = vmatpush.bf16.msra.mxu0 %v6058_v20 }
  0x85   : > { %892 = vmatpush.bf16.msra.mxu1 %v6098_v59  ;;  %v6496_v59 = vld [vmem:[#allocation8 + $0x25c] sm:$0xf0] }
  0x88   : > { %741 = vmatpush.bf16.msra.mxu0 %v6054_v23 }
  0x89   : > { %893 = vmatpush.bf16.msra.mxu1 %v6094_v62 }
  0x8b   : > { %742 = vmatmul.bf16.vlgmr.msra.gmra.mxu0 %v677_v26 }
  0x8d   : > { %894 = vmatpush.bf16.msra.mxu1 %v6090_v1  ;;  %v6495_v1 = vld [vmem:[#allocation8 + $0x20c] sm:$0xf0] }
  0x91   : > { %895 = vmatpush.bf16.msra.mxu1 %v6086_v4  ;;  %v7736_v4 = vor.u32 %v6495_v1, %v6141_v0 }
  0x93   : > { %12615 = vst [vmem:[#allocation21_spill] sm:$0xff] %v7736_v4 }
  0x9b   : > { %747 = vmatmul.bf16.gmra.mxu0 %v678_v29 }
  0xab   : > { %752 = vmatmul.bf16.gmra.mxu0 %v679_v32 }
  0xbb   : > { %757 = vmatmul.bf16.gmra.mxu0 %v680_v35 }
  0xcb   : > { %762 = vmatmul.bf16.gmra.mxu0 %v681_v38 }
  0xdb   : > { %767 = vmatmul.bf16.gmra.mxu0 %v682_v44 }
  0xeb   : > { %772 = vmatmul.bf16.gmra.mxu0 %v683_v58  ;;  %v6145_v58 = vld [vmem:[#allocation8 + $0x238] sm:$0xf] }
  0xec   : > { %v7733_v62 = vor.u32 %v6496_v59, %v6145_v58 }
  0xee   : > { %12614 = vst [vmem:[#allocation20_spill] sm:$0xff] %v7733_v62  ;;  %1226 = vmatpush.bf16.msra.mxu3 %v7733_v62 }
  0xf2   : > { %1227 = vmatpush.bf16.msra.mxu3 %v7736_v4 }
  0xfb   : > { %777 = vmatmul.bf16.gmra.mxu0 %v684_v7  ;;  %v6137_v7 = vld [vmem:[#allocation8 + $0x198] sm:$0xf] }
 0x108   : > { %v743_v9 = vpop.f32.mrf.mxu0 }
 0x109   : > { %v744_v11 = vadd.f32 %v743_v9, %v7719_v10  ;;  %v6133_v9 = vld [vmem:[#allocation8 + $0x148] sm:$0xf] }
 0x10b   : > { %v799_v13 = vmul.f32 0.01, %v744_v11  ;;  %vm783_vm0 = vcmp.gt.f32.partialorder %v744_v11, 0.0 }
 0x10d   : > { %v815_v16 = vsel %vm783_vm0, %v744_v11, %v799_v13  ;;  %v7739_v11 = vor.u32 %v6494_v8, %v6137_v7 }
 0x10f   : > { %12616 = vst [vmem:[#allocation22_spill] sm:$0xff] %v7739_v11  ;;  %1228 = vmatpush.bf16.msra.mxu3 %v7739_v11 }
 0x110   : > { %v745_v12 = vpop.f32.mrf.mxu0 }
 0x111   : > { %v746_v14 = vadd.f32 %v745_v12, %v7719_v10  ;;  %v6493_v12 = vld [vmem:[#allocation8 + $0x16c] sm:$0xf0] }
 0x112   : > { %v7742_v13 = vor.u32 %v6493_v12, %v6133_v9 }
 0x113   : > { %v800_v15 = vmul.f32 0.01, %v746_v14  ;;  %vm784_vm1 = vcmp.gt.f32.partialorder %v746_v14, 0.0 }
 0x114   : > { %12617 = vst [vmem:[#allocation23_spill] sm:$0xff] %v7742_v13  ;;  %1229 = vmatpush.bf16.msra.mxu3 %v7742_v13 }
 0x115   : > { %v816_v17 = vsel %vm784_vm1, %v746_v14, %v800_v15  ;;  %v6129_v14 = vld [vmem:[#allocation8 + $0xf8] sm:$0xf]  ;;  %v6492_v15 = vld [vmem:[#allocation8 + $0x11c] sm:$0xf0] }
 0x116   : > { %v831_v18 = vpack.c.bf16 %v816_v17, %v815_v16  ;;  %v7746_v17 = vor.u32 %v6492_v15, %v6129_v14 }
 0x118   : > { %v748_v19 = vpop.f32.mrf.mxu0  ;;  %896 = vmatmul.bf16.vlgmr.msra.gmra.mxu1 %v831_v18  ;;  %12618 = vst [vmem:[#allocation24_spill] sm:$0xff] %v7746_v17  ;;  %1230 = vmatpush.bf16.msra.mxu3 %v7746_v17 }
 0x119   : > { %v749_v20 = vadd.f32 %v748_v19, %v7719_v10 }
 0x11b   : > { %v801_v22 = vmul.f32 0.01, %v749_v20  ;;  %vm785_vm2 = vcmp.gt.f32.partialorder %v749_v20, 0.0 }
 0x11d   : > { %v817_v25 = vsel %vm785_vm2, %v749_v20, %v801_v22  ;;  %v6125_v22 = vld [vmem:[#allocation8 + $0xa8] sm:$0xf] }
 0x120   : > { %v750_v21 = vpop.f32.mrf.mxu0 }
 0x121   : > { %v751_v23 = vadd.f32 %v750_v21, %v7719_v10 }
 0x123   : > { %v802_v24 = vmul.f32 0.01, %v751_v23  ;;  %vm786_vm3 = vcmp.gt.f32.partialorder %v751_v23, 0.0 }
 0x125   : > { %v818_v26 = vsel %vm786_vm3, %v751_v23, %v802_v24  ;;  %v6491_v23 = vld [vmem:[#allocation8 + $0xcc] sm:$0xf0] }
 0x126   : > { %v832_v27 = vpack.c.bf16 %v818_v26, %v817_v25  ;;  %v7750_v26 = vor.u32 %v6491_v23, %v6125_v22 }
 0x128   : > { %v753_v28 = vpop.f32.mrf.mxu0  ;;  %901 = vmatmul.bf16.gmra.mxu1 %v832_v27  ;;  %12619 = vst [vmem:[#allocation25_spill] sm:$0xff] %v7750_v26  ;;  %1231 = vmatpush.bf16.msra.mxu3 %v7750_v26 }
 0x129   : > { %v754_v29 = vadd.f32 %v753_v28, %v7719_v10  ;;  %v6121_v28 = vld [vmem:[#allocation8 + $0x58] sm:$0xf] }
 0x12b   : > { %v803_v31 = vmul.f32 0.01, %v754_v29  ;;  %vm787_vm4 = vcmp.gt.f32.partialorder %v754_v29, 0.0 }
 0x12d   : > { %v819_v34 = vsel %vm787_vm4, %v754_v29, %v803_v31  ;;  %v6490_v29 = vld [vmem:[#allocation8 + $0x7c] sm:$0xf0] }
 0x130   : > { %v755_v30 = vpop.f32.mrf.mxu0 }
 0x131   : > { %v756_v32 = vadd.f32 %v755_v30, %v7719_v10  ;;  %v7753_v30 = vor.u32 %v6490_v29, %v6121_v28  ;;  %v444_v28 = vld [vmem:[%s7690_s1 + $0x208] sm:$0xff] }
 0x133   : > { %v804_v33 = vmul.f32 0.01, %v756_v32  ;;  %vm788_vm5 = vcmp.gt.f32.partialorder %v756_v32, 0.0  ;;  %12620 = vst [vmem:[#allocation26_spill] sm:$0xff] %v7753_v30  ;;  %1232 = vmatpush.bf16.msra.mxu3 %v7753_v30 }
 0x135   : > { %v820_v35 = vsel %vm788_vm5, %v756_v32, %v804_v33  ;;  %v6117_v32 = vld [vmem:[#allocation8 + $0x8] sm:$0xf]  ;;  %v6489_v33 = vld [vmem:[#allocation8 + $0x2c] sm:$0xf0] }
 0x136   : > { %v833_v36 = vpack.c.bf16 %v820_v35, %v819_v34  ;;  %v7757_v35 = vor.u32 %v6489_v33, %v6117_v32  ;;  %v446_v32 = vld [vmem:[%s7690_s1 + $0x218] sm:$0xff] }
 0x138   : > { %v758_v37 = vpop.f32.mrf.mxu0  ;;  %906 = vmatmul.bf16.gmra.mxu1 %v833_v36  ;;  %12621 = vst [vmem:[#allocation27_spill] sm:$0xff] %v7757_v35  ;;  %1233 = vmatpush.bf16.msra.mxu3 %v7757_v35 }
 0x139   : > { %v759_v38 = vadd.f32 %v758_v37, %v7719_v10 }
 0x13b   : > { %v805_v40 = vmul.f32 0.01, %v759_v38  ;;  %vm789_vm6 = vcmp.gt.f32.partialorder %v759_v38, 0.0 }
 0x13d   : > { %v821_v43 = vsel %vm789_vm6, %v759_v38, %v805_v40 }
 0x140   : > { %v760_v39 = vpop.f32.mrf.mxu0 }
 0x141   : > { %v761_v41 = vadd.f32 %v760_v39, %v7719_v10 }
 0x143   : > { %v806_v42 = vmul.f32 0.01, %v761_v41  ;;  %vm790_vm7 = vcmp.gt.f32.partialorder %v761_v41, 0.0 }
 0x145   : > { %v822_v44 = vsel %vm790_vm7, %v761_v41, %v806_v42 }
 0x146   : > { %v834_v45 = vpack.c.bf16 %v822_v44, %v821_v43  ;;  %v668_v44 = vld [vmem:[#allocation10 + $0x8] sm:$0xff] }
 0x148   : > { %v763_v46 = vpop.f32.mrf.mxu0  ;;  %911 = vmatmul.bf16.gmra.mxu1 %v834_v45  ;;  %v839_v45 = vperm.slane %v668_v44, 0  ;;  %v453_v44 = vld [vmem:[%s7690_s1 + $0x250] sm:$0xff] }
 0x149   : > { %v764_v47 = vadd.f32 %v763_v46, %v7719_v10 }
 0x14b   : > { %v807_v49 = vmul.f32 0.01, %v764_v47  ;;  %vm791_vm8 = vcmp.gt.f32.partialorder %v764_v47, 0.0 }
 0x14d   : > { %v823_v52 = vsel %vm791_vm8, %v764_v47, %v807_v49 }
 0x150   : > { %v765_v48 = vpop.f32.mrf.mxu0 }
 0x151   : > { %v766_v50 = vadd.f32 %v765_v48, %v7719_v10 }
 0x153   : > { %v808_v51 = vmul.f32 0.01, %v766_v50  ;;  %vm792_vm9 = vcmp.gt.f32.partialorder %v766_v50, 0.0 }
 0x155   : > { %v824_v53 = vsel %vm792_vm9, %v766_v50, %v808_v51 }
 0x156   : > { %v835_v54 = vpack.c.bf16 %v824_v53, %v823_v52 }
 0x158   : > { %v768_v55 = vpop.f32.mrf.mxu0  ;;  %916 = vmatmul.bf16.gmra.mxu1 %v835_v54 }
 0x159   : > { %v769_v56 = vadd.f32 %v768_v55, %v7719_v10 }
 0x15b   : > { %v809_v60 = vmul.f32 0.01, %v769_v56  ;;  %vm793_vm10 = vcmp.gt.f32.partialorder %v769_v56, 0.0 }
 0x15d   : > { %v825_v2 = vsel %vm793_vm10, %v769_v56, %v809_v60 }
 0x160   : > { %v770_v57 = vpop.f32.mrf.mxu0 }
 0x161   : > { %v771_v61 = vadd.f32 %v770_v57, %v7719_v10 }
 0x163   : > { %v810_v63 = vmul.f32 0.01, %v771_v61  ;;  %vm794_vm11 = vcmp.gt.f32.partialorder %v771_v61, 0.0 }
 0x165   : > { %v826_v3 = vsel %vm794_vm11, %v771_v61, %v810_v63 }
 0x166   : > { %v836_v5 = vpack.c.bf16 %v826_v3, %v825_v2 }
 0x168   : > { %v773_v6 = vpop.f32.mrf.mxu0  ;;  %921 = vmatmul.bf16.gmra.mxu1 %v836_v5 }
 0x169   : > { %v774_v16 = vadd.f32 %v773_v6, %v7719_v10 }
 0x16b   : > { %v811_v19 = vmul.f32 0.01, %v774_v16  ;;  %vm795_vm12 = vcmp.gt.f32.partialorder %v774_v16, 0.0 }
 0x16d   : > { %v827_v24 = vsel %vm795_vm12, %v774_v16, %v811_v19 }
 0x170   : > { %v775_v18 = vpop.f32.mrf.mxu0 }
 0x171   : > { %v776_v20 = vadd.f32 %v775_v18, %v7719_v10 }
 0x173   : > { %v812_v21 = vmul.f32 0.01, %v776_v20  ;;  %vm796_vm13 = vcmp.gt.f32.partialorder %v776_v20, 0.0 }
 0x175   : > { %v828_v25 = vsel %vm796_vm13, %v776_v20, %v812_v21 }
 0x176   : > { %v837_v27 = vpack.c.bf16 %v828_v25, %v827_v24 }
 0x178   : > { %v778_v31 = vpop.f32.mrf.mxu0  ;;  %926 = vmatmul.bf16.gmra.mxu1 %v837_v27  ;;  %v443_v27 = vld [vmem:[%s7690_s1 + $0x200] sm:$0xff] }
 0x179   : > { %v779_v34 = vadd.f32 %v778_v31, %v7719_v10  ;;  %v7842_v29 = vpack.c.bf16 %v444_v28, %v443_v27  ;;  %v445_v31 = vld [vmem:[%s7690_s1 + $0x210] sm:$0xff]  ;;  %v463_v28 = vld [vmem:[%s7690_s1 + $0x2a0] sm:$0xff] }
 0x17a   : > { %v7848_v33 = vpack.c.bf16 %v446_v32, %v445_v31  ;;  %v464_v31 = vld [vmem:[%s7690_s1 + $0x2a8] sm:$0xff] }
 0x17b   : > { %v813_v37 = vmul.f32 0.01, %v779_v34  ;;  %vm797_vm14 = vcmp.gt.f32.partialorder %v779_v34, 0.0  ;;  %12638 = vst [vmem:[#allocation44_spill] sm:$0xff] %v7842_v29 }
 0x17c   : > { %12639 = vst [vmem:[#allocation45_spill] sm:$0xff] %v7848_v33 }
 0x17d   : > { %v829_v40 = vsel %vm797_vm14, %v779_v34, %v813_v37  ;;  %v447_v34 = vld [vmem:[%s7690_s1 + $0x220] sm:$0xff] }
 0x180   : > { %v780_v36 = vpop.f32.mrf.mxu0 }
 0x181   : > { %v781_v38 = vadd.f32 %v780_v36, %v7719_v10  ;;  %v448_v36 = vld [vmem:[%s7690_s1 + $0x228] sm:$0xff] }
 0x182   : > { %v7853_v37 = vpack.c.bf16 %v448_v36, %v447_v34  ;;  %v7901_v34 = vpack.c.bf16 %v464_v31, %v463_v28  ;;  %v383_v36 = vld [vmem:[%s7690_s1 + $0x20] sm:$0xff] }
 0x183   : > { %v814_v39 = vmul.f32 0.01, %v781_v38  ;;  %vm798_vm15 = vcmp.gt.f32.partialorder %v781_v38, 0.0 }
 0x184   : > { %12640 = vst [vmem:[#allocation46_spill] sm:$0xff] %v7853_v37 }
 0x185   : > { %v830_v41 = vsel %vm798_vm15, %v781_v38, %v814_v39  ;;  %v449_v38 = vld [vmem:[%s7690_s1 + $0x230] sm:$0xff]  ;;  %v450_v39 = vld [vmem:[%s7690_s1 + $0x238] sm:$0xff]  ;;  %12648 = vst [vmem:[#allocation54_spill] sm:$0xff] %v7901_v34 }
 0x186   : > { %v838_v42 = vpack.c.bf16 %v830_v41, %v829_v40  ;;  %v7858_v40 = vpack.c.bf16 %v450_v39, %v449_v38  ;;  %v451_v41 = vld [vmem:[%s7690_s1 + $0x240] sm:$0xff] }
 0x188   : > { %931 = vmatmul.bf16.gmra.mxu1 %v838_v42  ;;  %12641 = vst [vmem:[#allocation47_spill] sm:$0xff] %v7858_v40  ;;  %v452_v42 = vld [vmem:[%s7690_s1 + $0x248] sm:$0xff] }
 0x195   : > { %v897_v43 = vpop.f32.mrf.mxu1 }
 0x196   : > { %v7761_v47 = vadd.f32 %v897_v43, %v839_v45  ;;  %v7863_v43 = vpack.c.bf16 %v452_v42, %v451_v41  ;;  %v384_v41 = vld [vmem:[%s7690_s1 + $0x28] sm:$0xff]  ;;  %v465_v42 = vld [vmem:[%s7690_s1 + $0x2b0] sm:$0xff] }
 0x198   : > { %12622 = vst [vmem:[#allocation28_spill] sm:$0xff] %v7761_v47 }
 0x199   : > { %12642 = vst [vmem:[#allocation48_spill] sm:$0xff] %v7863_v43 }
 0x19d   : > { %v899_v46 = vpop.f32.mrf.mxu1 }
 0x19e   : > { %v7763_v48 = vadd.f32 %v899_v46, %v839_v45 }
 0x1a0   : > { %12623 = vst [vmem:[#allocation29_spill] sm:$0xff] %v7763_v48  ;;  %v7767_v49 = vpack.c.bf16 %v7763_v48, %v7761_v47 }
 0x1a2   : > { %1234 = vmatmul.bf16.vlgmr.msra.gmra.mxu3 %v7767_v49 }
 0x1a5   : > { %v902_v10 = vpop.f32.mrf.mxu1 }
 0x1a6   : > { %v7770_v51 = vadd.f32 %v902_v10, %v839_v45  ;;  %v455_v10 = vld [vmem:[%s7690_s1 + $0x260] sm:$0xff] }
 0x1a8   : > { %12624 = vst [vmem:[#allocation30_spill] sm:$0xff] %v7770_v51 }
 0x1ad   : > { %v904_v50 = vpop.f32.mrf.mxu1 }
 0x1ae   : > { %v7772_v52 = vadd.f32 %v904_v50, %v839_v45  ;;  %v456_v50 = vld [vmem:[%s7690_s1 + $0x268] sm:$0xff] }
 0x1b0   : > { %12625 = vst [vmem:[#allocation31_spill] sm:$0xff] %v7772_v52  ;;  %v7776_v53 = vpack.c.bf16 %v7772_v52, %v7770_v51 }
 0x1b2   : > { %1239 = vmatmul.bf16.gmra.mxu3 %v7776_v53 }
 0x1b5   : > { %v907_v54 = vpop.f32.mrf.mxu1 }
 0x1b6   : > { %v7779_v56 = vadd.f32 %v907_v54, %v839_v45  ;;  %v7873_v54 = vpack.c.bf16 %v456_v50, %v455_v10 }
 0x1b8   : > { %12626 = vst [vmem:[#allocation32_spill] sm:$0xff] %v7779_v56 }
 0x1b9   : > { %12644 = vst [vmem:[#allocation50_spill] sm:$0xff] %v7873_v54 }
 0x1bd   : > { %v909_v55 = vpop.f32.mrf.mxu1 }
 0x1be   : > { %v7781_v57 = vadd.f32 %v909_v55, %v839_v45  ;;  %v457_v55 = vld [vmem:[%s7690_s1 + $0x270] sm:$0xff] }
 0x1c0   : > { %12627 = vst [vmem:[#allocation33_spill] sm:$0xff] %v7781_v57  ;;  %v7785_v58 = vpack.c.bf16 %v7781_v57, %v7779_v56 }
 0x1c2   : > { %1244 = vmatmul.bf16.gmra.mxu3 %v7785_v58 }
 0x1c5   : > { %v912_v59 = vpop.f32.mrf.mxu1 }
 0x1c6   : > { %v7788_v61 = vadd.f32 %v912_v59, %v839_v45  ;;  %v458_v59 = vld [vmem:[%s7690_s1 + $0x278] sm:$0xff] }
 0x1c8   : > { %12628 = vst [vmem:[#allocation34_spill] sm:$0xff] %v7788_v61 }
 0x1cd   : > { %v914_v60 = vpop.f32.mrf.mxu1 }
 0x1ce   : > { %v7790_v63 = vadd.f32 %v914_v60, %v839_v45  ;;  %v7878_v60 = vpack.c.bf16 %v458_v59, %v457_v55  ;;  %v385_v55 = vld [vmem:[%s7690_s1 + $0x30] sm:$0xff] }
 0x1d0   : > { %12629 = vst [vmem:[#allocation35_spill] sm:$0xff] %v7790_v63  ;;  %v7794_v0 = vpack.c.bf16 %v7790_v63, %v7788_v61 }
 0x1d1   : > { %12645 = vst [vmem:[#allocation51_spill] sm:$0xff] %v7878_v60 }
 0x1d2   : > { %1249 = vmatmul.bf16.gmra.mxu3 %v7794_v0 }
 0x1d5   : > { %v917_v1 = vpop.f32.mrf.mxu1 }
 0x1d6   : > { %v7797_v3 = vadd.f32 %v917_v1, %v839_v45  ;;  %v459_v1 = vld [vmem:[%s7690_s1 + $0x280] sm:$0xff] }
 0x1d8   : > { %12630 = vst [vmem:[#allocation36_spill] sm:$0xff] %v7797_v3 }
 0x1dd   : > { %v919_v2 = vpop.f32.mrf.mxu1 }
 0x1de   : > { %v7799_v5 = vadd.f32 %v919_v2, %v839_v45  ;;  %v460_v2 = vld [vmem:[%s7690_s1 + $0x288] sm:$0xff] }
 0x1e0   : > { %12631 = vst [vmem:[#allocation37_spill] sm:$0xff] %v7799_v5  ;;  %v7803_v6 = vpack.c.bf16 %v7799_v5, %v7797_v3 }
 0x1e2   : > { %1254 = vmatmul.bf16.gmra.mxu3 %v7803_v6 }
 0x1e5   : > { %v922_v7 = vpop.f32.mrf.mxu1 }
 0x1e6   : > { %v7806_v9 = vadd.f32 %v922_v7, %v839_v45  ;;  %v7883_v7 = vpack.c.bf16 %v460_v2, %v459_v1  ;;  %v386_v2 = vld [vmem:[%s7690_s1 + $0x38] sm:$0xff] }
 0x1e8   : > { %12632 = vst [vmem:[#allocation38_spill] sm:$0xff] %v7806_v9 }
 0x1e9   : > { %12646 = vst [vmem:[#allocation52_spill] sm:$0xff] %v7883_v7 }
 0x1ed   : > { %v924_v8 = vpop.f32.mrf.mxu1 }
 0x1ee   : > { %v7808_v12 = vadd.f32 %v924_v8, %v839_v45 }
 0x1f0   : > { %12633 = vst [vmem:[#allocation39_spill] sm:$0xff] %v7808_v12  ;;  %v7812_v14 = vpack.c.bf16 %v7808_v12, %v7806_v9 }
 0x1f2   : > { %1259 = vmatmul.bf16.gmra.mxu3 %v7812_v14 }
 0x1f5   : > { %v927_v15 = vpop.f32.mrf.mxu1 }
 0x1f6   : > { %v7815_v18 = vadd.f32 %v927_v15, %v839_v45  ;;  %v461_v15 = vld [vmem:[%s7690_s1 + $0x290] sm:$0xff] }
 0x1f8   : > { %12634 = vst [vmem:[#allocation40_spill] sm:$0xff] %v7815_v18 }
 0x1fd   : > { %v929_v16 = vpop.f32.mrf.mxu1 }
 0x1fe   : > { %v7817_v19 = vadd.f32 %v929_v16, %v839_v45  ;;  %v462_v16 = vld [vmem:[%s7690_s1 + $0x298] sm:$0xff] }
 0x200   : > { %12635 = vst [vmem:[#allocation41_spill] sm:$0xff] %v7817_v19  ;;  %v7821_v20 = vpack.c.bf16 %v7817_v19, %v7815_v18 }
 0x202   : > { %1264 = vmatmul.bf16.gmra.mxu3 %v7821_v20 }
 0x205   : > { %v932_v21 = vpop.f32.mrf.mxu1 }
 0x206   : > { %v7824_v23 = vadd.f32 %v932_v21, %v839_v45 }
 0x208   : > { %12636 = vst [vmem:[#allocation42_spill] sm:$0xff] %v7824_v23 }
 0x20d   : > { %v934_v22 = vpop.f32.mrf.mxu1 }
 0x20e   : > { %v7826_v24 = vadd.f32 %v934_v22, %v839_v45  ;;  %v454_v45 = vld [vmem:[%s7690_s1 + $0x258] sm:$0xff]  ;;  %v7892_v22 = vpack.c.bf16 %v462_v16, %v461_v15  ;;  %v467_v15 = vld [vmem:[%s7690_s1 + $0x2c0] sm:$0xff]  ;;  %v468_v16 = vld [vmem:[%s7690_s1 + $0x2c8] sm:$0xff] }
 0x20f   : > { %v7868_v46 = vpack.c.bf16 %v454_v45, %v453_v44  ;;  %v466_v44 = vld [vmem:[%s7690_s1 + $0x2b8] sm:$0xff] }
 0x210   : > { %12637 = vst [vmem:[#allocation43_spill] sm:$0xff] %v7826_v24  ;;  %v7830_v25 = vpack.c.bf16 %v7826_v24, %v7824_v23  ;;  %v7908_v50 = vpack.c.bf16 %v466_v44, %v465_v42  ;;  %v387_v42 = vld [vmem:[%s7690_s1 + $0x40] sm:$0xff]  ;;  %v6317_v44 = vld [vmem:[#allocation8 + $0x1f8] sm:$0xf] }
 0x211   : > { %12643 = vst [vmem:[#allocation49_spill] sm:$0xff] %v7868_v46 }
 0x212   : > { %945 = vmatpush.bf16.msra.mxu2 %v7830_v25  ;;  %1269 = vmatmul.bf16.gmra.mxu3 %v7830_v25  ;;  %12647 = vst [vmem:[#allocation53_spill] sm:$0xff] %v7892_v22 }
 0x213   : > { %12649 = vst [vmem:[#allocation55_spill] sm:$0xff] %v7908_v50 }
 0x216   : > { %946 = vmatpush.bf16.msra.mxu2 %v7821_v20 }
 0x21a   : > { %947 = vmatpush.bf16.msra.mxu2 %v7812_v14 }
 0x21e   : > { %948 = vmatpush.bf16.msra.mxu2 %v7803_v6 }
 0x222   : > { %949 = vmatpush.bf16.msra.mxu2 %v7794_v0 }
 0x226   : > { %950 = vmatpush.bf16.msra.mxu2 %v7785_v58 }
 0x22a   : > { %951 = vmatpush.bf16.msra.mxu2 %v7776_v53 }
 0x22e   : > { %952 = vmatpush.bf16.msra.mxu2 %v7767_v49 }
 0x231   : > { %953 = vmatmul.bf16.vlgmr.msra.gmra.mxu2 %v7842_v29 }
 0x241   : > { %958 = vmatmul.bf16.gmra.mxu2 %v7848_v33 }
 0x251   : > { %963 = vmatmul.bf16.gmra.mxu2 %v7853_v37 }
 0x261   : > { %968 = vmatmul.bf16.gmra.mxu2 %v7858_v40 }
 0x271   : > { %973 = vmatmul.bf16.gmra.mxu2 %v7863_v43  ;;  %v404_v43 = vld [vmem:[%s7690_s1 + $0xc8] sm:$0xff] }
 0x281   : > { %978 = vmatmul.bf16.gmra.mxu2 %v7868_v46 }
 0x291   : > { %983 = vmatmul.bf16.gmra.mxu2 %v7873_v54 }
 0x2a1   : > { %988 = vmatmul.bf16.gmra.mxu2 %v7878_v60  ;;  %v403_v60 = vld [vmem:[%s7690_s1 + $0xc0] sm:$0xff] }
 0x2b1   : > { %993 = vmatmul.bf16.gmra.mxu2 %v7883_v7 }
 0x2b4   : > { %v7886_v8 = vpop.f32.mrf.mxu2 }
 0x2bc   : > { %v7890_v21 = vpop.f32.mrf.mxu2 }
 0x2c1   : > { %998 = vmatmul.bf16.gmra.mxu2 %v7892_v22  ;;  %v6522_v22 = vld [vmem:[#allocation8 + $0x3c] sm:$0xf0] }
 0x2c4   : > { %v7895_v27 = vpop.f32.mrf.mxu2 }
 0x2cc   : > { %v7899_v32 = vpop.f32.mrf.mxu2 }
 0x2d1   : > { %1003 = vmatmul.bf16.gmra.mxu2 %v7901_v34  ;;  %v6245_v34 = vld [vmem:[#allocation8 + $0x18] sm:$0xf] }
 0x2d4   : > { %v964_v38 = vpop.f32.mrf.mxu2 }
 0x2d5   : > { %v1038_v39 = vmul.f32 %v964_v38, %v383_v36  ;;  %v7915_v36 = vpack.c.bf16 %v468_v16, %v467_v15  ;;  %v6329_v38 = vld [vmem:[#allocation8 + $0x248] sm:$0xf] }
 0x2d6   : > { %v388_v16 = vld [vmem:[%s7690_s1 + $0x48] sm:$0xff] }
 0x2d7   : > { %1074 = vadd.xlane.f32.xlu2 %v1038_v39  ;;  %12650 = vst [vmem:[#allocation56_spill] sm:$0xff] %v7915_v36  ;;  %v6543_v39 = vld [vmem:[#allocation8 + $0x26c] sm:$0xf0] }
 0x2dc   : > { %v966_v45 = vpop.f32.mrf.mxu2 }
 0x2dd   : > { %v1039_v10 = vmul.f32 %v966_v45, %v384_v41  ;;  %v7917_v41 = vor.u32 %v6543_v39, %v6329_v38  ;;  %v6540_v45 = vld [vmem:[#allocation8 + $0x21c] sm:$0xf0]  ;;  %v6293_v38 = vld [vmem:[#allocation8 + $0x158] sm:$0xf] }
 0x2de   : > { %v6534_v39 = vld [vmem:[#allocation8 + $0x17c] sm:$0xf0] }
 0x2df   : > { %1076 = vadd.xlane.f32.xlu0 %v1039_v10  ;;  %12651 = vst [vmem:[#allocation57_spill] sm:$0xff] %v7917_v41  ;;  %1848 = vmatpush.bf16.msrb.mxu2 %v7917_v41 }
 0x2e1   : > { %1008 = vmatmul.bf16.gmra.mxu2 %v7908_v50  ;;  %v7931_v50 = vor.u32 %v6534_v39, %v6293_v38  ;;  %v6528_v38 = vld [vmem:[#allocation8 + $0xdc] sm:$0xf0]  ;;  %v6525_v39 = vld [vmem:[#allocation8 + $0x8c] sm:$0xf0] }
 0x2e3   : > { %12654 = vst [vmem:[#allocation60_spill] sm:$0xff] %v7931_v50 }
 0x2e4   : > { %v969_v59 = vpop.f32.mrf.mxu2 }
 0x2e5   : > { %v1040_v1 = vmul.f32 %v969_v59, %v385_v55  ;;  %v7922_v55 = vor.u32 %v6540_v45, %v6317_v44  ;;  %v6281_v45 = vld [vmem:[#allocation8 + $0x108] sm:$0xf] }
 0x2e7   : > { %1078 = vadd.xlane.f32.xlu1 %v1040_v1  ;;  %12652 = vst [vmem:[#allocation58_spill] sm:$0xff] %v7922_v55  ;;  %1849 = vmatpush.bf16.msrb.mxu2 %v7922_v55  ;;  %v6305_v1 = vld [vmem:[#allocation8 + $0x1a8] sm:$0xf]  ;;  %v7125_v55 = vld [vmem:[#allocation10] sm:$0xff] }
 0x2e8   : > { %v8349_v29 = vperm.slane %v7125_v55, 1  ;;  %v8353_v24 = vperm.slane %v7125_v55, 2 }
 0x2ea   : > { %12719 = vst [vmem:[#allocation125_spill] sm:$0xff] %v8353_v24 }
 0x2ec   : > { %v971_v28 = vpop.f32.mrf.mxu2 }
 0x2ed   : > { %v1041_v31 = vmul.f32 %v971_v28, %v386_v2  ;;  %v6537_v2 = vld [vmem:[#allocation8 + $0x1cc] sm:$0xf0] }
 0x2ee   : > { %v7925_v15 = vor.u32 %v6537_v2, %v6305_v1  ;;  %v469_v28 = vld [vmem:[%s7690_s1 + $0x2d0] sm:$0xff]  ;;  %v6269_v2 = vld [vmem:[#allocation8 + $0xb8] sm:$0xf] }
 0x2ef   : > { %1080 = vadd.xlane.f32.xlu2 %v1041_v31  ;;  %v470_v31 = vld [vmem:[%s7690_s1 + $0x2d8] sm:$0xff]  ;;  %v389_v1 = vld [vmem:[%s7690_s1 + $0x50] sm:$0xff] }
 0x2f0   : > { %12653 = vst [vmem:[#allocation59_spill] sm:$0xff] %v7925_v15  ;;  %1850 = vmatpush.bf16.msrb.mxu2 %v7925_v15 }
 0x2f1   : > { %1013 = vmatmul.bf16.gmra.mxu2 %v7915_v36 }
 0x2f4   : > { %v974_v10 = vpop.f32.mrf.mxu2  ;;  %1851 = vmatpush.bf16.msrb.mxu2 %v7931_v50 }
 0x2f5   : > { %v1042_v59 = vmul.f32 %v974_v10, %v387_v42  ;;  %v7933_v42 = vpack.c.bf16 %v470_v31, %v469_v28  ;;  %v6531_v10 = vld [vmem:[#allocation8 + $0x12c] sm:$0xf0]  ;;  %v6257_v31 = vld [vmem:[#allocation8 + $0x68] sm:$0xf] }
 0x2f7   : > { %1082 = vadd.xlane.f32.xlu0 %v1042_v59  ;;  %12655 = vst [vmem:[#allocation61_spill] sm:$0xff] %v7933_v42  ;;  %v7936_v59 = vor.u32 %v6531_v10, %v6281_v45  ;;  %v390_v45 = vld [vmem:[%s7690_s1 + $0x58] sm:$0xff]  ;;  %v471_v10 = vld [vmem:[%s7690_s1 + $0x2e0] sm:$0xff] }
 0x2f9   : > { %12656 = vst [vmem:[#allocation62_spill] sm:$0xff] %v7936_v59  ;;  %1852 = vmatpush.bf16.msrb.mxu2 %v7936_v59 }
 0x2fc   : > { %v976_v36 = vpop.f32.mrf.mxu2 }
 0x2fd   : > { %v1043_v44 = vmul.f32 %v976_v36, %v388_v16  ;;  %v7941_v16 = vor.u32 %v6528_v38, %v6269_v2 }
 0x2ff   : > { %1084 = vadd.xlane.f32.xlu1 %v1043_v44  ;;  %12657 = vst [vmem:[#allocation63_spill] sm:$0xff] %v7941_v16  ;;  %1853 = vmatpush.bf16.msrb.mxu2 %v7941_v16  ;;  %v7944_v44 = vor.u32 %v6525_v39, %v6257_v31  ;;  %v422_v16 = vld [vmem:[%s7690_s1 + $0x158] sm:$0xff] }
 0x301   : > { %1018 = vmatmul.bf16.gmra.mxu2 %v7933_v42  ;;  %12658 = vst [vmem:[#allocation64_spill] sm:$0xff] %v7944_v44  ;;  %v472_v42 = vld [vmem:[%s7690_s1 + $0x2e8] sm:$0xff] }
 0x303   : > { %1854 = vmatpush.bf16.msrb.mxu2 %v7944_v44  ;;  %v380_v44 = vld [vmem:[%s7690_s1 + $0x8] sm:$0xff] }
 0x304   : > { %v979_v36 = vpop.f32.mrf.mxu2 }
 0x305   : > { %v1044_v28 = vmul.f32 %v979_v36, %v389_v1  ;;  %v7950_v1 = vor.u32 %v6522_v22, %v6245_v34  ;;  %v7952_v36 = vpack.c.bf16 %v472_v42, %v471_v10  ;;  %v392_v22 = vld [vmem:[%s7690_s1 + $0x68] sm:$0xff]  ;;  %v473_v34 = vld [vmem:[%s7690_s1 + $0x2f0] sm:$0xff]  ;;  %v474_v42 = vld [vmem:[%s7690_s1 + $0x2f8] sm:$0xff] }
 0x307   : > { %1086 = vadd.xlane.f32.xlu2 %v1044_v28  ;;  %12659 = vst [vmem:[#allocation65_spill] sm:$0xff] %v7950_v1  ;;  %1855 = vmatpush.bf16.msrb.mxu2 %v7950_v1  ;;  %v391_v28 = vld [vmem:[%s7690_s1 + $0x60] sm:$0xff]  ;;  %v409_v1 = vld [vmem:[%s7690_s1 + $0xf0] sm:$0xff] }
 0x308   : > { %12660 = vst [vmem:[#allocation66_spill] sm:$0xff] %v7952_v36 }
 0x30b   : > { %2988 = vmatpush.bf16.msra.mxu2 %v7733_v62 }
 0x30c   : > { %v981_v2 = vpop.f32.mrf.mxu2 }
 0x30d   : > { %v1045_v38 = vmul.f32 %v981_v2, %v390_v45  ;;  %v7964_v2 = vpack.c.bf16 %v474_v42, %v473_v34 }
 0x30f   : > { %1088 = vadd.xlane.f32.xlu0 %v1045_v38  ;;  %2989 = vmatpush.bf16.msra.mxu2 %v7736_v4  ;;  %12661 = vst [vmem:[#allocation67_spill] sm:$0xff] %v7964_v2  ;;  %v393_v38 = vld [vmem:[%s7690_s1 + $0x70] sm:$0xff] }
 0x311   : > { %1023 = vmatmul.bf16.gmra.mxu2 %v7952_v36 }
 0x313   : > { %2990 = vmatpush.bf16.msra.mxu2 %v7739_v11  ;;  %v397_v11 = vld [vmem:[%s7690_s1 + $0x90] sm:$0xff] }
 0x314   : > { %v984_v31 = vpop.f32.mrf.mxu2 }
 0x315   : > { %v1046_v39 = vmul.f32 %v984_v31, %v391_v28 }
 0x317   : > { %1090 = vadd.xlane.f32.xlu2 %v1046_v39  ;;  %2991 = vmatpush.bf16.msra.mxu2 %v7742_v13  ;;  %v394_v39 = vld [vmem:[%s7690_s1 + $0x78] sm:$0xff]  ;;  %v381_v13 = vld [vmem:[%s7690_s1 + $0x10] sm:$0xff] }
 0x318   : > { %v1036_v37 = vmul.f32 %v7895_v27, %v381_v13  ;;  %v398_v27 = vld [vmem:[%s7690_s1 + $0x98] sm:$0xff] }
 0x31b   : > { %2992 = vmatpush.bf16.msra.mxu2 %v7746_v17 }
 0x31c   : > { %v986_v45 = vpop.f32.mrf.mxu2 }
 0x31d   : > { %v1047_v10 = vmul.f32 %v986_v45, %v392_v22 }
 0x31f   : > { %1092 = vadd.xlane.f32.xlu2 %v1047_v10  ;;  %2993 = vmatpush.bf16.msra.mxu2 %v7750_v26  ;;  %v400_v26 = vld [vmem:[%s7690_s1 + $0xa8] sm:$0xff] }
 0x321   : > { %1028 = vmatmul.bf16.gmra.mxu2 %v7964_v2  ;;  %v402_v2 = vld [vmem:[%s7690_s1 + $0xb8] sm:$0xff] }
 0x323   : > { %2994 = vmatpush.bf16.msra.mxu2 %v7753_v30 }
 0x324   : > { %v989_v28 = vpop.f32.mrf.mxu2 }
 0x325   : > { %v1048_v31 = vmul.f32 %v989_v28, %v393_v38 }
 0x327   : > { %1094 = vadd.xlane.f32.xlu0 %v1048_v31  ;;  %2995 = vmatpush.bf16.msra.mxu2 %v7757_v35 }
 0x32c   : > { %v991_v22 = vpop.f32.mrf.mxu2 }
 0x32d   : > { %v1049_v34 = vmul.f32 %v991_v22, %v394_v39  ;;  %v401_v39 = vld [vmem:[%s7690_s1 + $0xb0] sm:$0xff] }
 0x32f   : > { %1096 = vadd.xlane.f32.xlu0 %v1049_v34 }
 0x331   : > { %1856 = vmatmul.bf16.vlgmr.msrb.gmra.mxu2 %v7767_v49 }
 0x334   : > { %v7974_v42 = vpop.f32.mrf.mxu2 }
 0x33c   : > { %v7976_v45 = vpop.f32.mrf.mxu2 }
 0x341   : > { %1861 = vmatmul.bf16.gmra.mxu2 %v7776_v53 }
 0x344   : > { %v999_v10 = vpop.f32.mrf.mxu2 }
 0x345   : > { %v1052_v4 = vmul.f32 %v999_v10, %v397_v11  ;;  %v423_v10 = vld [vmem:[%s7690_s1 + $0x160] sm:$0xff] }
 0x34a   : > { %v7990_v40 = vpop.xlane.xlu2 %1074 }
 0x34c   : > { %v7979_v38 = vpop.f32.mrf.mxu2 }
 0x34d   : > { %v1053_v33 = vmul.f32 %v7979_v38, %v398_v27  ;;  %v418_v27 = vld [vmem:[%s7690_s1 + $0x138] sm:$0xff] }
 0x351   : > { %1866 = vmatmul.bf16.gmra.mxu2 %v7785_v58 }
 0x354   : > { %v7982_v28 = vpop.f32.mrf.mxu2 }
 0x35c   : > { %v1006_v31 = vpop.f32.mrf.mxu2 }
 0x361   : > { %1871 = vmatmul.bf16.gmra.mxu2 %v7794_v0 }
 0x364   : > { %v1009_v22 = vpop.f32.mrf.mxu2 }
 0x365   : > { %v1056_v34 = vmul.f32 %v1009_v22, %v401_v39  ;;  %v7993_v39 = vpop.xlane.xlu0 %1076  ;;  %v7996_v22 = vpop.xlane.xlu2 %1080 }
 0x367   : > { %1110 = vadd.xlane.f32.xlu0 %v1056_v34  ;;  %v407_v34 = vld [vmem:[%s7690_s1 + $0xe0] sm:$0xff] }
 0x36c   : > { %v1011_v36 = vpop.f32.mrf.mxu2 }
 0x36d   : > { %v1057_v7 = vmul.f32 %v1011_v36, %v402_v2 }
 0x36f   : > { %1112 = vadd.xlane.f32.xlu1 %v1057_v7  ;;  %v405_v7 = vld [vmem:[%s7690_s1 + $0xd0] sm:$0xff] }
 0x371   : > { %1876 = vmatmul.bf16.gmra.mxu2 %v7803_v6 }
 0x374   : > { %v1014_v54 = vpop.f32.mrf.mxu2 }
 0x375   : > { %v1058_v46 = vmul.f32 %v1014_v54, %v403_v60  ;;  %v7998_v54 = vpop.xlane.xlu0 %1082 }
 0x377   : > { %1114 = vadd.xlane.f32.xlu2 %v1058_v46  ;;  %v406_v46 = vld [vmem:[%s7690_s1 + $0xd8] sm:$0xff] }
 0x37c   : > { %v1016_v35 = vpop.f32.mrf.mxu2 }
 0x37d   : > { %v1059_v30 = vmul.f32 %v1016_v35, %v404_v43  ;;  %v1087_v43 = vpop.xlane.xlu2 %1086 }
 0x37f   : > { %1116 = vadd.xlane.f32.xlu0 %v1059_v30 }
 0x381   : > { %1881 = vmatmul.bf16.gmra.mxu2 %v7812_v14 }
 0x382   : > { %v1089_v60 = vpop.xlane.xlu0 %1088 }
 0x384   : > { %v1019_v36 = vpop.f32.mrf.mxu2 }
 0x385   : > { %v1060_v2 = vmul.f32 %v1019_v36, %v405_v7  ;;  %v1055_v36 = vmul.f32 %v1006_v31, %v400_v26  ;;  %v426_v26 = vld [vmem:[%s7690_s1 + $0x178] sm:$0xff]  ;;  %v1079_v31 = vpop.xlane.xlu1 %1078 }
 0x387   : > { %1118 = vadd.xlane.f32.xlu1 %v1060_v2 }
 0x38a   : > { %v1091_v2 = vpop.xlane.xlu2 %1090 }
 0x38b   : > { %v1142_v59 = vmul.f32 %v1091_v2, %v423_v10  ;;  %v416_v10 = vld [vmem:[%s7690_s1 + $0x128] sm:$0xff] }
 0x38c   : > { %v1021_v30 = vpop.f32.mrf.mxu2 }
 0x38d   : > { %v1061_v35 = vmul.f32 %v1021_v30, %v406_v46  ;;  %v408_v30 = vld [vmem:[%s7690_s1 + $0xe8] sm:$0xff] }
 0x38f   : > { %1120 = vadd.xlane.f32.xlu2 %v1061_v35 }
 0x391   : > { %1886 = vmatmul.bf16.gmra.mxu2 %v7821_v20 }
 0x394   : > { %v1024_v17 = vpop.f32.mrf.mxu2 }
 0x395   : > { %v1062_v7 = vmul.f32 %v1024_v17, %v407_v34  ;;  %v425_v17 = vld [vmem:[%s7690_s1 + $0x170] sm:$0xff]  ;;  %v424_v34 = vld [vmem:[%s7690_s1 + $0x168] sm:$0xff] }
 0x397   : > { %1108 = vadd.xlane.f32.xlu2 %v1055_v36  ;;  %1122 = vadd.xlane.f32.xlu0 %v1062_v7  ;;  %v1093_v7 = vpop.xlane.xlu2 %1092 }
 0x39a   : > { %v1095_v46 = vpop.xlane.xlu0 %1094 }
 0x39b   : > { %v1144_v13 = vmul.f32 %v1095_v46, %v425_v17  ;;  %v421_v46 = vld [vmem:[%s7690_s1 + $0x150] sm:$0xff]  ;;  %v1141_v17 = vmul.f32 %v1089_v60, %v422_v16 }
 0x39c   : > { %v1026_v35 = vpop.f32.mrf.mxu2  ;;  %v417_v16 = vld [vmem:[%s7690_s1 + $0x130] sm:$0xff] }
 0x39d   : > { %v1063_v62 = vmul.f32 %v1026_v35, %v408_v30  ;;  %v1035_v35 = vmul.f32 %v7890_v21, %v380_v44  ;;  %v419_v21 = vld [vmem:[%s7690_s1 + $0x140] sm:$0xff] }
 0x39f   : > { %1102 = vadd.xlane.f32.xlu2 %v1052_v4  ;;  %1070 = vadd.xlane.f32.xlu0 %v1036_v37  ;;  %v1143_v37 = vmul.f32 %v1093_v7, %v424_v34  ;;  %v420_v34 = vld [vmem:[%s7690_s1 + $0x148] sm:$0xff]  ;;  %v410_v7 = vld [vmem:[%s7690_s1 + $0xf8] sm:$0xff] }
 0x3a0   : > { %1124 = vadd.xlane.f32.xlu1 %v1063_v62 }
 0x3a1   : > { %1891 = vmatmul.bf16.gmra.mxu2 %v7830_v25 }
 0x3a2   : > { %v1097_v36 = vpop.xlane.xlu0 %1096 }
 0x3a3   : > { %v1145_v11 = vmul.f32 %v1097_v36, %v426_v26  ;;  %v1168_v26 = vpack.c.bf16 %v1143_v37, %v1142_v59  ;;  %v395_v36 = vld [vmem:[%s7690_s1 + $0x80] sm:$0xff]  ;;  %v1138_v59 = vmul.f32 %v7998_v54, %v419_v21  ;;  %v1136_v37 = vmul.f32 %v1079_v31, %v417_v16 }
 0x3a4   : > { %v1029_v4 = vpop.f32.mrf.mxu2  ;;  %v379_v31 = vld [vmem:[%s7690_s1] sm:$0xff] }
 0x3a5   : > { %v1064_v62 = vmul.f32 %v1029_v4, %v409_v1  ;;  %v1169_v30 = vpack.c.bf16 %v1145_v11, %v1144_v13  ;;  %v1085_v1 = vpop.xlane.xlu1 %1084  ;;  %v1140_v13 = vmul.f32 %v1087_v43, %v421_v46  ;;  %v1137_v43 = vmul.f32 %v7996_v22, %v418_v27  ;;  %v399_v4 = vld [vmem:[%s7690_s1 + $0xa0] sm:$0xff]  ;;  %v382_v22 = vld [vmem:[%s7690_s1 + $0x18] sm:$0xff] }
 0x3a6   : > { %v1139_v38 = vmul.f32 %v1085_v1, %v420_v34  ;;  %v1054_v54 = vmul.f32 %v7982_v28, %v399_v4  ;;  %v437_v4 = vld [vmem:[%s7690_s1 + $0x1d0] sm:$0xff] }
 0x3a7   : > { %1275 = vmatpush.bf16.msrb.mxu0 %v1169_v30  ;;  %1068 = vadd.xlane.f32.xlu2 %v1035_v35  ;;  %v1167_v2 = vpack.c.bf16 %v1141_v17, %v1140_v13  ;;  %v1165_v30 = vpack.c.bf16 %v1137_v43, %v1136_v37  ;;  %v1037_v17 = vmul.f32 %v7899_v32, %v382_v22 }
 0x3a8   : > { %1104 = vadd.xlane.f32.xlu0 %v1053_v33  ;;  %1126 = vadd.xlane.f32.xlu1 %v1064_v62  ;;  %v1050_v33 = vmul.f32 %v7974_v42, %v395_v36  ;;  %v1166_v60 = vpack.c.bf16 %v1139_v38, %v1138_v59  ;;  %v415_v62 = vld [vmem:[%s7690_s1 + $0x120] sm:$0xff]  ;;  %v1135_v42 = vmul.f32 %v7993_v39, %v416_v10  ;;  %v396_v39 = vld [vmem:[%s7690_s1 + $0x88] sm:$0xff]  ;;  %v442_v38 = vld [vmem:[%s7690_s1 + $0x1f8] sm:$0xff] }
 0x3a9   : > { %v1134_v35 = vmul.f32 %v7990_v40, %v415_v62  ;;  %v1051_v28 = vmul.f32 %v7976_v45, %v396_v39  ;;  %v439_v59 = vld [vmem:[%s7690_s1 + $0x1e0] sm:$0xff] }
 0x3ab   : > { %1276 = vmatpush.bf16.msrb.mxu0 %v1168_v26  ;;  %v1164_v46 = vpack.c.bf16 %v1135_v42, %v1134_v35  ;;  %v1034_v26 = vmul.f32 %v7886_v8, %v379_v31  ;;  %v436_v42 = vld [vmem:[%s7690_s1 + $0x1c8] sm:$0xff]  ;;  %v435_v35 = vld [vmem:[%s7690_s1 + $0x1c0] sm:$0xff]  ;;  %v434_v31 = vld [vmem:[%s7690_s1 + $0x1b8] sm:$0xff] }
 0x3ac   : > { %v1031_v44 = vpop.f32.mrf.mxu2 }
 0x3ad   : > { %v1065_v11 = vmul.f32 %v1031_v44, %v410_v7  ;;  %v441_v44 = vld [vmem:[%s7690_s1 + $0x1f0] sm:$0xff] }
 0x3af   : > { %1277 = vmatpush.bf16.msrb.mxu0 %v1167_v2  ;;  %v440_v2 = vld [vmem:[%s7690_s1 + $0x1e8] sm:$0xff] }
 0x3b0   : > { %1098 = vadd.xlane.f32.xlu0 %v1050_v33  ;;  %1128 = vadd.xlane.f32.xlu1 %v1065_v11 }
 0x3b3   : > { %1278 = vmatpush.bf16.msrb.mxu0 %v1166_v60  ;;  %v438_v60 = vld [vmem:[%s7690_s1 + $0x1d8] sm:$0xff] }
 0x3b7   : > { %1279 = vmatpush.bf16.msrb.mxu0 %v1165_v30 }
 0x3b8   : > { %1106 = vadd.xlane.f32.xlu1 %v1054_v54 }
 0x3bb   : > { %1280 = vmatpush.bf16.msrb.mxu0 %v1164_v46 }
 0x3c0   : > { %1072 = vadd.xlane.f32.xlu1 %v1037_v17 }
 0x3c8   : > { %1066 = vadd.xlane.f32.xlu1 %v1034_v26 }
 0x3d0   : > { %1100 = vadd.xlane.f32.xlu1 %v1051_v28  ;;  %v433_v28 = vld [vmem:[%s7690_s1 + $0x1b0] sm:$0xff] }
 0x3da   : > { %v1111_v1 = vpop.xlane.xlu0 %1110 }
 0x3e2   : > { %v1113_v40 = vpop.xlane.xlu1 %1112 }
 0x3ea   : > { %v1115_v7 = vpop.xlane.xlu2 %1114 }
 0x3eb   : > { %v1154_v39 = vmul.f32 %v1115_v7, %v435_v35  ;;  %v491_v35 = vld [vmem:[%s7697_s12] sm:$0xff] }
 0x3f2   : > { %v1117_v32 = vpop.xlane.xlu0 %1116 }
 0x3f3   : > { %v1155_v22 = vmul.f32 %v1117_v32, %v436_v42 }
 0x3fa   : > { %v1119_v34 = vpop.xlane.xlu1 %1118 }
 0x3fb   : > { %v1156_v54 = vmul.f32 %v1119_v34, %v437_v4 }
 0x402   : > { %v1121_v13 = vpop.xlane.xlu2 %1120 }
 0x403   : > { %v1157_v37 = vmul.f32 %v1121_v13, %v438_v60  ;;  %v414_v13 = vld [vmem:[%s7690_s1 + $0x118] sm:$0xff]  ;;  %v412_v60 = vld [vmem:[%s7690_s1 + $0x108] sm:$0xff] }
 0x405   : > { %v1175_v17 = vpack.c.bf16 %v1157_v37, %v1156_v54 }
 0x40a   : > { %v1123_v8 = vpop.xlane.xlu0 %1122  ;;  %v1109_v27 = vpop.xlane.xlu2 %1108 }
 0x40b   : > { %v1158_v10 = vmul.f32 %v1123_v8, %v439_v59  ;;  %v1152_v8 = vmul.f32 %v1111_v1, %v433_v28  ;;  %v430_v59 = vld [vmem:[%s7690_s1 + $0x198] sm:$0xff]  ;;  %v411_v1 = vld [vmem:[%s7690_s1 + $0x100] sm:$0xff]  ;;  %v428_v28 = vld [vmem:[%s7690_s1 + $0x188] sm:$0xff] }
 0x412   : > { %v1071_v46 = vpop.xlane.xlu0 %1070  ;;  %v1103_v26 = vpop.xlane.xlu2 %1102 }
 0x413   : > { %v1125_v36 = vpop.xlane.xlu1 %1124 }
 0x414   : > { %v1159_v16 = vmul.f32 %v1125_v36, %v440_v2  ;;  %v413_v36 = vld [vmem:[%s7690_s1 + $0x110] sm:$0xff] }
 0x415   : > { %v1132_v2 = vmul.f32 %v1071_v46, %v413_v36  ;;  %v493_v46 = vld [vmem:[%s7697_s12 + $0x10] sm:$0xff] }
 0x416   : > { %v1176_v62 = vpack.c.bf16 %v1159_v16, %v1158_v10 }
 0x41a   : > { %v1069_v10 = vpop.xlane.xlu2 %1068 }
 0x41b   : > { %v1127_v21 = vpop.xlane.xlu1 %1126  ;;  %v1105_v16 = vpop.xlane.xlu0 %1104 }
 0x41c   : > { %v1160_v33 = vmul.f32 %v1127_v21, %v441_v44  ;;  %v1153_v21 = vmul.f32 %v1113_v40, %v434_v31  ;;  %v1174_v44 = vpack.c.bf16 %v1155_v22, %v1154_v39  ;;  %v429_v40 = vld [vmem:[%s7690_s1 + $0x190] sm:$0xff]  ;;  %v1149_v4 = vmul.f32 %v1105_v16, %v430_v59  ;;  %v427_v31 = vld [vmem:[%s7690_s1 + $0x180] sm:$0xff] }
 0x41d   : > { %v1148_v42 = vmul.f32 %v1103_v26, %v429_v40  ;;  %v501_v59 = vld [vmem:[%s7697_s12 + $0x50] sm:$0xff]  ;;  %v502_v40 = vld [vmem:[%s7697_s12 + $0x58] sm:$0xff] }
 0x41e   : > { %v1173_v7 = vpack.c.bf16 %v1153_v21, %v1152_v8  ;;  %v492_v21 = vld [vmem:[%s7697_s12 + $0x8] sm:$0xff]  ;;  %v495_v8 = vld [vmem:[%s7697_s12 + $0x20] sm:$0xff] }
 0x41f   : > { %v1171_v22 = vpack.c.bf16 %v1149_v4, %v1148_v42 }
 0x423   : > { %v1129_v11 = vpop.xlane.xlu1 %1128  ;;  %v1099_v39 = vpop.xlane.xlu0 %1098 }
 0x424   : > { %v1161_v45 = vmul.f32 %v1129_v11, %v442_v38  ;;  %v431_v38 = vld [vmem:[%s7690_s1 + $0x1a0] sm:$0xff]  ;;  %v432_v11 = vld [vmem:[%s7690_s1 + $0x1a8] sm:$0xff]  ;;  %v1146_v36 = vmul.f32 %v1099_v39, %v427_v31  ;;  %v513_v39 = vld [vmem:[%s7697_s12 + $0xb0] sm:$0xff] }
 0x425   : > { %v511_v31 = vld [vmem:[%s7697_s12 + $0xa0] sm:$0xff] }
 0x426   : > { %v1177_v43 = vpack.c.bf16 %v1161_v45, %v1160_v33 }
 0x428   : > { %1324 = vmatpush.bf16.msrb.mxu1 %v1177_v43  ;;  %v1151_v43 = vmul.f32 %v1109_v27, %v432_v11  ;;  %v496_v11 = vld [vmem:[%s7697_s12 + $0x28] sm:$0xff] }
 0x42b   : > { %v1107_v30 = vpop.xlane.xlu1 %1106 }
 0x42c   : > { %1325 = vmatpush.bf16.msrb.mxu1 %v1176_v62  ;;  %v1150_v33 = vmul.f32 %v1107_v30, %v431_v38  ;;  %v1131_v30 = vmul.f32 %v1069_v10, %v412_v60  ;;  %v503_v10 = vld [vmem:[%s7697_s12 + $0x60] sm:$0xff] }
 0x42e   : > { %v1172_v37 = vpack.c.bf16 %v1151_v43, %v1150_v33  ;;  %v498_v33 = vld [vmem:[%s7697_s12 + $0x38] sm:$0xff]  ;;  %v500_v43 = vld [vmem:[%s7697_s12 + $0x48] sm:$0xff] }
 0x42f   : > { %v8088_v60 = vpack.c.bf16 %v502_v40, %v500_v43 }
 0x430   : > { %1326 = vmatpush.bf16.msrb.mxu1 %v1175_v17  ;;  %v8061_v17 = vpack.c.bf16 %v493_v46, %v491_v35  ;;  %v508_v46 = vld [vmem:[%s7697_s12 + $0x88] sm:$0xff] }
 0x431   : > { %12667 = vst [vmem:[#allocation73_spill] sm:$0xff] %v8088_v60 }
 0x432   : > { %12662 = vst [vmem:[#allocation68_spill] sm:$0xff] %v8061_v17 }
 0x433   : > { %v1073_v34 = vpop.xlane.xlu1 %1072 }
 0x434   : > { %v1133_v32 = vmul.f32 %v1073_v34, %v414_v13  ;;  %1327 = vmatpush.bf16.msrb.mxu1 %v1174_v44  ;;  %v494_v44 = vld [vmem:[%s7697_s12 + $0x18] sm:$0xff] }
 0x435   : > { %v8068_v34 = vpack.c.bf16 %v494_v44, %v492_v21  ;;  %v6233_v21 = vld [vmem:[#allocation8 + $0x23c] sm:$0xf]  ;;  %v6519_v44 = vld [vmem:[#allocation8 + $0x260] sm:$0xf0] }
 0x436   : > { %v1163_v45 = vpack.c.bf16 %v1133_v32, %v1132_v2  ;;  %v497_v2 = vld [vmem:[%s7697_s12 + $0x30] sm:$0xff] }
 0x437   : > { %12663 = vst [vmem:[#allocation69_spill] sm:$0xff] %v8068_v34  ;;  %v8073_v32 = vpack.c.bf16 %v497_v2, %v495_v8  ;;  %v8120_v8 = vor.u32 %v6519_v44, %v6233_v21  ;;  %v6235_v2 = vld [vmem:[#allocation8 + $0x264] sm:$0xf0]  ;;  %v6512_v21 = vld [vmem:[#allocation8 + $0x1a0] sm:$0xf] }
 0x438   : > { %1281 = vmatpush.bf16.msrb.mxu0 %v1163_v45  ;;  %1328 = vmatpush.bf16.msrb.mxu1 %v1173_v7  ;;  %v8078_v45 = vpack.c.bf16 %v498_v33, %v496_v11  ;;  %v499_v7 = vld [vmem:[%s7697_s12 + $0x40] sm:$0xff]  ;;  %v6520_v33 = vld [vmem:[#allocation8 + $0x268] sm:$0xf0] }
 0x439   : > { %12664 = vst [vmem:[#allocation70_spill] sm:$0xff] %v8073_v32  ;;  %v8083_v16 = vpack.c.bf16 %v501_v59, %v499_v7  ;;  %v6241_v11 = vld [vmem:[#allocation8 + $0x244] sm:$0xf]  ;;  %v517_v59 = vld [vmem:[%s7697_s12 + $0xd0] sm:$0xff]  ;;  %1573 = vmatpush.bf16.msrb.mxu3 %v8120_v8  ;;  %3207 = vmatpush.bf16.msrb.mxu2 %v8120_v8 }
 0x43a   : > { %12665 = vst [vmem:[#allocation71_spill] sm:$0xff] %v8078_v45  ;;  %v515_v7 = vld [vmem:[%s7697_s12 + $0xc0] sm:$0xff]  ;;  %v8126_v40 = vor.u32 %v6520_v33, %v6241_v11  ;;  %v6514_v11 = vld [vmem:[#allocation8 + $0x1c8] sm:$0xf0] }
 0x43b   : > { %v1067_v62 = vpop.xlane.xlu1 %1066  ;;  %12666 = vst [vmem:[#allocation72_spill] sm:$0xff] %v8083_v16 }
 0x43c   : > { %v1130_v54 = vmul.f32 %v1067_v62, %v411_v1  ;;  %1329 = vmatpush.bf16.msrb.mxu1 %v1172_v37  ;;  %v505_v1 = vld [vmem:[%s7697_s12 + $0x70] sm:$0xff]  ;;  %v504_v37 = vld [vmem:[%s7697_s12 + $0x68] sm:$0xff]  ;;  %v506_v62 = vld [vmem:[%s7697_s12 + $0x78] sm:$0xff]  ;;  %12674 = vst [vmem:[#allocation80_spill] sm:$0xff] %v8120_v8 }
 0x43d   : > { %v8093_v4 = vpack.c.bf16 %v505_v1, %v503_v10  ;;  %v8098_v42 = vpack.c.bf16 %v506_v62, %v504_v37  ;;  %12676 = vst [vmem:[#allocation82_spill] sm:$0xff] %v8126_v40  ;;  %v6221_v10 = vld [vmem:[#allocation8 + $0x1ec] sm:$0xf]  ;;  %v6516_v1 = vld [vmem:[#allocation8 + $0x210] sm:$0xf0] }
 0x43e   : > { %v1162_v27 = vpack.c.bf16 %v1131_v30, %v1130_v54  ;;  %v507_v30 = vld [vmem:[%s7697_s12 + $0x80] sm:$0xff]  ;;  %v509_v54 = vld [vmem:[%s7697_s12 + $0x90] sm:$0xff]  ;;  %v8132_v62 = vor.u32 %v6516_v1, %v6221_v10 }
 0x43f   : > { %12668 = vst [vmem:[#allocation74_spill] sm:$0xff] %v8093_v4  ;;  %v8103_v35 = vpack.c.bf16 %v509_v54, %v507_v30  ;;  %v6515_v37 = vld [vmem:[#allocation8 + $0x1f0] sm:$0xf]  ;;  %v6223_v30 = vld [vmem:[#allocation8 + $0x214] sm:$0xf0] }
 0x440   : > { %1282 = vmatpush.bf16.msrb.mxu0 %v1162_v27  ;;  %1330 = vmatpush.bf16.msrb.mxu1 %v1171_v22  ;;  %12669 = vst [vmem:[#allocation75_spill] sm:$0xff] %v8098_v42  ;;  %v510_v27 = vld [vmem:[%s7697_s12 + $0x98] sm:$0xff]  ;;  %v6229_v54 = vld [vmem:[#allocation8 + $0x1f4] sm:$0xf]  ;;  %v6509_v1 = vld [vmem:[#allocation8 + $0x150] sm:$0xf] }
 0x441   : > { %12670 = vst [vmem:[#allocation76_spill] sm:$0xff] %v8103_v35  ;;  %v8108_v22 = vpack.c.bf16 %v510_v27, %v508_v46  ;;  %v6517_v46 = vld [vmem:[#allocation8 + $0x218] sm:$0xf0]  ;;  %v8134_v27 = vor.u32 %v6515_v37, %v6223_v30  ;;  %1574 = vmatpush.bf16.msrb.mxu3 %v8132_v62  ;;  %3208 = vmatpush.bf16.msrb.mxu2 %v8132_v62  ;;  %v6510_v10 = vld [vmem:[#allocation8 + $0x170] sm:$0xf0] }
 0x442   : > { %12677 = vst [vmem:[#allocation83_spill] sm:$0xff] %v8132_v62  ;;  %v6199_v30 = vld [vmem:[#allocation8 + $0x174] sm:$0xf0] }
 0x443   : > { %1283 = vmatmul.bf16.vlgmr.msrb.gmra.mxu0 %v8061_v17  ;;  %v1101_v26 = vpop.xlane.xlu1 %1100  ;;  %12671 = vst [vmem:[#allocation77_spill] sm:$0xff] %v8108_v22  ;;  %v6289_v17 = vld [vmem:[#allocation8 + $0x110] sm:$0xf] }
 0x444   : > { %v1147_v13 = vmul.f32 %v1101_v26, %v428_v28  ;;  %v8113_v28 = vpack.c.bf16 %v513_v39, %v511_v31  ;;  %v512_v26 = vld [vmem:[%s7697_s12 + $0xa8] sm:$0xff]  ;;  %12678 = vst [vmem:[#allocation84_spill] sm:$0xff] %v8134_v27  ;;  %v8136_v31 = vor.u32 %v6517_v46, %v6229_v54  ;;  %v8139_v39 = vpack.c.bf16 %v517_v59, %v515_v7  ;;  %v6205_v54 = vld [vmem:[#allocation8 + $0x154] sm:$0xf]  ;;  %v6511_v46 = vld [vmem:[#allocation8 + $0x178] sm:$0xf0] }
 0x445   : > { %v6197_v59 = vld [vmem:[#allocation8 + $0x14c] sm:$0xf] }
 0x446   : > { %v1170_v38 = vpack.c.bf16 %v1147_v13, %v1146_v36  ;;  %12672 = vst [vmem:[#allocation78_spill] sm:$0xff] %v8113_v28  ;;  %v514_v36 = vld [vmem:[%s7697_s12 + $0xb8] sm:$0xff]  ;;  %v8153_v37 = vor.u32 %v6510_v10, %v6197_v59  ;;  %v6507_v10 = vld [vmem:[#allocation8 + $0x120] sm:$0xf0] }
 0x447   : > { %v8118_v13 = vpack.c.bf16 %v514_v36, %v512_v26  ;;  %12679 = vst [vmem:[#allocation85_spill] sm:$0xff] %v8136_v31  ;;  %v6209_v26 = vld [vmem:[#allocation8 + $0x19c] sm:$0xf]  ;;  %v6513_v36 = vld [vmem:[#allocation8 + $0x1c0] sm:$0xf0] }
 0x448   : > { %1331 = vmatpush.bf16.msrb.mxu1 %v1170_v38  ;;  %v6518_v38 = vld [vmem:[#allocation8 + $0x240] sm:$0xf]  ;;  %12680 = vst [vmem:[#allocation86_spill] sm:$0xff] %v8139_v39  ;;  %v8144_v44 = vor.u32 %v6513_v36, %v6209_v26  ;;  %v516_v26 = vld [vmem:[%s7697_s12 + $0xc8] sm:$0xff]  ;;  %v518_v36 = vld [vmem:[%s7697_s12 + $0xd8] sm:$0xff] }
 0x449   : > { %12673 = vst [vmem:[#allocation79_spill] sm:$0xff] %v8118_v13  ;;  %v8124_v43 = vor.u32 %v6518_v38, %v6235_v2  ;;  %v6211_v38 = vld [vmem:[#allocation8 + $0x1c4] sm:$0xf0]  ;;  %v6217_v2 = vld [vmem:[#allocation8 + $0x1a4] sm:$0xf] }
 0x44a   : > { %12681 = vst [vmem:[#allocation87_spill] sm:$0xff] %v8144_v44  ;;  %v8147_v33 = vor.u32 %v6512_v21, %v6211_v38  ;;  %v8149_v7 = vor.u32 %v6514_v11, %v6217_v2  ;;  %1575 = vmatpush.bf16.msrb.mxu3 %v8144_v44  ;;  %v8159_v21 = vor.u32 %v6509_v1, %v6199_v30  ;;  %v8164_v2 = vpop.f32.mrf.mxu3  ;;  %v6185_v59 = vld [vmem:[#allocation8 + $0xfc] sm:$0xf]  ;;  %v6506_v30 = vld [vmem:[#allocation8 + $0x100] sm:$0xf] }
 0x44b   : > { %1332 = vmatmul.bf16.vlgmr.msrb.gmra.mxu1 %v8068_v34  ;;  %12675 = vst [vmem:[#allocation81_spill] sm:$0xff] %v8124_v43  ;;  %1622 = vmatpush.bf16.msra.mxu0 %v8124_v43  ;;  %v8161_v38 = vor.u32 %v6511_v46, %v6205_v54  ;;  %v8166_v11 = vpack.c.bf16 %v518_v36, %v516_v26  ;;  %v6187_v54 = vld [vmem:[#allocation8 + $0x124] sm:$0xf0]  ;;  %v519_v26 = vld [vmem:[%s7697_s12 + $0xe0] sm:$0xff]  ;;  %v521_v36 = vld [vmem:[%s7697_s12 + $0xf0] sm:$0xff] }
 0x44c   : > { %1671 = vmatpush.bf16.msra.mxu1 %v8126_v40  ;;  %12682 = vst [vmem:[#allocation88_spill] sm:$0xff] %v8147_v33  ;;  %3209 = vmatpush.bf16.msrb.mxu2 %v8144_v44  ;;  %v8171_v1 = vor.u32 %v6507_v10, %v6185_v59  ;;  %v8174_v46 = vor.u32 %v6506_v30, %v6187_v54  ;;  %v6173_v59 = vld [vmem:[#allocation8 + $0xac] sm:$0xf]  ;;  %v6504_v10 = vld [vmem:[#allocation8 + $0xd0] sm:$0xf0] }
 0x44d   : > { %12683 = vst [vmem:[#allocation89_spill] sm:$0xff] %v8149_v7  ;;  %v6175_v30 = vld [vmem:[#allocation8 + $0xd4] sm:$0xf0]  ;;  %v6181_v54 = vld [vmem:[#allocation8 + $0xb4] sm:$0xf] }
 0x44e   : > { %12684 = vst [vmem:[#allocation90_spill] sm:$0xff] %v8153_v37  ;;  %1576 = vmatpush.bf16.msrb.mxu3 %v8153_v37 }
 0x44f   : > { %1623 = vmatpush.bf16.msra.mxu0 %v8134_v27  ;;  %12685 = vst [vmem:[#allocation91_spill] sm:$0xff] %v8159_v21 }
 0x450   : > { %1672 = vmatpush.bf16.msra.mxu1 %v8136_v31  ;;  %12686 = vst [vmem:[#allocation92_spill] sm:$0xff] %v8161_v38  ;;  %3210 = vmatpush.bf16.msrb.mxu2 %v8153_v37 }
 0x451   : > { %12687 = vst [vmem:[#allocation93_spill] sm:$0xff] %v8166_v11 }
 0x452   : > { %12688 = vst [vmem:[#allocation94_spill] sm:$0xff] %v8171_v1  ;;  %1577 = vmatpush.bf16.msrb.mxu3 %v8171_v1 }
 0x453   : > { %1288 = vmatmul.bf16.gmra.mxu0 %v8073_v32  ;;  %12689 = vst [vmem:[#allocation95_spill] sm:$0xff] %v8174_v46 }
 0x454   : > { %1624 = vmatpush.bf16.msra.mxu0 %v8147_v33  ;;  %1673 = vmatpush.bf16.msra.mxu1 %v8149_v7 }
 0x455   : > { %3211 = vmatpush.bf16.msrb.mxu2 %v8171_v1 }
 0x458   : > { %1625 = vmatpush.bf16.msra.mxu0 %v8159_v21  ;;  %1674 = vmatpush.bf16.msra.mxu1 %v8161_v38  ;;  %v6151_v38 = vld [vmem:[#allocation8 + $0x34] sm:$0xf0] }
 0x45b   : > { %1337 = vmatmul.bf16.gmra.mxu1 %v8078_v45 }
 0x45c   : > { %1626 = vmatpush.bf16.msra.mxu0 %v8174_v46 }
 0x463   : > { %1293 = vmatmul.bf16.gmra.mxu0 %v8083_v16  ;;  %v522_v16 = vld [vmem:[%s7697_s12 + $0xf8] sm:$0xff] }
 0x46b   : > { %1342 = vmatmul.bf16.gmra.mxu1 %v8088_v60 }
 0x473   : > { %1298 = vmatmul.bf16.gmra.mxu0 %v8093_v4  ;;  %v1237_v4 = vpop.f32.mrf.mxu3 }
 0x47b   : > { %1347 = vmatmul.bf16.gmra.mxu1 %v8098_v42  ;;  %v8184_v42 = vor.u32 %v6504_v10, %v6173_v59  ;;  %v6501_v59 = vld [vmem:[#allocation8 + $0x80] sm:$0xf0]  ;;  %v6500_v10 = vld [vmem:[#allocation8 + $0x60] sm:$0xf] }
 0x47d   : > { %12691 = vst [vmem:[#allocation97_spill] sm:$0xff] %v8184_v42  ;;  %1578 = vmatpush.bf16.msrb.mxu3 %v8184_v42  ;;  %3212 = vmatpush.bf16.msrb.mxu2 %v8184_v42 }
 0x483   : > { %1303 = vmatmul.bf16.gmra.mxu0 %v8103_v35  ;;  %v6505_v35 = vld [vmem:[#allocation8 + $0xd8] sm:$0xf0] }
 0x484   : > { %v8189_v60 = vor.u32 %v6505_v35, %v6181_v54  ;;  %v6502_v35 = vld [vmem:[#allocation8 + $0x88] sm:$0xf0] }
 0x485   : > { %v520_v54 = vld [vmem:[%s7697_s12 + $0xe8] sm:$0xff] }
 0x486   : > { %12693 = vst [vmem:[#allocation99_spill] sm:$0xff] %v8189_v60 }
 0x48b   : > { %1352 = vmatmul.bf16.gmra.mxu1 %v8108_v22 }
 0x493   : > { %1308 = vmatmul.bf16.gmra.mxu0 %v8113_v28  ;;  %v6503_v28 = vld [vmem:[#allocation8 + $0xb0] sm:$0xf] }
 0x49b   : > { %1357 = vmatmul.bf16.gmra.mxu1 %v8118_v13  ;;  %v6193_v13 = vld [vmem:[#allocation8 + $0x104] sm:$0xf] }
 0x4a3   : > { %1313 = vmatmul.bf16.gmra.mxu0 %v8139_v39  ;;  %v6508_v39 = vld [vmem:[#allocation8 + $0x128] sm:$0xf0] }
 0x4a4   : > { %v8180_v22 = vor.u32 %v6508_v39, %v6193_v13  ;;  %v8191_v13 = vpack.c.bf16 %v521_v36, %v519_v26  ;;  %v6161_v39 = vld [vmem:[#allocation8 + $0x5c] sm:$0xf] }
 0x4a5   : > { %v8196_v45 = vor.u32 %v6501_v59, %v6161_v39  ;;  %v6498_v39 = vld [vmem:[#allocation8 + $0x30] sm:$0xf0]  ;;  %v6497_v59 = vld [vmem:[#allocation8 + $0x10] sm:$0xf] }
 0x4a6   : > { %12690 = vst [vmem:[#allocation96_spill] sm:$0xff] %v8180_v22  ;;  %1675 = vmatpush.bf16.msra.mxu1 %v8180_v22 }
 0x4a7   : > { %12694 = vst [vmem:[#allocation100_spill] sm:$0xff] %v8191_v13  ;;  %1579 = vmatpush.bf16.msrb.mxu3 %v8196_v45  ;;  %3213 = vmatpush.bf16.msrb.mxu2 %v8196_v45 }
 0x4a8   : > { %12695 = vst [vmem:[#allocation101_spill] sm:$0xff] %v8196_v45 }
 0x4aa   : > { %1676 = vmatpush.bf16.msra.mxu1 %v8189_v60  ;;  %v6149_v60 = vld [vmem:[#allocation8 + $0xc] sm:$0xf] }
 0x4ab   : > { %1362 = vmatmul.bf16.gmra.mxu1 %v8166_v11  ;;  %v8187_v11 = vor.u32 %v6503_v28, %v6175_v30  ;;  %v6163_v28 = vld [vmem:[#allocation8 + $0x84] sm:$0xf0]  ;;  %v6169_v30 = vld [vmem:[#allocation8 + $0x64] sm:$0xf]  ;;  %v8209_v22 = vor.u32 %v6498_v39, %v6149_v60  ;;  %v1240_v60 = vpop.f32.mrf.mxu3 }
 0x4ac   : > { %v8199_v26 = vor.u32 %v6500_v10, %v6163_v28  ;;  %v8201_v36 = vor.u32 %v6502_v35, %v6169_v30  ;;  %v6157_v10 = vld [vmem:[#allocation8 + $0x14] sm:$0xf]  ;;  %v6499_v28 = vld [vmem:[#allocation8 + $0x38] sm:$0xf0]  ;;  %v8212_v30 = vor.u32 %v6497_v59, %v6151_v38 }
 0x4ad   : > { %12692 = vst [vmem:[#allocation98_spill] sm:$0xff] %v8187_v11  ;;  %1627 = vmatpush.bf16.msra.mxu0 %v8187_v11  ;;  %v8214_v35 = vor.u32 %v6499_v28, %v6157_v10  ;;  %1580 = vmatpush.bf16.msrb.mxu3 %v8209_v22  ;;  %v8223_v38 = vld [vmem:[#allocation10 + $0x10] sm:$0xff] }
 0x4ae   : > { %12696 = vst [vmem:[#allocation102_spill] sm:$0xff] %v8199_v26  ;;  %1677 = vmatpush.bf16.msra.mxu1 %v8201_v36  ;;  %3214 = vmatpush.bf16.msrb.mxu2 %v8209_v22 }
 0x4af   : > { %12697 = vst [vmem:[#allocation103_spill] sm:$0xff] %v8201_v36 }
 0x4b0   : > { %12698 = vst [vmem:[#allocation104_spill] sm:$0xff] %v8209_v22 }
 0x4b1   : > { %1628 = vmatpush.bf16.msra.mxu0 %v8199_v26  ;;  %12699 = vst [vmem:[#allocation105_spill] sm:$0xff] %v8212_v30 }
 0x4b2   : > { %12700 = vst [vmem:[#allocation106_spill] sm:$0xff] %v8214_v35  ;;  %1678 = vmatpush.bf16.msra.mxu1 %v8214_v35 }
 0x4b3   : > { %1318 = vmatmul.bf16.gmra.mxu0 %v8191_v13  ;;  %v8216_v13 = vpack.c.bf16 %v522_v16, %v520_v54  ;;  %v1242_v36 = vpop.f32.mrf.mxu3  ;;  %v8227_v54 = vperm.slane %v8223_v38, 0 }
 0x4b5   : > { %12701 = vst [vmem:[#allocation107_spill] sm:$0xff] %v8216_v13  ;;  %1629 = vmatpush.bf16.msra.mxu0 %v8212_v30 }
 0x4b6   : > { %12702 = vst [vmem:[#allocation108_spill] sm:$0xff] %v8227_v54 }
 0x4bb   : > { %1367 = vmatmul.bf16.gmra.mxu1 %v8216_v13  ;;  %v1245_v28 = vpop.f32.mrf.mxu3 }
 0x4c0   : > { %v1284_v39 = vpop.f32.mrf.mxu0 }
 0x4c1   : > { %v1285_v16 = vadd.f32 %v1284_v39, %v8164_v2 }
 0x4c3   : > { %v1247_v33 = vpop.f32.mrf.mxu3 }
 0x4c8   : > { %v1286_v26 = vpop.f32.mrf.mxu0  ;;  %v1333_v59 = vpop.f32.mrf.mxu1 }
 0x4c9   : > { %v1334_v10 = vadd.f32 %v1333_v59, %v1285_v16  ;;  %v1287_v30 = vadd.f32 %v1286_v26, %v1237_v4 }
 0x4cb   : > { %v1373_v35 = vadd.f32 %v1334_v10, %v8227_v54  ;;  %v1250_v10 = vpop.f32.mrf.mxu3 }
 0x4cd   : > { %v1405_v13 = vmul.f32 0.01, %v1373_v35  ;;  %vm1389_vm0 = vcmp.gt.f32.partialorder %v1373_v35, 0.0 }
 0x4cf   : > { %v1421_v46 = vsel %vm1389_vm0, %v1373_v35, %v1405_v13 }
 0x4d0   : > { %v1289_v7 = vpop.f32.mrf.mxu0  ;;  %v1335_v11 = vpop.f32.mrf.mxu1 }
 0x4d1   : > { %v1336_v31 = vadd.f32 %v1335_v11, %v1287_v30  ;;  %v1290_v59 = vadd.f32 %v1289_v7, %v1240_v60 }
 0x4d3   : > { %v1374_v34 = vadd.f32 %v1336_v31, %v8227_v54 }
 0x4d5   : > { %v1406_v32 = vmul.f32 0.01, %v1374_v34  ;;  %vm1390_vm1 = vcmp.gt.f32.partialorder %v1374_v34, 0.0 }
 0x4d7   : > { %v1422_v40 = vsel %vm1390_vm1, %v1374_v34, %v1406_v32 }
 0x4d8   : > { %v1291_v2 = vpop.f32.mrf.mxu0  ;;  %v1338_v39 = vpop.f32.mrf.mxu1  ;;  %v1437_v21 = vpack.c.bf16 %v1422_v40, %v1421_v46 }
 0x4d9   : > { %v1339_v4 = vadd.f32 %v1338_v39, %v1290_v59  ;;  %v1292_v26 = vadd.f32 %v1291_v2, %v1242_v36  ;;  %v1252_v36 = vpop.f32.mrf.mxu3 }
 0x4da   : > { %1581 = vmatmul.bf16.vlgmr.msrb.gmra.mxu3 %v1437_v21  ;;  %1630 = vmatmul.bf16.vlgmr.msra.gmra.mxu0 %v1437_v21 }
 0x4db   : > { %1679 = vmatmul.bf16.vlgmr.msra.gmra.mxu1 %v1437_v21  ;;  %v1375_v11 = vadd.f32 %v1339_v4, %v8227_v54 }
 0x4dd   : > { %v1407_v27 = vmul.f32 0.01, %v1375_v11  ;;  %vm1391_vm2 = vcmp.gt.f32.partialorder %v1375_v11, 0.0 }
 0x4df   : > { %v1423_v32 = vsel %vm1391_vm2, %v1375_v11, %v1407_v27 }
 0x4e0   : > { %v1294_v30 = vpop.f32.mrf.mxu0  ;;  %v1340_v16 = vpop.f32.mrf.mxu1 }
 0x4e1   : > { %v1341_v31 = vadd.f32 %v1340_v16, %v1292_v26  ;;  %v1295_v60 = vadd.f32 %v1294_v30, %v1245_v28  ;;  %v1255_v11 = vpop.f32.mrf.mxu3 }
 0x4e3   : > { %v1376_v13 = vadd.f32 %v1341_v31, %v8227_v54 }
 0x4e5   : > { %v1408_v34 = vmul.f32 0.01, %v1376_v13  ;;  %vm1392_vm3 = vcmp.gt.f32.partialorder %v1376_v13, 0.0 }
 0x4e7   : > { %v1424_v40 = vsel %vm1392_vm3, %v1376_v13, %v1408_v34 }
 0x4e8   : > { %v1296_v7 = vpop.f32.mrf.mxu0  ;;  %v1343_v46 = vpop.f32.mrf.mxu1  ;;  %v1438_v35 = vpack.c.bf16 %v1424_v40, %v1423_v32 }
 0x4e9   : > { %v1344_v21 = vadd.f32 %v1343_v46, %v1295_v60  ;;  %v1297_v2 = vadd.f32 %v1296_v7, %v1247_v33 }
 0x4ea   : > { %1586 = vmatmul.bf16.gmra.mxu3 %v1438_v35  ;;  %1635 = vmatmul.bf16.gmra.mxu0 %v1438_v35 }
 0x4eb   : > { %1684 = vmatmul.bf16.gmra.mxu1 %v1438_v35  ;;  %v1377_v39 = vadd.f32 %v1344_v21, %v8227_v54  ;;  %v1257_v21 = vpop.f32.mrf.mxu3 }
 0x4ed   : > { %v1409_v16 = vmul.f32 0.01, %v1377_v39  ;;  %vm1393_vm4 = vcmp.gt.f32.partialorder %v1377_v39, 0.0 }
 0x4ef   : > { %v1425_v13 = vsel %vm1393_vm4, %v1377_v39, %v1409_v16 }
 0x4f0   : > { %v1299_v59 = vpop.f32.mrf.mxu0  ;;  %v1345_v4 = vpop.f32.mrf.mxu1 }
 0x4f1   : > { %v1346_v26 = vadd.f32 %v1345_v4, %v1297_v2  ;;  %v1300_v40 = vadd.f32 %v1299_v59, %v1250_v10 }
 0x4f3   : > { %v1378_v31 = vadd.f32 %v1346_v26, %v8227_v54 }
 0x4f5   : > { %v1410_v27 = vmul.f32 0.01, %v1378_v31  ;;  %vm1394_vm5 = vcmp.gt.f32.partialorder %v1378_v31, 0.0 }
 0x4f7   : > { %v1426_v28 = vsel %vm1394_vm5, %v1378_v31, %v1410_v27 }
 0x4f8   : > { %v1301_v30 = vpop.f32.mrf.mxu0  ;;  %v1348_v34 = vpop.f32.mrf.mxu1  ;;  %v1439_v32 = vpack.c.bf16 %v1426_v28, %v1425_v13 }
 0x4f9   : > { %v1349_v33 = vadd.f32 %v1348_v34, %v1300_v40  ;;  %v1302_v7 = vadd.f32 %v1301_v30, %v1252_v36  ;;  %v1260_v36 = vpop.f32.mrf.mxu3 }
 0x4fa   : > { %1591 = vmatmul.bf16.gmra.mxu3 %v1439_v32  ;;  %1640 = vmatmul.bf16.gmra.mxu0 %v1439_v32 }
 0x4fb   : > { %1689 = vmatmul.bf16.gmra.mxu1 %v1439_v32  ;;  %v1379_v46 = vadd.f32 %v1349_v33, %v8227_v54 }
 0x4fd   : > { %v1411_v4 = vmul.f32 0.01, %v1379_v46  ;;  %vm1395_vm6 = vcmp.gt.f32.partialorder %v1379_v46, 0.0 }
 0x4ff   : > { %v1427_v16 = vsel %vm1395_vm6, %v1379_v46, %v1411_v4 }
 0x500   : > { %v1304_v35 = vpop.f32.mrf.mxu0  ;;  %v1350_v60 = vpop.f32.mrf.mxu1 }
 0x501   : > { %v1351_v2 = vadd.f32 %v1350_v60, %v1302_v7  ;;  %v1305_v13 = vadd.f32 %v1304_v35, %v1255_v11  ;;  %v1262_v46 = vpop.f32.mrf.mxu3 }
 0x503   : > { %v1380_v26 = vadd.f32 %v1351_v2, %v8227_v54 }
 0x505   : > { %v1412_v39 = vmul.f32 0.01, %v1380_v26  ;;  %vm1396_vm7 = vcmp.gt.f32.partialorder %v1380_v26, 0.0 }
 0x507   : > { %v1428_v31 = vsel %vm1396_vm7, %v1380_v26, %v1412_v39 }
 0x508   : > { %v1306_v10 = vpop.f32.mrf.mxu0  ;;  %v1353_v59 = vpop.f32.mrf.mxu1  ;;  %v1440_v27 = vpack.c.bf16 %v1428_v31, %v1427_v16  ;;  %v6542_v31 = vld [vmem:[#allocation8 + $0x24c] sm:$0xf] }
 0x509   : > { %v1354_v28 = vadd.f32 %v1353_v59, %v1305_v13  ;;  %v1307_v30 = vadd.f32 %v1306_v10, %v1257_v21  ;;  %v6331_v21 = vld [vmem:[#allocation8 + $0x270] sm:$0xf0]  ;;  %v6337_v10 = vld [vmem:[#allocation8 + $0x250] sm:$0xf] }
 0x50a   : > { %1596 = vmatmul.bf16.gmra.mxu3 %v1440_v27  ;;  %1645 = vmatmul.bf16.gmra.mxu0 %v1440_v27  ;;  %v8239_v59 = vor.u32 %v6542_v31, %v6331_v21  ;;  %v6313_v31 = vld [vmem:[#allocation8 + $0x1b0] sm:$0xf] }
 0x50b   : > { %1694 = vmatmul.bf16.gmra.mxu1 %v1440_v27  ;;  %v1381_v34 = vadd.f32 %v1354_v28, %v8227_v54  ;;  %v6544_v27 = vld [vmem:[#allocation8 + $0x274] sm:$0xf0] }
 0x50c   : > { %12703 = vst [vmem:[#allocation109_spill] sm:$0xff] %v8239_v59  ;;  %v8241_v28 = vor.u32 %v6544_v27, %v6337_v10  ;;  %1897 = vmatpush.bf16.msra.mxu3 %v8239_v59  ;;  %v6538_v10 = vld [vmem:[#allocation8 + $0x1d4] sm:$0xf0] }
 0x50d   : > { %v1413_v7 = vmul.f32 0.01, %v1381_v34  ;;  %vm1397_vm8 = vcmp.gt.f32.partialorder %v1381_v34, 0.0  ;;  %v8255_v27 = vor.u32 %v6538_v10, %v6313_v31 }
 0x50e   : > { %12704 = vst [vmem:[#allocation110_spill] sm:$0xff] %v8241_v28  ;;  %1946 = vmatpush.bf16.msrb.mxu0 %v8241_v28  ;;  %v6530_v28 = vld [vmem:[#allocation8 + $0x10c] sm:$0xf] }
 0x50f   : > { %v1429_v4 = vsel %vm1397_vm8, %v1381_v34, %v1413_v7  ;;  %v6319_v34 = vld [vmem:[#allocation8 + $0x220] sm:$0xf0]  ;;  %12708 = vst [vmem:[#allocation114_spill] sm:$0xff] %v8255_v27 }
 0x510   : > { %v1309_v32 = vpop.f32.mrf.mxu0  ;;  %v1355_v40 = vpop.f32.mrf.mxu1 }
 0x511   : > { %v1356_v33 = vadd.f32 %v1355_v40, %v1307_v30  ;;  %v1310_v16 = vadd.f32 %v1309_v32, %v1260_v36  ;;  %v6539_v30 = vld [vmem:[#allocation8 + $0x1fc] sm:$0xf]  ;;  %v6325_v40 = vld [vmem:[#allocation8 + $0x200] sm:$0xf]  ;;  %v6541_v36 = vld [vmem:[#allocation8 + $0x224] sm:$0xf0]  ;;  %v1265_v32 = vpop.f32.mrf.mxu3 }
 0x513   : > { %v1382_v60 = vadd.f32 %v1356_v33, %v8227_v54 }
 0x515   : > { %v1414_v2 = vmul.f32 0.01, %v1382_v60  ;;  %vm1398_vm9 = vcmp.gt.f32.partialorder %v1382_v60, 0.0 }
 0x517   : > { %v1430_v11 = vsel %vm1398_vm9, %v1382_v60, %v1414_v2  ;;  %v8246_v60 = vor.u32 %v6539_v30, %v6319_v34  ;;  %v8248_v2 = vor.u32 %v6541_v36, %v6325_v40  ;;  %v6533_v30 = vld [vmem:[#allocation8 + $0x15c] sm:$0xf]  ;;  %v6295_v34 = vld [vmem:[#allocation8 + $0x180] sm:$0xf0]  ;;  %v6301_v40 = vld [vmem:[#allocation8 + $0x160] sm:$0xf] }
 0x518   : > { %v1311_v35 = vpop.f32.mrf.mxu0  ;;  %v1358_v26 = vpop.f32.mrf.mxu1  ;;  %v1441_v39 = vpack.c.bf16 %v1430_v11, %v1429_v4  ;;  %v6535_v36 = vld [vmem:[#allocation8 + $0x184] sm:$0xf0] }
 0x519   : > { %v1359_v13 = vadd.f32 %v1358_v26, %v1310_v16  ;;  %v1312_v33 = vadd.f32 %v1311_v35, %v1262_v46  ;;  %12705 = vst [vmem:[#allocation111_spill] sm:$0xff] %v8246_v60  ;;  %1898 = vmatpush.bf16.msra.mxu3 %v8246_v60  ;;  %1947 = vmatpush.bf16.msrb.mxu0 %v8248_v2  ;;  %v6307_v16 = vld [vmem:[#allocation8 + $0x1d0] sm:$0xf0]  ;;  %v1267_v43 = vpop.f32.mrf.mxu3 }
 0x51a   : > { %1601 = vmatmul.bf16.gmra.mxu3 %v1441_v39  ;;  %1650 = vmatmul.bf16.gmra.mxu0 %v1441_v39  ;;  %12706 = vst [vmem:[#allocation112_spill] sm:$0xff] %v8248_v2 }
 0x51b   : > { %1699 = vmatmul.bf16.gmra.mxu1 %v1441_v39  ;;  %v1383_v7 = vadd.f32 %v1359_v13, %v8227_v54  ;;  %v6536_v39 = vld [vmem:[#allocation8 + $0x1ac] sm:$0xf] }
 0x51c   : > { %v8252_v21 = vor.u32 %v6536_v39, %v6307_v16  ;;  %v8259_v39 = vor.u32 %v6533_v30, %v6295_v34  ;;  %v8261_v16 = vor.u32 %v6535_v36, %v6301_v40  ;;  %v6527_v30 = vld [vmem:[#allocation8 + $0xbc] sm:$0xf]  ;;  %v6271_v34 = vld [vmem:[#allocation8 + $0xe0] sm:$0xf0]  ;;  %v6529_v40 = vld [vmem:[#allocation8 + $0xe4] sm:$0xf0] }
 0x51d   : > { %v1415_v46 = vmul.f32 0.01, %v1383_v7  ;;  %vm1399_vm10 = vcmp.gt.f32.partialorder %v1383_v7, 0.0  ;;  %1948 = vmatpush.bf16.msrb.mxu0 %v8255_v27  ;;  %v6283_v27 = vld [vmem:[#allocation8 + $0x130] sm:$0xf0]  ;;  %v8273_v36 = vor.u32 %v6527_v30, %v6271_v34 }
 0x51e   : > { %12707 = vst [vmem:[#allocation113_spill] sm:$0xff] %v8252_v21  ;;  %1899 = vmatpush.bf16.msra.mxu3 %v8252_v21 }
 0x51f   : > { %12709 = vst [vmem:[#allocation115_spill] sm:$0xff] %v8259_v39 }
 0x520   : > { %v1314_v4 = vpop.f32.mrf.mxu0  ;;  %v1360_v11 = vpop.f32.mrf.mxu1  ;;  %12710 = vst [vmem:[#allocation116_spill] sm:$0xff] %v8261_v16 }
 0x521   : > { %v1361_v26 = vadd.f32 %v1360_v11, %v1312_v33  ;;  %v1431_v33 = vsel %vm1399_vm10, %v1383_v7, %v1415_v46  ;;  %v1315_v2 = vadd.f32 %v1314_v4, %v1265_v32  ;;  %1949 = vmatpush.bf16.msrb.mxu0 %v8261_v16  ;;  %v8265_v7 = vor.u32 %v6530_v28, %v6283_v27  ;;  %v6532_v46 = vld [vmem:[#allocation8 + $0x134] sm:$0xf0]  ;;  %v6277_v32 = vld [vmem:[#allocation8 + $0xc0] sm:$0xf]  ;;  %v8269_v4 = vpop.f32.mrf.mxu2  ;;  %v6524_v28 = vld [vmem:[#allocation8 + $0x6c] sm:$0xf] }
 0x522   : > { %1900 = vmatpush.bf16.msra.mxu3 %v8259_v39  ;;  %12713 = vst [vmem:[#allocation119_spill] sm:$0xff] %v8273_v36  ;;  %v6259_v27 = vld [vmem:[#allocation8 + $0x90] sm:$0xf0]  ;;  %v1858_v18 = vadd.f32 %v8269_v4, %v8353_v24  ;;  %v7126_v39 = vld [vmem:[#allocation10 + $0x8] sm:$0xff] }
 0x523   : > { %v1384_v35 = vadd.f32 %v1361_v26, %v8227_v54  ;;  %12711 = vst [vmem:[#allocation117_spill] sm:$0xff] %v8265_v7  ;;  %v8280_v16 = vor.u32 %v6524_v28, %v6259_v27  ;;  %v6253_v28 = vld [vmem:[#allocation8 + $0x20] sm:$0xf]  ;;  %v6523_v27 = vld [vmem:[#allocation8 + $0x44] sm:$0xf0] }
 0x525   : > { %v1416_v13 = vmul.f32 0.01, %v1384_v35  ;;  %vm1400_vm11 = vcmp.gt.f32.partialorder %v1384_v35, 0.0  ;;  %12715 = vst [vmem:[#allocation121_spill] sm:$0xff] %v8280_v16 }
 0x526   : > { %1901 = vmatpush.bf16.msra.mxu3 %v8265_v7 }
 0x527   : > { %v1432_v11 = vsel %vm1400_vm11, %v1384_v35, %v1416_v13  ;;  %v8267_v13 = vor.u32 %v6532_v46, %v6289_v17 }
 0x528   : > { %v1316_v26 = vpop.f32.mrf.mxu0  ;;  %v1363_v31 = vpop.f32.mrf.mxu1  ;;  %v1442_v10 = vpack.c.bf16 %v1432_v11, %v1431_v33  ;;  %v8275_v33 = vor.u32 %v6529_v40, %v6277_v32  ;;  %v6526_v11 = vld [vmem:[#allocation8 + $0x94] sm:$0xf0] }
 0x529   : > { %v1364_v35 = vadd.f32 %v1363_v31, %v1315_v2  ;;  %12712 = vst [vmem:[#allocation118_spill] sm:$0xff] %v8267_v13  ;;  %1950 = vmatpush.bf16.msrb.mxu0 %v8267_v13  ;;  %v6265_v2 = vld [vmem:[#allocation8 + $0x70] sm:$0xf]  ;;  %v1317_v17 = vadd.f32 %v1316_v26, %v1267_v43  ;;  %v1270_v40 = vpop.f32.mrf.mxu3  ;;  %v6521_v43 = vld [vmem:[#allocation8 + $0x1c] sm:$0xf]  ;;  %v8287_v26 = vpop.f32.mrf.mxu2 }
 0x52a   : > { %1606 = vmatmul.bf16.gmra.mxu3 %v1442_v10  ;;  %1655 = vmatmul.bf16.gmra.mxu0 %v1442_v10  ;;  %12714 = vst [vmem:[#allocation120_spill] sm:$0xff] %v8275_v33  ;;  %v8282_v13 = vor.u32 %v6526_v11, %v6265_v2  ;;  %v1860_v3 = vadd.f32 %v8287_v26, %v8353_v24 }
 0x52b   : > { %1704 = vmatmul.bf16.gmra.mxu1 %v1442_v10  ;;  %v1385_v31 = vadd.f32 %v1364_v35, %v8227_v54  ;;  %1902 = vmatpush.bf16.msra.mxu3 %v8273_v36  ;;  %v6247_v35 = vld [vmem:[#allocation8 + $0x40] sm:$0xf0] }
 0x52c   : > { %12716 = vst [vmem:[#allocation122_spill] sm:$0xff] %v8282_v13 }
 0x52d   : > { %1951 = vmatpush.bf16.msrb.mxu0 %v8275_v33  ;;  %v1417_v34 = vmul.f32 0.01, %v1385_v31  ;;  %vm1401_vm12 = vcmp.gt.f32.partialorder %v1385_v31, 0.0 }
 0x52f   : > { %1903 = vmatpush.bf16.msra.mxu3 %v8280_v16  ;;  %v1433_v2 = vsel %vm1401_vm12, %v1385_v31, %v1417_v34 }
 0x530   : > { %v1365_v10 = vpop.f32.mrf.mxu1  ;;  %v1319_v30 = vpop.f32.mrf.mxu0 }
 0x531   : > { %v1366_v46 = vadd.f32 %v1365_v10, %v1317_v17  ;;  %1952 = vmatpush.bf16.msrb.mxu0 %v8282_v13  ;;  %v8289_v17 = vor.u32 %v6521_v43, %v6247_v35  ;;  %v8291_v10 = vor.u32 %v6523_v27, %v6253_v28  ;;  %v1320_v45 = vadd.f32 %v1319_v30, %v1270_v40  ;;  %v1272_v1 = vpop.f32.mrf.mxu3  ;;  %v8296_v31 = vpop.f32.mrf.mxu2 }
 0x533   : > { %v1386_v32 = vadd.f32 %v1366_v46, %v8227_v54  ;;  %12717 = vst [vmem:[#allocation123_spill] sm:$0xff] %v8289_v17  ;;  %1904 = vmatpush.bf16.msra.mxu3 %v8289_v17 }
 0x534   : > { %12718 = vst [vmem:[#allocation124_spill] sm:$0xff] %v8291_v10 }
 0x535   : > { %v1418_v22 = vmul.f32 0.01, %v1386_v32  ;;  %vm1402_vm13 = vcmp.gt.f32.partialorder %v1386_v32, 0.0  ;;  %1953 = vmatpush.bf16.msrb.mxu0 %v8291_v10 }
 0x537   : > { %v1434_v11 = vsel %vm1402_vm13, %v1386_v32, %v1418_v22 }
 0x538   : > { %v1368_v46 = vpop.f32.mrf.mxu1  ;;  %v1443_v33 = vpack.c.bf16 %v1434_v11, %v1433_v2  ;;  %v1321_v42 = vpop.f32.mrf.mxu0 }
 0x539   : > { %v1369_v13 = vadd.f32 %v1368_v46, %v1320_v45  ;;  %v1322_v37 = vadd.f32 %v1321_v42, %v1272_v1  ;;  %v8299_v45 = vpop.f32.mrf.mxu2 }
 0x53a   : > { %1611 = vmatmul.bf16.gmra.mxu3 %v1443_v33  ;;  %1660 = vmatmul.bf16.gmra.mxu0 %v1443_v33 }
 0x53b   : > { %1709 = vmatmul.bf16.gmra.mxu1 %v1443_v33  ;;  %v1387_v22 = vadd.f32 %v1369_v13, %v8227_v54 }
 0x53d   : > { %v1419_v43 = vmul.f32 0.01, %v1387_v22  ;;  %vm1403_vm14 = vcmp.gt.f32.partialorder %v1387_v22, 0.0 }
 0x53f   : > { %v1435_v35 = vsel %vm1403_vm14, %v1387_v22, %v1419_v43 }
 0x540   : > { %v1370_v34 = vpop.f32.mrf.mxu1 }
 0x541   : > { %v1371_v32 = vadd.f32 %v1370_v34, %v1322_v37  ;;  %v8301_v42 = vpop.f32.mrf.mxu2 }
 0x543   : > { %v1388_v30 = vadd.f32 %v1371_v32, %v8227_v54 }
 0x545   : > { %v1420_v40 = vmul.f32 0.01, %v1388_v30  ;;  %vm1404_vm15 = vcmp.gt.f32.partialorder %v1388_v30, 0.0 }
 0x547   : > { %v1436_v28 = vsel %vm1404_vm15, %v1388_v30, %v1420_v40 }
 0x548   : > { %v1444_v27 = vpack.c.bf16 %v1436_v28, %v1435_v35 }
 0x549   : > { %v8307_v13 = vpop.f32.mrf.mxu2 }
 0x54a   : > { %1616 = vmatmul.bf16.gmra.mxu3 %v1444_v27  ;;  %1665 = vmatmul.bf16.gmra.mxu0 %v1444_v27 }
 0x54b   : > { %1714 = vmatmul.bf16.gmra.mxu1 %v1444_v27 }
 0x551   : > { %v8313_v46 = vpop.f32.mrf.mxu2 }
 0x557   : > { %v8303_v1 = vpop.f32.mrf.mxu0 }
 0x559   : > { %v8319_v32 = vpop.f32.mrf.mxu2 }
 0x55a   : > { %1905 = vmatmul.bf16.vlgmr.msra.gmra.mxu3 %v7767_v49  ;;  %1954 = vmatmul.bf16.vlgmr.msrb.gmra.mxu0 %v7767_v49  ;;  %v8321_v49 = vpop.f32.mrf.mxu1 }
 0x55d   : > { %v1582_v37 = vpop.f32.mrf.mxu3 }
 0x55f   : > { %v8309_v33 = vpop.f32.mrf.mxu0 }
 0x561   : > { %v8327_v40 = vpop.f32.mrf.mxu2 }
 0x562   : > { %v8329_v35 = vpop.f32.mrf.mxu1 }
 0x565   : > { %v1584_v2 = vpop.f32.mrf.mxu3 }
 0x566   : > { %v1585_v55 = vadd.f32 %v1584_v2, %v8349_v29 }
 0x567   : > { %v8311_v11 = vpop.f32.mrf.mxu0 }
 0x569   : > { %v8333_v54 = vpop.f32.mrf.mxu2 }
 0x56a   : > { %1910 = vmatmul.bf16.gmra.mxu3 %v7776_v53  ;;  %1959 = vmatmul.bf16.gmra.mxu0 %v7776_v53  ;;  %v8335_v10 = vpop.f32.mrf.mxu1 }
 0x56d   : > { %v1587_v22 = vpop.f32.mrf.mxu3 }
 0x56f   : > { %v8317_v34 = vpop.f32.mrf.mxu0 }
 0x571   : > { %v8343_v8 = vpop.f32.mrf.mxu2 }
 0x572   : > { %v8345_v50 = vpop.f32.mrf.mxu1  ;;  %v8461_v51 = vadd.f32 %v8343_v8, %v8353_v24 }
 0x575   : > { %v1589_v43 = vpop.f32.mrf.mxu3 }
 0x576   : > { %v1590_v26 = vadd.f32 %v1589_v43, %v8349_v29  ;;  %v1868_v43 = vadd.f32 %v8301_v42, %v8353_v24 }
 0x577   : > { %v8323_v30 = vpop.f32.mrf.mxu0 }
 0x579   : > { %v8355_v23 = vpop.f32.mrf.mxu2 }
 0x57a   : > { %1915 = vmatmul.bf16.gmra.mxu3 %v7785_v58  ;;  %1964 = vmatmul.bf16.gmra.mxu0 %v7785_v58  ;;  %v8360_v19 = vpop.f32.mrf.mxu1 }
 0x57d   : > { %v1592_v28 = vpop.f32.mrf.mxu3 }
 0x57f   : > { %v8331_v53 = vpop.f32.mrf.mxu0 }
 0x581   : > { %v8371_v61 = vpop.f32.mrf.mxu2 }
 0x582   : > { %v8374_v17 = vpop.f32.mrf.mxu1 }
 0x585   : > { %v1594_v27 = vpop.f32.mrf.mxu3 }
 0x587   : > { %v8337_v44 = vpop.f32.mrf.mxu0 }
 0x589   : > { %v8390_v16 = vpop.f32.mrf.mxu2 }
 0x58a   : > { %1920 = vmatmul.bf16.gmra.mxu3 %v7794_v0  ;;  %1969 = vmatmul.bf16.gmra.mxu0 %v7794_v0  ;;  %v1583_v0 = vadd.f32 %v1582_v37, %v8349_v29  ;;  %v1996_v37 = vadd.f32 %v1860_v3, %v1585_v55  ;;  %v1865_v3 = vadd.f32 %v8299_v45, %v8353_v24 }
 0x58c   : > { %v1995_v9 = vadd.f32 %v1858_v18, %v1583_v0  ;;  %v1863_v18 = vadd.f32 %v8296_v31, %v8353_v24  ;;  %v6340_v0 = vmul.f32 -1.442695, %v1996_v37  ;;  %v1998_v55 = vadd.f32 %v1865_v3, %v1590_v26 }
 0x58d   : > { %v1597_v62 = vpop.f32.mrf.mxu3  ;;  %v1593_v31 = vadd.f32 %v1592_v28, %v8349_v29  ;;  %v1870_v28 = vadd.f32 %v8307_v13, %v8353_v24 }
 0x58e   : > { %v6339_v63 = vmul.f32 -1.442695, %v1995_v9  ;;  %v6342_v45 = vmul.f32 -1.442695, %v1998_v55 }
 0x58f   : > { %v8341_v58 = vpop.f32.mrf.mxu0 }
 0x590   : > { %6645 = vpow2.f32 %v6339_v63 }
 0x591   : > { %6647 = vpow2.f32 %v6340_v0 }
 0x595   : > { %v8347_v15 = vpop.f32.mrf.mxu3 }
 0x597   : > { %v8351_v41 = vpop.f32.mrf.mxu0 }
 0x59a   : > { %1925 = vmatmul.bf16.gmra.mxu3 %v7803_v6  ;;  %1974 = vmatmul.bf16.gmra.mxu0 %v7803_v6  ;;  %v1588_v6 = vadd.f32 %v1587_v22, %v8349_v29  ;;  %v6646_v22 = vpop.eup %6645 }
 0x59b   : > { %v6648_v0 = vpop.eup %6647 }
 0x59c   : > { %v1997_v2 = vadd.f32 %v1863_v18, %v1588_v6  ;;  %v8394_v6 = vpop.f32.mrf.mxu1  ;;  %v1999_v18 = vadd.f32 %v1868_v43, %v1593_v31  ;;  %v8406_v36 = vadd.f32 1.0, %v6648_v0  ;;  %v1892_v31 = vpop.f32.mrf.mxu2  ;;  %v1875_v0 = vadd.f32 %v8319_v32, %v8353_v24 }
 0x59d   : > { %v8364_v12 = vpop.f32.mrf.mxu3  ;;  %v1878_v32 = vadd.f32 %v8327_v40, %v8353_v24  ;;  %v8452_v40 = vperm.slane %v7126_v39, 2 }
 0x59e   : > { %v6341_v9 = vmul.f32 -1.442695, %v1997_v2  ;;  %v1595_v2 = vadd.f32 %v1594_v27, %v8349_v29  ;;  %v6343_v26 = vmul.f32 -1.442695, %v1999_v18  ;;  %v1873_v27 = vadd.f32 %v8313_v46, %v8353_v24 }
 0x59f   : > { %v8366_v5 = vpop.f32.mrf.mxu0  ;;  %v1600_v46 = vadd.f32 %v8347_v15, %v8349_v29  ;;  %v1603_v15 = vadd.f32 %v8364_v12, %v8349_v29  ;;  %vm2095_vm4 = vweird.f32 %v8406_v36 }
 0x5a0   : > { %6649 = vpow2.f32 %v6341_v9  ;;  %v1598_v9 = vadd.f32 %v1597_v62, %v8349_v29 }
 0x5a1   : > { %v2002_v56 = vadd.f32 %v1875_v0, %v1600_v46  ;;  %v2003_v60 = vadd.f32 %v1878_v32, %v1603_v15 }
 0x5a3   : > { %v6346_v0 = vmul.f32 -1.442695, %v2002_v56  ;;  %v8465_v56 = vadd.f32 %v8355_v23, %v8353_v24 }
 0x5a4   : > { %v8415_v13 = vpop.f32.mrf.mxu1  ;;  %v1894_v46 = vpop.f32.mrf.mxu2 }
 0x5a5   : > { %v8376_v57 = vpop.f32.mrf.mxu3  ;;  %v8481_v8 = vadd.f32 %v1894_v46, %v8353_v24 }
 0x5a6   : > { %v6650_v3 = vpop.eup %6649 }
 0x5a7   : > { %v8380_v4 = vpop.f32.mrf.mxu0  ;;  %v8413_v43 = vadd.f32 1.0, %v6650_v3  ;;  %12722 = vst [vmem:[#allocation128_spill] sm:$0xff] %v8481_v8 }
 0x5a9   : > { %vm2110_vm8 = vweird.f32 %v8413_v43 }
 0x5aa   : > { %1930 = vmatmul.bf16.gmra.mxu3 %v7812_v14  ;;  %1979 = vmatmul.bf16.gmra.mxu0 %v7812_v14  ;;  %v8398_v14 = vadd.f32 1.0, %v6646_v22  ;;  %v2000_v22 = vadd.f32 %v1870_v28, %v1595_v2  ;;  %v2001_v2 = vadd.f32 %v1873_v27, %v1598_v9 }
 0x5ac   : > { %6651 = vrcp.f32 %v8398_v14  ;;  %v6344_v18 = vmul.f32 -1.442695, %v2000_v22  ;;  %v8448_v52 = vpop.f32.mrf.mxu1  ;;  %v2086_v8 = vand.u32 2147483648, %v8398_v14  ;;  %vm2080_vm1 = vweird.f32 %v8398_v14 }
 0x5ad   : > { %v8388_v63 = vpop.f32.mrf.mxu3  ;;  %6653 = vpow2.f32 %v6342_v45 }
 0x5ae   : > { %6655 = vpow2.f32 %v6343_v26 }
 0x5af   : > { %v8396_v37 = vpop.f32.mrf.mxu0  ;;  %6657 = vrcp.f32 %v8406_v36 }
 0x5b0   : > { %6659 = vrcp.f32 %v8413_v43 }
 0x5b1   : > { %6661 = vpow2.f32 %v6344_v18 }
 0x5b2   : > { %v8417_v45 = vpop.eup %6651 }
 0x5b3   : > { %v6654_v62 = vpop.eup %6653  ;;  %v2076_v3 = vmul.f32 %v8417_v45, %v8398_v14  ;;  %vm2081_vm0 = vweird.f32 %v8417_v45 }
 0x5b4   : > { %v8429_v26 = vadd.f32 1.0, %v6654_v62  ;;  %v6656_v22 = vpop.eup %6655  ;;  %vm8546_vm3 = vmor %vm2080_vm1, %vm2081_vm0 }
 0x5b5   : > { %v8404_v42 = vpop.f32.mrf.mxu3  ;;  %v8435_v27 = vpop.eup %6657  ;;  %v8442_v62 = vadd.f32 1.0, %v6656_v22  ;;  %v2077_v18 = vsub.f32 1.0, %v2076_v3  ;;  %v1880_v22 = vadd.f32 %v8333_v54, %v8353_v24  ;;  %v8457_v3 = vperm.slane %v8223_v38, 1 }
 0x5b6   : > { %6663 = vrcp.f32 %v8429_v26  ;;  %v8444_v7 = vpop.eup %6659  ;;  %v2091_v12 = vmul.f32 %v8435_v27, %v8406_v36  ;;  %v8478_v38 = vadd.f32 %v1892_v31, %v8353_v24  ;;  %vm2096_vm5 = vweird.f32 %v8435_v27 }
 0x5b7   : > { %v8409_v55 = vpop.f32.mrf.mxu0  ;;  %v6662_v21 = vpop.eup %6661  ;;  %12720 = vst [vmem:[#allocation126_spill] sm:$0xff] %v8457_v3  ;;  %v2078_v23 = vmul.f32 %v8417_v45, %v2077_v18  ;;  %v8499_v46 = vadd.f32 %v8321_v49, %v8457_v3  ;;  %v6347_v18 = vmul.f32 -1.442695, %v2003_v60  ;;  %v8517_v60 = vadd.f32 %v8335_v10, %v8457_v3  ;;  %vm8593_vm7 = vmor %vm2095_vm4, %vm2096_vm5 }
 0x5b8   : > { %12721 = vst [vmem:[#allocation127_spill] sm:$0xff] %v8478_v38  ;;  %v8485_v15 = vadd.f32 1.0, %v6662_v21  ;;  %v2092_v32 = vsub.f32 1.0, %v2091_v12  ;;  %v2084_v21 = vand.u32 2147483647, %v8398_v14  ;;  %v1605_v49 = vadd.f32 %v8376_v57, %v8349_v29  ;;  %v8542_v14 = vpop.f32.mrf.mxu1 }
 0x5b9   : > { %12725 = vst [vmem:[#allocation131_spill] sm:$0xff] %v8517_v60  ;;  %v8554_v60 = vadd.f32 %v8345_v50, %v8457_v3  ;;  %vm2111_vm9 = vweird.f32 %v8444_v7  ;;  %vm2125_vm12 = vweird.f32 %v8429_v26  ;;  %vm2140_vm0 = vweird.f32 %v8442_v62 }
 0x5ba   : > { %1935 = vmatmul.bf16.gmra.mxu3 %v7821_v20  ;;  %1984 = vmatmul.bf16.gmra.mxu0 %v7821_v20  ;;  %v6345_v20 = vmul.f32 -1.442695, %v2001_v2  ;;  %v8446_v2 = vperm.slane %v7126_v39, 1  ;;  %v8473_v39 = vadd.f32 %v8390_v16, %v8353_v24  ;;  %v2106_v16 = vmul.f32 %v8444_v7, %v8413_v43  ;;  %vm8631_vm11 = vmor %vm2110_vm8, %vm2111_vm9 }
 0x5bb   : > { %vm8532_vm2 = vcmp.eq.f32.partialorder %v2084_v21, 8.507059e+37  ;;  %v2099_v21 = vand.u32 2147483647, %v8406_v36  ;;  %vm2155_vm4 = vweird.f32 %v8485_v15 }
 0x5bc   : > { %6665 = vpow2.f32 %v6345_v20  ;;  %v8469_v20 = vadd.f32 %v8371_v61, %v8353_v24  ;;  %v8491_v59 = vpop.eup %6663  ;;  %v8495_v31 = vadd.f32 %v8303_v1, %v8446_v2  ;;  %v8504_v12 = vadd.f32 %v8309_v33, %v8446_v2 }
 0x5bd   : > { %v8427_v28 = vpop.f32.mrf.mxu3  ;;  %6667 = vrcp.f32 %v8442_v62  ;;  %v8508_v24 = vadd.f32 %v8329_v35, %v8457_v3  ;;  %v8512_v1 = vadd.f32 %v8311_v11, %v8446_v2  ;;  %v2079_v33 = vadd.f32 %v8417_v45, %v2078_v23 }
 0x5be   : > { %6669 = vpow2.f32 %v6346_v0  ;;  %v2093_v11 = vmul.f32 %v8435_v27, %v2092_v32  ;;  %v2107_v35 = vsub.f32 1.0, %v2106_v16  ;;  %v8540_v48 = vadd.f32 %v8317_v34, %v8446_v2 }
 0x5bf   : > { %v8433_v9 = vpop.f32.mrf.mxu0  ;;  %12724 = vst [vmem:[#allocation130_spill] sm:$0xff] %v8508_v24  ;;  %6671 = vrcp.f32 %v8485_v15  ;;  %v2083_v34 = vsel %vm8546_vm3, %v8417_v45, %v2079_v33  ;;  %v2114_v24 = vand.u32 2147483647, %v8413_v43  ;;  %v8575_v33 = vadd.f32 %v8323_v30, %v8446_v2 }
 0x5c0   : > { %6673 = vpow2.f32 %v6347_v18  ;;  %v2087_v18 = vor.u32 1.1754944e-38, %v2086_v8  ;;  %v2094_v47 = vadd.f32 %v8435_v27, %v2093_v11  ;;  %v2108_v8 = vmul.f32 %v8444_v7, %v2107_v35 }
 0x5c1   : > { %v8579_v11 = vadd.f32 %v8360_v19, %v8457_v3  ;;  %vm8581_vm6 = vcmp.eq.f32.partialorder %v2099_v21, 8.507059e+37  ;;  %v2116_v19 = vand.u32 2147483648, %v8413_v43  ;;  %vm8604_vm10 = vcmp.eq.f32.partialorder %v2114_v24, 8.507059e+37 }
 0x5c2   : > { %v6666_v0 = vpop.eup %6665  ;;  %v2109_v57 = vadd.f32 %v8444_v7, %v2108_v8  ;;  %v1608_v24 = vadd.f32 %v8388_v63, %v8349_v29  ;;  %v2129_v8 = vand.u32 2147483647, %v8429_v26  ;;  %v2131_v63 = vand.u32 2147483648, %v8429_v26 }
 0x5c3   : > { %v8528_v10 = vpop.eup %6667  ;;  %v8530_v38 = vadd.f32 1.0, %v6666_v0  ;;  %v2101_v0 = vand.u32 2147483648, %v8406_v36  ;;  %12732 = vst [vmem:[#allocation134_spill] sm:$0xff] %v8579_v11  ;;  %v2144_v43 = vand.u32 2147483647, %v8442_v62  ;;  %vm2126_vm13 = vweird.f32 %v8491_v59 }
 0x5c4   : > { %v6670_v23 = vpop.eup %6669  ;;  %v2136_v45 = vmul.f32 %v8528_v10, %v8442_v62  ;;  %v2005_v35 = vadd.f32 %v8461_v51, %v1608_v24  ;;  %vm8654_vm14 = vcmp.eq.f32.partialorder %v2129_v8, 8.507059e+37  ;;  %v2146_v51 = vand.u32 2147483648, %v8442_v62  ;;  %vm8677_vm15 = vmor %vm2125_vm12, %vm2126_vm13 }
 0x5c5   : > { %v8475_v54 = vpop.f32.mrf.mxu3  ;;  %6675 = vrcp.f32 %v8530_v38  ;;  %v8567_v50 = vadd.f32 1.0, %v6670_v23  ;;  %v2102_v23 = vor.u32 1.1754944e-38, %v2101_v0  ;;  %vm8682_vm1 = vcmp.eq.f32.partialorder %v2144_v43, 8.507059e+37 }
 0x5c6   : > { %v2137_v21 = vsub.f32 1.0, %v2136_v45  ;;  %v2117_v45 = vor.u32 1.1754944e-38, %v2116_v19  ;;  %v8701_v24 = vadd.f32 %v8415_v13, %v8457_v3  ;;  %v8736_v62 = vadd.f32 %v8351_v41, %v8446_v2 }
 0x5c7   : > { %v8487_v61 = vpop.f32.mrf.mxu0  ;;  %6677 = vrcp.f32 %v8567_v50  ;;  %vm2170_vm8 = vweird.f32 %v8530_v38  ;;  %v2191_v13 = vand.u32 2147483648, %v8567_v50  ;;  %vm2185_vm12 = vweird.f32 %v8567_v50 }
 0x5c8   : > { %12723 = vst [vmem:[#allocation129_spill] sm:$0xff] %v8487_v61  ;;  %v2004_v61 = vadd.f32 %v1880_v22, %v1605_v49  ;;  %v8571_v49 = vpop.eup %6671  ;;  %v2138_v19 = vmul.f32 %v8528_v10, %v2137_v21  ;;  %v2132_v21 = vor.u32 1.1754944e-38, %v2131_v63  ;;  %v6349_v63 = vmul.f32 -1.442695, %v2005_v35 }
 0x5c9   : > { %v6674_v16 = vpop.eup %6673  ;;  %v2151_v0 = vmul.f32 %v8571_v49, %v8485_v15 }
 0x5ca   : > { %1940 = vmatmul.bf16.gmra.mxu3 %v7830_v25  ;;  %1989 = vmatmul.bf16.gmra.mxu0 %v7830_v25  ;;  %v2121_v25 = vmul.f32 %v8491_v59, %v8429_v26 }
 0x5cb   : > { %v8623_v30 = vpop.eup %6675 }
 0x5cc   : > { %v2122_v22 = vsub.f32 1.0, %v2121_v25  ;;  %v6348_v25 = vmul.f32 -1.442695, %v2004_v61  ;;  %v2098_v61 = vsel %vm8593_vm7, %v8435_v27, %v2094_v47  ;;  %v8616_v47 = vadd.f32 1.0, %v6674_v16  ;;  %v8636_v16 = vpop.f32.mrf.mxu1 }
 0x5cd   : > { %v8544_v32 = vpop.f32.mrf.mxu3  ;;  %v8642_v11 = vsel %vm8581_vm6, %v2102_v23, %v2098_v61  ;;  %v8660_v61 = vpop.eup %6677  ;;  %vm2156_vm6 = vweird.f32 %v8571_v49  ;;  %vm2171_vm9 = vweird.f32 %v8623_v30 }
 0x5ce   : > { %12728 = vst [vmem:[#allocation132_spill] sm:$0xff] %v8544_v32  ;;  %v2123_v36 = vmul.f32 %v8491_v59, %v2122_v22  ;;  %v8627_v22 = vadd.f32 %v8374_v17, %v8457_v3  ;;  %6679 = vpow2.f32 %v6348_v25  ;;  %v2113_v17 = vsel %vm8631_vm11, %v8444_v7, %v2109_v57  ;;  %vm8755_vm7 = vmor %vm2155_vm4, %vm2156_vm6 }
 0x5cf   : > { %v8560_v32 = vpop.f32.mrf.mxu0  ;;  %6681 = vrcp.f32 %v8616_v47  ;;  %v2166_v7 = vmul.f32 %v8623_v30, %v8530_v38  ;;  %v8664_v57 = vadd.f32 %v8337_v44, %v8446_v2  ;;  %v2189_v44 = vand.u32 2147483647, %v8567_v50  ;;  %vm8794_vm11 = vmor %vm2170_vm8, %vm2171_vm9 }
 0x5d0   : > { %12731 = vst [vmem:[#allocation133_spill] sm:$0xff] %v8560_v32  ;;  %v8587_v32 = vsel %vm8532_vm2, %v2087_v18, %v2083_v34  ;;  %v8614_v34 = vadd.f32 %v8331_v53, %v8446_v2  ;;  %v2124_v25 = vadd.f32 %v8491_v59, %v2123_v36  ;;  %v8668_v36 = vadd.f32 %v8394_v6, %v8457_v3 }
 0x5d1   : > { %12740 = vst [vmem:[#allocation136_spill] sm:$0xff] %v8627_v22  ;;  %v2152_v22 = vsub.f32 1.0, %v2151_v0  ;;  %v8673_v0 = vsel %vm8604_vm10, %v2117_v45, %v2113_v17  ;;  %v2159_v6 = vand.u32 2147483647, %v8485_v15  ;;  %v2139_v53 = vadd.f32 %v8528_v10, %v2138_v19 }
 0x5d2   : > { %12745 = vst [vmem:[#allocation137_spill] sm:$0xff] %v8664_v57  ;;  %v2128_v18 = vsel %vm8677_vm15, %v8491_v59, %v2124_v25  ;;  %vm2141_vm2 = vweird.f32 %v8528_v10  ;;  %v8695_v45 = vadd.f32 %v8341_v58, %v8446_v2  ;;  %v2167_v43 = vsub.f32 1.0, %v2166_v7 }
 0x5d3   : > { %12746 = vst [vmem:[#allocation138_spill] sm:$0xff] %v8668_v36  ;;  %v2153_v26 = vmul.f32 %v8571_v49, %v2152_v22  ;;  %v2181_v36 = vmul.f32 %v8660_v61, %v8567_v50  ;;  %v2147_v25 = vor.u32 1.1754944e-38, %v2146_v51  ;;  %v2161_v19 = vand.u32 2147483648, %v8485_v15  ;;  %vm8719_vm3 = vmor %vm2140_vm0, %vm2141_vm2 }
 0x5d4   : > { %v6680_v8 = vpop.eup %6679  ;;  %v8713_v35 = vsel %vm8654_vm14, %v2132_v21, %v2128_v18  ;;  %vm8724_vm5 = vcmp.eq.f32.partialorder %v2159_v6, 8.507059e+37  ;;  %v2143_v23 = vsel %vm8719_vm3, %v8528_v10, %v2139_v53  ;;  %6683 = vpow2.f32 %v6349_v63 }
 0x5d5   : > { %v8620_v27 = vpop.f32.mrf.mxu3  ;;  %v8705_v22 = vpop.eup %6681  ;;  %v8707_v57 = vadd.f32 1.0, %v6680_v8  ;;  %v2154_v21 = vadd.f32 %v8571_v49, %v2153_v26  ;;  %v2168_v6 = vmul.f32 %v8623_v30, %v2167_v43  ;;  %v2182_v18 = vsub.f32 1.0, %v2181_v36 }
 0x5d6   : > { %12739 = vst [vmem:[#allocation135_spill] sm:$0xff] %v8620_v27  ;;  %v8738_v8 = vpop.f32.mrf.mxu1  ;;  %v2196_v10 = vmul.f32 %v8705_v22, %v8616_v47  ;;  %v8746_v53 = vadd.f32 %v8448_v52, %v8457_v3  ;;  %v8751_v41 = vsel %vm8682_vm1, %v2147_v25, %v2143_v23  ;;  %v2176_v26 = vand.u32 2147483648, %v8530_v38 }
 0x5d7   : > { %v8638_v27 = vpop.f32.mrf.mxu0  ;;  %6685 = vrcp.f32 %v8707_v57  ;;  %v1610_v63 = vadd.f32 %v8404_v42, %v8349_v29  ;;  %v2158_v52 = vsel %vm8755_vm7, %v8571_v49, %v2154_v21  ;;  %v2169_v25 = vadd.f32 %v8623_v30, %v2168_v6 }
 0x5d8   : > { %v2183_v15 = vmul.f32 %v8660_v61, %v2182_v18  ;;  %v2197_v49 = vsub.f32 1.0, %v2196_v10  ;;  %v8778_v23 = vadd.f32 %v8366_v5, %v8446_v2  ;;  %v8782_v21 = vadd.f32 %v8542_v14, %v8457_v3 }
 0x5d9   : > { %vm8799_vm13 = vcmp.eq.f32.partialorder %v2189_v44, 8.507059e+37  ;;  %vm2186_vm14 = vweird.f32 %v8660_v61  ;;  %v8819_v44 = vadd.f32 %v8636_v16, %v8457_v3  ;;  %vm2201_vm0 = vweird.f32 %v8705_v22 }
 0x5da   : > { %vm8834_vm15 = vmor %vm2185_vm12, %vm2186_vm14  ;;  %vm2200_vm1 = vweird.f32 %v8616_v47  ;;  %vm2215_vm4 = vweird.f32 %v8707_v57 }
 0x5db   : > { %vm8875_vm3 = vmor %vm2200_vm1, %vm2201_vm0 }
 0x5dd   : > { %v1906_v17 = vpop.f32.mrf.mxu3 }
 0x5de   : > { %v1907_v59 = vadd.f32 %v1906_v17, %v8452_v40 }
 0x5df   : > { %v8709_v58 = vpop.f32.mrf.mxu0 }
 0x5e0   : > { %v2315_v51 = vadd.f32 %v1907_v59, %v8495_v31  ;;  %v2162_v31 = vor.u32 1.1754944e-38, %v2161_v19  ;;  %v2174_v59 = vand.u32 2147483647, %v8530_v38  ;;  %v2184_v38 = vadd.f32 %v8660_v61, %v2183_v15 }
 0x5e2   : > { %v6355_v17 = vmul.f32 -1.442695, %v2315_v51  ;;  %vm8771_vm10 = vcmp.eq.f32.partialorder %v2174_v59, 8.507059e+37  ;;  %v6684_v51 = vpop.eup %6683  ;;  %v8788_v18 = vsel %vm8724_vm5, %v2162_v31, %v2158_v52  ;;  %v2006_v59 = vadd.f32 %v8465_v56, %v1610_v63 }
 0x5e3   : > { %v8803_v7 = vpop.eup %6685  ;;  %v8807_v31 = vadd.f32 %v8380_v4, %v8446_v2  ;;  %v2173_v56 = vsel %vm8794_vm11, %v8623_v30, %v2169_v25  ;;  %v8814_v36 = vadd.f32 1.0, %v6684_v51  ;;  %v2192_v63 = vor.u32 1.1754944e-38, %v2191_v13  ;;  %v1710_v4 = vpop.f32.mrf.mxu1 }
 0x5e4   : > { %6687 = vpow2.f32 %v6355_v17  ;;  %v2177_v17 = vor.u32 1.1754944e-38, %v2176_v26  ;;  %v2198_v52 = vmul.f32 %v8705_v22, %v2197_v49  ;;  %v2204_v25 = vand.u32 2147483647, %v8616_v47 }
 0x5e5   : > { %v1908_v43 = vpop.f32.mrf.mxu3  ;;  %v6350_v15 = vmul.f32 -1.442695, %v2006_v59  ;;  %v2211_v13 = vmul.f32 %v8803_v7, %v8707_v57  ;;  %v1613_v49 = vadd.f32 %v8427_v28, %v8349_v29  ;;  %v2188_v42 = vsel %vm8834_vm15, %v8660_v61, %v2184_v38 }
 0x5e6   : > { %v1909_v19 = vadd.f32 %v1908_v43, %v8452_v40  ;;  %v7127_v43 = vld [vmem:[#allocation10 + $0x10] sm:$0xff]  ;;  %v8828_v51 = vsel %vm8771_vm10, %v2177_v17, %v2173_v56  ;;  %v2206_v17 = vand.u32 2147483648, %v8616_v47  ;;  %vm8856_vm2 = vcmp.eq.f32.partialorder %v2204_v25, 8.507059e+37 }
 0x5e7   : > { %v8784_v6 = vpop.f32.mrf.mxu0  ;;  %v2221_v61 = vand.u32 2147483648, %v8707_v57  ;;  %v8863_v38 = vadd.f32 %v8396_v37, %v8446_v2  ;;  %v2007_v47 = vadd.f32 %v8469_v20, %v1613_v49  ;;  %v2219_v20 = vand.u32 2147483647, %v8707_v57 }
 0x5e8   : > { %v2316_v10 = vadd.f32 %v1909_v19, %v8504_v12  ;;  %v8821_v19 = vperm.slane %v7127_v43, 2  ;;  %v2207_v37 = vor.u32 1.1754944e-38, %v2206_v17  ;;  %vm2216_vm5 = vweird.f32 %v8803_v7 }
 0x5e9   : > { %v6351_v17 = vmul.f32 -1.442695, %v2007_v47  ;;  %vm8950_vm7 = vmor %vm2215_vm4, %vm2216_vm5  ;;  %vm8966_vm12 = vcmp.eq.f32.partialorder %v2219_v20, 8.507059e+37 }
 0x5ea   : > { %v6688_v12 = vpop.eup %6687  ;;  %v6356_v26 = vmul.f32 -1.442695, %v2316_v10  ;;  %v2199_v10 = vadd.f32 %v8705_v22, %v2198_v52  ;;  %v1956_v28 = vadd.f32 %v8638_v27, %v8821_v19  ;;  %v8868_v27 = vadd.f32 %v8738_v8, %v8457_v3 }
 0x5eb   : > { %v8823_v30 = vadd.f32 1.0, %v6688_v12  ;;  %v8873_v52 = vsel %vm8799_vm13, %v2192_v63, %v2188_v42  ;;  %v1958_v43 = vadd.f32 %v8709_v58, %v8821_v19  ;;  %v1615_v58 = vadd.f32 %v8475_v54, %v8349_v29 }
 0x5ec   : > { %6689 = vpow2.f32 %v6356_v26  ;;  %v2212_v26 = vsub.f32 1.0, %v2211_v13  ;;  %v2203_v8 = vsel %vm8875_vm3, %v8705_v22, %v2199_v10  ;;  %v2635_v63 = vmul.f32 %v8587_v32, %v1956_v28 }
 0x5ed   : > { %6691 = vrcp.f32 %v8823_v30  ;;  %v1911_v59 = vpop.f32.mrf.mxu3  ;;  %v8893_v13 = vor.u32 1.1754944e-38, %v2221_v61  ;;  %v8907_v10 = vsel %vm8856_vm2, %v2207_v37, %v2203_v8  ;;  %vm2400_vm8 = vweird.f32 %v8823_v30 }
 0x5ee   : > { %6693 = vrcp.f32 %v8814_v36  ;;  %v1912_v50 = vadd.f32 %v1911_v59, %v8452_v40  ;;  %v8899_v59 = vadd.f32 %v1710_v4, %v8457_v3  ;;  %v2213_v42 = vmul.f32 %v8803_v7, %v2212_v26 }
 0x5ef   : > { %v8853_v5 = vpop.f32.mrf.mxu0  ;;  %6695 = vpow2.f32 %v6350_v15  ;;  %v8912_v4 = vadd.f32 %v8433_v9, %v8446_v2  ;;  %v2234_v26 = vand.u32 2147483647, %v8814_v36  ;;  %v2651_v47 = vadd.f32 %v2635_v63, %v8499_v46 }
 0x5f0   : > { %v2317_v12 = vadd.f32 %v1912_v50, %v8512_v1  ;;  %v8881_v1 = vadd.f32 %v8409_v55, %v8446_v2  ;;  %v2236_v55 = vand.u32 2147483648, %v8814_v36  ;;  %v1712_v50 = vpop.f32.mrf.mxu1  ;;  %v2406_v63 = vand.u32 2147483648, %v8823_v30 }
 0x5f1   : > { %v8926_v9 = vadd.f32 %v1712_v50, %v8457_v3  ;;  %v2404_v50 = vand.u32 2147483647, %v8823_v30  ;;  %vm2230_vm13 = vweird.f32 %v8814_v36  ;;  %v1961_v20 = vadd.f32 %v8784_v6, %v8821_v19 }
 0x5f2   : > { %v6690_v25 = vpop.eup %6689  ;;  %v6357_v15 = vmul.f32 -1.442695, %v2317_v12  ;;  %v2407_v57 = vor.u32 1.1754944e-38, %v2406_v63  ;;  %vm8998_vm0 = vcmp.eq.f32.partialorder %v2234_v26, 8.507059e+37 }
 0x5f3   : > { %v8888_v14 = vpop.eup %6691  ;;  %v8891_v16 = vadd.f32 1.0, %v6690_v25  ;;  %v8923_v25 = vor.u32 1.1754944e-38, %v2236_v55  ;;  %vm2405_vm11 = vcmp.eq.f32.partialorder %v2404_v50, 8.507059e+37 }
 0x5f4   : > { %v8896_v49 = vpop.eup %6693  ;;  %v2396_v22 = vmul.f32 %v8888_v14, %v8823_v30  ;;  %6697 = vpow2.f32 %v6357_v15  ;;  %vm2401_vm6 = vweird.f32 %v8888_v14 }
 0x5f5   : > { %6699 = vrcp.f32 %v8891_v16  ;;  %v1913_v32 = vpop.f32.mrf.mxu3  ;;  %v6696_v28 = vpop.eup %6695  ;;  %v2226_v37 = vmul.f32 %v8896_v49, %v8814_v36  ;;  %vm2402_vm9 = vmor %vm2400_vm8, %vm2401_vm6  ;;  %vm2231_vm10 = vweird.f32 %v8896_v49  ;;  %vm2415_vm15 = vweird.f32 %v8891_v16 }
 0x5f6   : > { %v2397_v61 = vsub.f32 1.0, %v2396_v22  ;;  %v1914_v12 = vadd.f32 %v1913_v32, %v8452_v40  ;;  %v8931_v22 = vadd.f32 %v8803_v7, %v2213_v42  ;;  %v8933_v46 = vadd.f32 1.0, %v6696_v28  ;;  %vm9026_vm3 = vmor %vm2230_vm13, %vm2231_vm10 }
 0x5f7   : > { %v8919_v56 = vpop.f32.mrf.mxu0  ;;  %6701 = vpow2.f32 %v6351_v17  ;;  %v2636_v42 = vmul.f32 %v8642_v11, %v1958_v43  ;;  %v2227_v17 = vsub.f32 1.0, %v2226_v37 }
 0x5f8   : > { %v2398_v15 = vmul.f32 %v8888_v14, %v2397_v61  ;;  %v2318_v8 = vadd.f32 %v1914_v12, %v8540_v48  ;;  %6703 = vtanh.f32 %v2651_v47  ;;  %v2218_v11 = vsel %vm8950_vm7, %v8803_v7, %v8931_v22 }
 0x5f9   : > { %v2008_v47 = vadd.f32 %v8473_v39, %v1615_v58  ;;  %v12773_v39 = vld [vmem:[#allocation130_spill] sm:$0xff]  ;;  %vm2245_vm13 = vweird.f32 %v8933_v46 }
 0x5fa   : > { %v6698_v55 = vpop.eup %6697  ;;  %v2399_v32 = vadd.f32 %v8888_v14, %v2398_v15  ;;  %v6358_v61 = vmul.f32 -1.442695, %v2318_v8  ;;  %v2652_v22 = vadd.f32 %v2636_v42, %v12773_v39  ;;  %v2421_v42 = vand.u32 2147483648, %v8891_v16 }
 0x5fb   : > { %v8941_v48 = vpop.eup %6699  ;;  %v8944_v28 = vadd.f32 1.0, %v6698_v55  ;;  %v2228_v55 = vmul.f32 %v8896_v49, %v2227_v17  ;;  %v6352_v54 = vmul.f32 -1.442695, %v2008_v47 }
 0x5fc   : > { %v2411_v12 = vmul.f32 %v8941_v48, %v8891_v16  ;;  %6705 = vpow2.f32 %v6358_v61  ;;  %v2403_v15 = vsel %vm2402_vm9, %v8888_v14, %v2399_v32  ;;  %vm2416_vm14 = vweird.f32 %v8941_v48 }
 0x5fd   : > { %6707 = vrcp.f32 %v8944_v28  ;;  %v1916_v43 = vpop.f32.mrf.mxu3  ;;  %v6702_v7 = vpop.eup %6701  ;;  %v2408_v63 = vsel %vm2405_vm11, %v2407_v57, %v2403_v15  ;;  %v2251_v57 = vand.u32 2147483648, %v8933_v46  ;;  %v2229_v47 = vadd.f32 %v8896_v49, %v2228_v55  ;;  %vm2417_vm1 = vmor %vm2415_vm15, %vm2416_vm14 }
 0x5fe   : > { %v2412_v30 = vsub.f32 1.0, %v2411_v12  ;;  %v1917_v37 = vadd.f32 %v1916_v43, %v8452_v40  ;;  %6709 = vrcp.f32 %v8933_v46  ;;  %v2683_v32 = vsub.f32 1.0, %v2408_v63  ;;  %v6704_v61 = vpop.eup %6703 }
 0x5ff   : > { %v8972_v58 = vpop.f32.mrf.mxu0  ;;  %v2419_v12 = vand.u32 2147483647, %v8891_v16  ;;  %v8987_v6 = vadd.f32 1.0, %v6702_v7  ;;  %6711 = vtanh.f32 %v2652_v22  ;;  %v2422_v22 = vor.u32 1.1754944e-38, %v2421_v42  ;;  %v12776_v16 = vld [vmem:[#allocation28_spill] sm:$0xff] }
 0x600   : > { %v2413_v50 = vmul.f32 %v8941_v48, %v2412_v30  ;;  %v2319_v14 = vadd.f32 %v1917_v37, %v8575_v33  ;;  %v2699_v15 = vmul.f32 %v6704_v61, %v2683_v32  ;;  %v2637_v37 = vmul.f32 %v8673_v0, %v1961_v20 }
 0x601   : > { %v1963_v55 = vadd.f32 %v8853_v5, %v8821_v19  ;;  %v2715_v20 = vmul.f32 %v2408_v63, %v12776_v16  ;;  %vm2420_vm2 = vcmp.eq.f32.partialorder %v2419_v12, 8.507059e+37  ;;  %v9015_v42 = vsel %vm8966_vm12, %v8893_v13, %v2218_v11  ;;  %v12779_v11 = vld [vmem:[#allocation129_spill] sm:$0xff]  ;;  %v12789_v5 = vld [vmem:[#allocation30_spill] sm:$0xff] }
 0x602   : > { %v6706_v43 = vpop.eup %6705  ;;  %v2414_v17 = vadd.f32 %v8941_v48, %v2413_v50  ;;  %v6359_v30 = vmul.f32 -1.442695, %v2319_v14  ;;  %v9033_v8 = vadd.f32 %v12779_v11, %v8446_v2  ;;  %vm2430_vm5 = vweird.f32 %v8944_v28 }
 0x603   : > { %v8985_v39 = vpop.eup %6707  ;;  %v8989_v33 = vadd.f32 1.0, %v6706_v43 }
 0x604   : > { %v2426_v50 = vmul.f32 %v8985_v39, %v8944_v28  ;;  %6713 = vpow2.f32 %v6359_v30  ;;  %v9002_v7 = vpop.eup %6709  ;;  %v2418_v26 = vsel %vm2417_vm1, %v8941_v48, %v2414_v17  ;;  %v9010_v30 = vadd.f32 %v2715_v20, %v2699_v15  ;;  %v12780_v17 = vld [vmem:[#allocation131_spill] sm:$0xff] }
 0x605   : > { %6715 = vrcp.f32 %v8989_v33  ;;  %v1918_v0 = vpop.f32.mrf.mxu3  ;;  %v2423_v43 = vsel %vm2420_vm2, %v2422_v22, %v2418_v26  ;;  %v6712_v13 = vpop.eup %6711  ;;  %v2653_v36 = vadd.f32 %v2637_v37, %v12780_v17  ;;  %v2638_v15 = vmul.f32 %v8713_v35, %v1963_v55 }
 0x606   : > { %v2427_v32 = vsub.f32 1.0, %v2426_v50  ;;  %v1919_v61 = vadd.f32 %v1918_v0, %v8452_v40  ;;  %6717 = vpow2.f32 %v6352_v54  ;;  %v2684_v0 = vsub.f32 1.0, %v2423_v43 }
 0x607   : > { %v9020_v50 = vpop.f32.mrf.mxu0  ;;  %6719 = vrcp.f32 %v8987_v6  ;;  %v9038_v54 = vor.u32 1.1754944e-38, %v2251_v57  ;;  %vm2431_vm4 = vweird.f32 %v8985_v39  ;;  %v9062_v55 = vmul.f32 %v9002_v7, %v8933_v46 }
 0x608   : > { %v2428_v3 = vmul.f32 %v8985_v39, %v2427_v32  ;;  %v2320_v63 = vadd.f32 %v1919_v61, %v8614_v34  ;;  %v2233_v34 = vsel %vm9026_vm3, %v8896_v49, %v2229_v47  ;;  %v2700_v16 = vmul.f32 %v6712_v13, %v2684_v0  ;;  %v12781_v47 = vld [vmem:[#allocation29_spill] sm:$0xff]  ;;  %v12782_v0 = vld [vmem:[#allocation132_spill] sm:$0xff]  ;;  %vm9068_vm6 = vmor %vm2430_vm5, %vm2431_vm4 }
 0x609   : > { %v2436_v61 = vand.u32 2147483648, %v8944_v28  ;;  %v2434_v49 = vand.u32 2147483647, %v8944_v28  ;;  %v2716_v35 = vmul.f32 %v2423_v43, %v12781_v47  ;;  %v1618_v48 = vadd.f32 %v12782_v0, %v8349_v29  ;;  %v12787_v43 = vld [vmem:[#allocation109_spill] sm:$0xff] }
 0x60a   : > { %v6714_v12 = vpop.eup %6713  ;;  %v6360_v22 = vmul.f32 -1.442695, %v2320_v63  ;;  %v2429_v32 = vadd.f32 %v8985_v39, %v2428_v3  ;;  %v9058_v3 = vsel %vm8998_vm0, %v8923_v25, %v2233_v34  ;;  %v2654_v34 = vadd.f32 %v2638_v15, %v8554_v60 }
 0x60b   : > { %v9042_v20 = vpop.eup %6715  ;;  %v9047_v26 = vadd.f32 1.0, %v6714_v12  ;;  %v9073_v11 = vadd.f32 %v2716_v35, %v2700_v16  ;;  %v2437_v14 = vor.u32 1.1754944e-38, %v2436_v61  ;;  %vm2435_vm7 = vcmp.eq.f32.partialorder %v2434_v49, 8.507059e+37 }
 0x60c   : > { %v2441_v57 = vmul.f32 %v9042_v20, %v8989_v33  ;;  %6721 = vpow2.f32 %v6360_v22  ;;  %v9064_v63 = vpop.eup %6717  ;;  %v2433_v12 = vsel %vm9068_vm6, %v8985_v39, %v2429_v32  ;;  %v12786_v22 = vld [vmem:[#allocation137_spill] sm:$0xff]  ;;  %v2451_v16 = vand.u32 2147483648, %v8989_v33 }
 0x60d   : > { %6723 = vrcp.f32 %v9047_v26  ;;  %v1921_v37 = vpop.f32.mrf.mxu3  ;;  %12785 = vst [vmem:[#allocation130_spill] sm:$0xff] %v9073_v11  ;;  %v9075_v25 = vpop.eup %6719  ;;  %v2438_v61 = vsel %vm2435_vm7, %v2437_v14, %v2433_v12  ;;  %v2242_v60 = vsub.f32 1.0, %v9062_v55  ;;  %vm2446_vm8 = vweird.f32 %v9042_v20 }
 0x60e   : > { %v2442_v28 = vsub.f32 1.0, %v2441_v57  ;;  %v1922_v13 = vadd.f32 %v1921_v37, %v8452_v40  ;;  %6725 = vtanh.f32 %v2653_v36  ;;  %v9085_v57 = vpack.c.bf16 %v9073_v11, %v9010_v30 }
 0x60f   : > { %v1966_v36 = vadd.f32 %v8919_v56, %v8821_v19  ;;  %v2449_v32 = vand.u32 2147483647, %v8989_v33  ;;  %v9095_v35 = vpop.f32.mrf.mxu0  ;;  %6727 = vtanh.f32 %v2654_v34  ;;  %v2685_v56 = vsub.f32 1.0, %v2438_v61 }
 0x610   : > { %v2443_v17 = vmul.f32 %v9042_v20, %v2442_v28  ;;  %v2321_v47 = vadd.f32 %v1922_v13, %v12786_v22  ;;  %2996 = vmatmul.bf16.vlgmr.msra.gmra.mxu2 %v9085_v57  ;;  %v2266_v55 = vand.u32 2147483648, %v8987_v6  ;;  %v12788_v28 = vld [vmem:[#allocation127_spill] sm:$0xff]  ;;  %vm2445_vm9 = vweird.f32 %v8989_v33 }
 0x611   : > { %3403 = vmatpush.bf16.msra.mxu2 %v12787_v43  ;;  %v2009_v13 = vadd.f32 %v12788_v28, %v1618_v48  ;;  %vm2447_vm10 = vmor %vm2445_vm9, %vm2446_vm8  ;;  %v2452_v34 = vor.u32 1.1754944e-38, %v2451_v16  ;;  %v1968_v22 = vadd.f32 %v8972_v58, %v8821_v19  ;;  %vm2246_vm11 = vweird.f32 %v9002_v7  ;;  %v12790_v58 = vld [vmem:[#allocation111_spill] sm:$0xff] }
 0x612   : > { %v6722_v15 = vpop.eup %6721  ;;  %v2444_v39 = vadd.f32 %v9042_v20, %v2443_v17  ;;  %v6361_v49 = vmul.f32 -1.442695, %v2321_v47  ;;  %v2639_v17 = vmul.f32 %v8751_v41, %v1966_v36  ;;  %vm2450_vm12 = vcmp.eq.f32.partialorder %v2449_v32, 8.507059e+37  ;;  %v12791_v36 = vld [vmem:[#allocation133_spill] sm:$0xff]  ;;  %vm9183_vm3 = vmor %vm2245_vm13, %vm2246_vm11 }
 0x613   : > { %v9097_v37 = vpop.eup %6723  ;;  %v9099_v0 = vadd.f32 1.0, %v6722_v15  ;;  %v2717_v16 = vmul.f32 %v2438_v61, %v12789_v5  ;;  %v9122_v43 = vadd.f32 %v12791_v36, %v8446_v2  ;;  %v6353_v32 = vmul.f32 -1.442695, %v2009_v13 }
 0x614   : > { %v2456_v14 = vmul.f32 %v9097_v37, %v9047_v26  ;;  %6729 = vpow2.f32 %v6361_v49  ;;  %v6726_v12 = vpop.eup %6725  ;;  %v2448_v15 = vsel %vm2447_vm10, %v9042_v20, %v2444_v39  ;;  %v2243_v5 = vmul.f32 %v9002_v7, %v2242_v60  ;;  %v12794_v60 = vld [vmem:[#allocation113_spill] sm:$0xff] }
 0x615   : > { %6731 = vrcp.f32 %v9099_v0  ;;  %v1923_v47 = vpop.f32.mrf.mxu3  ;;  %v2453_v49 = vsel %vm2450_vm12, %v2452_v34, %v2448_v15  ;;  %v2701_v28 = vmul.f32 %v6726_v12, %v2685_v56  ;;  %3404 = vmatpush.bf16.msra.mxu2 %v12790_v58  ;;  %v6728_v39 = vpop.eup %6727  ;;  %v9129_v61 = vor.u32 1.1754944e-38, %v2266_v55  ;;  %v12793_v34 = vld [vmem:[#allocation134_spill] sm:$0xff] }
 0x616   : > { %v2457_v33 = vsub.f32 1.0, %v2456_v14  ;;  %v1924_v48 = vadd.f32 %v1923_v47, %v8452_v40  ;;  %v2686_v20 = vsub.f32 1.0, %v2453_v49  ;;  %v2655_v15 = vadd.f32 %v2639_v17, %v12793_v34 }
 0x617   : > { %v9126_v56 = vadd.f32 %v2717_v16, %v2701_v28  ;;  %v2640_v41 = vmul.f32 %v8788_v18, %v1968_v22  ;;  %vm2461_vm14 = vweird.f32 %v9097_v37  ;;  %v2466_v13 = vand.u32 2147483648, %v9047_v26  ;;  %v9144_v18 = vpop.f32.mrf.mxu0  ;;  %v12795_v22 = vld [vmem:[#allocation31_spill] sm:$0xff] }
 0x618   : > { %v2458_v14 = vmul.f32 %v9097_v37, %v2457_v33  ;;  %v2322_v47 = vadd.f32 %v1924_v48, %v8695_v45  ;;  %v2702_v58 = vmul.f32 %v6728_v39, %v2686_v20  ;;  %v2464_v55 = vand.u32 2147483647, %v9047_v26 }
 0x619   : > { %12792 = vst [vmem:[#allocation28_spill] sm:$0xff] %v9126_v56  ;;  %3405 = vmatpush.bf16.msra.mxu2 %v12794_v60  ;;  %v2718_v48 = vmul.f32 %v2453_v49, %v12795_v22  ;;  %v9148_v28 = vadd.f32 1.0, %v9064_v63  ;;  %vm2460_vm15 = vweird.f32 %v9047_v26  ;;  %v2467_v63 = vor.u32 1.1754944e-38, %v2466_v13  ;;  %v12799_v26 = vld [vmem:[#allocation136_spill] sm:$0xff] }
 0x61a   : > { %v6730_v12 = vpop.eup %6729  ;;  %v6362_v36 = vmul.f32 -1.442695, %v2322_v47  ;;  %v2459_v45 = vadd.f32 %v9097_v37, %v2458_v14  ;;  %v2244_v14 = vadd.f32 %v9002_v7, %v2243_v5  ;;  %vm9155_vm0 = vmor %vm2460_vm15, %vm2461_vm14  ;;  %vm2465_vm2 = vcmp.eq.f32.partialorder %v2464_v55, 8.507059e+37 }
 0x61b   : > { %v9133_v11 = vpop.eup %6731  ;;  %v9138_v33 = vadd.f32 1.0, %v6730_v12  ;;  %v9160_v39 = vadd.f32 %v2718_v48, %v2702_v58  ;;  %v2656_v12 = vadd.f32 %v2640_v41, %v12799_v26  ;;  %v1971_v13 = vadd.f32 %v9020_v50, %v8821_v19 }
 0x61c   : > { %v2471_v17 = vmul.f32 %v9133_v11, %v9099_v0  ;;  %6733 = vpow2.f32 %v6362_v36  ;;  %v2463_v5 = vsel %vm9155_vm0, %v9097_v37, %v2459_v45  ;;  %v12803_v36 = vld [vmem:[#allocation115_spill] sm:$0xff]  ;;  %v2481_v45 = vand.u32 2147483648, %v9099_v0 }
 0x61d   : > { %6735 = vrcp.f32 %v9138_v33  ;;  %v1926_v16 = vpop.f32.mrf.mxu3  ;;  %12798 = vst [vmem:[#allocation129_spill] sm:$0xff] %v9160_v39  ;;  %3406 = vmatpush.bf16.msra.mxu2 %v12803_v36  ;;  %v9177_v41 = vpack.c.bf16 %v9160_v39, %v9126_v56  ;;  %v2468_v55 = vsel %vm2465_vm2, %v2467_v63, %v2463_v5  ;;  %vm2476_vm4 = vweird.f32 %v9133_v11 }
 0x61e   : > { %6737 = vpow2.f32 %v6353_v32  ;;  %v2472_v20 = vsub.f32 1.0, %v2471_v17  ;;  %v1927_v49 = vadd.f32 %v1926_v16, %v8452_v40  ;;  %v12800_v32 = vand.u32 2147483647, %v8933_v46 }
 0x61f   : > { %6739 = vtanh.f32 %v2655_v15  ;;  %v2479_v46 = vand.u32 2147483647, %v9099_v0  ;;  %v2687_v50 = vsub.f32 1.0, %v2468_v55  ;;  %vm2475_vm5 = vweird.f32 %v9099_v0 }
 0x620   : > { %vm9168_vm1 = vcmp.eq.f32.partialorder %v12800_v32, 8.507059e+37  ;;  %v2473_v58 = vmul.f32 %v9133_v11, %v2472_v20  ;;  %v2323_v15 = vadd.f32 %v1927_v49, %v8736_v62  ;;  %v2248_v62 = vsel %vm9183_vm3, %v9002_v7, %v2244_v14  ;;  %3001 = vmatmul.bf16.gmra.mxu2 %v9177_v41  ;;  %v12806_v7 = vld [vmem:[#allocation117_spill] sm:$0xff]  ;;  %v12807_v49 = vld [vmem:[#allocation135_spill] sm:$0xff]  ;;  %vm2477_vm6 = vmor %vm2475_vm5, %vm2476_vm4 }
 0x621   : > { %6741 = vtanh.f32 %v2656_v12  ;;  %v2256_v20 = vmul.f32 %v9075_v25, %v8987_v6  ;;  %3407 = vmatpush.bf16.msra.mxu2 %v12806_v7  ;;  %v1620_v63 = vadd.f32 %v12807_v49, %v8349_v29  ;;  %v2482_v5 = vor.u32 1.1754944e-38, %v2481_v45  ;;  %v12808_v7 = vld [vmem:[#allocation32_spill] sm:$0xff] }
 0x622   : > { %v6734_v17 = vpop.eup %6733  ;;  %v2474_v22 = vadd.f32 %v9133_v11, %v2473_v58  ;;  %v6363_v48 = vmul.f32 -1.442695, %v2323_v15  ;;  %v2641_v32 = vmul.f32 %v8828_v51, %v1971_v13  ;;  %v1973_v58 = vadd.f32 %v9095_v35, %v8821_v19  ;;  %v12809_v13 = vld [vmem:[#allocation119_spill] sm:$0xff] }
 0x623   : > { %v9197_v16 = vpop.eup %6735  ;;  %v9199_v47 = vadd.f32 1.0, %v6734_v17  ;;  %v9217_v17 = vpop.f32.mrf.mxu0  ;;  %vm2480_vm7 = vcmp.eq.f32.partialorder %v2479_v46, 8.507059e+37  ;;  %v2719_v51 = vmul.f32 %v2468_v55, %v12808_v7  ;;  %v2496_v34 = vand.u32 2147483648, %v9138_v33 }
 0x624   : > { %v9204_v14 = vpop.eup %6737  ;;  %v2486_v26 = vmul.f32 %v9197_v16, %v9138_v33  ;;  %6743 = vpow2.f32 %v6363_v48  ;;  %v2478_v48 = vsel %vm2477_vm6, %v9133_v11, %v2474_v22  ;;  %v12810_v22 = vld [vmem:[#allocation128_spill] sm:$0xff]  ;;  %vm2491_vm8 = vweird.f32 %v9197_v16 }
 0x625   : > { %v6740_v12 = vpop.eup %6739  ;;  %6745 = vrcp.f32 %v9199_v47  ;;  %v1928_v15 = vpop.f32.mrf.mxu3  ;;  %v2483_v49 = vsel %vm2480_vm7, %v2482_v5, %v2478_v48  ;;  %3408 = vmatpush.bf16.msra.mxu2 %v12809_v13  ;;  %v2010_v46 = vadd.f32 %v12810_v22, %v1620_v63  ;;  %v2494_v63 = vand.u32 2147483647, %v9138_v33 }
 0x626   : > { %v2487_v37 = vsub.f32 1.0, %v2486_v26  ;;  %v1929_v0 = vadd.f32 %v1928_v15, %v8452_v40  ;;  %6747 = vrcp.f32 %v9148_v28  ;;  %v2703_v45 = vmul.f32 %v6740_v12, %v2687_v50  ;;  %v12812_v12 = vld [vmem:[#allocation138_spill] sm:$0xff] }
 0x627   : > { %v2688_v26 = vsub.f32 1.0, %v2483_v49  ;;  %v9229_v15 = vsel %vm9168_vm1, %v9038_v54, %v2248_v62  ;;  %v6742_v11 = vpop.eup %6741  ;;  %v2257_v50 = vsub.f32 1.0, %v2256_v20  ;;  %v2657_v5 = vadd.f32 %v2641_v32, %v12812_v12  ;;  %v12813_v20 = vld [vmem:[#allocation121_spill] sm:$0xff]  ;;  %v12818_v12 = vld [vmem:[#allocation123_spill] sm:$0xff] }
 0x628   : > { %v2488_v35 = vmul.f32 %v9197_v16, %v2487_v37  ;;  %v2324_v36 = vadd.f32 %v1929_v0, %v8778_v23  ;;  %v9232_v39 = vadd.f32 %v2719_v51, %v2703_v45  ;;  %v2642_v37 = vmul.f32 %v8873_v52, %v1973_v58  ;;  %v12814_v52 = vld [vmem:[#allocation33_spill] sm:$0xff] }
 0x629   : > { %v2704_v0 = vmul.f32 %v6742_v11, %v2688_v26  ;;  %3409 = vmatpush.bf16.msra.mxu2 %v12813_v20  ;;  %vm2490_vm9 = vweird.f32 %v9138_v33  ;;  %v2258_v51 = vmul.f32 %v9075_v25, %v2257_v50  ;;  %vm2261_vm10 = vweird.f32 %v9075_v25 }
 0x62a   : > { %12811 = vst [vmem:[#allocation131_spill] sm:$0xff] %v9232_v39  ;;  %v6744_v7 = vpop.eup %6743  ;;  %v6364_v23 = vmul.f32 -1.442695, %v2324_v36  ;;  %v2489_v54 = vadd.f32 %v9197_v16, %v2488_v35  ;;  %v2720_v36 = vmul.f32 %v2483_v49, %v12814_v52  ;;  %v2281_v35 = vand.u32 2147483648, %v9148_v28  ;;  %vm9258_vm11 = vmor %vm2490_vm9, %vm2491_vm8 }
 0x62b   : > { %v9237_v48 = vpop.eup %6745  ;;  %v9242_v62 = vadd.f32 1.0, %v6744_v7  ;;  %v6354_v26 = vmul.f32 -1.442695, %v2010_v46  ;;  %v2497_v7 = vor.u32 1.1754944e-38, %v2496_v34  ;;  %v2658_v50 = vadd.f32 %v2642_v37, %v8701_v24 }
 0x62c   : > { %v2501_v32 = vmul.f32 %v9237_v48, %v9199_v47  ;;  %6749 = vpow2.f32 %v6364_v23  ;;  %v9249_v58 = vpop.eup %6747  ;;  %v9263_v33 = vadd.f32 %v2720_v36, %v2704_v0  ;;  %vm2260_vm12 = vweird.f32 %v8987_v6 }
 0x62d   : > { %6751 = vrcp.f32 %v9242_v62  ;;  %v1931_v45 = vpop.f32.mrf.mxu3  ;;  %v2493_v46 = vsel %vm9258_vm11, %v9197_v16, %v2489_v54  ;;  %3410 = vmatpush.bf16.msra.mxu2 %v12818_v12  ;;  %vm2495_vm13 = vcmp.eq.f32.partialorder %v2494_v63, 8.507059e+37  ;;  %v2511_v24 = vand.u32 2147483648, %v9199_v47  ;;  %v12822_v12 = vld [vmem:[#allocation34_spill] sm:$0xff]  ;;  %vm9322_vm3 = vmor %vm2260_vm12, %vm2261_vm10 }
 0x62e   : > { %v2502_v49 = vsub.f32 1.0, %v2501_v32  ;;  %v1932_v22 = vadd.f32 %v1931_v45, %v8452_v40  ;;  %12817 = vst [vmem:[#allocation29_spill] sm:$0xff] %v9263_v33  ;;  %6753 = vtanh.f32 %v2657_v5  ;;  %v9272_v32 = vpop.f32.mrf.mxu0  ;;  %v9277_v5 = vpack.c.bf16 %v9263_v33, %v9232_v39 }
 0x62f   : > { %v1976_v37 = vadd.f32 %v9144_v18, %v8821_v19  ;;  %v2259_v16 = vadd.f32 %v9075_v25, %v2258_v51  ;;  %v2498_v54 = vsel %vm2495_vm13, %v2497_v7, %v2493_v46  ;;  %vm2506_vm14 = vweird.f32 %v9237_v48 }
 0x630   : > { %v2503_v23 = vmul.f32 %v9237_v48, %v2502_v49  ;;  %v2325_v0 = vadd.f32 %v1932_v22, %v8807_v31  ;;  %v2509_v52 = vand.u32 2147483647, %v9199_v47  ;;  %3006 = vmatmul.bf16.gmra.mxu2 %v9277_v5  ;;  %v9290_v45 = vadd.f32 1.0, %v9204_v14 }
 0x631   : > { %6755 = vtanh.f32 %v2658_v50  ;;  %v2689_v51 = vsub.f32 1.0, %v2498_v54  ;;  %vm2505_vm15 = vweird.f32 %v9199_v47  ;;  %v12819_v49 = vand.u32 2147483647, %v8987_v6 }
 0x632   : > { %v6750_v34 = vpop.eup %6749  ;;  %v2504_v63 = vadd.f32 %v9237_v48, %v2503_v23  ;;  %v6365_v31 = vmul.f32 -1.442695, %v2325_v0  ;;  %v2271_v14 = vmul.f32 %v9249_v58, %v9148_v28  ;;  %vm2507_vm1 = vmor %vm2505_vm15, %vm2506_vm14  ;;  %v2512_v50 = vor.u32 1.1754944e-38, %v2511_v24 }
 0x633   : > { %v9287_v36 = vpop.eup %6751  ;;  %v9292_v18 = vadd.f32 1.0, %v6750_v34  ;;  %vm9299_vm0 = vcmp.eq.f32.partialorder %v12819_v49, 8.507059e+37  ;;  %v2643_v47 = vmul.f32 %v8907_v10, %v1976_v37  ;;  %v1978_v46 = vadd.f32 %v9217_v17, %v8821_v19 }
 0x634   : > { %v2516_v11 = vmul.f32 %v9287_v36, %v9242_v62  ;;  %6757 = vpow2.f32 %v6365_v31  ;;  %v6754_v7 = vpop.eup %6753  ;;  %v2508_v31 = vsel %vm2507_vm1, %v9237_v48, %v2504_v63  ;;  %vm2510_vm2 = vcmp.eq.f32.partialorder %v2509_v52, 8.507059e+37 }
 0x635   : > { %6759 = vrcp.f32 %v9292_v18  ;;  %v1933_v23 = vpop.f32.mrf.mxu3  ;;  %v2513_v49 = vsel %vm2510_vm2, %v2512_v50, %v2508_v31  ;;  %v2705_v55 = vmul.f32 %v6754_v7, %v2689_v51  ;;  %v2721_v33 = vmul.f32 %v2498_v54, %v12822_v12 }
 0x636   : > { %v2517_v0 = vsub.f32 1.0, %v2516_v11  ;;  %v1934_v34 = vadd.f32 %v1933_v23, %v8452_v40  ;;  %v9314_v20 = vor.u32 1.1754944e-38, %v2281_v35  ;;  %6761 = vpow2.f32 %v6354_v26  ;;  %v1982_v63 = vpop.f32.mrf.mxu0 }
 0x637   : > { %v2690_v48 = vsub.f32 1.0, %v2513_v49  ;;  %v6756_v37 = vpop.eup %6755  ;;  %6763 = vrcp.f32 %v9290_v45  ;;  %v2263_v35 = vsel %vm9322_vm3, %v9075_v25, %v2259_v16  ;;  %v9330_v26 = vadd.f32 %v2721_v33, %v2705_v55 }
 0x638   : > { %v2518_v10 = vmul.f32 %v9287_v36, %v2517_v0  ;;  %v2326_v17 = vadd.f32 %v1934_v34, %v8863_v38  ;;  %v2272_v12 = vsub.f32 1.0, %v2271_v14  ;;  %v2659_v54 = vadd.f32 %v2643_v47, %v8746_v53 }
 0x639   : > { %12825 = vst [vmem:[#allocation132_spill] sm:$0xff] %v9330_v26  ;;  %v2644_v6 = vmul.f32 %v9015_v42, %v1978_v46  ;;  %v2706_v51 = vmul.f32 %v6756_v37, %v2690_v48  ;;  %vm2521_vm4 = vweird.f32 %v9287_v36  ;;  %v2526_v50 = vand.u32 2147483648, %v9242_v62  ;;  %v12826_v42 = vld [vmem:[#allocation35_spill] sm:$0xff] }
 0x63a   : > { %v6758_v38 = vpop.eup %6757  ;;  %v6366_v52 = vmul.f32 -1.442695, %v2326_v17  ;;  %v2519_v7 = vadd.f32 %v9287_v36, %v2518_v10  ;;  %v2524_v55 = vand.u32 2147483647, %v9242_v62  ;;  %v2722_v33 = vmul.f32 %v2513_v49, %v12826_v42 }
 0x63b   : > { %v9334_v11 = vpop.eup %6759  ;;  %v9339_v25 = vadd.f32 1.0, %v6758_v38  ;;  %vm2520_vm5 = vweird.f32 %v9242_v62  ;;  %v9350_v16 = vsel %vm9299_vm0, %v9129_v61, %v2263_v35  ;;  %vm2276_vm6 = vweird.f32 %v9249_v58 }
 0x63c   : > { %v2531_v53 = vmul.f32 %v9334_v11, %v9292_v18  ;;  %6765 = vpow2.f32 %v6366_v52  ;;  %v6762_v47 = vpop.eup %6761  ;;  %vm9353_vm7 = vmor %vm2520_vm5, %vm2521_vm4  ;;  %v9358_v34 = vadd.f32 %v2722_v33, %v2706_v51  ;;  %v2273_v62 = vmul.f32 %v9249_v58, %v2272_v12 }
 0x63d   : > { %6767 = vrcp.f32 %v9339_v25  ;;  %v1936_v14 = vpop.f32.mrf.mxu3  ;;  %v9361_v31 = vpop.eup %6763  ;;  %v2527_v61 = vor.u32 1.1754944e-38, %v2526_v50  ;;  %v2660_v22 = vadd.f32 %v2644_v6, %v8782_v21  ;;  %vm2275_vm8 = vweird.f32 %v9148_v28 }
 0x63e   : > { %v2532_v23 = vsub.f32 1.0, %v2531_v53  ;;  %v1937_v0 = vadd.f32 %v1936_v14, %v8452_v40  ;;  %12829 = vst [vmem:[#allocation137_spill] sm:$0xff] %v9358_v34  ;;  %6769 = vtanh.f32 %v2659_v54  ;;  %v2523_v49 = vsel %vm9353_vm7, %v9287_v36, %v2519_v7  ;;  %v1985_v50 = vpop.f32.mrf.mxu0  ;;  %vm9413_vm15 = vmor %vm2275_vm8, %vm2276_vm6 }
 0x63f   : > { %vm2525_vm9 = vcmp.eq.f32.partialorder %v2524_v55, 8.507059e+37  ;;  %v9372_v24 = vpack.c.bf16 %v9358_v34, %v9330_v26  ;;  %v2541_v48 = vand.u32 2147483648, %v9292_v18  ;;  %v1981_v21 = vadd.f32 %v9272_v32, %v8821_v19 }
 0x640   : > { %v2533_v10 = vmul.f32 %v9334_v11, %v2532_v23  ;;  %v2327_v17 = vadd.f32 %v1937_v0, %v8881_v1  ;;  %v2296_v37 = vand.u32 2147483648, %v9290_v45  ;;  %v2528_v35 = vsel %vm2525_vm9, %v2527_v61, %v2523_v49  ;;  %v12833_v49 = vld [vmem:[#allocation36_spill] sm:$0xff] }
 0x641   : > { %vm2536_vm10 = vweird.f32 %v9334_v11  ;;  %v2539_v38 = vand.u32 2147483647, %v9292_v18  ;;  %3011 = vmatmul.bf16.gmra.mxu2 %v9372_v24  ;;  %6771 = vtanh.f32 %v2660_v22  ;;  %v2274_v32 = vadd.f32 %v9249_v58, %v2273_v62 }
 0x642   : > { %v6766_v12 = vpop.eup %6765  ;;  %v2534_v36 = vadd.f32 %v9334_v11, %v2533_v10  ;;  %v6367_v1 = vmul.f32 -1.442695, %v2327_v17  ;;  %v2691_v52 = vsub.f32 1.0, %v2528_v35  ;;  %v9387_v51 = vadd.f32 1.0, %v6762_v47 }
 0x643   : > { %v9382_v54 = vpop.eup %6767  ;;  %v9384_v6 = vadd.f32 1.0, %v6766_v12  ;;  %vm2535_vm11 = vweird.f32 %v9292_v18  ;;  %v12830_v55 = vand.u32 2147483647, %v9148_v28  ;;  %v2542_v33 = vor.u32 1.1754944e-38, %v2541_v48 }
 0x644   : > { %v2546_v7 = vmul.f32 %v9382_v54, %v9339_v25  ;;  %6773 = vpow2.f32 %v6367_v1  ;;  %v6770_v42 = vpop.eup %6769  ;;  %vm2537_vm13 = vmor %vm2535_vm11, %vm2536_vm10  ;;  %v2645_v14 = vmul.f32 %v9058_v3, %v1981_v21  ;;  %v1983_v18 = vadd.f32 %v1982_v63, %v8821_v19 }
 0x645   : > { %vm9394_vm12 = vcmp.eq.f32.partialorder %v12830_v55, 8.507059e+37  ;;  %6775 = vrcp.f32 %v9384_v6  ;;  %v1938_v47 = vpop.f32.mrf.mxu3  ;;  %v2538_v0 = vsel %vm2537_vm13, %v9334_v11, %v2534_v36  ;;  %vm2540_vm14 = vcmp.eq.f32.partialorder %v2539_v38, 8.507059e+37 }
 0x646   : > { %v2547_v46 = vsub.f32 1.0, %v2546_v7  ;;  %v1939_v23 = vadd.f32 %v1938_v47, %v8452_v40  ;;  %v2294_v62 = vand.u32 2147483647, %v9290_v45  ;;  %v2543_v61 = vsel %vm2540_vm14, %v2542_v33, %v2538_v0  ;;  %v1987_v0 = vpop.f32.mrf.mxu0 }
 0x647   : > { %v2707_v22 = vmul.f32 %v6770_v42, %v2691_v52  ;;  %v2723_v10 = vmul.f32 %v2528_v35, %v12833_v49  ;;  %6777 = vrcp.f32 %v9387_v51  ;;  %v2692_v17 = vsub.f32 1.0, %v2543_v61  ;;  %v6772_v48 = vpop.eup %6771 }
 0x648   : > { %v2548_v3 = vmul.f32 %v9382_v54, %v2547_v46  ;;  %v2328_v11 = vadd.f32 %v1939_v23, %v8912_v4  ;;  %v2278_v21 = vsel %vm9413_vm15, %v9249_v58, %v2274_v32  ;;  %v2286_v35 = vmul.f32 %v9361_v31, %v9290_v45 }
 0x649   : > { %v9423_v12 = vor.u32 1.1754944e-38, %v2296_v37  ;;  %v9425_v36 = vadd.f32 %v2723_v10, %v2707_v22  ;;  %v2661_v38 = vadd.f32 %v2645_v14, %v8819_v44  ;;  %v2646_v1 = vmul.f32 %v9229_v15, %v1983_v18  ;;  %v12837_v44 = vld [vmem:[#allocation37_spill] sm:$0xff] }
 0x64a   : > { %v6774_v28 = vpop.eup %6773  ;;  %v6368_v52 = vmul.f32 -1.442695, %v2328_v11  ;;  %v2708_v4 = vmul.f32 %v6772_v48, %v2692_v17  ;;  %v2549_v55 = vadd.f32 %v9382_v54, %v2548_v3  ;;  %vm2551_vm0 = vweird.f32 %v9382_v54 }
 0x64b   : > { %12836 = vst [vmem:[#allocation127_spill] sm:$0xff] %v9425_v36  ;;  %v9429_v7 = vpop.eup %6775  ;;  %v2556_v58 = vand.u32 2147483648, %v9339_v25  ;;  %v9434_v32 = vadd.f32 1.0, %v6774_v28  ;;  %v2554_v37 = vand.u32 2147483647, %v9339_v25  ;;  %v2724_v15 = vmul.f32 %v2543_v61, %v12837_v44 }
 0x64c   : > { %v2561_v42 = vmul.f32 %v9429_v7, %v9384_v6  ;;  %6779 = vpow2.f32 %v6368_v52  ;;  %vm2550_vm1 = vweird.f32 %v9339_v25  ;;  %v2283_v33 = vsel %vm9394_vm12, %v9314_v20, %v2278_v21 }
 0x64d   : > { %6781 = vrcp.f32 %v9434_v32  ;;  %v2287_v14 = vsub.f32 1.0, %v2286_v35  ;;  %v1941_v18 = vpop.f32.mrf.mxu3  ;;  %v9445_v47 = vpop.eup %6777  ;;  %vm9447_vm2 = vmor %vm2550_vm1, %vm2551_vm0  ;;  %v9452_v25 = vadd.f32 %v2724_v15, %v2708_v4  ;;  %v2557_v22 = vor.u32 1.1754944e-38, %v2556_v58 }
 0x64e   : > { %6783 = vtanh.f32 %v2661_v38  ;;  %v2562_v23 = vsub.f32 1.0, %v2561_v42  ;;  %v1942_v61 = vadd.f32 %v1941_v18, %v8452_v40  ;;  %v2662_v49 = vadd.f32 %v2646_v1, %v8868_v27 }
 0x64f   : > { %12840 = vst [vmem:[#allocation30_spill] sm:$0xff] %v9452_v25  ;;  %v1986_v20 = vadd.f32 %v1985_v50, %v8821_v19  ;;  %vm2291_vm3 = vweird.f32 %v9361_v31  ;;  %v2553_v53 = vsel %vm9447_vm2, %v9382_v54, %v2549_v55  ;;  %vm2555_vm4 = vcmp.eq.f32.partialorder %v2554_v37, 8.507059e+37 }
 0x650   : > { %v2563_v10 = vmul.f32 %v9429_v7, %v2562_v23  ;;  %v2329_v3 = vadd.f32 %v1942_v61, %v9033_v8  ;;  %v9464_v63 = vpack.c.bf16 %v9452_v25, %v9425_v36  ;;  %v2571_v11 = vand.u32 2147483648, %v9384_v6 }
 0x651   : > { %v2288_v27 = vmul.f32 %v9361_v31, %v2287_v14  ;;  %vm2290_vm5 = vweird.f32 %v9290_v45  ;;  %v2301_v50 = vmul.f32 %v9445_v47, %v9387_v51  ;;  %v2558_v17 = vsel %vm2555_vm4, %v2557_v22, %v2553_v53 }
 0x652   : > { %v6780_v54 = vpop.eup %6779  ;;  %v2564_v48 = vadd.f32 %v9429_v7, %v2563_v10  ;;  %vm2566_vm6 = vweird.f32 %v9429_v7  ;;  %v2569_v8 = vand.u32 2147483647, %v9384_v6  ;;  %v6369_v21 = vmul.f32 -1.442695, %v2329_v3  ;;  %3016 = vmatmul.bf16.gmra.mxu2 %v9464_v63  ;;  %vm9509_vm13 = vmor %vm2290_vm5, %vm2291_vm3 }
 0x653   : > { %v9475_v35 = vpop.eup %6781  ;;  %6785 = vtanh.f32 %v2662_v49  ;;  %v2647_v28 = vmul.f32 %v9350_v16, %v1986_v20  ;;  %v9478_v38 = vadd.f32 1.0, %v6780_v54  ;;  %v2693_v1 = vsub.f32 1.0, %v2558_v17  ;;  %v1990_v20 = vpop.f32.mrf.mxu0 }
 0x654   : > { %v6784_v52 = vpop.eup %6783  ;;  %vm2565_vm7 = vweird.f32 %v9384_v6  ;;  %v2576_v4 = vmul.f32 %v9475_v35, %v9434_v32  ;;  %v1988_v55 = vadd.f32 %v1987_v0, %v8821_v19  ;;  %6787 = vpow2.f32 %v6369_v21  ;;  %v12843_v0 = vld [vmem:[#allocation38_spill] sm:$0xff] }
 0x655   : > { %vm2567_vm8 = vmor %vm2565_vm7, %vm2566_vm6  ;;  %v2572_v58 = vor.u32 1.1754944e-38, %v2571_v11  ;;  %6789 = vrcp.f32 %v9478_v38  ;;  %v2289_v37 = vadd.f32 %v9361_v31, %v2288_v27  ;;  %v2302_v42 = vsub.f32 1.0, %v2301_v50  ;;  %v1943_v16 = vpop.f32.mrf.mxu3 }
 0x656   : > { %v2577_v44 = vsub.f32 1.0, %v2576_v4  ;;  %vm9488_vm9 = vcmp.eq.f32.partialorder %v2294_v62, 8.507059e+37  ;;  %v1944_v6 = vadd.f32 %v1943_v16, %v8452_v40  ;;  %v2568_v14 = vsel %vm2567_vm8, %v9429_v7, %v2564_v48 }
 0x657   : > { %vm2570_vm10 = vcmp.eq.f32.partialorder %v2569_v8, 8.507059e+37  ;;  %v2663_v18 = vadd.f32 %v2647_v28, %v8899_v59  ;;  %v2709_v23 = vmul.f32 %v6784_v52, %v2693_v1  ;;  %v2725_v61 = vmul.f32 %v2558_v17, %v12843_v0  ;;  %v12847_v17 = vld [vmem:[#allocation39_spill] sm:$0xff] }
 0x658   : > { %v2573_v46 = vsel %vm2570_vm10, %v2572_v58, %v2568_v14  ;;  %v2578_v22 = vmul.f32 %v9475_v35, %v2577_v44  ;;  %v2648_v49 = vmul.f32 %v2283_v33, %v1988_v55  ;;  %v2330_v62 = vadd.f32 %v1944_v6, %v9122_v43 }
 0x659   : > { %v2694_v53 = vsub.f32 1.0, %v2573_v46  ;;  %v6786_v10 = vpop.eup %6785  ;;  %vm2581_vm11 = vweird.f32 %v9475_v35  ;;  %v2584_v3 = vand.u32 2147483647, %v9434_v32  ;;  %v2586_v7 = vand.u32 2147483648, %v9434_v32 }
 0x65a   : > { %vm2305_vm12 = vweird.f32 %v9387_v51  ;;  %v9502_v59 = vadd.f32 %v2725_v61, %v2709_v23  ;;  %v6788_v11 = vpop.eup %6787  ;;  %v2579_v27 = vadd.f32 %v9475_v35, %v2578_v22  ;;  %v6370_v33 = vmul.f32 -1.442695, %v2330_v62 }
 0x65b   : > { %v2710_v50 = vmul.f32 %v6786_v10, %v2694_v53  ;;  %v2726_v54 = vmul.f32 %v2573_v46, %v12847_v17  ;;  %v6790_v48 = vpop.eup %6789  ;;  %6791 = vtanh.f32 %v2663_v18  ;;  %v2293_v8 = vsel %vm9509_vm13, %v9361_v31, %v2289_v37  ;;  %v1715_v31 = vpop.f32.mrf.mxu1  ;;  %v12852_v53 = vld [vmem:[#allocation126_spill] sm:$0xff] }
 0x65c   : > { %12844 = vst [vmem:[#allocation133_spill] sm:$0xff] %v9502_v59  ;;  %v9517_v21 = vadd.f32 1.0, %v6788_v11  ;;  %v2303_v28 = vmul.f32 %v9445_v47, %v2302_v42  ;;  %vm2580_vm14 = vweird.f32 %v9434_v32  ;;  %v2591_v45 = vmul.f32 %v6790_v48, %v9478_v38 }
 0x65d   : > { %6793 = vpow2.f32 %v6370_v33  ;;  %v9522_v1 = vadd.f32 %v2726_v54, %v2710_v50  ;;  %vm2582_vm15 = vmor %vm2580_vm14, %vm2581_vm11  ;;  %v2587_v52 = vor.u32 1.1754944e-38, %v2586_v7  ;;  %v2664_v4 = vadd.f32 %v2648_v49, %v8926_v9  ;;  %v12851_v49 = vld [vmem:[#allocation40_spill] sm:$0xff] }
 0x65e   : > { %v1991_v55 = vadd.f32 %v1990_v20, %v8821_v19  ;;  %6795 = vrcp.f32 %v9517_v21  ;;  %vm2585_vm0 = vcmp.eq.f32.partialorder %v2584_v3, 8.507059e+37  ;;  %v2592_v58 = vsub.f32 1.0, %v2591_v45 }
 0x65f   : > { %12848 = vst [vmem:[#allocation134_spill] sm:$0xff] %v9522_v1  ;;  %v9531_v32 = vpack.c.bf16 %v9522_v1, %v9502_v59  ;;  %v2583_v37 = vsel %vm2582_vm15, %v9475_v35, %v2579_v27  ;;  %v2298_v42 = vsel %vm9488_vm9, %v9423_v12, %v2293_v8  ;;  %v2304_v16 = vadd.f32 %v9445_v47, %v2303_v28  ;;  %v1992_v12 = vpop.f32.mrf.mxu0 }
 0x660   : > { %vm2306_vm1 = vweird.f32 %v9445_v47  ;;  %v2588_v9 = vsel %vm2585_vm0, %v2587_v52, %v2583_v37  ;;  %v2593_v44 = vmul.f32 %v6790_v48, %v2592_v58  ;;  %vm2596_vm2 = vweird.f32 %v6790_v48  ;;  %v12854_v37 = vld [vmem:[#allocation41_spill] sm:$0xff] }
 0x661   : > { %v2601_v6 = vand.u32 2147483648, %v9478_v38  ;;  %v2695_v14 = vsub.f32 1.0, %v2588_v9  ;;  %v6792_v18 = vpop.eup %6791  ;;  %6797 = vtanh.f32 %v2664_v4  ;;  %v2599_v46 = vand.u32 2147483647, %v9478_v38  ;;  %vm9547_vm4 = vmor %vm2305_vm12, %vm2306_vm1 }
 0x662   : > { %v2649_v23 = vmul.f32 %v2298_v42, %v1991_v55  ;;  %v2311_v35 = vand.u32 2147483648, %v9387_v51  ;;  %v2594_v15 = vadd.f32 %v6790_v48, %v2593_v44  ;;  %vm2595_vm3 = vweird.f32 %v9478_v38  ;;  %3021 = vmatmul.bf16.gmra.mxu2 %v9531_v32 }
 0x663   : > { %v6794_v0 = vpop.eup %6793  ;;  %v2711_v22 = vmul.f32 %v6792_v18, %v2695_v14  ;;  %v2727_v20 = vmul.f32 %v2588_v9, %v12851_v49  ;;  %v1716_v10 = vadd.f32 %v1715_v31, %v12852_v53  ;;  %vm2597_vm5 = vmor %vm2595_vm3, %vm2596_vm2  ;;  %v2308_v38 = vsel %vm9547_vm4, %v9445_v47, %v2304_v16  ;;  %v1717_v52 = vpop.f32.mrf.mxu1 }
 0x664   : > { %v6796_v62 = vpop.eup %6795  ;;  %v2309_v3 = vand.u32 2147483647, %v9387_v51  ;;  %v2394_v7 = vadd.f32 1.0, %v6794_v0  ;;  %v2602_v11 = vor.u32 1.1754944e-38, %v2601_v6  ;;  %v2598_v43 = vsel %vm2597_vm5, %v6790_v48, %v2594_v15 }
 0x665   : > { %v2606_v27 = vmul.f32 %v6796_v62, %v9517_v21  ;;  %v9560_v33 = vadd.f32 %v2727_v20, %v2711_v22  ;;  %v2665_v50 = vadd.f32 %v2649_v23, %v1716_v10  ;;  %v1993_v17 = vadd.f32 %v1992_v12, %v8821_v19  ;;  %v12856_v10 = vld [vmem:[#allocation42_spill] sm:$0xff] }
 0x666   : > { %6799 = vrcp.f32 %v2394_v7  ;;  %vm2600_vm6 = vcmp.eq.f32.partialorder %v2599_v46, 8.507059e+37  ;;  %v2312_v8 = vor.u32 1.1754944e-38, %v2311_v35  ;;  %v2616_v47 = vand.u32 2147483648, %v9517_v21 }
 0x667   : > { %12853 = vst [vmem:[#allocation31_spill] sm:$0xff] %v9560_v33  ;;  %v2607_v54 = vsub.f32 1.0, %v2606_v27  ;;  %v2603_v28 = vsel %vm2600_vm6, %v2602_v11, %v2598_v43  ;;  %v6798_v45 = vpop.eup %6797  ;;  %vm2310_vm7 = vcmp.eq.f32.partialorder %v2309_v3, 8.507059e+37  ;;  %vm2611_vm8 = vweird.f32 %v6796_v62 }
 0x668   : > { %v2696_v51 = vsub.f32 1.0, %v2603_v28  ;;  %v2614_v48 = vand.u32 2147483647, %v9517_v21  ;;  %v2313_v55 = vsel %vm2310_vm7, %v2312_v8, %v2308_v38  ;;  %6801 = vtanh.f32 %v2665_v50  ;;  %v12858_v8 = vld [vmem:[#allocation43_spill] sm:$0xff] }
 0x669   : > { %v2608_v4 = vmul.f32 %v6796_v62, %v2607_v54  ;;  %v2650_v31 = vmul.f32 %v2313_v55, %v1993_v17  ;;  %v2728_v42 = vmul.f32 %v2603_v28, %v12854_v37  ;;  %vm2610_vm9 = vweird.f32 %v9517_v21  ;;  %v12865_v55 = vld [vmem:[#allocation62_spill] sm:$0xff]  ;;  %v12868_v37 = vld [vmem:[#allocation64_spill] sm:$0xff] }
 0x66a   : > { %v2712_v58 = vmul.f32 %v6798_v45, %v2696_v51  ;;  %v1718_v44 = vadd.f32 %v1717_v52, %v12852_v53  ;;  %vm2612_vm10 = vmor %vm2610_vm9, %vm2611_vm8  ;;  %v2617_v6 = vor.u32 1.1754944e-38, %v2616_v47  ;;  %vm2615_vm11 = vcmp.eq.f32.partialorder %v2614_v48, 8.507059e+37  ;;  %v12861_v51 = vld [vmem:[#allocation44_spill] sm:$0xff]  ;;  %v12862_v52 = vld [vmem:[#allocation58_spill] sm:$0xff] }
 0x66b   : > { %v2609_v16 = vadd.f32 %v6796_v62, %v2608_v4  ;;  %v2629_v21 = vand.u32 2147483647, %v2394_v7  ;;  %v2631_v22 = vand.u32 2147483648, %v2394_v7  ;;  %vm2625_vm13 = vweird.f32 %v2394_v7  ;;  %v12863_v4 = vld [vmem:[#allocation59_spill] sm:$0xff]  ;;  %v12864_v48 = vld [vmem:[#allocation60_spill] sm:$0xff] }
 0x66c   : > { %v6800_v9 = vpop.eup %6799  ;;  %v9568_v14 = vadd.f32 %v2728_v42, %v2712_v58  ;;  %v2666_v23 = vadd.f32 %v2650_v31, %v1718_v44  ;;  %v12866_v31 = vld [vmem:[#allocation45_spill] sm:$0xff]  ;;  %v12867_v58 = vld [vmem:[#allocation63_spill] sm:$0xff]  ;;  %v12872_v44 = vld [vmem:[#allocation46_spill] sm:$0xff] }
 0x66d   : > { %v2621_v18 = vmul.f32 %v6800_v9, %v2394_v7  ;;  %v2613_v46 = vsel %vm2612_vm10, %v6796_v62, %v2609_v16  ;;  %vm2626_vm12 = vweird.f32 %v6800_v9  ;;  %v2632_v11 = vor.u32 1.1754944e-38, %v2631_v22  ;;  %v12860_v7 = vld [vmem:[#allocation57_spill] sm:$0xff]  ;;  %v12870_v16 = vld [vmem:[#allocation20_spill] sm:$0xff]  ;;  %v12882_v22 = vld [vmem:[#allocation50_spill] sm:$0xff] }
 0x66e   : > { %12855 = vst [vmem:[#allocation136_spill] sm:$0xff] %v9568_v14  ;;  %v2618_v35 = vsel %vm2615_vm11, %v2617_v6, %v2613_v46  ;;  %v9572_v15 = vpack.c.bf16 %v9568_v14, %v9560_v33  ;;  %v6802_v61 = vpop.eup %6801  ;;  %6803 = vtanh.f32 %v2666_v23  ;;  %vm2627_vm14 = vmor %vm2625_vm13, %vm2626_vm12  ;;  %vm2630_vm15 = vcmp.eq.f32.partialorder %v2629_v21, 8.507059e+37  ;;  %v12869_v42 = vld [vmem:[#allocation65_spill] sm:$0xff]  ;;  %v12873_v6 = vld [vmem:[#allocation22_spill] sm:$0xff] }
 0x66f   : > { %v2622_v0 = vsub.f32 1.0, %v2621_v18  ;;  %v2697_v12 = vsub.f32 1.0, %v2618_v35  ;;  %v2729_v38 = vmul.f32 %v2618_v35, %v12856_v10  ;;  %v12874_v18 = vld [vmem:[#allocation23_spill] sm:$0xff]  ;;  %v12875_v46 = vld [vmem:[#allocation24_spill] sm:$0xff]  ;;  %v12876_v23 = vld [vmem:[#allocation25_spill] sm:$0xff] }
 0x670   : > { %v12877_v35 = vld [vmem:[#allocation47_spill] sm:$0xff]  ;;  %v12881_v21 = vld [vmem:[#allocation49_spill] sm:$0xff]  ;;  %v12884_v10 = vld [vmem:[#allocation52_spill] sm:$0xff] }
 0x671   : > { %v2623_v49 = vmul.f32 %v6800_v9, %v2622_v0  ;;  %v2713_v20 = vmul.f32 %v6802_v61, %v2697_v12  ;;  %v12878_v0 = vld [vmem:[#allocation26_spill] sm:$0xff]  ;;  %v12879_v12 = vld [vmem:[#allocation27_spill] sm:$0xff]  ;;  %v12880_v61 = vld [vmem:[#allocation48_spill] sm:$0xff] }
 0x672   : > { %3026 = vmatmul.bf16.gmra.mxu2 %v9572_v15 }
 0x673   : > { %v2624_v3 = vadd.f32 %v6800_v9, %v2623_v49  ;;  %v9576_v62 = vadd.f32 %v2729_v38, %v2713_v20  ;;  %v12883_v49 = vld [vmem:[#allocation51_spill] sm:$0xff] }
 0x674   : > { %v6804_v17 = vpop.eup %6803 }
 0x675   : > { %12857 = vst [vmem:[#allocation135_spill] sm:$0xff] %v9576_v62  ;;  %v2628_v27 = vsel %vm2627_vm14, %v6800_v9, %v2624_v3  ;;  %v12871_v9 = vld [vmem:[#allocation21_spill] sm:$0xff] }
 0x676   : > { %v2633_v43 = vsel %vm2630_vm15, %v2632_v11, %v2628_v27  ;;  %v7128_v11 = vld [vmem:[%s7690_s1 + $0x10] sm:$0xff] }
 0x677   : > { %v2698_v50 = vsub.f32 1.0, %v2633_v43  ;;  %v2730_v28 = vmul.f32 %v2633_v43, %v12858_v8  ;;  %v12885_v43 = vld [vmem:[#allocation53_spill] sm:$0xff] }
 0x679   : > { %v2714_v54 = vmul.f32 %v6804_v17, %v2698_v50 }
 0x67b   : > { %v9579_v45 = vadd.f32 %v2730_v28, %v2714_v54  ;;  %v7129_v54 = vld [vmem:[%s7690_s1 + $0x20] sm:$0xff]  ;;  %v12886_v28 = vld [vmem:[#allocation54_spill] sm:$0xff] }
 0x67d   : > { %12859 = vst [vmem:[#allocation32_spill] sm:$0xff] %v9579_v45  ;;  %v9583_v47 = vpack.c.bf16 %v9579_v45, %v9576_v62  ;;  %v7151_v62 = vld [vmem:[%s7690_s1 + $0xb8] sm:$0xff] }
 0x67f   : > { %2755 = vmatpush.bf16.msrb.mxu1 %v9583_v47 }
 0x682   : > { %3031 = vmatmul.bf16.gmra.mxu2 %v9583_v47 }
 0x683   : > { %2756 = vmatpush.bf16.msrb.mxu1 %v9572_v15 }
 0x687   : > { %2757 = vmatpush.bf16.msrb.mxu1 %v9531_v32 }
 0x68b   : > { %2758 = vmatpush.bf16.msrb.mxu1 %v9464_v63 }
 0x68f   : > { %2759 = vmatpush.bf16.msrb.mxu1 %v9372_v24 }
 0x693   : > { %2760 = vmatpush.bf16.msrb.mxu1 %v9277_v5 }
 0x697   : > { %2761 = vmatpush.bf16.msrb.mxu1 %v9177_v41 }
 0x69b   : > { %2762 = vmatpush.bf16.msrb.mxu1 %v9085_v57 }
 0x69e   : > { %2763 = vmatmul.bf16.vlgmr.msrb.gmra.mxu1 %v12861_v51 }
 0x69f   : > { %3354 = vmatpush.bf16.msra.mxu1 %v12860_v7  ;;  %v7150_v7 = vld [vmem:[%s7690_s1 + $0xf0] sm:$0xff] }
 0x6a3   : > { %3355 = vmatpush.bf16.msra.mxu1 %v12862_v52  ;;  %v7149_v52 = vld [vmem:[%s7690_s1 + $0x168] sm:$0xff] }
 0x6a7   : > { %3356 = vmatpush.bf16.msra.mxu1 %v12863_v4 }
 0x6ab   : > { %3357 = vmatpush.bf16.msra.mxu1 %v12864_v48  ;;  %v7148_v48 = vld [vmem:[%s7690_s1 + $0x178] sm:$0xff] }
 0x6ae   : > { %2768 = vmatmul.bf16.gmra.mxu1 %v12866_v31  ;;  %v7147_v31 = vld [vmem:[%s7690_s1 + $0x170] sm:$0xff] }
 0x6af   : > { %3358 = vmatpush.bf16.msra.mxu1 %v12865_v55 }
 0x6b3   : > { %3359 = vmatpush.bf16.msra.mxu1 %v12867_v58  ;;  %v7146_v58 = vld [vmem:[%s7690_s1 + $0xe8] sm:$0xff] }
 0x6b7   : > { %3360 = vmatpush.bf16.msra.mxu1 %v12868_v37 }
 0x6bb   : > { %3361 = vmatpush.bf16.msra.mxu1 %v12869_v42 }
 0x6be   : > { %2773 = vmatmul.bf16.gmra.mxu1 %v12872_v44 }
 0x6bf   : > { %4494 = vmatpush.bf16.msrb.mxu1 %v12870_v16 }
 0x6c3   : > { %4495 = vmatpush.bf16.msrb.mxu1 %v12871_v9  ;;  %v7130_v9 = vld [vmem:[%s7690_s1 + $0x28] sm:$0xff] }
 0x6c7   : > { %4496 = vmatpush.bf16.msrb.mxu1 %v12873_v6 }
 0x6cb   : > { %4497 = vmatpush.bf16.msrb.mxu1 %v12874_v18 }
 0x6ce   : > { %2778 = vmatmul.bf16.gmra.mxu1 %v12877_v35 }
 0x6cf   : > { %4498 = vmatpush.bf16.msrb.mxu1 %v12875_v46  ;;  %v7131_v46 = vld [vmem:[%s7690_s1 + $0x30] sm:$0xff] }
 0x6d3   : > { %4499 = vmatpush.bf16.msrb.mxu1 %v12876_v23 }
 0x6d7   : > { %4500 = vmatpush.bf16.msrb.mxu1 %v12878_v0  ;;  %v12887_v0 = vld [vmem:[#allocation55_spill] sm:$0xff] }
 0x6db   : > { %4501 = vmatpush.bf16.msrb.mxu1 %v12879_v12 }
 0x6de   : > { %2783 = vmatmul.bf16.gmra.mxu1 %v12880_v61 }
 0x6ee   : > { %2788 = vmatmul.bf16.gmra.mxu1 %v12881_v21  ;;  %v7144_v21 = vld [vmem:[%s7690_s1 + $0xd8] sm:$0xff] }
 0x6fe   : > { %2793 = vmatmul.bf16.gmra.mxu1 %v12882_v22 }
 0x70e   : > { %2798 = vmatmul.bf16.gmra.mxu1 %v12883_v49 }
 0x71b   : > { %v9618_v20 = vpop.f32.mrf.mxu1 }
 0x71e   : > { %2803 = vmatmul.bf16.gmra.mxu1 %v12884_v10  ;;  %v7143_v10 = vld [vmem:[%s7690_s1 + $0xd0] sm:$0xff] }
 0x723   : > { %v9621_v38 = vpop.f32.mrf.mxu1 }
 0x72b   : > { %v2769_v3 = vpop.f32.mrf.mxu1 }
 0x72c   : > { %v2846_v27 = vmul.f32 %v7128_v11, %v2769_v3  ;;  %v7132_v3 = vld [vmem:[%s7690_s1 + $0x38] sm:$0xff] }
 0x72e   : > { %2808 = vmatmul.bf16.gmra.mxu1 %v12885_v43  ;;  %2880 = vadd.xlane.f32.xlu1 %v2846_v27 }
 0x733   : > { %v9625_v50 = vpop.f32.mrf.mxu1 }
 0x73b   : > { %v2774_v17 = vpop.f32.mrf.mxu1 }
 0x73c   : > { %v2848_v8 = vmul.f32 %v7129_v54, %v2774_v17  ;;  %v7133_v17 = vld [vmem:[%s7690_s1 + $0x40] sm:$0xff] }
 0x73e   : > { %2813 = vmatmul.bf16.gmra.mxu1 %v12886_v28  ;;  %2884 = vadd.xlane.f32.xlu0 %v2848_v8  ;;  %v12888_v8 = vld [vmem:[#allocation56_spill] sm:$0xff]  ;;  %v12891_v28 = vld [vmem:[#allocation67_spill] sm:$0xff] }
 0x743   : > { %v2776_v16 = vpop.f32.mrf.mxu1 }
 0x744   : > { %v2849_v6 = vmul.f32 %v7130_v9, %v2776_v16  ;;  %v7134_v9 = vld [vmem:[%s7690_s1 + $0x48] sm:$0xff] }
 0x746   : > { %2886 = vadd.xlane.f32.xlu1 %v2849_v6 }
 0x74b   : > { %v2779_v18 = vpop.f32.mrf.mxu1 }
 0x74c   : > { %v2850_v23 = vmul.f32 %v7131_v46, %v2779_v18  ;;  %v7135_v46 = vld [vmem:[%s7690_s1 + $0x50] sm:$0xff] }
 0x74e   : > { %2818 = vmatmul.bf16.gmra.mxu1 %v12887_v0  ;;  %2888 = vadd.xlane.f32.xlu2 %v2850_v23  ;;  %v12889_v0 = vld [vmem:[#allocation61_spill] sm:$0xff] }
 0x753   : > { %v2781_v12 = vpop.f32.mrf.mxu1 }
 0x754   : > { %v2851_v11 = vmul.f32 %v7132_v3, %v2781_v12  ;;  %v7136_v3 = vld [vmem:[%s7690_s1 + $0x58] sm:$0xff] }
 0x756   : > { %2890 = vadd.xlane.f32.xlu0 %v2851_v11 }
 0x75b   : > { %v2784_v27 = vpop.f32.mrf.mxu1 }
 0x75c   : > { %v2852_v54 = vmul.f32 %v7133_v17, %v2784_v27  ;;  %v7137_v17 = vld [vmem:[%s7690_s1 + $0x60] sm:$0xff] }
 0x75e   : > { %2823 = vmatmul.bf16.gmra.mxu1 %v12888_v8  ;;  %2892 = vadd.xlane.f32.xlu1 %v2852_v54  ;;  %v12890_v8 = vld [vmem:[#allocation66_spill] sm:$0xff] }
 0x763   : > { %v2786_v16 = vpop.f32.mrf.mxu1 }
 0x764   : > { %v2853_v6 = vmul.f32 %v7134_v9, %v2786_v16  ;;  %v7138_v9 = vld [vmem:[%s7690_s1 + $0x68] sm:$0xff] }
 0x766   : > { %2894 = vadd.xlane.f32.xlu2 %v2853_v6 }
 0x76b   : > { %v2789_v18 = vpop.f32.mrf.mxu1 }
 0x76c   : > { %v2854_v23 = vmul.f32 %v7135_v46, %v2789_v18  ;;  %v7139_v46 = vld [vmem:[%s7690_s1 + $0x70] sm:$0xff] }
 0x76e   : > { %2828 = vmatmul.bf16.gmra.mxu1 %v12889_v0  ;;  %2896 = vadd.xlane.f32.xlu0 %v2854_v23 }
 0x773   : > { %v2791_v12 = vpop.f32.mrf.mxu1 }
 0x774   : > { %v2855_v11 = vmul.f32 %v7136_v3, %v2791_v12  ;;  %v7140_v12 = vld [vmem:[%s7690_s1 + $0x78] sm:$0xff] }
 0x776   : > { %2898 = vadd.xlane.f32.xlu1 %v2855_v11 }
 0x77b   : > { %v2794_v27 = vpop.f32.mrf.mxu1 }
 0x77c   : > { %v2856_v54 = vmul.f32 %v7137_v17, %v2794_v27  ;;  %v12892_v27 = vld [vmem:[#allocation80_spill] sm:$0xff] }
 0x77e   : > { %2833 = vmatmul.bf16.gmra.mxu1 %v12890_v8  ;;  %2900 = vadd.xlane.f32.xlu1 %v2856_v54  ;;  %v12893_v54 = vld [vmem:[#allocation83_spill] sm:$0xff] }
 0x783   : > { %v2796_v16 = vpop.f32.mrf.mxu1 }
 0x784   : > { %v2857_v6 = vmul.f32 %v7138_v9, %v2796_v16  ;;  %v12894_v16 = vld [vmem:[#allocation87_spill] sm:$0xff] }
 0x786   : > { %2902 = vadd.xlane.f32.xlu2 %v2857_v6  ;;  %v12896_v6 = vld [vmem:[#allocation94_spill] sm:$0xff] }
 0x78b   : > { %v2799_v18 = vpop.f32.mrf.mxu1 }
 0x78c   : > { %v2858_v0 = vmul.f32 %v7139_v46, %v2799_v18  ;;  %v12897_v46 = vld [vmem:[#allocation97_spill] sm:$0xff] }
 0x78e   : > { %2838 = vmatmul.bf16.gmra.mxu1 %v12891_v28  ;;  %2904 = vadd.xlane.f32.xlu2 %v2858_v0  ;;  %v12895_v0 = vld [vmem:[#allocation90_spill] sm:$0xff] }
 0x793   : > { %v2801_v23 = vpop.f32.mrf.mxu1 }
 0x794   : > { %v2859_v3 = vmul.f32 %v7140_v12, %v2801_v23  ;;  %v12898_v23 = vld [vmem:[#allocation101_spill] sm:$0xff] }
 0x796   : > { %2906 = vadd.xlane.f32.xlu0 %v2859_v3  ;;  %v12899_v3 = vld [vmem:[#allocation104_spill] sm:$0xff] }
 0x79b   : > { %v9645_v11 = vpop.f32.mrf.mxu1 }
 0x79e   : > { %3362 = vmatmul.bf16.vlgmr.msra.gmra.mxu1 %v9085_v57 }
 0x79f   : > { %4713 = vmatpush.bf16.msra.mxu1 %v12892_v27 }
 0x7a1   : > { %v9674_v8 = vpop.xlane.xlu1 %2880 }
 0x7a3   : > { %v9649_v17 = vpop.f32.mrf.mxu1  ;;  %4714 = vmatpush.bf16.msra.mxu1 %v12893_v54 }
 0x7a7   : > { %4715 = vmatpush.bf16.msra.mxu1 %v12894_v16 }
 0x7ab   : > { %v9653_v9 = vpop.f32.mrf.mxu1  ;;  %4716 = vmatpush.bf16.msra.mxu1 %v12895_v0 }
 0x7ae   : > { %3367 = vmatmul.bf16.gmra.mxu1 %v9177_v41 }
 0x7af   : > { %4717 = vmatpush.bf16.msra.mxu1 %v12896_v6  ;;  %v7141_v6 = vld [vmem:[%s7690_s1 + $0xc0] sm:$0xff] }
 0x7b3   : > { %v9658_v18 = vpop.f32.mrf.mxu1  ;;  %4718 = vmatpush.bf16.msra.mxu1 %v12897_v46 }
 0x7b7   : > { %4719 = vmatpush.bf16.msra.mxu1 %v12898_v23  ;;  %v7142_v23 = vld [vmem:[%s7690_s1 + $0xc8] sm:$0xff] }
 0x7bb   : > { %v9662_v12 = vpop.f32.mrf.mxu1  ;;  %4720 = vmatpush.bf16.msra.mxu1 %v12899_v3 }
 0x7be   : > { %3372 = vmatmul.bf16.gmra.mxu1 %v9277_v5 }
 0x7c1   : > { %v9677_v22 = vpop.xlane.xlu2 %2888 }
 0x7c3   : > { %v9666_v27 = vpop.f32.mrf.mxu1 }
 0x7cb   : > { %v9668_v54 = vpop.f32.mrf.mxu1 }
 0x7ce   : > { %3377 = vmatmul.bf16.gmra.mxu1 %v9372_v24 }
 0x7d3   : > { %v2821_v16 = vpop.f32.mrf.mxu1 }
 0x7db   : > { %v2824_v0 = vpop.f32.mrf.mxu1 }
 0x7dc   : > { %v2868_v28 = vmul.f32 %v7141_v6, %v2824_v0  ;;  %v9680_v0 = vpop.xlane.xlu0 %2884  ;;  %v9682_v6 = vpop.xlane.xlu1 %2886 }
 0x7de   : > { %3382 = vmatmul.bf16.gmra.mxu1 %v9464_v63  ;;  %2924 = vadd.xlane.f32.xlu2 %v2868_v28 }
 0x7e3   : > { %v2826_v46 = vpop.f32.mrf.mxu1 }
 0x7e4   : > { %v2869_v3 = vmul.f32 %v7142_v23, %v2826_v46  ;;  %v2895_v23 = vpop.xlane.xlu2 %2894  ;;  %v2893_v61 = vpop.xlane.xlu1 %2892 }
 0x7e6   : > { %2926 = vadd.xlane.f32.xlu0 %v2869_v3  ;;  %v2891_v3 = vpop.xlane.xlu0 %2890 }
 0x7eb   : > { %v2829_v43 = vpop.f32.mrf.mxu1 }
 0x7ec   : > { %v2870_v49 = vmul.f32 %v7143_v10, %v2829_v43  ;;  %v7145_v10 = vld [vmem:[%s7690_s1 + $0xe0] sm:$0xff]  ;;  %v2899_v42 = vpop.xlane.xlu1 %2898 }
 0x7ee   : > { %3387 = vmatmul.bf16.gmra.mxu1 %v9531_v32  ;;  %2928 = vadd.xlane.f32.xlu1 %v2870_v49  ;;  %v2897_v49 = vpop.xlane.xlu0 %2896 }
 0x7f3   : > { %v2831_v28 = vpop.f32.mrf.mxu1 }
 0x7f4   : > { %v2871_v46 = vmul.f32 %v7144_v21, %v2831_v28 }
 0x7f6   : > { %2930 = vadd.xlane.f32.xlu2 %v2871_v46 }
 0x7f9   : > { %v2903_v44 = vpop.xlane.xlu2 %2902 }
 0x7fb   : > { %v2834_v35 = vpop.f32.mrf.mxu1 }
 0x7fc   : > { %v2872_v43 = vmul.f32 %v7145_v10, %v2834_v35  ;;  %v2901_v10 = vpop.xlane.xlu1 %2900 }
 0x7fe   : > { %3392 = vmatmul.bf16.gmra.mxu1 %v9572_v15  ;;  %2932 = vadd.xlane.f32.xlu0 %v2872_v43  ;;  %v2953_v43 = vmul.f32 %v7149_v52, %v2903_v44 }
 0x801   : > { %v2905_v28 = vpop.xlane.xlu2 %2904 }
 0x802   : > { %v2954_v55 = vmul.f32 %v7147_v31, %v2905_v28 }
 0x803   : > { %v2836_v37 = vpop.f32.mrf.mxu1 }
 0x804   : > { %v2873_v21 = vmul.f32 %v7146_v58, %v2836_v37  ;;  %v2867_v58 = vmul.f32 %v7151_v62, %v2821_v16  ;;  %v7152_v37 = vld [vmem:[%s7690_s1 + $0x160] sm:$0xff]  ;;  %v7155_v62 = vld [vmem:[%s7690_s1 + $0x148] sm:$0xff] }
 0x806   : > { %2934 = vadd.xlane.f32.xlu1 %v2873_v21  ;;  %v2952_v21 = vmul.f32 %v7152_v37, %v2901_v10  ;;  %v7161_v37 = vld [vmem:[%s7690_s1 + $0x130] sm:$0xff] }
 0x808   : > { %v2978_v52 = vpack.c.bf16 %v2953_v43, %v2952_v21  ;;  %v2946_v21 = vmul.f32 %v7161_v37, %v9677_v22 }
 0x809   : > { %v2907_v46 = vpop.xlane.xlu0 %2906 }
 0x80a   : > { %v2955_v35 = vmul.f32 %v7148_v48, %v2907_v46  ;;  %v7153_v48 = vld [vmem:[%s7690_s1 + $0x158] sm:$0xff]  ;;  %v7157_v46 = vld [vmem:[%s7690_s1 + $0xa0] sm:$0xff] }
 0x80b   : > { %v2839_v4 = vpop.f32.mrf.mxu1  ;;  %v2951_v31 = vmul.f32 %v7153_v48, %v2899_v42  ;;  %v7159_v42 = vld [vmem:[%s7690_s1 + $0x140] sm:$0xff] }
 0x80c   : > { %v2979_v51 = vpack.c.bf16 %v2955_v35, %v2954_v55  ;;  %v2874_v45 = vmul.f32 %v7150_v7, %v2839_v4  ;;  %v7154_v55 = vld [vmem:[%s7690_s1 + $0x150] sm:$0xff]  ;;  %v2949_v4 = vmul.f32 %v7155_v62, %v2895_v23  ;;  %v2864_v35 = vmul.f32 %v7157_v46, %v9662_v12  ;;  %v7160_v23 = vld [vmem:[%s7690_s1 + $0x138] sm:$0xff]  ;;  %v7162_v12 = vld [vmem:[%s7690_s1 + $0x128] sm:$0xff] }
 0x80d   : > { %v2950_v44 = vmul.f32 %v7154_v55, %v2897_v49  ;;  %v2948_v43 = vmul.f32 %v7159_v42, %v2893_v61  ;;  %v2947_v49 = vmul.f32 %v7160_v23, %v2891_v3  ;;  %v7163_v61 = vld [vmem:[%s7690_s1 + $0xb0] sm:$0xff]  ;;  %v7167_v62 = vld [vmem:[%s7690_s1 + $0x8] sm:$0xff] }
 0x80e   : > { %3037 = vmatpush.bf16.msrb.mxu3 %v2979_v51  ;;  %3397 = vmatmul.bf16.gmra.mxu1 %v9583_v47  ;;  %v7156_v51 = vld [vmem:[%s7690_s1 + $0xf8] sm:$0xff] }
 0x80f   : > { %2922 = vadd.xlane.f32.xlu1 %v2867_v58  ;;  %2936 = vadd.xlane.f32.xlu2 %v2874_v45  ;;  %v2977_v16 = vpack.c.bf16 %v2951_v31, %v2950_v44  ;;  %v7158_v45 = vld [vmem:[%s7690_s1 + $0x18] sm:$0xff]  ;;  %v2976_v58 = vpack.c.bf16 %v2949_v4, %v2948_v43  ;;  %v2975_v48 = vpack.c.bf16 %v2947_v49, %v2946_v21  ;;  %v7168_v4 = vld [vmem:[%s7690_s1 + $0xa8] sm:$0xff]  ;;  %v7174_v21 = vld [vmem:[%s7690_s1 + $0x110] sm:$0xff] }
 0x810   : > { %v2847_v10 = vmul.f32 %v7158_v45, %v9625_v50  ;;  %v2945_v50 = vmul.f32 %v7162_v12, %v9682_v6  ;;  %v2866_v31 = vmul.f32 %v7163_v61, %v9668_v54  ;;  %v7165_v44 = vld [vmem:[%s7690_s1 + $0x98] sm:$0xff]  ;;  %v2845_v54 = vmul.f32 %v7167_v62, %v9621_v38  ;;  %v7176_v61 = vld [vmem:[%s7690_s1 + $0x1e8] sm:$0xff] }
 0x811   : > { %v2863_v3 = vmul.f32 %v7165_v44, %v9658_v18  ;;  %v7169_v18 = vld [vmem:[%s7690_s1 + $0x90] sm:$0xff]  ;;  %v7177_v44 = vld [vmem:[%s7690_s1 + $0x1e0] sm:$0xff] }
 0x812   : > { %3038 = vmatpush.bf16.msrb.mxu3 %v2978_v52  ;;  %v7164_v52 = vld [vmem:[%s7690_s1] sm:$0xff] }
 0x813   : > { %v2841_v7 = vpop.f32.mrf.mxu1  ;;  %v2844_v55 = vmul.f32 %v7164_v52, %v9618_v20  ;;  %v2865_v20 = vmul.f32 %v7168_v4, %v9666_v27 }
 0x814   : > { %v2875_v28 = vmul.f32 %v7156_v51, %v2841_v7  ;;  %v7166_v7 = vld [vmem:[%s7690_s1 + $0x120] sm:$0xff] }
 0x815   : > { %v2944_v22 = vmul.f32 %v7166_v7, %v9680_v0  ;;  %v7170_v0 = vld [vmem:[%s7690_s1 + $0x80] sm:$0xff]  ;;  %v7178_v7 = vld [vmem:[%s7690_s1 + $0x1d8] sm:$0xff] }
 0x816   : > { %3039 = vmatpush.bf16.msrb.mxu3 %v2977_v16  ;;  %2938 = vadd.xlane.f32.xlu0 %v2875_v28  ;;  %v2862_v16 = vmul.f32 %v7169_v18, %v9653_v9  ;;  %v2860_v51 = vmul.f32 %v7170_v0, %v9645_v11  ;;  %v7171_v28 = vld [vmem:[%s7690_s1 + $0x88] sm:$0xff]  ;;  %v7172_v11 = vld [vmem:[%s7690_s1 + $0x1f0] sm:$0xff] }
 0x817   : > { %2916 = vadd.xlane.f32.xlu1 %v2864_v35  ;;  %2882 = vadd.xlane.f32.xlu2 %v2847_v10  ;;  %v2974_v6 = vpack.c.bf16 %v2945_v50, %v2944_v22  ;;  %v2861_v46 = vmul.f32 %v7171_v28, %v9649_v17  ;;  %v2942_v17 = vmul.f32 %v7174_v21, %v9674_v8  ;;  %v7175_v50 = vld [vmem:[%s7690_s1 + $0x118] sm:$0xff]  ;;  %v7179_v8 = vld [vmem:[%s7690_s1 + $0x1d0] sm:$0xff] }
 0x81a   : > { %3040 = vmatpush.bf16.msrb.mxu3 %v2976_v58  ;;  %v7173_v58 = vld [vmem:[%s7690_s1 + $0x1f8] sm:$0xff] }
 0x81e   : > { %3041 = vmatpush.bf16.msrb.mxu3 %v2975_v48  ;;  %2920 = vadd.xlane.f32.xlu0 %v2866_v31 }
 0x81f   : > { %2914 = vadd.xlane.f32.xlu1 %v2863_v3  ;;  %2876 = vadd.xlane.f32.xlu2 %v2844_v55 }
 0x822   : > { %3042 = vmatpush.bf16.msrb.mxu3 %v2974_v6 }
 0x826   : > { %2878 = vadd.xlane.f32.xlu0 %v2845_v54 }
 0x827   : > { %2918 = vadd.xlane.f32.xlu2 %v2865_v20  ;;  %v7180_v20 = vld [vmem:[%s7690_s1 + $0x1c8] sm:$0xff] }
 0x82e   : > { %2912 = vadd.xlane.f32.xlu0 %v2862_v16 }
 0x82f   : > { %2908 = vadd.xlane.f32.xlu2 %v2860_v51  ;;  %v7181_v51 = vld [vmem:[%s7690_s1 + $0x1c0] sm:$0xff] }
 0x836   : > { %2910 = vadd.xlane.f32.xlu0 %v2861_v46 }
 0x851   : > { %v2925_v38 = vpop.xlane.xlu2 %2924 }
 0x852   : > { %v2964_v28 = vmul.f32 %v7181_v51, %v2925_v38 }
 0x859   : > { %v2927_v27 = vpop.xlane.xlu0 %2926 }
 0x85a   : > { %v2965_v18 = vmul.f32 %v7180_v20, %v2927_v27 }
 0x85c   : > { %v2984_v46 = vpack.c.bf16 %v2965_v18, %v2964_v28  ;;  %v7191_v18 = vld [vmem:[%s7690_s1 + $0x188] sm:$0xff] }
 0x85d   : > { %v12905_v28 = vld [vmem:[#allocation82_spill] sm:$0xff] }
 0x861   : > { %v2929_v35 = vpop.xlane.xlu1 %2928 }
 0x862   : > { %v2966_v54 = vmul.f32 %v7179_v8, %v2929_v35  ;;  %v7184_v35 = vld [vmem:[%s7690_s1 + $0x100] sm:$0xff]  ;;  %v12903_v8 = vld [vmem:[#allocation88_spill] sm:$0xff] }
 0x869   : > { %v2931_v45 = vpop.xlane.xlu2 %2930 }
 0x86a   : > { %v2967_v22 = vmul.f32 %v7178_v7, %v2931_v45  ;;  %v7182_v45 = vld [vmem:[%s7690_s1 + $0x1b0] sm:$0xff] }
 0x86c   : > { %v2985_v16 = vpack.c.bf16 %v2967_v22, %v2966_v54  ;;  %v12902_v22 = vld [vmem:[#allocation84_spill] sm:$0xff] }
 0x871   : > { %v2933_v10 = vpop.xlane.xlu0 %2932 }
 0x872   : > { %v2968_v3 = vmul.f32 %v7177_v44, %v2933_v10 }
 0x879   : > { %v2935_v9 = vpop.xlane.xlu1 %2934 }
 0x87a   : > { %v2969_v31 = vmul.f32 %v7176_v61, %v2935_v9  ;;  %v12900_v61 = vld [vmem:[#allocation81_spill] sm:$0xff] }
 0x87c   : > { %v2986_v6 = vpack.c.bf16 %v2969_v31, %v2968_v3  ;;  %v12901_v31 = vld [vmem:[#allocation68_spill] sm:$0xff]  ;;  %v7189_v3 = vld [vmem:[%s7690_s1 + $0x190] sm:$0xff] }
 0x882   : > { %v2937_v42 = vpop.xlane.xlu2 %2936  ;;  %v2923_v12 = vpop.xlane.xlu1 %2922 }
 0x883   : > { %v2970_v23 = vmul.f32 %v7172_v11, %v2937_v42  ;;  %v7183_v42 = vld [vmem:[%s7690_s1 + $0x1b8] sm:$0xff] }
 0x889   : > { %v2939_v43 = vpop.xlane.xlu0 %2938 }
 0x88a   : > { %v2883_v49 = vpop.xlane.xlu2 %2882  ;;  %v2971_v37 = vmul.f32 %v7173_v58, %v2939_v43  ;;  %v2917_v0 = vpop.xlane.xlu1 %2916  ;;  %v2963_v43 = vmul.f32 %v7183_v42, %v2923_v12  ;;  %v12910_v42 = vld [vmem:[#allocation98_spill] sm:$0xff] }
 0x88b   : > { %v2943_v48 = vmul.f32 %v7175_v50, %v2883_v49  ;;  %v7185_v49 = vld [vmem:[%s7690_s1 + $0x108] sm:$0xff] }
 0x88c   : > { %v2987_v52 = vpack.c.bf16 %v2971_v37, %v2970_v23  ;;  %v7186_v37 = vld [vmem:[%s7690_s1 + $0x1a8] sm:$0xff] }
 0x88d   : > { %v2973_v55 = vpack.c.bf16 %v2943_v48, %v2942_v17  ;;  %v7187_v17 = vld [vmem:[%s7690_s1 + $0x1a0] sm:$0xff] }
 0x88e   : > { %3086 = vmatpush.bf16.msra.mxu0 %v2987_v52  ;;  %v2960_v50 = vmul.f32 %v7187_v17, %v2917_v0  ;;  %v12904_v0 = vld [vmem:[#allocation91_spill] sm:$0xff]  ;;  %v12921_v17 = vld [vmem:[#allocation114_spill] sm:$0xff] }
 0x88f   : > { %3043 = vmatpush.bf16.msrb.mxu3 %v2973_v55  ;;  %v7188_v55 = vld [vmem:[%s7690_s1 + $0x198] sm:$0xff] }
 0x891   : > { %v2921_v62 = vpop.xlane.xlu0 %2920 }
 0x892   : > { %v2877_v4 = vpop.xlane.xlu2 %2876  ;;  %3087 = vmatpush.bf16.msra.mxu0 %v2986_v6  ;;  %v2962_v10 = vmul.f32 %v7182_v45, %v2921_v62  ;;  %v2915_v48 = vpop.xlane.xlu1 %2914  ;;  %v12907_v45 = vld [vmem:[#allocation70_spill] sm:$0xff] }
 0x893   : > { %v2940_v11 = vmul.f32 %v7184_v35, %v2877_v4  ;;  %v2959_v44 = vmul.f32 %v7188_v55, %v2915_v48  ;;  %v7190_v4 = vld [vmem:[%s7690_s1 + $0x180] sm:$0xff]  ;;  %v12912_v35 = vld [vmem:[#allocation102_spill] sm:$0xff]  ;;  %v12923_v48 = vld [vmem:[#allocation116_spill] sm:$0xff] }
 0x894   : > { %v2983_v27 = vpack.c.bf16 %v2963_v43, %v2962_v10  ;;  %v12908_v10 = vld [vmem:[#allocation69_spill] sm:$0xff]  ;;  %v12926_v55 = vld [vmem:[#allocation120_spill] sm:$0xff] }
 0x895   : > { %v12911_v43 = vld [vmem:[#allocation89_spill] sm:$0xff] }
 0x896   : > { %3088 = vmatpush.bf16.msra.mxu0 %v2985_v16 }
 0x899   : > { %v2879_v9 = vpop.xlane.xlu0 %2878 }
 0x89a   : > { %v2919_v23 = vpop.xlane.xlu2 %2918  ;;  %v2941_v58 = vmul.f32 %v7185_v49, %v2879_v9  ;;  %3089 = vmatpush.bf16.msra.mxu0 %v2984_v46  ;;  %v12906_v46 = vld [vmem:[#allocation95_spill] sm:$0xff]  ;;  %v12909_v9 = vld [vmem:[#allocation85_spill] sm:$0xff]  ;;  %v12915_v49 = vld [vmem:[#allocation110_spill] sm:$0xff] }
 0x89b   : > { %v2961_v21 = vmul.f32 %v7186_v37, %v2919_v23  ;;  %v12914_v23 = vld [vmem:[#allocation105_spill] sm:$0xff]  ;;  %v12918_v37 = vld [vmem:[#allocation72_spill] sm:$0xff] }
 0x89c   : > { %v2972_v38 = vpack.c.bf16 %v2941_v58, %v2940_v11  ;;  %v12913_v11 = vld [vmem:[#allocation92_spill] sm:$0xff] }
 0x89d   : > { %v2982_v12 = vpack.c.bf16 %v2961_v21, %v2960_v50  ;;  %v12916_v58 = vld [vmem:[#allocation96_spill] sm:$0xff]  ;;  %v12919_v21 = vld [vmem:[#allocation71_spill] sm:$0xff] }
 0x89e   : > { %3044 = vmatpush.bf16.msrb.mxu3 %v2972_v38  ;;  %3090 = vmatpush.bf16.msra.mxu0 %v2983_v27  ;;  %v12917_v27 = vld [vmem:[#allocation112_spill] sm:$0xff]  ;;  %v12920_v38 = vld [vmem:[#allocation99_spill] sm:$0xff] }
 0x89f   : > { %v12922_v50 = vld [vmem:[#allocation103_spill] sm:$0xff] }
 0x8a1   : > { %3045 = vmatmul.bf16.vlgmr.msrb.gmra.mxu3 %v12901_v31  ;;  %v2913_v52 = vpop.xlane.xlu0 %2912 }
 0x8a2   : > { %3256 = vmatpush.bf16.msra.mxu3 %v12900_v61  ;;  %v2958_v7 = vmul.f32 %v7189_v3, %v2913_v52  ;;  %3091 = vmatpush.bf16.msra.mxu0 %v2982_v12  ;;  %v2909_v62 = vpop.xlane.xlu2 %2908  ;;  %v12924_v12 = vld [vmem:[#allocation106_spill] sm:$0xff]  ;;  %v12928_v3 = vld [vmem:[#allocation73_spill] sm:$0xff] }
 0x8a3   : > { %v2956_v20 = vmul.f32 %v7190_v4, %v2909_v62  ;;  %v12925_v52 = vld [vmem:[#allocation118_spill] sm:$0xff]  ;;  %v12931_v62 = vld [vmem:[#allocation76_spill] sm:$0xff] }
 0x8a4   : > { %v2981_v6 = vpack.c.bf16 %v2959_v44, %v2958_v7  ;;  %v12927_v44 = vld [vmem:[#allocation74_spill] sm:$0xff] }
 0x8a5   : > { %v12929_v7 = vld [vmem:[#allocation122_spill] sm:$0xff] }
 0x8a6   : > { %3257 = vmatpush.bf16.msra.mxu3 %v12902_v22  ;;  %3092 = vmatpush.bf16.msra.mxu0 %v2981_v6  ;;  %v12930_v6 = vld [vmem:[#allocation124_spill] sm:$0xff]  ;;  %v12933_v4 = vld [vmem:[#allocation78_spill] sm:$0xff] }
 0x8a9   : > { %v2911_v54 = vpop.xlane.xlu0 %2910 }
 0x8aa   : > { %3258 = vmatpush.bf16.msra.mxu3 %v12903_v8  ;;  %v2957_v16 = vmul.f32 %v7191_v18, %v2911_v54  ;;  %v12932_v54 = vld [vmem:[#allocation75_spill] sm:$0xff]  ;;  %v12935_v18 = vld [vmem:[#allocation86_spill] sm:$0xff] }
 0x8ac   : > { %v2980_v51 = vpack.c.bf16 %v2957_v16, %v2956_v20  ;;  %v12934_v20 = vld [vmem:[#allocation77_spill] sm:$0xff]  ;;  %v12936_v16 = vld [vmem:[#allocation79_spill] sm:$0xff] }
 0x8ae   : > { %3259 = vmatpush.bf16.msra.mxu3 %v12904_v0  ;;  %3093 = vmatpush.bf16.msra.mxu0 %v2980_v51  ;;  %v2997_v51 = vpop.f32.mrf.mxu2 }
 0x8b1   : > { %3050 = vmatmul.bf16.gmra.mxu3 %v12907_v45  ;;  %3094 = vmatmul.bf16.vlgmr.msra.gmra.mxu0 %v12908_v10 }
 0x8b2   : > { %3305 = vmatpush.bf16.msrb.mxu0 %v12905_v28  ;;  %3260 = vmatpush.bf16.msra.mxu3 %v12906_v46 }
 0x8b6   : > { %3306 = vmatpush.bf16.msrb.mxu0 %v12909_v9  ;;  %3261 = vmatpush.bf16.msra.mxu3 %v12910_v42  ;;  %v12941_v9 = vld [vmem:[#allocation125_spill] sm:$0xff] }
 0x8ba   : > { %3307 = vmatpush.bf16.msrb.mxu0 %v12911_v43  ;;  %3262 = vmatpush.bf16.msra.mxu3 %v12912_v35 }
 0x8be   : > { %3308 = vmatpush.bf16.msrb.mxu0 %v12913_v11  ;;  %3263 = vmatpush.bf16.msra.mxu3 %v12914_v23 }
 0x8c1   : > { %3055 = vmatmul.bf16.gmra.mxu3 %v12918_v37  ;;  %3099 = vmatmul.bf16.gmra.mxu0 %v12919_v21 }
 0x8c2   : > { %3452 = vmatpush.bf16.msrb.mxu3 %v12915_v49  ;;  %3309 = vmatpush.bf16.msrb.mxu0 %v12916_v58 }
 0x8c6   : > { %3453 = vmatpush.bf16.msrb.mxu3 %v12917_v27  ;;  %3310 = vmatpush.bf16.msrb.mxu0 %v12920_v38 }
 0x8ca   : > { %3454 = vmatpush.bf16.msrb.mxu3 %v12921_v17  ;;  %3311 = vmatpush.bf16.msrb.mxu0 %v12922_v50 }
 0x8ce   : > { %3455 = vmatpush.bf16.msrb.mxu3 %v12923_v48  ;;  %3312 = vmatpush.bf16.msrb.mxu0 %v12924_v12 }
 0x8d1   : > { %3060 = vmatmul.bf16.gmra.mxu3 %v12927_v44  ;;  %3104 = vmatmul.bf16.gmra.mxu0 %v12928_v3  ;;  %v12937_v44 = vld [vmem:[#allocation100_spill] sm:$0xff] }
 0x8d2   : > { %3456 = vmatpush.bf16.msrb.mxu3 %v12925_v52  ;;  %v12939_v52 = vld [vmem:[#allocation107_spill] sm:$0xff] }
 0x8d6   : > { %3457 = vmatpush.bf16.msrb.mxu3 %v12926_v55  ;;  %v12938_v55 = vld [vmem:[#allocation93_spill] sm:$0xff] }
 0x8da   : > { %3458 = vmatpush.bf16.msrb.mxu3 %v12929_v7  ;;  %v2999_v7 = vpop.f32.mrf.mxu2 }
 0x8de   : > { %3459 = vmatpush.bf16.msrb.mxu3 %v12930_v6 }
 0x8e1   : > { %3065 = vmatmul.bf16.gmra.mxu3 %v12931_v62  ;;  %3109 = vmatmul.bf16.gmra.mxu0 %v12932_v54 }
 0x8e2   : > { %v3002_v6 = vpop.f32.mrf.mxu2 }
 0x8ea   : > { %v3004_v48 = vpop.f32.mrf.mxu2 }
 0x8f1   : > { %3070 = vmatmul.bf16.gmra.mxu3 %v12933_v4  ;;  %3114 = vmatmul.bf16.gmra.mxu0 %v12934_v20 }
 0x901   : > { %3075 = vmatmul.bf16.gmra.mxu3 %v12935_v18  ;;  %3119 = vmatmul.bf16.gmra.mxu0 %v12936_v16  ;;  %v12940_v18 = vld [vmem:[#allocation108_spill] sm:$0xff]  ;;  %v3007_v16 = vpop.f32.mrf.mxu2 }
 0x911   : > { %3080 = vmatmul.bf16.gmra.mxu3 %v12937_v44  ;;  %3124 = vmatmul.bf16.gmra.mxu0 %v12938_v55 }
 0x921   : > { %3129 = vmatmul.bf16.gmra.mxu0 %v12939_v52 }
 0x924   : > { %v3046_v62 = vpop.f32.mrf.mxu3 }
 0x925   : > { %v3047_v4 = vadd.f32 %v3046_v62, %v2997_v51 }
 0x92c   : > { %v3048_v54 = vpop.f32.mrf.mxu3 }
 0x92d   : > { %v3049_v12 = vadd.f32 %v3048_v54, %v2999_v7 }
 0x92e   : > { %v3095_v3 = vpop.f32.mrf.mxu0 }
 0x92f   : > { %v3096_v17 = vadd.f32 %v3095_v3, %v3047_v4  ;;  %v3009_v3 = vpop.f32.mrf.mxu2 }
 0x931   : > { %v3135_v37 = vadd.f32 %v3096_v17, %v12940_v18 }
 0x933   : > { %v3167_v44 = vmul.f32 0.01, %v3135_v37  ;;  %vm3151_vm0 = vcmp.gt.f32.partialorder %v3135_v37, 0.0 }
 0x934   : > { %v3051_v20 = vpop.f32.mrf.mxu3 }
 0x935   : > { %v3183_v23 = vsel %vm3151_vm0, %v3135_v37, %v3167_v44  ;;  %v3052_v62 = vadd.f32 %v3051_v20, %v3002_v6 }
 0x936   : > { %v3097_v27 = vpop.f32.mrf.mxu0 }
 0x937   : > { %v3098_v50 = vadd.f32 %v3097_v27, %v3049_v12  ;;  %v3012_v58 = vpop.f32.mrf.mxu2 }
 0x939   : > { %v3136_v55 = vadd.f32 %v3098_v50, %v12940_v18 }
 0x93b   : > { %vm3152_vm1 = vcmp.gt.f32.partialorder %v3136_v55, 0.0  ;;  %v3168_v52 = vmul.f32 0.01, %v3136_v55 }
 0x93c   : > { %v3053_v49 = vpop.f32.mrf.mxu3 }
 0x93d   : > { %v3184_v38 = vsel %vm3152_vm1, %v3136_v55, %v3168_v52  ;;  %v3054_v54 = vadd.f32 %v3053_v49, %v3004_v48 }
 0x93e   : > { %v3199_v21 = vpack.c.bf16 %v3184_v38, %v3183_v23  ;;  %v3100_v35 = vpop.f32.mrf.mxu0 }
 0x93f   : > { %v3101_v7 = vadd.f32 %v3100_v35, %v3052_v62 }
 0x940   : > { %3215 = vmatmul.bf16.vlgmr.msrb.gmra.mxu2 %v3199_v21  ;;  %3264 = vmatmul.bf16.vlgmr.msra.gmra.mxu3 %v3199_v21 }
 0x941   : > { %3313 = vmatmul.bf16.vlgmr.msrb.gmra.mxu0 %v3199_v21  ;;  %v3137_v27 = vadd.f32 %v3101_v7, %v12940_v18  ;;  %v3014_v21 = vpop.f32.mrf.mxu2 }
 0x943   : > { %v3169_v4 = vmul.f32 0.01, %v3137_v27  ;;  %vm3153_vm2 = vcmp.gt.f32.partialorder %v3137_v27, 0.0 }
 0x944   : > { %v3056_v17 = vpop.f32.mrf.mxu3 }
 0x945   : > { %v3185_v38 = vsel %vm3153_vm2, %v3137_v27, %v3169_v4  ;;  %v3057_v35 = vadd.f32 %v3056_v17, %v3007_v16 }
 0x946   : > { %v3102_v12 = vpop.f32.mrf.mxu0 }
 0x947   : > { %v3103_v50 = vadd.f32 %v3102_v12, %v3054_v54 }
 0x949   : > { %v3138_v51 = vadd.f32 %v3103_v50, %v12940_v18  ;;  %v3017_v17 = vpop.f32.mrf.mxu2 }
 0x94b   : > { %v3170_v37 = vmul.f32 0.01, %v3138_v51  ;;  %vm3154_vm3 = vcmp.gt.f32.partialorder %v3138_v51, 0.0 }
 0x94c   : > { %v3058_v23 = vpop.f32.mrf.mxu3 }
 0x94d   : > { %v3186_v52 = vsel %vm3154_vm3, %v3138_v51, %v3170_v37  ;;  %v3059_v6 = vadd.f32 %v3058_v23, %v3009_v3 }
 0x94e   : > { %v3105_v55 = vpop.f32.mrf.mxu0  ;;  %v3200_v44 = vpack.c.bf16 %v3186_v52, %v3185_v38 }
 0x94f   : > { %v3106_v49 = vadd.f32 %v3105_v55, %v3057_v35 }
 0x950   : > { %3220 = vmatmul.bf16.gmra.mxu2 %v3200_v44  ;;  %3269 = vmatmul.bf16.gmra.mxu3 %v3200_v44 }
 0x951   : > { %3318 = vmatmul.bf16.gmra.mxu0 %v3200_v44  ;;  %v3139_v20 = vadd.f32 %v3106_v49, %v12940_v18  ;;  %v3019_v49 = vpop.f32.mrf.mxu2 }
 0x953   : > { %v3171_v54 = vmul.f32 0.01, %v3139_v20  ;;  %vm3155_vm4 = vcmp.gt.f32.partialorder %v3139_v20, 0.0 }
 0x954   : > { %v3061_v48 = vpop.f32.mrf.mxu3 }
 0x955   : > { %v3187_v4 = vsel %vm3155_vm4, %v3139_v20, %v3171_v54  ;;  %v3062_v38 = vadd.f32 %v3061_v48, %v3012_v58 }
 0x956   : > { %v3107_v62 = vpop.f32.mrf.mxu0 }
 0x957   : > { %v3108_v7 = vadd.f32 %v3107_v62, %v3059_v6 }
 0x959   : > { %v3140_v12 = vadd.f32 %v3108_v7, %v12940_v18 }
 0x95b   : > { %v3172_v27 = vmul.f32 0.01, %v3140_v12  ;;  %vm3156_vm5 = vcmp.gt.f32.partialorder %v3140_v12, 0.0 }
 0x95c   : > { %v3063_v50 = vpop.f32.mrf.mxu3 }
 0x95d   : > { %v3188_v16 = vsel %vm3156_vm5, %v3140_v12, %v3172_v27  ;;  %v3064_v52 = vadd.f32 %v3063_v50, %v3014_v21  ;;  %v3022_v50 = vpop.f32.mrf.mxu2 }
 0x95e   : > { %v3110_v51 = vpop.f32.mrf.mxu0  ;;  %v3201_v37 = vpack.c.bf16 %v3188_v16, %v3187_v4 }
 0x95f   : > { %v3111_v3 = vadd.f32 %v3110_v51, %v3062_v38 }
 0x960   : > { %3225 = vmatmul.bf16.gmra.mxu2 %v3201_v37  ;;  %3274 = vmatmul.bf16.gmra.mxu3 %v3201_v37 }
 0x961   : > { %3323 = vmatmul.bf16.gmra.mxu0 %v3201_v37  ;;  %v3141_v55 = vadd.f32 %v3111_v3, %v12940_v18 }
 0x963   : > { %v3173_v6 = vmul.f32 0.01, %v3141_v55  ;;  %vm3157_vm6 = vcmp.gt.f32.partialorder %v3141_v55, 0.0 }
 0x964   : > { %v3066_v23 = vpop.f32.mrf.mxu3 }
 0x965   : > { %v3189_v54 = vsel %vm3157_vm6, %v3141_v55, %v3173_v6  ;;  %v3067_v27 = vadd.f32 %v3066_v23, %v3017_v17 }
 0x966   : > { %v3112_v44 = vpop.f32.mrf.mxu0 }
 0x967   : > { %v3113_v35 = vadd.f32 %v3112_v44, %v3064_v52  ;;  %v3024_v44 = vpop.f32.mrf.mxu2 }
 0x969   : > { %v3142_v62 = vadd.f32 %v3113_v35, %v12940_v18 }
 0x96b   : > { %v3174_v20 = vmul.f32 0.01, %v3142_v62  ;;  %vm3158_vm7 = vcmp.gt.f32.partialorder %v3142_v62, 0.0 }
 0x96c   : > { %v3068_v7 = vpop.f32.mrf.mxu3 }
 0x96d   : > { %v3190_v58 = vsel %vm3158_vm7, %v3142_v62, %v3174_v20  ;;  %v3069_v16 = vadd.f32 %v3068_v7, %v3019_v49 }
 0x96e   : > { %v3115_v48 = vpop.f32.mrf.mxu0  ;;  %v3202_v12 = vpack.c.bf16 %v3190_v58, %v3189_v54 }
 0x96f   : > { %v3116_v21 = vadd.f32 %v3115_v48, %v3067_v27  ;;  %v3027_v48 = vpop.f32.mrf.mxu2 }
 0x970   : > { %3230 = vmatmul.bf16.gmra.mxu2 %v3202_v12  ;;  %3279 = vmatmul.bf16.gmra.mxu3 %v3202_v12 }
 0x971   : > { %3328 = vmatmul.bf16.gmra.mxu0 %v3202_v12  ;;  %v3143_v51 = vadd.f32 %v3116_v21, %v12940_v18 }
 0x973   : > { %v3175_v3 = vmul.f32 0.01, %v3143_v51  ;;  %vm3159_vm8 = vcmp.gt.f32.partialorder %v3143_v51, 0.0 }
 0x974   : > { %v3071_v4 = vpop.f32.mrf.mxu3 }
 0x975   : > { %v3191_v17 = vsel %vm3159_vm8, %v3143_v51, %v3175_v3  ;;  %v3072_v20 = vadd.f32 %v3071_v4, %v3022_v50 }
 0x976   : > { %v3117_v37 = vpop.f32.mrf.mxu0 }
 0x977   : > { %v3118_v38 = vadd.f32 %v3117_v37, %v3069_v16 }
 0x979   : > { %v3144_v52 = vadd.f32 %v3118_v38, %v12940_v18 }
 0x97b   : > { %v3176_v55 = vmul.f32 0.01, %v3144_v52  ;;  %vm3160_vm9 = vcmp.gt.f32.partialorder %v3144_v52, 0.0 }
 0x97c   : > { %v3073_v35 = vpop.f32.mrf.mxu3 }
 0x97d   : > { %v3192_v23 = vsel %vm3160_vm9, %v3144_v52, %v3176_v55  ;;  %v3074_v54 = vadd.f32 %v3073_v35, %v3024_v44  ;;  %v3029_v55 = vpop.f32.mrf.mxu2  ;;  %v9800_v35 = vpop.f32.mrf.mxu1 }
 0x97e   : > { %v3120_v6 = vpop.f32.mrf.mxu0  ;;  %v3203_v62 = vpack.c.bf16 %v3192_v23, %v3191_v17  ;;  %v3364_v10 = vadd.f32 %v9800_v35, %v12941_v9 }
 0x97f   : > { %v3121_v49 = vadd.f32 %v3120_v6, %v3072_v20 }
 0x980   : > { %3235 = vmatmul.bf16.gmra.mxu2 %v3203_v62  ;;  %3284 = vmatmul.bf16.gmra.mxu3 %v3203_v62 }
 0x981   : > { %3333 = vmatmul.bf16.gmra.mxu0 %v3203_v62  ;;  %v3145_v58 = vadd.f32 %v3121_v49, %v12940_v18 }
 0x983   : > { %v3177_v21 = vmul.f32 0.01, %v3145_v58  ;;  %vm3161_vm10 = vcmp.gt.f32.partialorder %v3145_v58, 0.0 }
 0x984   : > { %v3076_v7 = vpop.f32.mrf.mxu3 }
 0x985   : > { %v3193_v37 = vsel %vm3161_vm10, %v3145_v58, %v3177_v21  ;;  %v3077_v52 = vadd.f32 %v3076_v7, %v3027_v48  ;;  %v3032_v58 = vpop.f32.mrf.mxu2 }
 0x986   : > { %v3122_v12 = vpop.f32.mrf.mxu0 }
 0x987   : > { %v3123_v27 = vadd.f32 %v3122_v12, %v3074_v54 }
 0x989   : > { %v3146_v16 = vadd.f32 %v3123_v27, %v12940_v18  ;;  %v9804_v27 = vpop.f32.mrf.mxu1 }
 0x98a   : > { %v3366_v31 = vadd.f32 %v9804_v27, %v12941_v9 }
 0x98b   : > { %v3178_v51 = vmul.f32 0.01, %v3146_v16  ;;  %vm3162_vm11 = vcmp.gt.f32.partialorder %v3146_v16, 0.0 }
 0x98c   : > { %v3078_v50 = vpop.f32.mrf.mxu3 }
 0x98d   : > { %v3194_v38 = vsel %vm3162_vm11, %v3146_v16, %v3178_v51  ;;  %v3079_v17 = vadd.f32 %v3078_v50, %v3029_v55  ;;  %v3034_v50 = vpop.f32.mrf.mxu2 }
 0x98e   : > { %v3125_v4 = vpop.f32.mrf.mxu0  ;;  %v3204_v3 = vpack.c.bf16 %v3194_v38, %v3193_v37 }
 0x98f   : > { %v3126_v44 = vadd.f32 %v3125_v4, %v3077_v52 }
 0x990   : > { %3240 = vmatmul.bf16.gmra.mxu2 %v3204_v3  ;;  %3289 = vmatmul.bf16.gmra.mxu3 %v3204_v3 }
 0x991   : > { %3338 = vmatmul.bf16.gmra.mxu0 %v3204_v3  ;;  %v3147_v23 = vadd.f32 %v3126_v44, %v12940_v18  ;;  %v9807_v44 = vpop.f32.mrf.mxu1 }
 0x992   : > { %v3369_v1 = vadd.f32 %v9807_v44, %v12941_v9 }
 0x993   : > { %v3179_v49 = vmul.f32 0.01, %v3147_v23  ;;  %vm3163_vm12 = vcmp.gt.f32.partialorder %v3147_v23, 0.0 }
 0x994   : > { %v3081_v20 = vpop.f32.mrf.mxu3 }
 0x995   : > { %v3195_v7 = vsel %vm3163_vm12, %v3147_v23, %v3179_v49  ;;  %v3082_v51 = vadd.f32 %v3081_v20, %v3032_v58 }
 0x996   : > { %v3127_v6 = vpop.f32.mrf.mxu0 }
 0x997   : > { %v3128_v62 = vadd.f32 %v3127_v6, %v3079_v17 }
 0x999   : > { %v3148_v54 = vadd.f32 %v3128_v62, %v12940_v18 }
 0x99b   : > { %v3180_v12 = vmul.f32 0.01, %v3148_v54  ;;  %vm3164_vm13 = vcmp.gt.f32.partialorder %v3148_v54, 0.0 }
 0x99c   : > { %v3083_v38 = vpop.f32.mrf.mxu3 }
 0x99d   : > { %v3196_v48 = vsel %vm3164_vm13, %v3148_v54, %v3180_v12  ;;  %v3084_v4 = vadd.f32 %v3083_v38, %v3034_v50  ;;  %v3370_v54 = vpop.f32.mrf.mxu1 }
 0x99e   : > { %v3130_v21 = vpop.f32.mrf.mxu0  ;;  %v3205_v16 = vpack.c.bf16 %v3196_v48, %v3195_v7  ;;  %v3371_v27 = vadd.f32 %v3370_v54, %v12941_v9 }
 0x99f   : > { %v3131_v37 = vadd.f32 %v3130_v21, %v3082_v51 }
 0x9a0   : > { %3245 = vmatmul.bf16.gmra.mxu2 %v3205_v16  ;;  %3294 = vmatmul.bf16.gmra.mxu3 %v3205_v16 }
 0x9a1   : > { %3343 = vmatmul.bf16.gmra.mxu0 %v3205_v16  ;;  %v3149_v3 = vadd.f32 %v3131_v37, %v12940_v18 }
 0x9a3   : > { %v3181_v17 = vmul.f32 0.01, %v3149_v3  ;;  %vm3165_vm14 = vcmp.gt.f32.partialorder %v3149_v3, 0.0 }
 0x9a5   : > { %v3197_v62 = vsel %vm3165_vm14, %v3149_v3, %v3181_v17  ;;  %v9810_v58 = vpop.f32.mrf.mxu1 }
 0x9a6   : > { %v3132_v52 = vpop.f32.mrf.mxu0 }
 0x9a7   : > { %v3133_v55 = vadd.f32 %v3132_v52, %v3084_v4 }
 0x9a9   : > { %v3150_v23 = vadd.f32 %v3133_v55, %v12940_v18 }
 0x9ab   : > { %v3182_v6 = vmul.f32 0.01, %v3150_v23  ;;  %vm3166_vm15 = vcmp.gt.f32.partialorder %v3150_v23, 0.0 }
 0x9ad   : > { %v3198_v20 = vsel %vm3166_vm15, %v3150_v23, %v3182_v6  ;;  %v9816_v48 = vpop.f32.mrf.mxu1 }
 0x9ae   : > { %v3206_v49 = vpack.c.bf16 %v3198_v20, %v3197_v62 }
 0x9b0   : > { %3250 = vmatmul.bf16.gmra.mxu2 %v3206_v49  ;;  %3299 = vmatmul.bf16.gmra.mxu3 %v3206_v49 }
 0x9b1   : > { %3348 = vmatmul.bf16.gmra.mxu0 %v3206_v49 }
 0x9b5   : > { %v9820_v51 = vpop.f32.mrf.mxu1 }
 0x9bd   : > { %v9826_v50 = vpop.f32.mrf.mxu1 }
 0x9be   : > { %v9830_v3 = vpop.f32.mrf.mxu0 }
 0x9c0   : > { %3411 = vmatmul.bf16.vlgmr.msra.gmra.mxu2 %v9085_v57  ;;  %3460 = vmatmul.bf16.vlgmr.msrb.gmra.mxu3 %v9085_v57 }
 0x9c3   : > { %v3216_v12 = vpop.f32.mrf.mxu2  ;;  %v9814_v7 = vpop.f32.mrf.mxu3 }
 0x9c5   : > { %v9836_v17 = vpop.f32.mrf.mxu1 }
 0x9cb   : > { %v3218_v21 = vpop.f32.mrf.mxu2  ;;  %v9818_v16 = vpop.f32.mrf.mxu3 }
 0x9cc   : > { %v3219_v28 = vadd.f32 %v3218_v21, %v8349_v29 }
 0x9cd   : > { %v9842_v62 = vpop.f32.mrf.mxu1 }
 0x9ce   : > { %v3502_v61 = vadd.f32 %v3366_v31, %v3219_v28  ;;  %v3386_v26 = vadd.f32 %v9842_v62, %v12941_v9 }
 0x9d0   : > { %3416 = vmatmul.bf16.gmra.mxu2 %v9177_v41  ;;  %3465 = vmatmul.bf16.gmra.mxu3 %v9177_v41  ;;  %v9838_v41 = vpop.f32.mrf.mxu0 }
 0x9d3   : > { %v3221_v37 = vpop.f32.mrf.mxu2  ;;  %v9824_v38 = vpop.f32.mrf.mxu3 }
 0x9d4   : > { %v3222_v14 = vadd.f32 %v3221_v37, %v8349_v29 }
 0x9d5   : > { %v9850_v18 = vpop.f32.mrf.mxu1 }
 0x9d6   : > { %v3503_v21 = vadd.f32 %v3369_v1, %v3222_v14  ;;  %v3374_v14 = vadd.f32 %v9810_v58, %v12941_v9 }
 0x9d8   : > { %v9846_v20 = vpop.f32.mrf.mxu0  ;;  %v6373_v31 = vmul.f32 -1.442695, %v3503_v21 }
 0x9db   : > { %v3223_v57 = vpop.f32.mrf.mxu2  ;;  %v9828_v4 = vpop.f32.mrf.mxu3 }
 0x9dd   : > { %v9860_v46 = vpop.f32.mrf.mxu1 }
 0x9e0   : > { %3421 = vmatmul.bf16.gmra.mxu2 %v9277_v5  ;;  %3470 = vmatmul.bf16.gmra.mxu3 %v9277_v5  ;;  %v9856_v45 = vpop.f32.mrf.mxu0 }
 0x9e3   : > { %v3226_v52 = vpop.f32.mrf.mxu2  ;;  %v9834_v55 = vpop.f32.mrf.mxu3 }
 0x9e4   : > { %v3227_v44 = vadd.f32 %v3226_v52, %v8349_v29  ;;  %v3376_v52 = vadd.f32 %v9816_v48, %v12941_v9 }
 0x9e5   : > { %v9881_v35 = vpop.f32.mrf.mxu1 }
 0x9e8   : > { %v9870_v22 = vpop.f32.mrf.mxu0 }
 0x9eb   : > { %v3228_v23 = vpop.f32.mrf.mxu2  ;;  %v9840_v6 = vpop.f32.mrf.mxu3 }
 0x9f0   : > { %3426 = vmatmul.bf16.gmra.mxu2 %v9372_v24  ;;  %3475 = vmatmul.bf16.gmra.mxu3 %v9372_v24  ;;  %v3217_v24 = vadd.f32 %v3216_v12, %v8349_v29 }
 0x9f2   : > { %v3501_v8 = vadd.f32 %v3364_v10, %v3217_v24  ;;  %v6372_v10 = vmul.f32 -1.442695, %v3502_v61  ;;  %v3224_v24 = vadd.f32 %v3223_v57, %v8349_v29  ;;  %v9896_v61 = vpop.f32.mrf.mxu1  ;;  %v3505_v57 = vadd.f32 %v3374_v14, %v3227_v44 }
 0x9f3   : > { %v3231_v49 = vpop.f32.mrf.mxu2  ;;  %v9848_v5 = vpop.f32.mrf.mxu3 }
 0x9f4   : > { %v3504_v28 = vadd.f32 %v3371_v27, %v3224_v24  ;;  %v6375_v21 = vmul.f32 -1.442695, %v3505_v57 }
 0x9f6   : > { %v6374_v54 = vmul.f32 -1.442695, %v3504_v28 }
 0x9fb   : > { %v9852_v42 = vpop.f32.mrf.mxu2  ;;  %v9854_v11 = vpop.f32.mrf.mxu3 }
 0x9fc   : > { %v3234_v25 = vadd.f32 %v9852_v42, %v8349_v29 }
 0xa00   : > { %3431 = vmatmul.bf16.gmra.mxu2 %v9464_v63  ;;  %3480 = vmatmul.bf16.gmra.mxu3 %v9464_v63  ;;  %v6371_v63 = vmul.f32 -1.442695, %v3501_v8  ;;  %v9885_v8 = vpop.f32.mrf.mxu0 }
 0xa02   : > { %6805 = vpow2.f32 %v6371_v63 }
 0xa03   : > { %v9863_v43 = vpop.f32.mrf.mxu2  ;;  %v9865_v0 = vpop.f32.mrf.mxu3  ;;  %6807 = vpow2.f32 %v6372_v10  ;;  %v3229_v10 = vadd.f32 %v3228_v23, %v8349_v29  ;;  %v3379_v23 = vadd.f32 %v9820_v51, %v12941_v9  ;;  %v3381_v51 = vadd.f32 %v9826_v50, %v12941_v9 }
 0xa04   : > { %6809 = vpow2.f32 %v6373_v31 }
 0xa05   : > { %6811 = vpow2.f32 %v6374_v54  ;;  %v3506_v44 = vadd.f32 %v3376_v52, %v3229_v10  ;;  %v3398_v54 = vpop.f32.mrf.mxu1 }
 0xa06   : > { %v9979_v60 = vadd.f32 %v3398_v54, %v12941_v9 }
 0xa07   : > { %v6376_v57 = vmul.f32 -1.442695, %v3506_v44 }
 0xa08   : > { %v6806_v1 = vpop.eup %6805  ;;  %v9903_v24 = vpop.f32.mrf.mxu0  ;;  %12944 = vst [vmem:[#allocation33_spill] sm:$0xff] %v9979_v60 }
 0xa09   : > { %v9898_v59 = vadd.f32 1.0, %v6806_v1  ;;  %v3232_v1 = vadd.f32 %v3231_v49, %v8349_v29 }
 0xa0b   : > { %v9875_v12 = vpop.f32.mrf.mxu2  ;;  %v9877_v33 = vpop.f32.mrf.mxu3  ;;  %6813 = vrcp.f32 %v9898_v59  ;;  %v3590_v54 = vand.u32 2147483647, %v9898_v59  ;;  %vm3586_vm1 = vweird.f32 %v9898_v59 }
 0xa0c   : > { %6815 = vpow2.f32 %v6375_v21 }
 0xa0d   : > { %vm10029_vm2 = vcmp.eq.f32.partialorder %v3590_v54, 8.507059e+37 }
 0xa10   : > { %3436 = vmatmul.bf16.gmra.mxu2 %v9531_v32  ;;  %3485 = vmatmul.bf16.gmra.mxu3 %v9531_v32  ;;  %v6808_v32 = vpop.eup %6807  ;;  %v9933_v44 = vpop.f32.mrf.mxu0 }
 0xa11   : > { %v9906_v58 = vadd.f32 1.0, %v6808_v32  ;;  %v6810_v28 = vpop.eup %6809  ;;  %v3507_v32 = vadd.f32 %v3379_v23, %v3232_v1  ;;  %v3508_v1 = vadd.f32 %v3381_v51, %v3234_v25  ;;  %v3384_v25 = vadd.f32 %v9836_v17, %v12941_v9 }
 0xa12   : > { %v9916_v48 = vadd.f32 1.0, %v6810_v28  ;;  %v6812_v14 = vpop.eup %6811 }
 0xa13   : > { %v9890_v37 = vpop.f32.mrf.mxu2  ;;  %v9892_v63 = vpop.f32.mrf.mxu3  ;;  %6817 = vrcp.f32 %v9906_v58  ;;  %v9927_v10 = vadd.f32 1.0, %v6812_v14  ;;  %v6377_v42 = vmul.f32 -1.442695, %v3507_v32  ;;  %v3237_v14 = vadd.f32 %v9863_v43, %v8349_v29 }
 0xa14   : > { %v9922_v49 = vpop.eup %6813  ;;  %6819 = vrcp.f32 %v9916_v48  ;;  %v6378_v36 = vmul.f32 -1.442695, %v3508_v1  ;;  %v3400_v43 = vpop.f32.mrf.mxu1  ;;  %v9962_v1 = vadd.f32 %v9881_v35, %v12941_v9  ;;  %v9976_v35 = vadd.f32 %v9896_v61, %v12941_v9 }
 0xa15   : > { %v6816_v28 = vpop.eup %6815  ;;  %6821 = vpow2.f32 %v6376_v57  ;;  %v3509_v17 = vadd.f32 %v3384_v25, %v3237_v14  ;;  %v9982_v14 = vadd.f32 %v3400_v43, %v12941_v9  ;;  %v3239_v61 = vadd.f32 %v9875_v12, %v8349_v29 }
 0xa16   : > { %6823 = vrcp.f32 %v9927_v10  ;;  %v9940_v50 = vadd.f32 1.0, %v6816_v28  ;;  %v9954_v28 = vadd.f32 %v9850_v18, %v12941_v9  ;;  %12943 = vst [vmem:[#allocation138_spill] sm:$0xff] %v9976_v35  ;;  %v10005_v43 = vadd.f32 %v9818_v16, %v8446_v2 }
 0xa17   : > { %6825 = vpow2.f32 %v6377_v42  ;;  %v9958_v42 = vadd.f32 %v9860_v46, %v12941_v9  ;;  %12945 = vst [vmem:[#allocation34_spill] sm:$0xff] %v9982_v14  ;;  %v3592_v9 = vand.u32 2147483648, %v9898_v59  ;;  %vm3587_vm0 = vweird.f32 %v9922_v49 }
 0xa18   : > { %6827 = vrcp.f32 %v9940_v50  ;;  %v9994_v56 = vpop.f32.mrf.mxu0  ;;  %v10017_v16 = vadd.f32 %v9846_v20, %v12852_v53  ;;  %vm10039_vm3 = vmor %vm3586_vm1, %vm3587_vm0  ;;  %v10058_v35 = vadd.f32 %v9856_v45, %v12852_v53  ;;  %vm3601_vm5 = vweird.f32 %v9906_v58 }
 0xa19   : > { %v9937_v23 = vpop.eup %6817  ;;  %6829 = vpow2.f32 %v6378_v36  ;;  %v3620_v45 = vand.u32 2147483647, %v9916_v48  ;;  %vm3616_vm9 = vweird.f32 %v9916_v48  ;;  %vm3631_vm12 = vweird.f32 %v9927_v10 }
 0xa1a   : > { %v3597_v57 = vmul.f32 %v9937_v23, %v9906_v58  ;;  %v9946_v32 = vpop.eup %6819  ;;  %12946 = vst [vmem:[#allocation35_spill] sm:$0xff] %v10017_v16  ;;  %vm3602_vm4 = vweird.f32 %v9937_v23  ;;  %vm3646_vm0 = vweird.f32 %v9940_v50 }
 0xa1b   : > { %v9908_v27 = vpop.f32.mrf.mxu2  ;;  %v9910_v31 = vpop.f32.mrf.mxu3  ;;  %v3612_v39 = vmul.f32 %v9946_v32, %v9916_v48  ;;  %12953 = vst [vmem:[#allocation38_spill] sm:$0xff] %v10058_v35  ;;  %vm10067_vm6 = vmor %vm3601_vm5, %vm3602_vm4  ;;  %vm3617_vm8 = vweird.f32 %v9946_v32  ;;  %vm10107_vm10 = vcmp.eq.f32.partialorder %v3620_v45, 8.507059e+37 }
 0xa1c   : > { %v6822_v51 = vpop.eup %6821  ;;  %v3598_v62 = vsub.f32 1.0, %v3597_v57  ;;  %v9992_v57 = vadd.f32 %v9814_v7, %v8446_v2  ;;  %vm10125_vm11 = vmor %vm3616_vm9, %vm3617_vm8 }
 0xa1d   : > { %v9972_v46 = vpop.eup %6823  ;;  %v9984_v25 = vadd.f32 1.0, %v6822_v51  ;;  %v10001_v51 = vadd.f32 %v9838_v41, %v12852_v53  ;;  %v3613_v14 = vsub.f32 1.0, %v3612_v39 }
 0xa1e   : > { %v6826_v36 = vpop.eup %6825  ;;  %v3599_v12 = vmul.f32 %v9937_v23, %v3598_v62  ;;  %v3510_v62 = vadd.f32 %v3386_v26, %v3239_v61  ;;  %v3605_v26 = vand.u32 2147483647, %v9906_v58  ;;  %vm3632_vm13 = vweird.f32 %v9972_v46 }
 0xa1f   : > { %v10013_v41 = vpop.eup %6827  ;;  %6831 = vrcp.f32 %v9984_v25  ;;  %vm10162_vm15 = vmor %vm3631_vm12, %vm3632_vm13  ;;  %vm3661_vm4 = vweird.f32 %v9984_v25 }
 0xa20   : > { %3441 = vmatmul.bf16.gmra.mxu2 %v9572_v15  ;;  %3490 = vmatmul.bf16.gmra.mxu3 %v9572_v15  ;;  %v3582_v15 = vmul.f32 %v9922_v49, %v9898_v59  ;;  %v6830_v60 = vpop.eup %6829  ;;  %v3607_v59 = vand.u32 2147483648, %v9906_v58  ;;  %v3600_v54 = vadd.f32 %v9937_v23, %v3599_v12  ;;  %vm10071_vm7 = vcmp.eq.f32.partialorder %v3605_v26, 8.507059e+37  ;;  %v10081_v58 = vpop.f32.mrf.mxu0 }
 0xa21   : > { %vm3647_vm1 = vweird.f32 %v10013_v41 }
 0xa22   : > { %v3583_v34 = vsub.f32 1.0, %v3582_v15  ;;  %v3608_v16 = vor.u32 1.1754944e-38, %v3607_v59  ;;  %v3604_v26 = vsel %vm10067_vm6, %v9937_v23, %v3600_v54  ;;  %v3665_v54 = vand.u32 2147483647, %v9984_v25 }
 0xa23   : > { %v9929_v52 = vpop.f32.mrf.mxu2  ;;  %v9931_v21 = vpop.f32.mrf.mxu3 }
 0xa24   : > { %v3584_v18 = vmul.f32 %v9922_v49, %v3583_v34  ;;  %v9988_v34 = vadd.f32 %v9830_v3, %v12852_v53  ;;  %v6379_v3 = vmul.f32 -1.442695, %v3509_v17  ;;  %v10020_v17 = vadd.f32 1.0, %v6826_v36 }
 0xa25   : > { %vm10218_vm5 = vcmp.eq.f32.partialorder %v3665_v54, 8.507059e+37  ;;  %v3244_v54 = vadd.f32 %v9908_v27, %v8349_v29 }
 0xa26   : > { %v3585_v7 = vadd.f32 %v9922_v49, %v3584_v18  ;;  %v10026_v18 = vadd.f32 %v9824_v38, %v8446_v2  ;;  %6833 = vpow2.f32 %v6379_v3  ;;  %v3593_v38 = vor.u32 1.1754944e-38, %v3592_v9 }
 0xa27   : > { %v3614_v3 = vmul.f32 %v9946_v32, %v3613_v14  ;;  %6835 = vrcp.f32 %v10020_v17  ;;  %v3642_v9 = vmul.f32 %v10013_v41, %v9940_v50  ;;  %v10065_v14 = vpop.eup %6831  ;;  %vm3676_vm8 = vweird.f32 %v10020_v17 }
 0xa28   : > { %v3589_v61 = vsel %vm10039_vm3, %v9922_v49, %v3585_v7  ;;  %v10062_v49 = vadd.f32 %v9828_v4, %v8446_v2  ;;  %v6380_v7 = vmul.f32 -1.442695, %v3510_v62  ;;  %v10079_v4 = vadd.f32 %v9870_v22, %v12852_v53  ;;  %vm10206_vm3 = vmor %vm3646_vm0, %vm3647_vm1 }
 0xa29   : > { %v10085_v62 = vsel %vm10029_vm2, %v3593_v38, %v3589_v61  ;;  %v3615_v35 = vadd.f32 %v9946_v32, %v3614_v3  ;;  %v3657_v23 = vmul.f32 %v10065_v14, %v9984_v25  ;;  %v3637_v3 = vand.u32 2147483648, %v9927_v10 }
 0xa2a   : > { %12958 = vst [vmem:[#allocation39_spill] sm:$0xff] %v10079_v4  ;;  %v3643_v4 = vsub.f32 1.0, %v3642_v9  ;;  %vm3662_vm6 = vweird.f32 %v10065_v14 }
 0xa2b   : > { %v9965_v15 = vpop.f32.mrf.mxu2  ;;  %v9967_v13 = vpop.f32.mrf.mxu3  ;;  %v3619_v45 = vsel %vm10125_vm11, %v9946_v32, %v3615_v35  ;;  %v10147_v32 = vadd.f32 %v9903_v24, %v12852_v53  ;;  %v3242_v35 = vadd.f32 %v9890_v37, %v8349_v29  ;;  %v3652_v37 = vand.u32 2147483648, %v9940_v50 }
 0xa2c   : > { %12942 = vst [vmem:[#allocation128_spill] sm:$0xff] %v9967_v13  ;;  %v6834_v59 = vpop.eup %6833  ;;  %v10096_v13 = vadd.f32 %v9834_v55, %v8446_v2  ;;  %v3635_v55 = vand.u32 2147483647, %v9927_v10  ;;  %v3644_v12 = vmul.f32 %v10013_v41, %v3643_v4 }
 0xa2d   : > { %v10101_v39 = vpop.eup %6835  ;;  %v10117_v9 = vadd.f32 1.0, %v6834_v59  ;;  %12966 = vst [vmem:[#allocation42_spill] sm:$0xff] %v10147_v32  ;;  %v3667_v32 = vand.u32 2147483648, %v9984_v25 }
 0xa2e   : > { %v3672_v59 = vmul.f32 %v10101_v39, %v10020_v17  ;;  %vm10151_vm14 = vcmp.eq.f32.partialorder %v3635_v55, 8.507059e+37  ;;  %vm3677_vm9 = vweird.f32 %v10101_v39 }
 0xa2f   : > { %vm10284_vm11 = vmor %vm3676_vm8, %vm3677_vm9  ;;  %vm3706_vm0 = vweird.f32 %v10117_v9 }
 0xa30   : > { %3446 = vmatmul.bf16.gmra.mxu2 %v9583_v47  ;;  %3495 = vmatmul.bf16.gmra.mxu3 %v9583_v47  ;;  %v3627_v47 = vmul.f32 %v9972_v46, %v9927_v10  ;;  %v10176_v10 = vadd.f32 %v9848_v5, %v8446_v2  ;;  %v3673_v24 = vsub.f32 1.0, %v3672_v59  ;;  %v3653_v59 = vor.u32 1.1754944e-38, %v3652_v37 }
 0xa33   : > { %v10033_v20 = vpop.f32.mrf.mxu2  ;;  %v10035_v36 = vpop.f32.mrf.mxu3 }
 0xa34   : > { %12949 = vst [vmem:[#allocation36_spill] sm:$0xff] %v10033_v20  ;;  %v3628_v20 = vsub.f32 1.0, %v3627_v47  ;;  %v3622_v47 = vand.u32 2147483648, %v9916_v48  ;;  %v10115_v48 = vadd.f32 %v9885_v8, %v12852_v53 }
 0xa35   : > { %12950 = vst [vmem:[#allocation37_spill] sm:$0xff] %v10035_v36  ;;  %v10052_v36 = vadd.f32 1.0, %v6830_v60 }
 0xa36   : > { %v3629_v22 = vmul.f32 %v9972_v46, %v3628_v20  ;;  %v3623_v20 = vor.u32 1.1754944e-38, %v3622_v47  ;;  %12963 = vst [vmem:[#allocation41_spill] sm:$0xff] %v10115_v48  ;;  %v3650_v47 = vand.u32 2147483647, %v9940_v50 }
 0xa37   : > { %6837 = vrcp.f32 %v10052_v36  ;;  %vm3691_vm12 = vweird.f32 %v10052_v36 }
 0xa38   : > { %6839 = vpow2.f32 %v6380_v7  ;;  %v10121_v7 = vsel %vm10071_vm7, %v3608_v16, %v3604_v26  ;;  %v3630_v8 = vadd.f32 %v9972_v46, %v3629_v22  ;;  %v10138_v16 = vadd.f32 %v9840_v6, %v8446_v2  ;;  %vm10242_vm7 = vmor %vm3661_vm4, %vm3662_vm6 }
 0xa39   : > { %v3658_v26 = vsub.f32 1.0, %v3657_v23  ;;  %v3638_v6 = vor.u32 1.1754944e-38, %v3637_v3  ;;  %6841 = vrcp.f32 %v10117_v9  ;;  %v10158_v23 = vsel %vm10107_vm10, %v3623_v20, %v3619_v45  ;;  %v10178_v20 = vpop.f32.mrf.mxu0 }
 0xa3a   : > { %v3634_v55 = vsel %vm10162_vm15, %v9972_v46, %v3630_v8  ;;  %v3645_v3 = vadd.f32 %v10013_v41, %v3644_v12  ;;  %vm10180_vm2 = vcmp.eq.f32.partialorder %v3650_v47, 8.507059e+37  ;;  %v3511_v8 = vadd.f32 %v9954_v28, %v3242_v35 }
 0xa3b   : > { %v10103_v38 = vpop.f32.mrf.mxu2  ;;  %v10105_v61 = vpop.f32.mrf.mxu3  ;;  %v3659_v45 = vmul.f32 %v10065_v14, %v3658_v26  ;;  %v10195_v47 = vadd.f32 %v9933_v44, %v12852_v53  ;;  %v10200_v26 = vsel %vm10151_vm14, %v3638_v6, %v3634_v55  ;;  %v10212_v35 = vadd.f32 %v9854_v11, %v8446_v2 }
 0xa3c   : > { %12959 = vst [vmem:[#allocation40_spill] sm:$0xff] %v10103_v38  ;;  %v3649_v44 = vsel %vm10206_vm3, %v10013_v41, %v3645_v3  ;;  %v3674_v11 = vmul.f32 %v10101_v39, %v3673_v24  ;;  %v6381_v37 = vmul.f32 -1.442695, %v3511_v8  ;;  %v3668_v41 = vor.u32 1.1754944e-38, %v3667_v32 }
 0xa3d   : > { %12960 = vst [vmem:[#allocation126_spill] sm:$0xff] %v10105_v61  ;;  %v10143_v61 = vpop.eup %6837  ;;  %v10231_v3 = vadd.f32 %v9994_v56, %v12852_v53  ;;  %v3682_v56 = vand.u32 2147483648, %v10020_v17  ;;  %v3697_v28 = vand.u32 2147483648, %v10052_v36 }
 0xa3e   : > { %v6840_v22 = vpop.eup %6839  ;;  %v3687_v5 = vmul.f32 %v10143_v61, %v10052_v36  ;;  %v3675_v60 = vadd.f32 %v10101_v39, %v3674_v11  ;;  %v10274_v11 = vadd.f32 %v10081_v58, %v12852_v53  ;;  %vm3692_vm13 = vweird.f32 %v10143_v61 }
 0xa3f   : > { %v10185_v46 = vadd.f32 1.0, %v6840_v22  ;;  %v10222_v50 = vpop.eup %6841  ;;  %v3660_v22 = vadd.f32 %v10065_v14, %v3659_v45  ;;  %vm10320_vm15 = vmor %vm3691_vm12, %vm3692_vm13 }
 0xa40   : > { %v3688_v55 = vsub.f32 1.0, %v3687_v5  ;;  %v3702_v27 = vmul.f32 %v10222_v50, %v10117_v9  ;;  %v3695_v5 = vand.u32 2147483647, %v10052_v36  ;;  %v3679_v4 = vsel %vm10284_vm11, %v10101_v39, %v3675_v60 }
 0xa41   : > { %6843 = vrcp.f32 %v10185_v46  ;;  %v3664_v32 = vsel %vm10242_vm7, %v10065_v14, %v3660_v22  ;;  %v3512_v14 = vadd.f32 %v9958_v42, %v3244_v54  ;;  %v3683_v42 = vor.u32 1.1754944e-38, %v3682_v56 }
 0xa42   : > { %v3689_v8 = vmul.f32 %v10143_v61, %v3688_v55  ;;  %v10278_v55 = vsel %vm10218_vm5, %v3668_v41, %v3664_v32  ;;  %v3703_v54 = vsub.f32 1.0, %v3702_v27  ;;  %vm10299_vm14 = vcmp.eq.f32.partialorder %v3695_v5, 8.507059e+37 }
 0xa43   : > { %v3412_v12 = vpop.f32.mrf.mxu2  ;;  %v10188_v38 = vpop.f32.mrf.mxu3  ;;  %v3247_v32 = vadd.f32 %v9929_v52, %v8349_v29  ;;  %v3710_v5 = vand.u32 2147483647, %v10117_v9  ;;  %v3712_v52 = vand.u32 2147483648, %v10117_v9  ;;  %vm3707_vm1 = vweird.f32 %v10222_v50 }
 0xa44   : > { %v3413_v48 = vadd.f32 %v3412_v12, %v8452_v40  ;;  %vm3721_vm3 = vweird.f32 %v10185_v46  ;;  %vm10370_vm4 = vmor %vm3706_vm0, %vm3707_vm1 }
 0xa46   : > { %v3821_v6 = vadd.f32 %v3413_v48, %v9992_v57  ;;  %v3680_v57 = vand.u32 2147483647, %v10020_v17  ;;  %v10238_v48 = vsel %vm10180_vm2, %v3653_v59, %v3649_v44  ;;  %v10262_v59 = vadd.f32 %v9865_v0, %v8446_v2 }
 0xa47   : > { %v10270_v22 = vpop.eup %6843  ;;  %v3690_v17 = vadd.f32 %v10143_v61, %v3689_v8  ;;  %v3704_v8 = vmul.f32 %v10222_v50, %v3703_v54  ;;  %vm10350_vm2 = vcmp.eq.f32.partialorder %v3710_v5, 8.507059e+37 }
 0xa48   : > { %v6387_v12 = vmul.f32 -1.442695, %v3821_v6  ;;  %vm10266_vm10 = vcmp.eq.f32.partialorder %v3680_v57, 8.507059e+37  ;;  %v3698_v57 = vor.u32 1.1754944e-38, %v3697_v28  ;;  %v3717_v39 = vmul.f32 %v10270_v22, %v10185_v46 }
 0xa49   : > { %v10329_v28 = vadd.f32 %v9892_v63, %v8446_v2  ;;  %v3694_v6 = vsel %vm10320_vm15, %v10143_v61, %v3690_v17  ;;  %v3513_v63 = vadd.f32 %v9962_v1, %v3247_v32  ;;  %v3713_v17 = vor.u32 1.1754944e-38, %v3712_v52 }
 0xa4a   : > { %6845 = vpow2.f32 %v6387_v12  ;;  %v10290_v12 = vadd.f32 %v9877_v33, %v8446_v2  ;;  %v10305_v33 = vadd.f32 %v10178_v20, %v12852_v53  ;;  %v3718_v54 = vsub.f32 1.0, %v3717_v39 }
 0xa4b   : > { %6847 = vpow2.f32 %v6381_v37  ;;  %v3414_v25 = vpop.f32.mrf.mxu2  ;;  %v10255_v24 = vpop.f32.mrf.mxu3  ;;  %v10357_v1 = vsel %vm10299_vm14, %v3698_v57, %v3694_v6  ;;  %v3725_v39 = vand.u32 2147483647, %v10185_v46  ;;  %v6383_v32 = vmul.f32 -1.442695, %v3513_v63 }
 0xa4c   : > { %v3415_v44 = vadd.f32 %v3414_v25, %v8452_v40  ;;  %v3341_v37 = vpop.f32.mrf.mxu0  ;;  %v10315_v25 = vsel %vm10266_vm10, %v3683_v42, %v3679_v4  ;;  %v3719_v41 = vmul.f32 %v10270_v22, %v3718_v54  ;;  %vm3722_vm5 = vweird.f32 %v10270_v22 }
 0xa4d   : > { %v10347_v4 = vadd.f32 %v3341_v37, %v12852_v53  ;;  %vm10391_vm6 = vcmp.eq.f32.partialorder %v3725_v39, 8.507059e+37  ;;  %v10412_v61 = vadd.f32 %v9931_v21, %v8446_v2  ;;  %vm10419_vm8 = vmor %vm3721_vm3, %vm3722_vm5 }
 0xa4e   : > { %v3822_v58 = vadd.f32 %v3415_v44, %v10005_v43  ;;  %v6382_v43 = vmul.f32 -1.442695, %v3512_v14  ;;  %v3462_v14 = vadd.f32 %v10188_v38, %v8821_v19  ;;  %v3727_v38 = vand.u32 2147483648, %v10185_v46 }
 0xa50   : > { %v6846_v45 = vpop.eup %6845  ;;  %v6388_v56 = vmul.f32 -1.442695, %v3822_v58  ;;  %v3705_v58 = vadd.f32 %v10222_v50, %v3704_v8  ;;  %v3728_v20 = vor.u32 1.1754944e-38, %v3727_v38  ;;  %v3720_v38 = vadd.f32 %v10270_v22, %v3719_v41 }
 0xa51   : > { %v6848_v27 = vpop.eup %6847  ;;  %v10311_v60 = vadd.f32 1.0, %v6846_v45 }
 0xa52   : > { %6849 = vpow2.f32 %v6388_v56  ;;  %v10339_v0 = vadd.f32 1.0, %v6848_v27  ;;  %v4141_v56 = vmul.f32 %v10085_v62, %v3462_v14  ;;  %v3724_v21 = vsel %vm10419_vm8, %v10270_v22, %v3720_v38 }
 0xa53   : > { %6851 = vrcp.f32 %v10311_v60  ;;  %v3417_v36 = vpop.f32.mrf.mxu2  ;;  %v10334_v44 = vpop.f32.mrf.mxu3  ;;  %vm3906_vm9 = vweird.f32 %v10311_v60 }
 0xa54   : > { %6853 = vpow2.f32 %v6382_v43  ;;  %v3418_v42 = vadd.f32 %v3417_v36, %v8452_v40  ;;  %v3344_v43 = vpop.f32.mrf.mxu0  ;;  %v4157_v14 = vadd.f32 %v4141_v56, %v9988_v34  ;;  %v3464_v36 = vadd.f32 %v10255_v24, %v8821_v19 }
 0xa55   : > { %6855 = vrcp.f32 %v10339_v0  ;;  %v10381_v52 = vadd.f32 %v3344_v43, %v12852_v53  ;;  %v3742_v54 = vand.u32 2147483648, %v10339_v0  ;;  %v3912_v24 = vand.u32 2147483648, %v10311_v60 }
 0xa56   : > { %v3823_v45 = vadd.f32 %v3418_v42, %v10026_v18  ;;  %v10364_v18 = vadd.f32 %v9910_v31, %v8446_v2  ;;  %v3709_v31 = vsel %vm10370_vm4, %v10222_v50, %v3705_v58  ;;  %v3740_v43 = vand.u32 2147483647, %v10339_v0 }
 0xa57   : > { %v10399_v34 = vsel %vm10350_vm2, %v3713_v17, %v3709_v31  ;;  %v4142_v17 = vmul.f32 %v10121_v7, %v3464_v36  ;;  %v10423_v41 = vor.u32 1.1754944e-38, %v3742_v54  ;;  %v3913_v46 = vor.u32 1.1754944e-38, %v3912_v24 }
 0xa58   : > { %v6850_v37 = vpop.eup %6849  ;;  %v6389_v27 = vmul.f32 -1.442695, %v3823_v45  ;;  %v3467_v54 = vadd.f32 %v10334_v44, %v8821_v19  ;;  %vm3736_vm1 = vweird.f32 %v10339_v0 }
 0xa59   : > { %v6852_v57 = vpop.eup %6851  ;;  %v10375_v8 = vadd.f32 1.0, %v6850_v37  ;;  %v3910_v37 = vand.u32 2147483647, %v10311_v60  ;;  %v4158_v22 = vadd.f32 %v4142_v17, %v10001_v51  ;;  %v3249_v51 = vadd.f32 %v9965_v15, %v8349_v29 }
 0xa5a   : > { %v6854_v5 = vpop.eup %6853  ;;  %v3902_v9 = vmul.f32 %v6852_v57, %v10311_v60  ;;  %6857 = vpow2.f32 %v6389_v27  ;;  %vm3907_vm7 = vweird.f32 %v6852_v57  ;;  %v4143_v15 = vmul.f32 %v10158_v23, %v3467_v54 }
 0xa5b   : > { %6859 = vrcp.f32 %v10375_v8  ;;  %v3419_v6 = vpop.f32.mrf.mxu2  ;;  %v10389_v42 = vpop.f32.mrf.mxu3  ;;  %v10402_v45 = vadd.f32 1.0, %v6854_v5  ;;  %vm3908_vm10 = vmor %vm3906_vm9, %vm3907_vm7  ;;  %vm3911_vm11 = vcmp.eq.f32.partialorder %v3910_v37, 8.507059e+37  ;;  %v3925_v17 = vand.u32 2147483647, %v10375_v8 }
 0xa5c   : > { %v3903_v63 = vsub.f32 1.0, %v3902_v9  ;;  %v3420_v58 = vadd.f32 %v3419_v6, %v8452_v40  ;;  %6861 = vpow2.f32 %v6383_v32  ;;  %v10406_v56 = vpop.eup %6855  ;;  %vm3921_vm13 = vweird.f32 %v10375_v8 }
 0xa5d   : > { %6863 = vtanh.f32 %v4157_v14  ;;  %v3732_v9 = vmul.f32 %v10406_v56, %v10339_v0  ;;  %vm3926_vm15 = vcmp.eq.f32.partialorder %v3925_v17, 8.507059e+37  ;;  %vm3737_vm0 = vweird.f32 %v10406_v56 }
 0xa5e   : > { %v3904_v39 = vmul.f32 %v6852_v57, %v3903_v63  ;;  %v3824_v27 = vadd.f32 %v3420_v58, %v10062_v49  ;;  %6865 = vrcp.f32 %v10402_v45  ;;  %vm10528_vm8 = vmor %vm3736_vm1, %vm3737_vm0 }
 0xa60   : > { %v6858_v32 = vpop.eup %6857  ;;  %v3905_v49 = vadd.f32 %v6852_v57, %v3904_v39  ;;  %v6390_v31 = vmul.f32 -1.442695, %v3824_v27  ;;  %v3755_v39 = vand.u32 2147483647, %v10402_v45  ;;  %v3927_v27 = vand.u32 2147483648, %v10375_v8 }
 0xa61   : > { %v6860_v7 = vpop.eup %6859  ;;  %v10431_v5 = vadd.f32 1.0, %v6858_v32 }
 0xa62   : > { %v3909_v14 = vsel %vm3908_vm10, %v6852_v57, %v3905_v49  ;;  %v3917_v60 = vmul.f32 %v6860_v7, %v10375_v8  ;;  %6867 = vpow2.f32 %v6390_v31  ;;  %v10436_v36 = vpop.eup %6861  ;;  %v10446_v57 = vsel %vm10391_vm6, %v3728_v20, %v3724_v21  ;;  %v12995_v20 = vld [vmem:[#allocation128_spill] sm:$0xff]  ;;  %v12998_v8 = vld [vmem:[#allocation35_spill] sm:$0xff] }
 0xa63   : > { %v3914_v6 = vsel %vm3911_vm11, %v3913_v46, %v3909_v14  ;;  %6869 = vrcp.f32 %v10431_v5  ;;  %v3422_v63 = vpop.f32.mrf.mxu2  ;;  %v10442_v58 = vpop.f32.mrf.mxu3  ;;  %vm3922_vm12 = vweird.f32 %v6860_v7  ;;  %v10459_v31 = vadd.f32 %v12995_v20, %v8446_v2 }
 0xa64   : > { %v4189_v38 = vsub.f32 1.0, %v3914_v6  ;;  %v3918_v24 = vsub.f32 1.0, %v3917_v60  ;;  %v6864_v37 = vpop.eup %6863  ;;  %v3423_v44 = vadd.f32 %v3422_v63, %v8452_v40  ;;  %v4221_v49 = vmul.f32 %v3914_v6, %v9010_v30  ;;  %v12997_v30 = vld [vmem:[#allocation138_spill] sm:$0xff]  ;;  %vm3923_vm14 = vmor %vm3921_vm13, %vm3922_vm12 }
 0xa65   : > { %v10455_v50 = vpop.eup %6865  ;;  %6871 = vtanh.f32 %v4158_v22  ;;  %v3733_v63 = vsub.f32 1.0, %v3732_v9  ;;  %v3514_v6 = vadd.f32 %v12997_v30, %v3249_v51  ;;  %v3469_v9 = vadd.f32 %v10389_v42, %v8821_v19  ;;  %v12999_v30 = vld [vmem:[#allocation130_spill] sm:$0xff] }
 0xa66   : > { %v4205_v62 = vmul.f32 %v6864_v37, %v4189_v38  ;;  %v3919_v32 = vmul.f32 %v6860_v7, %v3918_v24  ;;  %v3825_v21 = vadd.f32 %v3423_v44, %v10096_v13  ;;  %v3928_v24 = vor.u32 1.1754944e-38, %v3927_v27 }
 0xa67   : > { %v3757_v13 = vand.u32 2147483648, %v10402_v45  ;;  %v4159_v44 = vadd.f32 %v4143_v15, %v12998_v8  ;;  %v3734_v17 = vmul.f32 %v10406_v56, %v3733_v63  ;;  %v3940_v15 = vand.u32 2147483647, %v10431_v5 }
 0xa68   : > { %v6868_v46 = vpop.eup %6867  ;;  %v3920_v14 = vadd.f32 %v6860_v7, %v3919_v32  ;;  %v10464_v60 = vadd.f32 %v4221_v49, %v4205_v62  ;;  %v6391_v20 = vmul.f32 -1.442695, %v3825_v21  ;;  %v6384_v49 = vmul.f32 -1.442695, %v3514_v6 }
 0xa69   : > { %v6870_v38 = vpop.eup %6869  ;;  %v10467_v37 = vadd.f32 1.0, %v6868_v46  ;;  %v3942_v21 = vand.u32 2147483648, %v10431_v5  ;;  %vm3936_vm3 = vweird.f32 %v10431_v5  ;;  %v10492_v8 = vadd.f32 %v10406_v56, %v3734_v17 }
 0xa6a   : > { %12996 = vst [vmem:[#allocation43_spill] sm:$0xff] %v10464_v60  ;;  %v3924_v22 = vsel %vm3923_vm14, %v6860_v7, %v3920_v14  ;;  %v3932_v23 = vmul.f32 %v6870_v38, %v10431_v5  ;;  %vm3937_vm2 = vweird.f32 %v6870_v38  ;;  %vm3941_vm5 = vcmp.eq.f32.partialorder %v3940_v15, 8.507059e+37 }
 0xa6b   : > { %v3929_v54 = vsel %vm3926_vm15, %v3928_v24, %v3924_v22  ;;  %6873 = vrcp.f32 %v10467_v37  ;;  %v3424_v51 = vpop.f32.mrf.mxu2  ;;  %v10475_v62 = vpop.f32.mrf.mxu3  ;;  %v10486_v22 = vor.u32 1.1754944e-38, %v3757_v13  ;;  %vm3938_vm4 = vmor %vm3936_vm3, %vm3937_vm2  ;;  %vm10509_vm6 = vcmp.eq.f32.partialorder %v3740_v43, 8.507059e+37 }
 0xa6c   : > { %v4190_v27 = vsub.f32 1.0, %v3929_v54  ;;  %v3933_v7 = vsub.f32 1.0, %v3932_v23  ;;  %6875 = vpow2.f32 %v6391_v20  ;;  %v6872_v32 = vpop.eup %6871  ;;  %v3425_v46 = vadd.f32 %v3424_v51, %v8452_v40 }
 0xa6d   : > { %v4222_v24 = vmul.f32 %v3929_v54, %v12999_v30  ;;  %6877 = vtanh.f32 %v4159_v44  ;;  %v4144_v20 = vmul.f32 %v10200_v26, %v3469_v9  ;;  %v3943_v54 = vor.u32 1.1754944e-38, %v3942_v21 }
 0xa6e   : > { %v4206_v42 = vmul.f32 %v6872_v32, %v4190_v27  ;;  %v3934_v14 = vmul.f32 %v6870_v38, %v3933_v7  ;;  %v3826_v63 = vadd.f32 %v3425_v46, %v10138_v16  ;;  %v10495_v27 = vadd.f32 1.0, %v10436_v36  ;;  %v13001_v7 = vld [vmem:[#allocation38_spill] sm:$0xff] }
 0xa6f   : > { %6879 = vpow2.f32 %v6384_v49  ;;  %v4160_v17 = vadd.f32 %v4144_v20, %v13001_v7  ;;  %v3957_v30 = vand.u32 2147483648, %v10467_v37  ;;  %v3472_v43 = vadd.f32 %v10442_v58, %v8821_v19  ;;  %v13004_v20 = vld [vmem:[#allocation109_spill] sm:$0xff]  ;;  %v13008_v58 = vld [vmem:[#allocation28_spill] sm:$0xff] }
 0xa70   : > { %v3935_v6 = vadd.f32 %v6870_v38, %v3934_v14  ;;  %v10489_v23 = vadd.f32 %v4222_v24, %v4206_v42  ;;  %v6392_v26 = vmul.f32 -1.442695, %v3826_v63  ;;  %v3747_v42 = vmul.f32 %v10455_v50, %v10402_v45 }
 0xa71   : > { %v6874_v51 = vpop.eup %6873  ;;  %v3955_v24 = vand.u32 2147483647, %v10467_v37  ;;  %vm3951_vm9 = vweird.f32 %v10467_v37  ;;  %vm3752_vm12 = vweird.f32 %v10455_v50  ;;  %vm3751_vm13 = vweird.f32 %v10402_v45 }
 0xa72   : > { %13000 = vst [vmem:[#allocation20_spill] sm:$0xff] %v10489_v23  ;;  %v6876_v44 = vpop.eup %6875  ;;  %v3939_v16 = vsel %vm3938_vm4, %v6870_v38, %v3935_v6  ;;  %v3947_v13 = vmul.f32 %v6874_v51, %v10467_v37  ;;  %v10500_v5 = vpack.c.bf16 %v10489_v23, %v10464_v60  ;;  %6881 = vpow2.f32 %v6392_v26  ;;  %v13011_v37 = vld [vmem:[#allocation33_spill] sm:$0xff]  ;;  %vm10613_vm3 = vmor %vm3751_vm13, %vm3752_vm12 }
 0xa73   : > { %v3944_v9 = vsel %vm3941_vm5, %v3943_v54, %v3939_v16  ;;  %v10503_v32 = vadd.f32 1.0, %v6876_v44  ;;  %v3427_v36 = vpop.f32.mrf.mxu2  ;;  %v10505_v49 = vpop.f32.mrf.mxu3  ;;  %vm3952_vm7 = vweird.f32 %v6874_v51  ;;  %v13007_v16 = vld [vmem:[#allocation36_spill] sm:$0xff]  ;;  %vm3956_vm11 = vcmp.eq.f32.partialorder %v3955_v24, 8.507059e+37 }
 0xa74   : > { %v4191_v21 = vsub.f32 1.0, %v3944_v9  ;;  %v3948_v15 = vsub.f32 1.0, %v3947_v13  ;;  %v3428_v46 = vadd.f32 %v3427_v36, %v8452_v40  ;;  %4502 = vmatmul.bf16.vlgmr.msrb.gmra.mxu1 %v10500_v5  ;;  %v6878_v14 = vpop.eup %6877  ;;  %v3252_v13 = vadd.f32 %v13007_v16, %v8349_v29  ;;  %vm3953_vm10 = vmor %vm3951_vm9, %vm3952_vm7 }
 0xa75   : > { %6883 = vrcp.f32 %v10503_v32  ;;  %4909 = vmatpush.bf16.msrb.mxu1 %v13004_v20  ;;  %v6880_v44 = vpop.eup %6879  ;;  %v4223_v7 = vmul.f32 %v3944_v9, %v13008_v58  ;;  %v13010_v9 = vld [vmem:[#allocation111_spill] sm:$0xff]  ;;  %vm3966_vm15 = vweird.f32 %v10503_v32  ;;  %vm10638_vm7 = vcmp.eq.f32.partialorder %v3755_v39, 8.507059e+37 }
 0xa76   : > { %v4207_v63 = vmul.f32 %v6878_v14, %v4191_v21  ;;  %v3949_v6 = vmul.f32 %v6874_v51, %v3948_v15  ;;  %v3827_v54 = vadd.f32 %v3428_v46, %v10176_v10  ;;  %6885 = vtanh.f32 %v4160_v17 }
 0xa77   : > { %v3739_v10 = vsel %vm10528_vm8, %v10406_v56, %v10492_v8  ;;  %v3748_v21 = vsub.f32 1.0, %v3747_v42  ;;  %v3958_v46 = vor.u32 1.1754944e-38, %v3957_v30  ;;  %v4145_v14 = vmul.f32 %v10238_v48, %v3472_v43 }
 0xa78   : > { %v3950_v36 = vadd.f32 %v6874_v51, %v3949_v6  ;;  %v6393_v0 = vmul.f32 -1.442695, %v3827_v54  ;;  %v6882_v15 = vpop.eup %6881  ;;  %v10541_v20 = vadd.f32 %v4223_v7, %v4207_v63  ;;  %v3772_v17 = vand.u32 2147483648, %v10495_v27  ;;  %v13012_v54 = vld [vmem:[#allocation37_spill] sm:$0xff] }
 0xa79   : > { %4910 = vmatpush.bf16.msrb.mxu1 %v13010_v9  ;;  %v10545_v26 = vadd.f32 1.0, %v6882_v15  ;;  %v3515_v8 = vadd.f32 %v13011_v37, %v3252_v13  ;;  %v3474_v48 = vadd.f32 %v10475_v62, %v8821_v19  ;;  %v10563_v13 = vadd.f32 %v13012_v54, %v8446_v2  ;;  %v13013_v62 = vld [vmem:[#allocation39_spill] sm:$0xff] }
 0xa7a   : > { %13009 = vst [vmem:[#allocation21_spill] sm:$0xff] %v10541_v20  ;;  %v3954_v16 = vsel %vm3953_vm10, %v6874_v51, %v3950_v36  ;;  %6887 = vpow2.f32 %v6393_v0  ;;  %v10558_v51 = vsel %vm10509_vm6, %v10423_v41, %v3739_v10  ;;  %v4161_v58 = vadd.f32 %v4145_v14, %v13013_v62  ;;  %v13014_v0 = vld [vmem:[#allocation113_spill] sm:$0xff] }
 0xa7b   : > { %v6884_v56 = vpop.eup %6883  ;;  %6889 = vrcp.f32 %v10495_v27  ;;  %v3959_v42 = vsel %vm3956_vm11, %v3958_v46, %v3954_v16  ;;  %v3429_v30 = vpop.f32.mrf.mxu2  ;;  %v3749_v7 = vmul.f32 %v10455_v50, %v3748_v21  ;;  %v10571_v38 = vor.u32 1.1754944e-38, %v3772_v17  ;;  %v13015_v14 = vld [vmem:[#allocation129_spill] sm:$0xff] }
 0xa7c   : > { %v10551_v43 = vpop.f32.mrf.mxu3  ;;  %v4192_v63 = vsub.f32 1.0, %v3959_v42  ;;  %v3962_v6 = vmul.f32 %v6884_v56, %v10503_v32  ;;  %6891 = vrcp.f32 %v10545_v26  ;;  %v6886_v24 = vpop.eup %6885  ;;  %v3430_v41 = vadd.f32 %v3429_v30, %v8452_v40 }
 0xa7d   : > { %4911 = vmatpush.bf16.msrb.mxu1 %v13014_v0  ;;  %v6385_v10 = vmul.f32 -1.442695, %v3515_v8  ;;  %v3972_v9 = vand.u32 2147483648, %v10503_v32  ;;  %v4146_v16 = vmul.f32 %v10278_v55, %v3474_v48  ;;  %v4224_v37 = vmul.f32 %v3959_v42, %v13015_v14  ;;  %v13017_v55 = vld [vmem:[#allocation115_spill] sm:$0xff] }
 0xa7e   : > { %v4208_v15 = vmul.f32 %v6886_v24, %v4192_v63  ;;  %v3963_v46 = vsub.f32 1.0, %v3962_v6  ;;  %vm3967_vm14 = vweird.f32 %v6884_v56  ;;  %v3970_v62 = vand.u32 2147483647, %v10503_v32  ;;  %v13018_v32 = vld [vmem:[#allocation41_spill] sm:$0xff] }
 0xa7f   : > { %v3828_v63 = vadd.f32 %v3430_v41, %v10212_v35  ;;  %6893 = vtanh.f32 %v4161_v58  ;;  %v10585_v8 = vadd.f32 %v10455_v50, %v3749_v7  ;;  %v3477_v24 = vadd.f32 %v10505_v49, %v8821_v19  ;;  %vm3968_vm0 = vmor %vm3966_vm15, %vm3967_vm14 }
 0xa80   : > { %v6888_v21 = vpop.eup %6887  ;;  %v3964_v54 = vmul.f32 %v6884_v56, %v3963_v46  ;;  %v10582_v17 = vadd.f32 %v4224_v37, %v4208_v15  ;;  %v10591_v0 = vadd.f32 1.0, %v6880_v44  ;;  %v3973_v58 = vor.u32 1.1754944e-38, %v3972_v9 }
 0xa81   : > { %v10578_v6 = vpop.eup %6889  ;;  %v10580_v30 = vadd.f32 1.0, %v6888_v21  ;;  %4912 = vmatpush.bf16.msrb.mxu1 %v13017_v55  ;;  %v6394_v35 = vmul.f32 -1.442695, %v3828_v63  ;;  %vm3971_vm1 = vcmp.eq.f32.partialorder %v3970_v62, 8.507059e+37  ;;  %v4162_v14 = vadd.f32 %v4146_v16, %v13018_v32  ;;  %v13019_v21 = vld [vmem:[#allocation117_spill] sm:$0xff] }
 0xa82   : > { %13016 = vst [vmem:[#allocation22_spill] sm:$0xff] %v10582_v17  ;;  %v6892_v42 = vpop.eup %6891  ;;  %v3965_v48 = vadd.f32 %v6884_v56, %v3964_v54  ;;  %v3987_v54 = vand.u32 2147483648, %v10545_v26  ;;  %v3985_v63 = vand.u32 2147483647, %v10545_v26  ;;  %v4147_v55 = vmul.f32 %v10315_v25, %v3477_v24  ;;  %v13022_v25 = vld [vmem:[#allocation131_spill] sm:$0xff] }
 0xa83   : > { %v3977_v15 = vmul.f32 %v6892_v42, %v10545_v26  ;;  %6895 = vrcp.f32 %v10580_v30  ;;  %v3432_v7 = vpop.f32.mrf.mxu2  ;;  %vm3982_vm2 = vweird.f32 %v6892_v42  ;;  %vm3981_vm4 = vweird.f32 %v10545_v26 }
 0xa84   : > { %v10596_v46 = vpop.f32.mrf.mxu3  ;;  %v3969_v41 = vsel %vm3968_vm0, %v6884_v56, %v3965_v48  ;;  %6897 = vpow2.f32 %v6394_v35  ;;  %v3433_v44 = vadd.f32 %v3432_v7, %v8452_v40  ;;  %v3762_v7 = vmul.f32 %v10578_v6, %v10495_v27  ;;  %vm3983_vm5 = vmor %vm3981_vm4, %vm3982_vm2 }
 0xa85   : > { %6899 = vpow2.f32 %v6385_v10  ;;  %v3974_v49 = vsel %vm3971_vm1, %v3973_v58, %v3969_v41  ;;  %v3978_v37 = vsub.f32 1.0, %v3977_v15  ;;  %4913 = vmatpush.bf16.msrb.mxu1 %v13019_v21  ;;  %v6894_v36 = vpop.eup %6893  ;;  %v10607_v10 = vpack.c.bf16 %v10582_v17, %v10541_v20 }
 0xa86   : > { %v4193_v9 = vsub.f32 1.0, %v3974_v49  ;;  %v3829_v16 = vadd.f32 %v3433_v44, %v10262_v59  ;;  %6901 = vtanh.f32 %v4162_v14  ;;  %v4225_v24 = vmul.f32 %v3974_v49, %v13022_v25  ;;  %v13023_v14 = vld [vmem:[#allocation42_spill] sm:$0xff]  ;;  %v13025_v44 = vld [vmem:[#allocation119_spill] sm:$0xff] }
 0xa87   : > { %v3979_v56 = vmul.f32 %v6892_v42, %v3978_v37  ;;  %4507 = vmatmul.bf16.gmra.mxu1 %v10607_v10  ;;  %v4163_v49 = vadd.f32 %v4147_v55, %v13023_v14  ;;  %vm3986_vm6 = vcmp.eq.f32.partialorder %v3985_v63, 8.507059e+37  ;;  %v13028_v55 = vld [vmem:[#allocation40_spill] sm:$0xff]  ;;  %v4002_v63 = vand.u32 2147483648, %v10580_v30 }
 0xa88   : > { %v4209_v48 = vmul.f32 %v6894_v36, %v4193_v9  ;;  %v6395_v15 = vmul.f32 -1.442695, %v3829_v16  ;;  %v3988_v36 = vor.u32 1.1754944e-38, %v3987_v54  ;;  %v3254_v16 = vadd.f32 %v13028_v55, %v8349_v29 }
 0xa89   : > { %v6896_v35 = vpop.eup %6895  ;;  %v3980_v58 = vadd.f32 %v6892_v42, %v3979_v56  ;;  %4914 = vmatpush.bf16.msrb.mxu1 %v13025_v44  ;;  %v3479_v45 = vadd.f32 %v10551_v43, %v8821_v19  ;;  %v13030_v44 = vld [vmem:[#allocation29_spill] sm:$0xff]  ;;  %vm3996_vm9 = vweird.f32 %v10580_v30  ;;  %v4003_v20 = vor.u32 1.1754944e-38, %v4002_v63 }
 0xa8a   : > { %v6898_v41 = vpop.eup %6897  ;;  %v3992_v32 = vmul.f32 %v6896_v35, %v10580_v30  ;;  %v10629_v37 = vadd.f32 %v4225_v24, %v4209_v48  ;;  %6903 = vpow2.f32 %v6395_v15  ;;  %vm3997_vm8 = vweird.f32 %v6896_v35 }
 0xa8b   : > { %v10632_v26 = vpop.eup %6899  ;;  %v3984_v21 = vsel %vm3983_vm5, %v6892_v42, %v3980_v58  ;;  %v10634_v9 = vadd.f32 1.0, %v6898_v41  ;;  %v3434_v56 = vpop.f32.mrf.mxu2  ;;  %v4000_v15 = vand.u32 2147483647, %v10580_v30  ;;  %vm3998_vm10 = vmor %vm3996_vm9, %vm3997_vm8  ;;  %vm3767_vm12 = vweird.f32 %v10578_v6 }
 0xa8c   : > { %13024 = vst [vmem:[#allocation23_spill] sm:$0xff] %v10629_v37  ;;  %v3989_v48 = vsel %vm3986_vm6, %v3988_v36, %v3984_v21  ;;  %v3993_v25 = vsub.f32 1.0, %v3992_v32  ;;  %v3435_v24 = vadd.f32 %v3434_v56, %v8452_v40  ;;  %v10645_v14 = vpop.f32.mrf.mxu3  ;;  %v6902_v39 = vpop.eup %6901  ;;  %v13029_v36 = vld [vmem:[#allocation121_spill] sm:$0xff]  ;;  %v3763_v56 = vsub.f32 1.0, %v3762_v7  ;;  %v13033_v7 = vld [vmem:[#allocation123_spill] sm:$0xff] }
 0xa8d   : > { %v4194_v42 = vsub.f32 1.0, %v3989_v48  ;;  %6905 = vrcp.f32 %v10634_v9  ;;  %4915 = vmatpush.bf16.msrb.mxu1 %v13029_v36  ;;  %v4226_v21 = vmul.f32 %v3989_v48, %v13030_v44  ;;  %vm4001_vm11 = vcmp.eq.f32.partialorder %v4000_v15, 8.507059e+37 }
 0xa8e   : > { %v3994_v58 = vmul.f32 %v6896_v35, %v3993_v25  ;;  %v3830_v41 = vadd.f32 %v3435_v24, %v10290_v12  ;;  %6907 = vtanh.f32 %v4163_v49  ;;  %v13031_v25 = vld [vmem:[#allocation34_spill] sm:$0xff]  ;;  %v4148_v12 = vmul.f32 %v10357_v1, %v3479_v45 }
 0xa8f   : > { %v4210_v32 = vmul.f32 %v6902_v39, %v4194_v42  ;;  %6909 = vrcp.f32 %v10591_v0  ;;  %v3516_v17 = vadd.f32 %v13031_v25, %v3254_v16  ;;  %v3482_v39 = vadd.f32 %v10596_v46, %v8821_v19 }
 0xa90   : > { %v3995_v55 = vadd.f32 %v6896_v35, %v3994_v58  ;;  %v6396_v43 = vmul.f32 -1.442695, %v3830_v41  ;;  %v6904_v59 = vpop.eup %6903  ;;  %v3764_v16 = vmul.f32 %v10578_v6, %v3763_v56  ;;  %vm3766_vm13 = vweird.f32 %v10495_v27 }
 0xa91   : > { %v10659_v24 = vadd.f32 %v4226_v21, %v4210_v32  ;;  %v10661_v49 = vadd.f32 1.0, %v6904_v59  ;;  %4916 = vmatpush.bf16.msrb.mxu1 %v13033_v7  ;;  %v13034_v59 = vsel %vm10613_vm3, %v10455_v50, %v10585_v8  ;;  %v3785_v15 = vand.u32 2147483647, %v10591_v0  ;;  %v13035_v21 = vld [vmem:[#allocation132_spill] sm:$0xff]  ;;  %vm10722_vm2 = vmor %vm3766_vm13, %vm3767_vm12 }
 0xa92   : > { %v3999_v42 = vsel %vm3998_vm10, %v6896_v35, %v3995_v55  ;;  %6911 = vpow2.f32 %v6396_v43  ;;  %v4164_v35 = vadd.f32 %v4148_v12, %v10195_v47  ;;  %v3787_v62 = vand.u32 2147483648, %v10591_v0 }
 0xa93   : > { %13032 = vst [vmem:[#allocation24_spill] sm:$0xff] %v10659_v24  ;;  %v6906_v48 = vpop.eup %6905  ;;  %v4004_v30 = vsel %vm4001_vm11, %v4003_v20, %v3999_v42  ;;  %v3437_v58 = vpop.f32.mrf.mxu2  ;;  %6913 = vrcp.f32 %v10661_v49  ;;  %v10678_v20 = vsel %vm10638_vm7, %v10486_v22, %v13034_v59  ;;  %v10684_v45 = vpack.c.bf16 %v10659_v24, %v10629_v37 }
 0xa94   : > { %v4195_v1 = vsub.f32 1.0, %v4004_v30  ;;  %v4007_v63 = vmul.f32 %v6906_v48, %v10634_v9  ;;  %v6908_v46 = vpop.eup %6907  ;;  %v6386_v50 = vmul.f32 -1.442695, %v3516_v17  ;;  %v3438_v22 = vadd.f32 %v3437_v58, %v8452_v40  ;;  %v10691_v36 = vpop.f32.mrf.mxu3 }
 0xa95   : > { %v10688_v41 = vpop.eup %6909  ;;  %v4017_v32 = vand.u32 2147483648, %v10634_v9  ;;  %v4149_v47 = vmul.f32 %v10399_v34, %v3482_v39  ;;  %v10696_v44 = vadd.f32 %v10578_v6, %v3764_v16  ;;  %v4227_v56 = vmul.f32 %v4004_v30, %v13035_v21 }
 0xa96   : > { %v4211_v8 = vmul.f32 %v6908_v46, %v4195_v1  ;;  %v4008_v54 = vsub.f32 1.0, %v4007_v63  ;;  %vm4012_vm14 = vweird.f32 %v6906_v48  ;;  %v4015_v17 = vand.u32 2147483647, %v10634_v9 }
 0xa97   : > { %v3831_v25 = vadd.f32 %v3438_v22, %v10329_v28  ;;  %v10702_v12 = vadd.f32 1.0, %v10632_v26  ;;  %6915 = vtanh.f32 %v4164_v35  ;;  %4512 = vmatmul.bf16.gmra.mxu1 %v10684_v45  ;;  %vm4011_vm15 = vweird.f32 %v10634_v9 }
 0xa98   : > { %v6912_v55 = vpop.eup %6911  ;;  %v4009_v43 = vmul.f32 %v6906_v48, %v4008_v54  ;;  %v10707_v34 = vadd.f32 %v4227_v56, %v4211_v8  ;;  %v3777_v58 = vmul.f32 %v10688_v41, %v10591_v0  ;;  %vm4013_vm0 = vmor %vm4011_vm15, %vm4012_vm14  ;;  %v4018_v28 = vor.u32 1.1754944e-38, %v4017_v32 }
 0xa99   : > { %v10704_v42 = vadd.f32 1.0, %v6912_v55  ;;  %v6914_v7 = vpop.eup %6913  ;;  %v6397_v39 = vmul.f32 -1.442695, %v3831_v25  ;;  %v4165_v16 = vadd.f32 %v4149_v47, %v10231_v3  ;;  %vm4016_vm1 = vcmp.eq.f32.partialorder %v4015_v17, 8.507059e+37 }
 0xa9a   : > { %13036 = vst [vmem:[#allocation25_spill] sm:$0xff] %v10707_v34  ;;  %v4010_v30 = vadd.f32 %v6906_v48, %v4009_v43  ;;  %v4022_v26 = vmul.f32 %v6914_v7, %v10661_v49  ;;  %v3484_v59 = vadd.f32 %v10645_v14, %v8821_v19  ;;  %v3769_v14 = vsel %vm10722_vm2, %v10578_v6, %v10696_v44  ;;  %v13039_v43 = vld [vmem:[#allocation137_spill] sm:$0xff] }
 0xa9b   : > { %6917 = vrcp.f32 %v10704_v42  ;;  %v3439_v1 = vpop.f32.mrf.mxu2  ;;  %vm4027_vm3 = vweird.f32 %v6914_v7  ;;  %v4030_v32 = vand.u32 2147483647, %v10661_v49  ;;  %vm4026_vm4 = vweird.f32 %v10661_v49 }
 0xa9c   : > { %v4014_v63 = vsel %vm4013_vm0, %v6906_v48, %v4010_v30  ;;  %6919 = vpow2.f32 %v6397_v39  ;;  %v4023_v46 = vsub.f32 1.0, %v4022_v26  ;;  %v3440_v35 = vadd.f32 %v3439_v1, %v8452_v40  ;;  %v3488_v55 = vpop.f32.mrf.mxu3  ;;  %vm4028_vm5 = vmor %vm4026_vm4, %vm4027_vm3 }
 0xa9d   : > { %6921 = vpow2.f32 %v6386_v50  ;;  %v4019_v9 = vsel %vm4016_vm1, %v4018_v28, %v4014_v63  ;;  %v4032_v48 = vand.u32 2147483648, %v10661_v49  ;;  %v3778_v50 = vsub.f32 1.0, %v3777_v58  ;;  %v6916_v54 = vpop.eup %6915 }
 0xa9e   : > { %v4196_v8 = vsub.f32 1.0, %v4019_v9  ;;  %v4024_v22 = vmul.f32 %v6914_v7, %v4023_v46  ;;  %v3832_v47 = vadd.f32 %v3440_v35, %v10364_v18  ;;  %6923 = vtanh.f32 %v4165_v16 }
 0xa9f   : > { %v4150_v56 = vmul.f32 %v10446_v57, %v3484_v59  ;;  %v4228_v17 = vmul.f32 %v4019_v9, %v13039_v43  ;;  %6925 = vrcp.f32 %v10702_v12  ;;  %v4033_v28 = vor.u32 1.1754944e-38, %v4032_v48  ;;  %v13044_v43 = vld [vmem:[#allocation127_spill] sm:$0xff] }
 0xaa0   : > { %v4212_v21 = vmul.f32 %v6916_v54, %v4196_v8  ;;  %v4025_v30 = vadd.f32 %v6914_v7, %v4024_v22  ;;  %v6398_v39 = vmul.f32 -1.442695, %v3832_v47  ;;  %v3779_v16 = vmul.f32 %v10688_v41, %v3778_v50 }
 0xaa1   : > { %v6918_v25 = vpop.eup %6917  ;;  %vm4031_vm6 = vcmp.eq.f32.partialorder %v4030_v32, 8.507059e+37  ;;  %v4166_v46 = vadd.f32 %v4150_v56, %v10274_v11  ;;  %v13041_v8 = vand.u32 2147483647, %v10495_v27  ;;  %vm3781_vm8 = vweird.f32 %v10591_v0 }
 0xaa2   : > { %v6920_v58 = vpop.eup %6919  ;;  %v4037_v26 = vmul.f32 %v6918_v25, %v10704_v42  ;;  %v10738_v18 = vadd.f32 %v4228_v17, %v4212_v21  ;;  %v4029_v1 = vsel %vm4028_vm5, %v6914_v7, %v4025_v30  ;;  %6927 = vpow2.f32 %v6398_v39 }
 0xaa3   : > { %v6922_v57 = vpop.eup %6921  ;;  %v10741_v63 = vadd.f32 1.0, %v6920_v58  ;;  %v3442_v59 = vpop.f32.mrf.mxu2  ;;  %v4034_v9 = vsel %vm4031_vm6, %v4033_v28, %v4029_v1  ;;  %vm10747_vm7 = vcmp.eq.f32.partialorder %v13041_v8, 8.507059e+37  ;;  %v4047_v50 = vand.u32 2147483648, %v10704_v42 }
 0xaa4   : > { %13040 = vst [vmem:[#allocation26_spill] sm:$0xff] %v10738_v18  ;;  %v4038_v49 = vsub.f32 1.0, %v4037_v26  ;;  %v3443_v35 = vadd.f32 %v3442_v59, %v8452_v40  ;;  %v4197_v7 = vsub.f32 1.0, %v4034_v9  ;;  %v3487_v54 = vadd.f32 %v10691_v36, %v8821_v19  ;;  %v6924_v22 = vpop.eup %6923 }
 0xaa5   : > { %6929 = vrcp.f32 %v10741_v63  ;;  %vm4042_vm9 = vweird.f32 %v6918_v25  ;;  %v4045_v32 = vand.u32 2147483647, %v10704_v42  ;;  %v10758_v47 = vpop.eup %6925  ;;  %v10762_v56 = vpack.c.bf16 %v10738_v18, %v10707_v34 }
 0xaa6   : > { %v4039_v11 = vmul.f32 %v6918_v25, %v4038_v49  ;;  %v3833_v27 = vadd.f32 %v3443_v35, %v10412_v61  ;;  %v4213_v21 = vmul.f32 %v6924_v22, %v4197_v7  ;;  %vm3782_vm10 = vweird.f32 %v10688_v41 }
 0xaa7   : > { %v4229_v17 = vmul.f32 %v4034_v9, %v13044_v43  ;;  %vm4041_vm11 = vweird.f32 %v10704_v42  ;;  %6931 = vtanh.f32 %v4166_v46  ;;  %v4048_v58 = vor.u32 1.1754944e-38, %v4047_v50  ;;  %4517 = vmatmul.bf16.gmra.mxu1 %v10762_v56  ;;  %v3491_v42 = vpop.f32.mrf.mxu3  ;;  %v13046_v46 = vld [vmem:[#allocation126_spill] sm:$0xff]  ;;  %vm10802_vm14 = vmor %vm3781_vm8, %vm3782_vm10 }
 0xaa8   : > { %v4040_v36 = vadd.f32 %v6918_v25, %v4039_v11  ;;  %v6399_v30 = vmul.f32 -1.442695, %v3833_v27  ;;  %v6928_v39 = vpop.eup %6927  ;;  %vm4043_vm12 = vmor %vm4041_vm11, %vm4042_vm9  ;;  %v4151_v61 = vmul.f32 %v10558_v51, %v3487_v54  ;;  %v10770_v28 = vadd.f32 %v10688_v41, %v3779_v16 }
 0xaa9   : > { %v10772_v26 = vadd.f32 %v4229_v17, %v4213_v21  ;;  %vm4046_vm13 = vcmp.eq.f32.partialorder %v4045_v32, 8.507059e+37  ;;  %v10774_v59 = vadd.f32 1.0, %v6928_v39  ;;  %v10776_v49 = vadd.f32 1.0, %v6922_v57 }
 0xaaa   : > { %v4044_v1 = vsel %vm4043_vm12, %v6918_v25, %v4040_v36  ;;  %6933 = vpow2.f32 %v6399_v30  ;;  %v10780_v35 = vadd.f32 %v13046_v46, %v8446_v2  ;;  %v3489_v8 = vadd.f32 %v3488_v55, %v8821_v19  ;;  %v13049_v30 = vld [vmem:[#allocation30_spill] sm:$0xff] }
 0xaab   : > { %13045 = vst [vmem:[#allocation27_spill] sm:$0xff] %v10772_v26  ;;  %v6930_v9 = vpop.eup %6929  ;;  %v4049_v51 = vsel %vm4046_vm13, %v4048_v58, %v4044_v1  ;;  %v3444_v16 = vpop.f32.mrf.mxu2  ;;  %6935 = vrcp.f32 %v10774_v59  ;;  %v10787_v25 = vor.u32 1.1754944e-38, %v3787_v62  ;;  %v4167_v57 = vadd.f32 %v4151_v61, %v10305_v33 }
 0xaac   : > { %v4198_v7 = vsub.f32 1.0, %v4049_v51  ;;  %v4052_v50 = vmul.f32 %v6930_v9, %v10741_v63  ;;  %v3774_v55 = vsel %vm10747_vm7, %v10571_v38, %v3769_v14  ;;  %v3792_v33 = vmul.f32 %v10758_v47, %v10702_v12 }
 0xaad   : > { %v3800_v62 = vand.u32 2147483647, %v10702_v12  ;;  %v6932_v3 = vpop.eup %6931  ;;  %v3445_v6 = vadd.f32 %v3444_v16, %v8452_v40  ;;  %v3784_v38 = vsel %vm10802_vm14, %v10688_v41, %v10770_v28  ;;  %v3802_v44 = vand.u32 2147483648, %v10702_v12 }
 0xaae   : > { %v4053_v22 = vsub.f32 1.0, %v4052_v50  ;;  %6937 = vrcp.f32 %v10776_v49  ;;  %v4214_v14 = vmul.f32 %v6932_v3, %v4198_v7  ;;  %v4062_v48 = vand.u32 2147483648, %v10741_v63 }
 0xaaf   : > { %v4152_v11 = vmul.f32 %v10678_v20, %v3489_v8  ;;  %vm4057_vm15 = vweird.f32 %v6930_v9  ;;  %v4060_v21 = vand.u32 2147483647, %v10741_v63  ;;  %v3834_v43 = vadd.f32 %v3445_v6, %v10459_v31  ;;  %v3493_v50 = vpop.f32.mrf.mxu3 }
 0xab0   : > { %v6934_v32 = vpop.eup %6933  ;;  %v4054_v27 = vmul.f32 %v6930_v9, %v4053_v22  ;;  %6939 = vtanh.f32 %v4167_v57  ;;  %v3793_v36 = vsub.f32 1.0, %v3792_v33  ;;  %v4230_v39 = vmul.f32 %v4049_v51, %v13049_v30 }
 0xab1   : > { %v10820_v17 = vadd.f32 1.0, %v6934_v32  ;;  %v6936_v58 = vpop.eup %6935  ;;  %vm4056_vm0 = vweird.f32 %v10741_v63  ;;  %v3492_v1 = vadd.f32 %v3491_v42, %v8821_v19  ;;  %v6400_v20 = vmul.f32 -1.442695, %v3834_v43 }
 0xab2   : > { %v4055_v61 = vadd.f32 %v6930_v9, %v4054_v27  ;;  %vm4058_vm1 = vmor %vm4056_vm0, %vm4057_vm15  ;;  %v4063_v46 = vor.u32 1.1754944e-38, %v4062_v48  ;;  %v4067_v8 = vmul.f32 %v6936_v58, %v10774_v59  ;;  %v10827_v16 = vadd.f32 %v4230_v39, %v4214_v14 }
 0xab3   : > { %6941 = vrcp.f32 %v10820_v17  ;;  %v3447_v31 = vpop.f32.mrf.mxu2  ;;  %vm4061_vm2 = vcmp.eq.f32.partialorder %v4060_v21, 8.507059e+37  ;;  %v4168_v51 = vadd.f32 %v4152_v11, %v10347_v4  ;;  %vm3797_vm3 = vweird.f32 %v10758_v47 }
 0xab4   : > { %13050 = vst [vmem:[#allocation80_spill] sm:$0xff] %v10827_v16  ;;  %v4059_v7 = vsel %vm4058_vm1, %v6930_v9, %v4055_v61  ;;  %6943 = vpow2.f32 %v6400_v20  ;;  %v10831_v63 = vpop.eup %6937  ;;  %v4068_v57 = vsub.f32 1.0, %v4067_v8  ;;  %v3448_v33 = vadd.f32 %v3447_v31, %v8452_v40  ;;  %v3346_v61 = vpop.f32.mrf.mxu0 }
 0xab5   : > { %v4064_v42 = vsel %vm4061_vm2, %v4063_v46, %v4059_v7  ;;  %v3794_v3 = vmul.f32 %v10758_v47, %v3793_v36  ;;  %v4077_v6 = vand.u32 2147483648, %v10774_v59  ;;  %v4075_v9 = vand.u32 2147483647, %v10774_v59 }
 0xab6   : > { %v4199_v22 = vsub.f32 1.0, %v4064_v42  ;;  %v4153_v14 = vmul.f32 %v3774_v55, %v3492_v1  ;;  %vm10839_vm4 = vcmp.eq.f32.partialorder %v3785_v15, 8.507059e+37  ;;  %vm3796_vm5 = vweird.f32 %v10702_v12  ;;  %v6940_v48 = vpop.eup %6939  ;;  %v13053_v15 = vld [vmem:[#allocation133_spill] sm:$0xff] }
 0xab7   : > { %v4069_v11 = vmul.f32 %v6936_v58, %v4068_v57  ;;  %vm4072_vm6 = vweird.f32 %v6936_v58  ;;  %v3835_v32 = vadd.f32 %v3448_v33, %v10563_v13  ;;  %v10847_v27 = vpack.c.bf16 %v10827_v16, %v10772_v26  ;;  %vm10880_vm11 = vmor %vm3796_vm5, %vm3797_vm3 }
 0xab8   : > { %v4215_v21 = vmul.f32 %v6940_v48, %v4199_v22  ;;  %6945 = vtanh.f32 %v4168_v51  ;;  %v3807_v0 = vmul.f32 %v10831_v63, %v10776_v49  ;;  %v4231_v55 = vmul.f32 %v4064_v42, %v13053_v15 }
 0xab9   : > { %v6942_v43 = vpop.eup %6941  ;;  %vm4071_vm7 = vweird.f32 %v10774_v59  ;;  %v4070_v36 = vadd.f32 %v6936_v58, %v4069_v11  ;;  %v6401_v30 = vmul.f32 -1.442695, %v3835_v32  ;;  %v3795_v39 = vadd.f32 %v10758_v47, %v3794_v3  ;;  %4522 = vmatmul.bf16.gmra.mxu1 %v10847_v27 }
 0xaba   : > { %v6944_v13 = vpop.eup %6943  ;;  %vm4073_vm8 = vmor %vm4071_vm7, %vm4072_vm6  ;;  %v4078_v1 = vor.u32 1.1754944e-38, %v4077_v6  ;;  %v4082_v20 = vmul.f32 %v6942_v43, %v10820_v17  ;;  %v4169_v46 = vadd.f32 %v4153_v14, %v10381_v52  ;;  %v10858_v8 = vadd.f32 %v4231_v55, %v4215_v21 }
 0xabb   : > { %v4074_v31 = vsel %vm4073_vm8, %v6936_v58, %v4070_v36  ;;  %vm4076_vm9 = vcmp.eq.f32.partialorder %v4075_v9, 8.507059e+37  ;;  %v10860_v59 = vadd.f32 1.0, %v6944_v13  ;;  %6947 = vpow2.f32 %v6401_v30  ;;  %v3449_v7 = vpop.f32.mrf.mxu2  ;;  %v3496_v9 = vpop.f32.mrf.mxu3 }
 0xabc   : > { %13054 = vst [vmem:[#allocation83_spill] sm:$0xff] %v10858_v8  ;;  %v4079_v51 = vsel %vm4076_vm9, %v4078_v1, %v4074_v31  ;;  %v4083_v42 = vsub.f32 1.0, %v4082_v20  ;;  %v3450_v57 = vadd.f32 %v3449_v7, %v8452_v40  ;;  %v3808_v33 = vsub.f32 1.0, %v3807_v0  ;;  %v3349_v1 = vpop.f32.mrf.mxu0 }
 0xabd   : > { %v4200_v3 = vsub.f32 1.0, %v4079_v51  ;;  %v4092_v22 = vand.u32 2147483648, %v10820_v17  ;;  %6949 = vrcp.f32 %v10860_v59  ;;  %v3494_v52 = vadd.f32 %v3493_v50, %v8821_v19 }
 0xabe   : > { %v6946_v6 = vpop.eup %6945  ;;  %v4084_v14 = vmul.f32 %v6942_v43, %v4083_v42  ;;  %vm4087_vm10 = vweird.f32 %v6942_v43  ;;  %v4090_v58 = vand.u32 2147483647, %v10820_v17  ;;  %v3836_v48 = vadd.f32 %v3450_v57, %v10780_v35  ;;  %v13057_v35 = vld [vmem:[#allocation134_spill] sm:$0xff]  ;;  %v13059_v57 = vld [vmem:[#allocation31_spill] sm:$0xff] }
 0xabf   : > { %v4216_v11 = vmul.f32 %v6946_v6, %v4200_v3  ;;  %6951 = vtanh.f32 %v4169_v46  ;;  %v3789_v32 = vsel %vm10839_vm4, %v10787_v25, %v3784_v38  ;;  %v4232_v21 = vmul.f32 %v4079_v51, %v13057_v35 }
 0xac0   : > { %vm4086_vm12 = vweird.f32 %v10820_v17  ;;  %v4085_v54 = vadd.f32 %v6942_v43, %v4084_v14  ;;  %v3799_v41 = vsel %vm10880_vm11, %v10758_v47, %v3795_v39  ;;  %v6402_v28 = vmul.f32 -1.442695, %v3836_v48 }
 0xac1   : > { %v6948_v4 = vpop.eup %6947  ;;  %vm4088_vm13 = vmor %vm4086_vm12, %vm4087_vm10  ;;  %v4093_v25 = vor.u32 1.1754944e-38, %v4092_v22  ;;  %v4154_v38 = vmul.f32 %v3789_v32, %v3494_v52  ;;  %v3809_v0 = vmul.f32 %v10831_v63, %v3808_v33  ;;  %v10890_v15 = vadd.f32 %v4232_v21, %v4216_v11 }
 0xac2   : > { %v4089_v55 = vsel %vm4088_vm13, %v6942_v43, %v4085_v54  ;;  %vm4091_vm14 = vcmp.eq.f32.partialorder %v4090_v58, 8.507059e+37  ;;  %v10892_v36 = vadd.f32 1.0, %v6948_v4  ;;  %6953 = vpow2.f32 %v6402_v28 }
 0xac3   : > { %13058 = vst [vmem:[#allocation87_spill] sm:$0xff] %v10890_v15  ;;  %v6950_v17 = vpop.eup %6949  ;;  %v3347_v30 = vadd.f32 %v3346_v61, %v12852_v53  ;;  %v4094_v13 = vsel %vm4091_vm14, %v4093_v25, %v4089_v55  ;;  %v3497_v47 = vadd.f32 %v3496_v9, %v8821_v19  ;;  %v3803_v39 = vor.u32 1.1754944e-38, %v3802_v44  ;;  %v3498_v14 = vpop.f32.mrf.mxu3 }
 0xac4   : > { %v4201_v20 = vsub.f32 1.0, %v4094_v13  ;;  %v4097_v46 = vmul.f32 %v6950_v17, %v10860_v59  ;;  %6955 = vrcp.f32 %v10892_v36  ;;  %vm3801_vm15 = vcmp.eq.f32.partialorder %v3800_v62, 8.507059e+37 }
 0xac5   : > { %v6952_v43 = vpop.eup %6951  ;;  %v4170_v31 = vadd.f32 %v4154_v38, %v3347_v30  ;;  %v3804_v7 = vsel %vm3801_vm15, %v3803_v39, %v3799_v41  ;;  %vm3812_vm0 = vweird.f32 %v10831_v63  ;;  %v10905_v61 = vpack.c.bf16 %v10890_v15, %v10858_v8 }
 0xac6   : > { %v4217_v51 = vmul.f32 %v6952_v43, %v4201_v20  ;;  %v4098_v44 = vsub.f32 1.0, %v4097_v46  ;;  %v3810_v42 = vadd.f32 %v10831_v63, %v3809_v0  ;;  %v4233_v33 = vmul.f32 %v4094_v13, %v13059_v57 }
 0xac7   : > { %v4107_v3 = vand.u32 2147483648, %v10860_v59  ;;  %v4155_v22 = vmul.f32 %v3804_v7, %v3497_v47  ;;  %vm3811_vm1 = vweird.f32 %v10776_v49  ;;  %v3817_v12 = vand.u32 2147483648, %v10776_v49 }
 0xac8   : > { %v6954_v62 = vpop.eup %6953  ;;  %v4099_v52 = vmul.f32 %v6950_v17, %v4098_v44  ;;  %vm4102_vm2 = vweird.f32 %v6950_v17  ;;  %v4105_v6 = vand.u32 2147483647, %v10860_v59  ;;  %v10913_v58 = vadd.f32 %v4233_v33, %v4217_v51  ;;  %vm10919_vm3 = vmor %vm3811_vm1, %vm3812_vm0 }
 0xac9   : > { %6957 = vtanh.f32 %v4170_v31  ;;  %v10915_v9 = vadd.f32 1.0, %v6954_v62  ;;  %v3815_v11 = vand.u32 2147483647, %v10776_v49  ;;  %4527 = vmatmul.bf16.gmra.mxu1 %v10905_v61  ;;  %v3350_v50 = vadd.f32 %v3349_v1, %v12852_v53 }
 0xaca   : > { %13060 = vst [vmem:[#allocation90_spill] sm:$0xff] %v10913_v58  ;;  %v6956_v32 = vpop.eup %6955  ;;  %vm4101_vm4 = vweird.f32 %v10860_v59  ;;  %v4100_v35 = vadd.f32 %v6950_v17, %v4099_v52  ;;  %v3814_v21 = vsel %vm10919_vm3, %v10831_v63, %v3810_v42  ;;  %v4108_v54 = vor.u32 1.1754944e-38, %v4107_v3  ;;  %v3351_v59 = vpop.f32.mrf.mxu0 }
 0xacb   : > { %vm4103_vm5 = vmor %vm4101_vm4, %vm4102_vm2  ;;  %v4112_v41 = vmul.f32 %v6956_v32, %v10892_v36  ;;  %6959 = vrcp.f32 %v10915_v9  ;;  %v3499_v49 = vadd.f32 %v3498_v14, %v8821_v19  ;;  %vm4106_vm6 = vcmp.eq.f32.partialorder %v4105_v6, 8.507059e+37 }
 0xacc   : > { %v4104_v28 = vsel %vm4103_vm5, %v6950_v17, %v4100_v35  ;;  %v4171_v4 = vadd.f32 %v4155_v22, %v3350_v50  ;;  %v3818_v25 = vor.u32 1.1754944e-38, %v3817_v12  ;;  %vm3816_vm7 = vcmp.eq.f32.partialorder %v3815_v11, 8.507059e+37  ;;  %v13063_v17 = vld [vmem:[#allocation136_spill] sm:$0xff]  ;;  %v13065_v11 = vld [vmem:[#allocation135_spill] sm:$0xff] }
 0xacd   : > { %v4109_v38 = vsel %vm4106_vm6, %v4108_v54, %v4104_v28  ;;  %v4113_v0 = vsub.f32 1.0, %v4112_v41  ;;  %v4122_v30 = vand.u32 2147483648, %v10892_v36  ;;  %vm4117_vm8 = vweird.f32 %v6956_v32 }
 0xace   : > { %v4202_v55 = vsub.f32 1.0, %v4109_v38  ;;  %v3819_v63 = vsel %vm3816_vm7, %v3818_v25, %v3814_v21  ;;  %v4120_v39 = vand.u32 2147483647, %v10892_v36  ;;  %6961 = vtanh.f32 %v4171_v4  ;;  %v13067_v25 = vld [vmem:[#allocation32_spill] sm:$0xff] }
 0xacf   : > { %v6958_v13 = vpop.eup %6957  ;;  %v4114_v47 = vmul.f32 %v6956_v32, %v4113_v0  ;;  %v4156_v1 = vmul.f32 %v3819_v63, %v3499_v49  ;;  %v4234_v46 = vmul.f32 %v4109_v38, %v13063_v17  ;;  %v3352_v31 = vadd.f32 %v3351_v59, %v12852_v53  ;;  %v13069_v59 = vld [vmem:[#allocation57_spill] sm:$0xff]  ;;  %v13072_v63 = vld [vmem:[#allocation59_spill] sm:$0xff] }
 0xad0   : > { %v4218_v20 = vmul.f32 %v6958_v13, %v4202_v55  ;;  %vm4116_vm9 = vweird.f32 %v10892_v36  ;;  %v4123_v51 = vor.u32 1.1754944e-38, %v4122_v30  ;;  %vm4121_vm11 = vcmp.eq.f32.partialorder %v4120_v39, 8.507059e+37  ;;  %v13070_v55 = vld [vmem:[#allocation44_spill] sm:$0xff]  ;;  %v13071_v30 = vld [vmem:[#allocation58_spill] sm:$0xff]  ;;  %v13075_v39 = vld [vmem:[#allocation45_spill] sm:$0xff] }
 0xad1   : > { %v6960_v43 = vpop.eup %6959  ;;  %v4115_v7 = vadd.f32 %v6956_v32, %v4114_v47  ;;  %vm4118_vm10 = vmor %vm4116_vm9, %vm4117_vm8  ;;  %v4172_v33 = vadd.f32 %v4156_v1, %v3352_v31  ;;  %v4137_v62 = vand.u32 2147483648, %v10915_v9  ;;  %v4135_v14 = vand.u32 2147483647, %v10915_v9  ;;  %v13073_v13 = vld [vmem:[#allocation60_spill] sm:$0xff]  ;;  %v13074_v47 = vld [vmem:[#allocation62_spill] sm:$0xff] }
 0xad2   : > { %v4127_v44 = vmul.f32 %v6960_v43, %v10915_v9  ;;  %v10939_v42 = vadd.f32 %v4234_v46, %v4218_v20  ;;  %vm4132_vm12 = vweird.f32 %v6960_v43  ;;  %vm4131_vm13 = vweird.f32 %v10915_v9  ;;  %v13076_v1 = vld [vmem:[#allocation63_spill] sm:$0xff]  ;;  %v13077_v20 = vld [vmem:[#allocation64_spill] sm:$0xff]  ;;  %v13078_v17 = vld [vmem:[#allocation65_spill] sm:$0xff] }
 0xad3   : > { %v4119_v57 = vsel %vm4118_vm10, %v6956_v32, %v4115_v7  ;;  %6963 = vtanh.f32 %v4172_v33  ;;  %vm4133_vm14 = vmor %vm4131_vm13, %vm4132_vm12  ;;  %v4138_v35 = vor.u32 1.1754944e-38, %v4137_v62  ;;  %vm4136_vm15 = vcmp.eq.f32.partialorder %v4135_v14, 8.507059e+37  ;;  %v13079_v46 = vld [vmem:[#allocation46_spill] sm:$0xff]  ;;  %v13081_v31 = vld [vmem:[#allocation48_spill] sm:$0xff] }
 0xad4   : > { %13064 = vst [vmem:[#allocation94_spill] sm:$0xff] %v10939_v42  ;;  %v4124_v3 = vsel %vm4121_vm11, %v4123_v51, %v4119_v57  ;;  %v4128_v22 = vsub.f32 1.0, %v4127_v44  ;;  %v10944_v52 = vpack.c.bf16 %v10939_v42, %v10913_v58  ;;  %v6962_v36 = vpop.eup %6961  ;;  %v13082_v7 = vld [vmem:[#allocation49_spill] sm:$0xff]  ;;  %v13083_v51 = vld [vmem:[#allocation50_spill] sm:$0xff]  ;;  %v13084_v44 = vld [vmem:[#allocation51_spill] sm:$0xff] }
 0xad5   : > { %v4203_v12 = vsub.f32 1.0, %v4124_v3  ;;  %v4235_v32 = vmul.f32 %v4124_v3, %v13065_v11  ;;  %v13085_v33 = vld [vmem:[#allocation52_spill] sm:$0xff]  ;;  %v7192_v11 = vld [vmem:[%s7690_s1 + $0x30] sm:$0xff] }
 0xad6   : > { %v4129_v6 = vmul.f32 %v6960_v43, %v4128_v22 }
 0xad7   : > { %v4219_v48 = vmul.f32 %v6962_v36, %v4203_v12  ;;  %v13086_v12 = vld [vmem:[#allocation53_spill] sm:$0xff] }
 0xad8   : > { %v4130_v50 = vadd.f32 %v6960_v43, %v4129_v6  ;;  %v13087_v6 = vld [vmem:[#allocation54_spill] sm:$0xff] }
 0xad9   : > { %4532 = vmatmul.bf16.gmra.mxu1 %v10944_v52  ;;  %v10950_v21 = vadd.f32 %v4235_v32, %v4219_v48  ;;  %v6964_v28 = vpop.eup %6963 }
 0xada   : > { %v4134_v54 = vsel %vm4133_vm14, %v6960_v43, %v4130_v50  ;;  %v13080_v43 = vld [vmem:[#allocation47_spill] sm:$0xff] }
 0xadb   : > { %13066 = vst [vmem:[#allocation97_spill] sm:$0xff] %v10950_v21  ;;  %v4139_v41 = vsel %vm4136_vm15, %v4138_v35, %v4134_v54  ;;  %v13088_v50 = vld [vmem:[#allocation55_spill] sm:$0xff]  ;;  %v7193_v54 = vld [vmem:[%s7690_s1 + $0x38] sm:$0xff] }
 0xadc   : > { %v4204_v49 = vsub.f32 1.0, %v4139_v41  ;;  %v4236_v38 = vmul.f32 %v4139_v41, %v13067_v25  ;;  %v13089_v25 = vld [vmem:[#allocation56_spill] sm:$0xff] }
 0xade   : > { %v4220_v4 = vmul.f32 %v6964_v28, %v4204_v49  ;;  %v7194_v28 = vld [vmem:[%s7690_s1 + $0x40] sm:$0xff] }
 0xae0   : > { %v10953_v0 = vadd.f32 %v4236_v38, %v4220_v4 }
 0xae2   : > { %13068 = vst [vmem:[#allocation101_spill] sm:$0xff] %v10953_v0  ;;  %v10957_v9 = vpack.c.bf16 %v10953_v0, %v10950_v21 }
 0xae4   : > { %4261 = vmatpush.bf16.msra.mxu0 %v10957_v9 }
 0xae8   : > { %4262 = vmatpush.bf16.msra.mxu0 %v10944_v52 }
 0xae9   : > { %4537 = vmatmul.bf16.gmra.mxu1 %v10957_v9 }
 0xaec   : > { %4263 = vmatpush.bf16.msra.mxu0 %v10905_v61 }
 0xaf0   : > { %4264 = vmatpush.bf16.msra.mxu0 %v10847_v27 }
 0xaf4   : > { %4265 = vmatpush.bf16.msra.mxu0 %v10762_v56 }
 0xaf8   : > { %4266 = vmatpush.bf16.msra.mxu0 %v10684_v45 }
 0xafc   : > { %4267 = vmatpush.bf16.msra.mxu0 %v10607_v10 }
 0xb00   : > { %4268 = vmatpush.bf16.msra.mxu0 %v10500_v5 }
 0xb03   : > { %4269 = vmatmul.bf16.vlgmr.msra.gmra.mxu0 %v13070_v55 }
 0xb04   : > { %4860 = vmatpush.bf16.msrb.mxu0 %v13069_v59  ;;  %v7195_v59 = vld [vmem:[%s7690_s1 + $0x48] sm:$0xff] }
 0xb08   : > { %4861 = vmatpush.bf16.msrb.mxu0 %v13071_v30 }
 0xb0c   : > { %4862 = vmatpush.bf16.msrb.mxu0 %v13072_v63  ;;  %v7196_v63 = vld [vmem:[%s7690_s1 + $0x50] sm:$0xff] }
 0xb10   : > { %4863 = vmatpush.bf16.msrb.mxu0 %v13073_v13 }
 0xb13   : > { %4274 = vmatmul.bf16.gmra.mxu0 %v13075_v39 }
 0xb14   : > { %4864 = vmatpush.bf16.msrb.mxu0 %v13074_v47  ;;  %v13090_v47 = vld [vmem:[#allocation61_spill] sm:$0xff] }
 0xb18   : > { %4865 = vmatpush.bf16.msrb.mxu0 %v13076_v1  ;;  %v7197_v1 = vld [vmem:[%s7690_s1 + $0x58] sm:$0xff] }
 0xb1c   : > { %4866 = vmatpush.bf16.msrb.mxu0 %v13077_v20 }
 0xb20   : > { %4867 = vmatpush.bf16.msrb.mxu0 %v13078_v17 }
 0xb23   : > { %4279 = vmatmul.bf16.gmra.mxu0 %v13079_v46  ;;  %v7198_v46 = vld [vmem:[%s7690_s1 + $0x60] sm:$0xff] }
 0xb33   : > { %4284 = vmatmul.bf16.gmra.mxu0 %v13080_v43 }
 0xb43   : > { %4289 = vmatmul.bf16.gmra.mxu0 %v13081_v31  ;;  %v13091_v31 = vld [vmem:[#allocation66_spill] sm:$0xff] }
 0xb53   : > { %4294 = vmatmul.bf16.gmra.mxu0 %v13082_v7 }
 0xb63   : > { %4299 = vmatmul.bf16.gmra.mxu0 %v13083_v51  ;;  %v7199_v51 = vld [vmem:[%s7690_s1 + $0x68] sm:$0xff] }
 0xb73   : > { %4304 = vmatmul.bf16.gmra.mxu0 %v13084_v44 }
 0xb80   : > { %v10984_v57 = vpop.f32.mrf.mxu0 }
 0xb83   : > { %4309 = vmatmul.bf16.gmra.mxu0 %v13085_v33 }
 0xb88   : > { %v10987_v3 = vpop.f32.mrf.mxu0 }
 0xb90   : > { %v10989_v22 = vpop.f32.mrf.mxu0 }
 0xb93   : > { %4314 = vmatmul.bf16.gmra.mxu0 %v13086_v12  ;;  %v7200_v12 = vld [vmem:[%s7690_s1 + $0x70] sm:$0xff] }
 0xb98   : > { %v10992_v62 = vpop.f32.mrf.mxu0 }
 0xba0   : > { %v10994_v36 = vpop.f32.mrf.mxu0 }
 0xba3   : > { %4319 = vmatmul.bf16.gmra.mxu0 %v13087_v6 }
 0xba8   : > { %v10997_v14 = vpop.f32.mrf.mxu0 }
 0xbb0   : > { %v4285_v48 = vpop.f32.mrf.mxu0 }
 0xbb1   : > { %v4356_v32 = vmul.f32 %v7192_v11, %v4285_v48  ;;  %v13092_v48 = vld [vmem:[#allocation67_spill] sm:$0xff] }
 0xbb3   : > { %4324 = vmatmul.bf16.gmra.mxu0 %v13088_v50  ;;  %4394 = vadd.xlane.f32.xlu2 %v4356_v32  ;;  %v7201_v32 = vld [vmem:[%s7690_s1 + $0x78] sm:$0xff] }
 0xbb8   : > { %v4287_v35 = vpop.f32.mrf.mxu0 }
 0xbb9   : > { %v4357_v41 = vmul.f32 %v7193_v54, %v4287_v35 }
 0xbbb   : > { %4396 = vadd.xlane.f32.xlu0 %v4357_v41 }
 0xbc0   : > { %v4290_v49 = vpop.f32.mrf.mxu0 }
 0xbc1   : > { %v4358_v4 = vmul.f32 %v7194_v28, %v4290_v49 }
 0xbc3   : > { %4329 = vmatmul.bf16.gmra.mxu0 %v13089_v25  ;;  %4398 = vadd.xlane.f32.xlu1 %v4358_v4 }
 0xbc8   : > { %v4292_v38 = vpop.f32.mrf.mxu0 }
 0xbc9   : > { %v4359_v55 = vmul.f32 %v7195_v59, %v4292_v38  ;;  %v7202_v38 = vld [vmem:[%s7690_s1 + $0xb0] sm:$0xff] }
 0xbcb   : > { %4400 = vadd.xlane.f32.xlu2 %v4359_v55 }
 0xbd0   : > { %v4295_v30 = vpop.f32.mrf.mxu0 }
 0xbd1   : > { %v4360_v13 = vmul.f32 %v7196_v63, %v4295_v30  ;;  %v7203_v30 = vld [vmem:[%s7690_s1 + $0xb8] sm:$0xff] }
 0xbd3   : > { %4334 = vmatmul.bf16.gmra.mxu0 %v13090_v47  ;;  %4402 = vadd.xlane.f32.xlu0 %v4360_v13  ;;  %v7204_v47 = vld [vmem:[%s7690_s1 + $0xc0] sm:$0xff] }
 0xbd8   : > { %v4297_v39 = vpop.f32.mrf.mxu0 }
 0xbd9   : > { %v4361_v20 = vmul.f32 %v7197_v1, %v4297_v39 }
 0xbdb   : > { %4404 = vadd.xlane.f32.xlu1 %v4361_v20  ;;  %v7205_v20 = vld [vmem:[%s7690_s1 + $0xc8] sm:$0xff] }
 0xbe0   : > { %v4300_v17 = vpop.f32.mrf.mxu0 }
 0xbe1   : > { %v4362_v43 = vmul.f32 %v7198_v46, %v4300_v17 }
 0xbe3   : > { %4339 = vmatmul.bf16.gmra.mxu0 %v13091_v31  ;;  %4406 = vadd.xlane.f32.xlu2 %v4362_v43  ;;  %v7206_v43 = vld [vmem:[%s7690_s1 + $0xd0] sm:$0xff] }
 0xbe8   : > { %v4302_v7 = vpop.f32.mrf.mxu0 }
 0xbe9   : > { %v4363_v44 = vmul.f32 %v7199_v51, %v4302_v7 }
 0xbeb   : > { %4408 = vadd.xlane.f32.xlu0 %v4363_v44  ;;  %v7207_v44 = vld [vmem:[%s7690_s1 + $0xd8] sm:$0xff] }
 0xbf0   : > { %v4305_v33 = vpop.f32.mrf.mxu0 }
 0xbf1   : > { %v4364_v6 = vmul.f32 %v7200_v12, %v4305_v33 }
 0xbf3   : > { %4344 = vmatmul.bf16.gmra.mxu0 %v13092_v48  ;;  %4410 = vadd.xlane.f32.xlu1 %v4364_v6 }
 0xbf8   : > { %v4307_v11 = vpop.f32.mrf.mxu0 }
 0xbf9   : > { %v4365_v50 = vmul.f32 %v7201_v32, %v4307_v11  ;;  %v7208_v32 = vld [vmem:[%s7690_s1 + $0xe0] sm:$0xff] }
 0xbfb   : > { %4412 = vadd.xlane.f32.xlu2 %v4365_v50 }
 0xc00   : > { %v11014_v35 = vpop.f32.mrf.mxu0 }
 0xc03   : > { %4868 = vmatmul.bf16.vlgmr.msrb.gmra.mxu0 %v10500_v5 }
 0xc08   : > { %v11017_v54 = vpop.f32.mrf.mxu0 }
 0xc10   : > { %v11019_v41 = vpop.f32.mrf.mxu0 }
 0xc13   : > { %4873 = vmatmul.bf16.gmra.mxu0 %v10607_v10 }
 0xc18   : > { %v11022_v49 = vpop.f32.mrf.mxu0 }
 0xc20   : > { %v4320_v28 = vpop.f32.mrf.mxu0 }
 0xc23   : > { %4878 = vmatmul.bf16.gmra.mxu0 %v10684_v45 }
 0xc26   : > { %v11035_v7 = vpop.xlane.xlu2 %4394 }
 0xc28   : > { %v11025_v4 = vpop.f32.mrf.mxu0 }
 0xc2e   : > { %v4397_v6 = vpop.xlane.xlu0 %4396 }
 0xc30   : > { %v4325_v25 = vpop.f32.mrf.mxu0 }
 0xc31   : > { %v4372_v59 = vmul.f32 %v7202_v38, %v4325_v25 }
 0xc33   : > { %4883 = vmatmul.bf16.gmra.mxu0 %v10762_v56  ;;  %4426 = vadd.xlane.f32.xlu1 %v4372_v59 }
 0xc36   : > { %v4399_v12 = vpop.xlane.xlu1 %4398 }
 0xc38   : > { %v4327_v55 = vpop.f32.mrf.mxu0 }
 0xc39   : > { %v4373_v63 = vmul.f32 %v7203_v30, %v4327_v55  ;;  %v7209_v30 = vld [vmem:[%s7690_s1 + $0xe8] sm:$0xff] }
 0xc3b   : > { %4428 = vadd.xlane.f32.xlu2 %v4373_v63 }
 0xc3e   : > { %v4401_v48 = vpop.xlane.xlu2 %4400 }
 0xc40   : > { %v4330_v13 = vpop.f32.mrf.mxu0 }
 0xc41   : > { %v4374_v39 = vmul.f32 %v7204_v47, %v4330_v13 }
 0xc43   : > { %4888 = vmatmul.bf16.gmra.mxu0 %v10847_v27  ;;  %4430 = vadd.xlane.f32.xlu0 %v4374_v39 }
 0xc46   : > { %v4403_v38 = vpop.xlane.xlu0 %4402 }
 0xc48   : > { %v4332_v1 = vpop.f32.mrf.mxu0 }
 0xc49   : > { %v4375_v17 = vmul.f32 %v7205_v20, %v4332_v1  ;;  %v7210_v1 = vld [vmem:[%s7690_s1 + $0x170] sm:$0xff] }
 0xc4b   : > { %4432 = vadd.xlane.f32.xlu1 %v4375_v17  ;;  %v7211_v17 = vld [vmem:[%s7690_s1 + $0x178] sm:$0xff] }
 0xc4e   : > { %v4405_v25 = vpop.xlane.xlu1 %4404 }
 0xc50   : > { %v4335_v46 = vpop.f32.mrf.mxu0 }
 0xc51   : > { %v4376_v31 = vmul.f32 %v7206_v43, %v4335_v46 }
 0xc53   : > { %4893 = vmatmul.bf16.gmra.mxu0 %v10905_v61  ;;  %4434 = vadd.xlane.f32.xlu2 %v4376_v31  ;;  %v7212_v31 = vld [vmem:[%s7690_s1 + $0x168] sm:$0xff] }
 0xc56   : > { %v4407_v59 = vpop.xlane.xlu2 %4406 }
 0xc58   : > { %v4337_v51 = vpop.f32.mrf.mxu0 }
 0xc59   : > { %v4377_v33 = vmul.f32 %v7207_v44, %v4337_v51 }
 0xc5b   : > { %4436 = vadd.xlane.f32.xlu0 %v4377_v33  ;;  %v7213_v33 = vld [vmem:[%s7690_s1 + $0xf0] sm:$0xff] }
 0xc5e   : > { %v4409_v47 = vpop.xlane.xlu0 %4408 }
 0xc5f   : > { %v4459_v51 = vmul.f32 %v7212_v31, %v4409_v47  ;;  %v7220_v31 = vld [vmem:[%s7690_s1 + $0x20] sm:$0xff] }
 0xc60   : > { %v4340_v11 = vpop.f32.mrf.mxu0 }
 0xc61   : > { %v4378_v50 = vmul.f32 %v7208_v32, %v4340_v11  ;;  %v7214_v32 = vld [vmem:[%s7690_s1 + $0xa0] sm:$0xff] }
 0xc63   : > { %4898 = vmatmul.bf16.gmra.mxu0 %v10944_v52  ;;  %4438 = vadd.xlane.f32.xlu1 %v4378_v50  ;;  %v4370_v50 = vmul.f32 %v7214_v32, %v4320_v28  ;;  %v7218_v28 = vld [vmem:[%s7690_s1 + $0x148] sm:$0xff] }
 0xc66   : > { %v4411_v13 = vpop.xlane.xlu1 %4410 }
 0xc67   : > { %v4460_v20 = vmul.f32 %v7210_v1, %v4411_v13 }
 0xc68   : > { %v4342_v55 = vpop.f32.mrf.mxu0 }
 0xc69   : > { %v4379_v63 = vmul.f32 %v7209_v30, %v4342_v55  ;;  %v7215_v55 = vld [vmem:[%s7690_s1 + $0x160] sm:$0xff] }
 0xc6a   : > { %v4458_v30 = vmul.f32 %v7215_v55, %v4407_v59  ;;  %v7219_v59 = vld [vmem:[%s7690_s1 + $0xf8] sm:$0xff] }
 0xc6b   : > { %4440 = vadd.xlane.f32.xlu2 %v4379_v63  ;;  %v7216_v63 = vld [vmem:[%s7690_s1 + $0x158] sm:$0xff] }
 0xc6c   : > { %v4457_v13 = vmul.f32 %v7216_v63, %v4405_v25  ;;  %v4484_v47 = vpack.c.bf16 %v4459_v51, %v4458_v30  ;;  %v7222_v25 = vld [vmem:[%s7690_s1 + $0x140] sm:$0xff] }
 0xc6d   : > { %v4454_v51 = vmul.f32 %v7222_v25, %v4399_v12  ;;  %v7226_v12 = vld [vmem:[%s7690_s1] sm:$0xff] }
 0xc6e   : > { %v4413_v39 = vpop.xlane.xlu2 %4412  ;;  %v4350_v63 = vmul.f32 %v7226_v12, %v10984_v57  ;;  %v7231_v57 = vld [vmem:[%s7690_s1 + $0x98] sm:$0xff] }
 0xc6f   : > { %v4461_v46 = vmul.f32 %v7211_v17, %v4413_v39  ;;  %v7217_v39 = vld [vmem:[%s7690_s1 + $0x150] sm:$0xff]  ;;  %v4455_v17 = vmul.f32 %v7218_v28, %v4401_v48  ;;  %v7223_v48 = vld [vmem:[%s7690_s1 + $0x138] sm:$0xff]  ;;  %v7232_v28 = vld [vmem:[%s7690_s1 + $0x8] sm:$0xff] }
 0xc70   : > { %v4345_v43 = vpop.f32.mrf.mxu0  ;;  %v4456_v1 = vmul.f32 %v7217_v39, %v4403_v38  ;;  %v4453_v38 = vmul.f32 %v7223_v48, %v4397_v6  ;;  %v7229_v39 = vld [vmem:[%s7690_s1 + $0x90] sm:$0xff]  ;;  %v7238_v12 = vld [vmem:[%s7690_s1 + $0x1d8] sm:$0xff] }
 0xc71   : > { %v4485_v44 = vpack.c.bf16 %v4461_v46, %v4460_v20  ;;  %v4380_v11 = vmul.f32 %v7213_v33, %v4345_v43  ;;  %v7221_v33 = vld [vmem:[%s7690_s1 + $0x18] sm:$0xff]  ;;  %v4482_v32 = vpack.c.bf16 %v4455_v17, %v4454_v51  ;;  %v4351_v17 = vmul.f32 %v7232_v28, %v10987_v3  ;;  %v7234_v51 = vld [vmem:[%s7690_s1 + $0x1f0] sm:$0xff]  ;;  %v7242_v28 = vld [vmem:[%s7690_s1 + $0x1c8] sm:$0xff] }
 0xc72   : > { %v4483_v46 = vpack.c.bf16 %v4457_v13, %v4456_v1  ;;  %v7227_v13 = vld [vmem:[%s7690_s1 + $0xa8] sm:$0xff]  ;;  %v4368_v1 = vmul.f32 %v7229_v39, %v11019_v41  ;;  %v7240_v39 = vld [vmem:[%s7690_s1 + $0x120] sm:$0xff] }
 0xc73   : > { %4543 = vmatpush.bf16.msrb.mxu2 %v4485_v44  ;;  %4903 = vmatmul.bf16.gmra.mxu0 %v10957_v9  ;;  %v4354_v44 = vmul.f32 %v7220_v31, %v10994_v36 }
 0xc74   : > { %4422 = vadd.xlane.f32.xlu2 %v4370_v50  ;;  %4442 = vadd.xlane.f32.xlu0 %v4380_v11  ;;  %v4353_v11 = vmul.f32 %v7221_v33, %v10992_v62  ;;  %v7224_v50 = vld [vmem:[%s7690_s1 + $0x130] sm:$0xff]  ;;  %v7225_v62 = vld [vmem:[%s7690_s1 + $0x28] sm:$0xff] }
 0xc75   : > { %v4452_v36 = vmul.f32 %v7224_v50, %v11035_v7  ;;  %v4355_v30 = vmul.f32 %v7225_v62, %v10997_v14  ;;  %v7228_v7 = vld [vmem:[%s7690_s1 + $0x10] sm:$0xff]  ;;  %v7230_v14 = vld [vmem:[%s7690_s1 + $0x88] sm:$0xff]  ;;  %v7237_v62 = vld [vmem:[%s7690_s1 + $0x1e0] sm:$0xff] }
 0xc76   : > { %v4352_v6 = vmul.f32 %v7228_v7, %v10989_v22  ;;  %v7236_v50 = vld [vmem:[%s7690_s1 + $0x1e8] sm:$0xff]  ;;  %v7239_v7 = vld [vmem:[%s7690_s1 + $0x1d0] sm:$0xff] }
 0xc77   : > { %4544 = vmatpush.bf16.msrb.mxu2 %v4484_v47  ;;  %v4481_v55 = vpack.c.bf16 %v4453_v38, %v4452_v36  ;;  %v4371_v47 = vmul.f32 %v7227_v13, %v11025_v4  ;;  %v4369_v4 = vmul.f32 %v7231_v57, %v11022_v49  ;;  %v7235_v38 = vld [vmem:[%s7690_s1 + $0x1f8] sm:$0xff] }
 0xc78   : > { %v4347_v20 = vpop.f32.mrf.mxu0 }
 0xc79   : > { %v4381_v43 = vmul.f32 %v7219_v59, %v4347_v20  ;;  %v4367_v20 = vmul.f32 %v7230_v14, %v11017_v54 }
 0xc7b   : > { %4545 = vmatpush.bf16.msrb.mxu2 %v4483_v46  ;;  %4444 = vadd.xlane.f32.xlu1 %v4381_v43  ;;  %v7233_v46 = vld [vmem:[%s7690_s1 + $0x80] sm:$0xff] }
 0xc7c   : > { %4388 = vadd.xlane.f32.xlu2 %v4353_v11  ;;  %4390 = vadd.xlane.f32.xlu0 %v4354_v44  ;;  %v4366_v22 = vmul.f32 %v7233_v46, %v11014_v35 }
 0xc7f   : > { %4546 = vmatpush.bf16.msrb.mxu2 %v4482_v32 }
 0xc83   : > { %4547 = vmatpush.bf16.msrb.mxu2 %v4481_v55  ;;  %4392 = vadd.xlane.f32.xlu1 %v4355_v30 }
 0xc84   : > { %4382 = vadd.xlane.f32.xlu2 %v4350_v63  ;;  %4424 = vadd.xlane.f32.xlu0 %v4371_v47 }
 0xc8b   : > { %4386 = vadd.xlane.f32.xlu1 %v4352_v6 }
 0xc8c   : > { %4416 = vadd.xlane.f32.xlu2 %v4367_v20  ;;  %4418 = vadd.xlane.f32.xlu0 %v4368_v1  ;;  %v7241_v20 = vld [vmem:[%s7690_s1 + $0x128] sm:$0xff] }
 0xc93   : > { %4420 = vadd.xlane.f32.xlu1 %v4369_v4 }
 0xc94   : > { %4384 = vadd.xlane.f32.xlu0 %v4351_v17 }
 0xc9b   : > { %4414 = vadd.xlane.f32.xlu1 %v4366_v22 }
 0xca6   : > { %v4427_v54 = vpop.xlane.xlu1 %4426 }
 0xcae   : > { %v4429_v41 = vpop.xlane.xlu2 %4428 }
 0xcb6   : > { %v4431_v59 = vpop.xlane.xlu0 %4430 }
 0xcbe   : > { %v4433_v31 = vpop.xlane.xlu1 %4432 }
 0xcbf   : > { %v4471_v17 = vmul.f32 %v7242_v28, %v4433_v31  ;;  %v7247_v31 = vld [vmem:[%s7690_s1 + $0x110] sm:$0xff] }
 0xcc6   : > { %v4435_v43 = vpop.xlane.xlu2 %4434 }
 0xcc7   : > { %v4472_v6 = vmul.f32 %v7239_v7, %v4435_v43  ;;  %v7244_v43 = vld [vmem:[%s7690_s1 + $0x1b8] sm:$0xff] }
 0xcce   : > { %v4437_v44 = vpop.xlane.xlu0 %4436 }
 0xccf   : > { %v4473_v63 = vmul.f32 %v7238_v12, %v4437_v44  ;;  %v7243_v44 = vld [vmem:[%s7690_s1 + $0x1c0] sm:$0xff] }
 0xcd1   : > { %v4491_v46 = vpack.c.bf16 %v4473_v63, %v4472_v6  ;;  %v7251_v6 = vld [vmem:[%s7690_s1 + $0x198] sm:$0xff] }
 0xcd6   : > { %v4439_v33 = vpop.xlane.xlu1 %4438 }
 0xcd7   : > { %v4474_v30 = vmul.f32 %v7237_v62, %v4439_v33  ;;  %v4469_v33 = vmul.f32 %v7244_v43, %v4429_v41  ;;  %v7255_v43 = vld [vmem:[%s7690_s1 + $0x180] sm:$0xff] }
 0xcde   : > { %v4441_v49 = vpop.xlane.xlu2 %4440 }
 0xcdf   : > { %v4475_v36 = vmul.f32 %v7236_v50, %v4441_v49  ;;  %v4470_v49 = vmul.f32 %v7243_v44, %v4431_v59  ;;  %v7248_v59 = vld [vmem:[%s7690_s1 + $0x1a8] sm:$0xff] }
 0xce1   : > { %v4492_v13 = vpack.c.bf16 %v4475_v36, %v4474_v30  ;;  %v7249_v30 = vld [vmem:[%s7690_s1 + $0x1a0] sm:$0xff] }
 0xce7   : > { %v4443_v3 = vpop.xlane.xlu0 %4442  ;;  %v4423_v11 = vpop.xlane.xlu2 %4422 }
 0xce8   : > { %v4476_v48 = vmul.f32 %v7234_v51, %v4443_v3  ;;  %v4490_v3 = vpack.c.bf16 %v4471_v17, %v4470_v49  ;;  %v7245_v51 = vld [vmem:[%s7690_s1 + $0x1b0] sm:$0xff]  ;;  %v4466_v12 = vmul.f32 %v7249_v30, %v4423_v11  ;;  %v13093_v17 = vld [vmem:[#allocation81_spill] sm:$0xff]  ;;  %v13094_v49 = vld [vmem:[#allocation68_spill] sm:$0xff] }
 0xce9   : > { %v13108_v30 = vld [vmem:[#allocation71_spill] sm:$0xff] }
 0xcee   : > { %v4445_v25 = vpop.xlane.xlu1 %4444 }
 0xcef   : > { %v4391_v35 = vpop.xlane.xlu0 %4390  ;;  %v4477_v32 = vmul.f32 %v7235_v38, %v4445_v25  ;;  %v4389_v4 = vpop.xlane.xlu2 %4388 }
 0xcf0   : > { %v4450_v1 = vmul.f32 %v7240_v39, %v4391_v35  ;;  %v7246_v35 = vld [vmem:[%s7690_s1 + $0x118] sm:$0xff] }
 0xcf1   : > { %v4493_v55 = vpack.c.bf16 %v4477_v32, %v4476_v48  ;;  %v4468_v48 = vmul.f32 %v7245_v51, %v4427_v54  ;;  %v4449_v38 = vmul.f32 %v7246_v35, %v4389_v4  ;;  %v13096_v51 = vld [vmem:[#allocation82_spill] sm:$0xff]  ;;  %v13098_v35 = vld [vmem:[#allocation69_spill] sm:$0xff] }
 0xcf3   : > { %4592 = vmatpush.bf16.msra.mxu3 %v4493_v55  ;;  %v4489_v36 = vpack.c.bf16 %v4469_v33, %v4468_v48  ;;  %v13097_v48 = vld [vmem:[#allocation88_spill] sm:$0xff] }
 0xcf6   : > { %v4393_v47 = vpop.xlane.xlu1 %4392 }
 0xcf7   : > { %v4425_v14 = vpop.xlane.xlu0 %4424  ;;  %v4451_v57 = vmul.f32 %v7241_v20, %v4393_v47  ;;  %4593 = vmatpush.bf16.msra.mxu3 %v4492_v13  ;;  %v4383_v41 = vpop.xlane.xlu2 %4382  ;;  %v7250_v13 = vld [vmem:[%s7690_s1 + $0x190] sm:$0xff] }
 0xcf8   : > { %v4467_v55 = vmul.f32 %v7248_v59, %v4425_v14  ;;  %v7253_v14 = vld [vmem:[%s7690_s1 + $0x108] sm:$0xff]  ;;  %v13104_v59 = vld [vmem:[#allocation92_spill] sm:$0xff] }
 0xcf9   : > { %v4480_v22 = vpack.c.bf16 %v4451_v57, %v4450_v1  ;;  %v7252_v1 = vld [vmem:[%s7690_s1 + $0x100] sm:$0xff] }
 0xcfa   : > { %v4488_v54 = vpack.c.bf16 %v4467_v55, %v4466_v12  ;;  %v4446_v20 = vmul.f32 %v7252_v1, %v4383_v41  ;;  %v13105_v55 = vld [vmem:[#allocation98_spill] sm:$0xff]  ;;  %v13109_v12 = vld [vmem:[#allocation99_spill] sm:$0xff]  ;;  %v13117_v1 = vld [vmem:[#allocation73_spill] sm:$0xff] }
 0xcfb   : > { %4548 = vmatpush.bf16.msrb.mxu2 %v4480_v22  ;;  %4594 = vmatpush.bf16.msra.mxu3 %v4491_v46  ;;  %v7254_v22 = vld [vmem:[%s7690_s1 + $0x188] sm:$0xff] }
 0xcfc   : > { %v13107_v41 = vld [vmem:[#allocation102_spill] sm:$0xff] }
 0xcfe   : > { %v4387_v25 = vpop.xlane.xlu1 %4386 }
 0xcff   : > { %v4419_v32 = vpop.xlane.xlu0 %4418  ;;  %v4448_v50 = vmul.f32 %v7247_v31, %v4387_v25  ;;  %4595 = vmatpush.bf16.msra.mxu3 %v4490_v3  ;;  %v4417_v11 = vpop.xlane.xlu2 %4416  ;;  %v13095_v25 = vld [vmem:[#allocation84_spill] sm:$0xff]  ;;  %v13101_v31 = vld [vmem:[#allocation89_spill] sm:$0xff] }
 0xd00   : > { %v4464_v47 = vmul.f32 %v7250_v13, %v4419_v32  ;;  %v4463_v44 = vmul.f32 %v7254_v22, %v4417_v11  ;;  %v13100_v32 = vld [vmem:[#allocation91_spill] sm:$0xff]  ;;  %v13126_v22 = vld [vmem:[#allocation77_spill] sm:$0xff] }
 0xd01   : > { %v4479_v62 = vpack.c.bf16 %v4449_v38, %v4448_v50  ;;  %v13099_v38 = vld [vmem:[#allocation85_spill] sm:$0xff]  ;;  %v13102_v50 = vld [vmem:[#allocation95_spill] sm:$0xff] }
 0xd02   : > { %v13112_v13 = vld [vmem:[#allocation103_spill] sm:$0xff] }
 0xd03   : > { %4549 = vmatpush.bf16.msrb.mxu2 %v4479_v62  ;;  %4596 = vmatpush.bf16.msra.mxu3 %v4489_v36  ;;  %v13103_v36 = vld [vmem:[#allocation70_spill] sm:$0xff]  ;;  %v13106_v62 = vld [vmem:[#allocation96_spill] sm:$0xff]  ;;  %v13123_v11 = vld [vmem:[#allocation75_spill] sm:$0xff] }
 0xd06   : > { %v4421_v63 = vpop.xlane.xlu1 %4420 }
 0xd07   : > { %v4385_v7 = vpop.xlane.xlu0 %4384  ;;  %v4465_v39 = vmul.f32 %v7251_v6, %v4421_v63  ;;  %4597 = vmatpush.bf16.msra.mxu3 %v4488_v54  ;;  %v13110_v54 = vld [vmem:[#allocation105_spill] sm:$0xff]  ;;  %v13111_v63 = vld [vmem:[#allocation110_spill] sm:$0xff] }
 0xd08   : > { %v4447_v57 = vmul.f32 %v7253_v14, %v4385_v7  ;;  %v13114_v7 = vld [vmem:[#allocation72_spill] sm:$0xff]  ;;  %v13115_v6 = vld [vmem:[#allocation106_spill] sm:$0xff] }
 0xd09   : > { %v4487_v4 = vpack.c.bf16 %v4465_v39, %v4464_v47  ;;  %v13113_v47 = vld [vmem:[#allocation112_spill] sm:$0xff]  ;;  %v13116_v39 = vld [vmem:[#allocation114_spill] sm:$0xff] }
 0xd0a   : > { %v4478_v28 = vpack.c.bf16 %v4447_v57, %v4446_v20  ;;  %v13118_v20 = vld [vmem:[#allocation116_spill] sm:$0xff]  ;;  %v13119_v14 = vld [vmem:[#allocation118_spill] sm:$0xff] }
 0xd0b   : > { %4598 = vmatpush.bf16.msra.mxu3 %v4487_v4  ;;  %v13120_v57 = vld [vmem:[#allocation120_spill] sm:$0xff]  ;;  %v13121_v4 = vld [vmem:[#allocation74_spill] sm:$0xff] }
 0xd0c   : > { %4550 = vmatpush.bf16.msrb.mxu2 %v4478_v28  ;;  %v13122_v28 = vld [vmem:[#allocation122_spill] sm:$0xff] }
 0xd0e   : > { %v4415_v46 = vpop.xlane.xlu1 %4414 }
 0xd0f   : > { %4551 = vmatmul.bf16.vlgmr.msrb.gmra.mxu2 %v13094_v49  ;;  %v4462_v33 = vmul.f32 %v7255_v43, %v4415_v46  ;;  %v13125_v46 = vld [vmem:[#allocation76_spill] sm:$0xff]  ;;  %v13128_v49 = vld [vmem:[#allocation79_spill] sm:$0xff]  ;;  %v13129_v43 = vld [vmem:[#allocation86_spill] sm:$0xff] }
 0xd10   : > { %4762 = vmatpush.bf16.msra.mxu2 %v13093_v17  ;;  %v13124_v17 = vld [vmem:[#allocation124_spill] sm:$0xff] }
 0xd11   : > { %v4486_v3 = vpack.c.bf16 %v4463_v44, %v4462_v33  ;;  %v13127_v44 = vld [vmem:[#allocation78_spill] sm:$0xff]  ;;  %v13130_v33 = vld [vmem:[#allocation93_spill] sm:$0xff] }
 0xd13   : > { %4599 = vmatpush.bf16.msra.mxu3 %v4486_v3  ;;  %v4503_v3 = vpop.f32.mrf.mxu1 }
 0xd14   : > { %4763 = vmatpush.bf16.msra.mxu2 %v13095_v25  ;;  %v13131_v25 = vld [vmem:[#allocation100_spill] sm:$0xff] }
 0xd16   : > { %4600 = vmatmul.bf16.vlgmr.msra.gmra.mxu3 %v13098_v35 }
 0xd17   : > { %4811 = vmatpush.bf16.msrb.mxu3 %v13096_v51 }
 0xd18   : > { %4764 = vmatpush.bf16.msra.mxu2 %v13097_v48  ;;  %v13132_v48 = vld [vmem:[#allocation107_spill] sm:$0xff] }
 0xd1b   : > { %4812 = vmatpush.bf16.msrb.mxu3 %v13099_v38  ;;  %v4505_v51 = vpop.f32.mrf.mxu1 }
 0xd1c   : > { %4765 = vmatpush.bf16.msra.mxu2 %v13100_v32 }
 0xd1f   : > { %4813 = vmatpush.bf16.msrb.mxu3 %v13101_v31  ;;  %4556 = vmatmul.bf16.gmra.mxu2 %v13103_v36 }
 0xd20   : > { %4766 = vmatpush.bf16.msra.mxu2 %v13102_v50 }
 0xd23   : > { %4814 = vmatpush.bf16.msrb.mxu3 %v13104_v59  ;;  %v4508_v35 = vpop.f32.mrf.mxu1 }
 0xd24   : > { %4767 = vmatpush.bf16.msra.mxu2 %v13105_v55 }
 0xd26   : > { %4605 = vmatmul.bf16.gmra.mxu3 %v13108_v30 }
 0xd27   : > { %4815 = vmatpush.bf16.msrb.mxu3 %v13106_v62  ;;  %v13133_v62 = vld [vmem:[#allocation108_spill] sm:$0xff] }
 0xd28   : > { %4768 = vmatpush.bf16.msra.mxu2 %v13107_v41 }
 0xd2b   : > { %4816 = vmatpush.bf16.msrb.mxu3 %v13109_v12  ;;  %v4510_v32 = vpop.f32.mrf.mxu1 }
 0xd2c   : > { %4769 = vmatpush.bf16.msra.mxu2 %v13110_v54 }
 0xd2f   : > { %4817 = vmatpush.bf16.msrb.mxu3 %v13112_v13  ;;  %4561 = vmatmul.bf16.gmra.mxu2 %v13114_v7 }
 0xd30   : > { %4958 = vmatpush.bf16.msrb.mxu2 %v13111_v63 }
 0xd33   : > { %4818 = vmatpush.bf16.msrb.mxu3 %v13115_v6  ;;  %v4513_v30 = vpop.f32.mrf.mxu1 }
 0xd34   : > { %4959 = vmatpush.bf16.msrb.mxu2 %v13113_v47 }
 0xd36   : > { %4610 = vmatmul.bf16.gmra.mxu3 %v13117_v1 }
 0xd38   : > { %4960 = vmatpush.bf16.msrb.mxu2 %v13116_v39 }
 0xd3c   : > { %4961 = vmatpush.bf16.msrb.mxu2 %v13118_v20 }
 0xd3f   : > { %4566 = vmatmul.bf16.gmra.mxu2 %v13121_v4  ;;  %v4515_v4 = vpop.f32.mrf.mxu1 }
 0xd40   : > { %4962 = vmatpush.bf16.msrb.mxu2 %v13119_v14 }
 0xd44   : > { %4963 = vmatpush.bf16.msrb.mxu2 %v13120_v57 }
 0xd46   : > { %4615 = vmatmul.bf16.gmra.mxu3 %v13123_v11 }
 0xd48   : > { %4964 = vmatpush.bf16.msrb.mxu2 %v13122_v28 }
 0xd4c   : > { %4965 = vmatpush.bf16.msrb.mxu2 %v13124_v17 }
 0xd4f   : > { %4571 = vmatmul.bf16.gmra.mxu2 %v13125_v46 }
 0xd56   : > { %4620 = vmatmul.bf16.gmra.mxu3 %v13126_v22 }
 0xd5f   : > { %4576 = vmatmul.bf16.gmra.mxu2 %v13127_v44 }
 0xd66   : > { %4625 = vmatmul.bf16.gmra.mxu3 %v13128_v49 }
 0xd6f   : > { %4581 = vmatmul.bf16.gmra.mxu2 %v13129_v43 }
 0xd76   : > { %4630 = vmatmul.bf16.gmra.mxu3 %v13130_v33  ;;  %v4518_v33 = vpop.f32.mrf.mxu1 }
 0xd7f   : > { %4586 = vmatmul.bf16.gmra.mxu2 %v13131_v25 }
 0xd86   : > { %4635 = vmatmul.bf16.gmra.mxu3 %v13132_v48 }
 0xd92   : > { %v4552_v38 = vpop.f32.mrf.mxu2 }
 0xd93   : > { %v4553_v50 = vadd.f32 %v4552_v38, %v4503_v3 }
 0xd99   : > { %v4601_v31 = vpop.f32.mrf.mxu3 }
 0xd9a   : > { %v4554_v36 = vpop.f32.mrf.mxu2  ;;  %v4602_v59 = vadd.f32 %v4601_v31, %v4553_v50  ;;  %v4520_v50 = vpop.f32.mrf.mxu1 }
 0xd9b   : > { %v4555_v55 = vadd.f32 %v4554_v36, %v4505_v51 }
 0xd9c   : > { %v4641_v41 = vadd.f32 %v4602_v59, %v13133_v62 }
 0xd9e   : > { %v4673_v13 = vmul.f32 0.01, %v4641_v41  ;;  %vm4657_vm0 = vcmp.gt.f32.partialorder %v4641_v41, 0.0 }
 0xda0   : > { %v4689_v6 = vsel %vm4657_vm0, %v4641_v41, %v4673_v13 }
 0xda1   : > { %v4603_v12 = vpop.f32.mrf.mxu3 }
 0xda2   : > { %v4557_v54 = vpop.f32.mrf.mxu2  ;;  %v4604_v63 = vadd.f32 %v4603_v12, %v4555_v55 }
 0xda3   : > { %v4558_v14 = vadd.f32 %v4557_v54, %v4508_v35 }
 0xda4   : > { %v4642_v47 = vadd.f32 %v4604_v63, %v13133_v62 }
 0xda6   : > { %vm4658_vm1 = vcmp.gt.f32.partialorder %v4642_v47, 0.0  ;;  %v4674_v7 = vmul.f32 0.01, %v4642_v47 }
 0xda8   : > { %v4690_v39 = vsel %vm4658_vm1, %v4642_v47, %v4674_v7  ;;  %v4523_v7 = vpop.f32.mrf.mxu1 }
 0xda9   : > { %v4705_v1 = vpack.c.bf16 %v4690_v39, %v4689_v6  ;;  %v4606_v20 = vpop.f32.mrf.mxu3 }
 0xdaa   : > { %v4559_v57 = vpop.f32.mrf.mxu2  ;;  %v4607_v28 = vadd.f32 %v4606_v20, %v4558_v14 }
 0xdab   : > { %4721 = vmatmul.bf16.vlgmr.msra.gmra.mxu1 %v4705_v1  ;;  %4770 = vmatmul.bf16.vlgmr.msra.gmra.mxu2 %v4705_v1  ;;  %v4560_v11 = vadd.f32 %v4559_v57, %v4510_v32 }
 0xdac   : > { %4819 = vmatmul.bf16.vlgmr.msrb.gmra.mxu3 %v4705_v1  ;;  %v4643_v17 = vadd.f32 %v4607_v28, %v13133_v62 }
 0xdae   : > { %v4675_v49 = vmul.f32 0.01, %v4643_v17  ;;  %vm4659_vm2 = vcmp.gt.f32.partialorder %v4643_v17, 0.0 }
 0xdb0   : > { %v4691_v25 = vsel %vm4659_vm2, %v4643_v17, %v4675_v49 }
 0xdb1   : > { %v4608_v46 = vpop.f32.mrf.mxu3 }
 0xdb2   : > { %v4562_v22 = vpop.f32.mrf.mxu2  ;;  %v4609_v44 = vadd.f32 %v4608_v46, %v4560_v11  ;;  %v4525_v46 = vpop.f32.mrf.mxu1 }
 0xdb3   : > { %v4563_v38 = vadd.f32 %v4562_v22, %v4513_v30 }
 0xdb4   : > { %v4644_v43 = vadd.f32 %v4609_v44, %v13133_v62 }
 0xdb6   : > { %v4676_v3 = vmul.f32 0.01, %v4644_v43  ;;  %vm4660_vm3 = vcmp.gt.f32.partialorder %v4644_v43, 0.0 }
 0xdb8   : > { %v4692_v51 = vsel %vm4660_vm3, %v4644_v43, %v4676_v3 }
 0xdb9   : > { %v4611_v48 = vpop.f32.mrf.mxu3  ;;  %v4706_v35 = vpack.c.bf16 %v4692_v51, %v4691_v25 }
 0xdba   : > { %v4564_v31 = vpop.f32.mrf.mxu2  ;;  %v4612_v32 = vadd.f32 %v4611_v48, %v4563_v38  ;;  %v4528_v38 = vpop.f32.mrf.mxu1 }
 0xdbb   : > { %4726 = vmatmul.bf16.gmra.mxu1 %v4706_v35  ;;  %4775 = vmatmul.bf16.gmra.mxu2 %v4706_v35  ;;  %v4565_v36 = vadd.f32 %v4564_v31, %v4515_v4 }
 0xdbc   : > { %4824 = vmatmul.bf16.gmra.mxu3 %v4706_v35  ;;  %v4645_v59 = vadd.f32 %v4612_v32, %v13133_v62 }
 0xdbe   : > { %v4677_v54 = vmul.f32 0.01, %v4645_v59  ;;  %vm4661_vm4 = vcmp.gt.f32.partialorder %v4645_v59, 0.0 }
 0xdc0   : > { %v4693_v47 = vsel %vm4661_vm4, %v4645_v59, %v4677_v54 }
 0xdc1   : > { %v4613_v55 = vpop.f32.mrf.mxu3 }
 0xdc2   : > { %v4567_v41 = vpop.f32.mrf.mxu2  ;;  %v4614_v12 = vadd.f32 %v4613_v55, %v4565_v36  ;;  %v4530_v54 = vpop.f32.mrf.mxu1 }
 0xdc3   : > { %v4568_v1 = vadd.f32 %v4567_v41, %v4518_v33 }
 0xdc4   : > { %v4646_v63 = vadd.f32 %v4614_v12, %v13133_v62 }
 0xdc6   : > { %v4678_v13 = vmul.f32 0.01, %v4646_v63  ;;  %vm4662_vm5 = vcmp.gt.f32.partialorder %v4646_v63, 0.0 }
 0xdc8   : > { %v4694_v30 = vsel %vm4662_vm5, %v4646_v63, %v4678_v13 }
 0xdc9   : > { %v4616_v6 = vpop.f32.mrf.mxu3  ;;  %v4707_v39 = vpack.c.bf16 %v4694_v30, %v4693_v47 }
 0xdca   : > { %v4569_v20 = vpop.f32.mrf.mxu2  ;;  %v4617_v14 = vadd.f32 %v4616_v6, %v4568_v1 }
 0xdcb   : > { %4731 = vmatmul.bf16.gmra.mxu1 %v4707_v39  ;;  %4780 = vmatmul.bf16.gmra.mxu2 %v4707_v39  ;;  %v4570_v57 = vadd.f32 %v4569_v20, %v4520_v50 }
 0xdcc   : > { %4829 = vmatmul.bf16.gmra.mxu3 %v4707_v39  ;;  %v4647_v4 = vadd.f32 %v4617_v14, %v13133_v62  ;;  %v4533_v14 = vpop.f32.mrf.mxu1 }
 0xdce   : > { %v4679_v22 = vmul.f32 0.01, %v4647_v4  ;;  %vm4663_vm6 = vcmp.gt.f32.partialorder %v4647_v4, 0.0 }
 0xdd0   : > { %v4695_v43 = vsel %vm4663_vm6, %v4647_v4, %v4679_v22 }
 0xdd1   : > { %v4618_v28 = vpop.f32.mrf.mxu3 }
 0xdd2   : > { %v4572_v11 = vpop.f32.mrf.mxu2  ;;  %v4619_v17 = vadd.f32 %v4618_v28, %v4570_v57 }
 0xdd3   : > { %v4573_v51 = vadd.f32 %v4572_v11, %v4523_v7 }
 0xdd4   : > { %v4648_v44 = vadd.f32 %v4619_v17, %v13133_v62 }
 0xdd6   : > { %v4680_v49 = vmul.f32 0.01, %v4648_v44  ;;  %vm4664_vm7 = vcmp.gt.f32.partialorder %v4648_v44, 0.0 }
 0xdd8   : > { %v4696_v33 = vsel %vm4664_vm7, %v4648_v44, %v4680_v49  ;;  %v4869_v49 = vpop.f32.mrf.mxu0 }
 0xdd9   : > { %v4621_v3 = vpop.f32.mrf.mxu3  ;;  %v4708_v25 = vpack.c.bf16 %v4696_v33, %v4695_v43 }
 0xdda   : > { %v4574_v48 = vpop.f32.mrf.mxu2  ;;  %v4622_v35 = vadd.f32 %v4621_v3, %v4573_v51  ;;  %v4535_v51 = vpop.f32.mrf.mxu1 }
 0xddb   : > { %4736 = vmatmul.bf16.gmra.mxu1 %v4708_v25  ;;  %4785 = vmatmul.bf16.gmra.mxu2 %v4708_v25  ;;  %v4575_v31 = vadd.f32 %v4574_v48, %v4525_v46 }
 0xddc   : > { %4834 = vmatmul.bf16.gmra.mxu3 %v4708_v25  ;;  %v4649_v32 = vadd.f32 %v4622_v35, %v13133_v62 }
 0xdde   : > { %v4681_v55 = vmul.f32 0.01, %v4649_v32  ;;  %vm4665_vm8 = vcmp.gt.f32.partialorder %v4649_v32, 0.0 }
 0xde0   : > { %v4697_v63 = vsel %vm4665_vm8, %v4649_v32, %v4681_v55 }
 0xde1   : > { %v4623_v50 = vpop.f32.mrf.mxu3 }
 0xde2   : > { %v4577_v36 = vpop.f32.mrf.mxu2  ;;  %v4624_v59 = vadd.f32 %v4623_v50, %v4575_v31  ;;  %v4871_v50 = vpop.f32.mrf.mxu0 }
 0xde3   : > { %v4578_v7 = vadd.f32 %v4577_v36, %v4528_v38 }
 0xde4   : > { %v4650_v41 = vadd.f32 %v4624_v59, %v13133_v62 }
 0xde6   : > { %v4682_v12 = vmul.f32 0.01, %v4650_v41  ;;  %vm4666_vm9 = vcmp.gt.f32.partialorder %v4650_v41, 0.0 }
 0xde8   : > { %v4698_v13 = vsel %vm4666_vm9, %v4650_v41, %v4682_v12  ;;  %v4538_v41 = vpop.f32.mrf.mxu1 }
 0xde9   : > { %v4626_v47 = vpop.f32.mrf.mxu3  ;;  %v4709_v30 = vpack.c.bf16 %v4698_v13, %v4697_v63 }
 0xdea   : > { %v4579_v6 = vpop.f32.mrf.mxu2  ;;  %v4627_v39 = vadd.f32 %v4626_v47, %v4578_v7 }
 0xdeb   : > { %4741 = vmatmul.bf16.gmra.mxu1 %v4709_v30  ;;  %4790 = vmatmul.bf16.gmra.mxu2 %v4709_v30  ;;  %v4580_v1 = vadd.f32 %v4579_v6, %v4530_v54  ;;  %v4874_v6 = vpop.f32.mrf.mxu0 }
 0xdec   : > { %4839 = vmatmul.bf16.gmra.mxu3 %v4709_v30  ;;  %v4651_v20 = vadd.f32 %v4627_v39, %v13133_v62 }
 0xdee   : > { %v4683_v11 = vmul.f32 0.01, %v4651_v20  ;;  %vm4667_vm10 = vcmp.gt.f32.partialorder %v4651_v20, 0.0 }
 0xdf0   : > { %v4699_v22 = vsel %vm4667_vm10, %v4651_v20, %v4683_v11 }
 0xdf1   : > { %v4628_v57 = vpop.f32.mrf.mxu3 }
 0xdf2   : > { %v4582_v4 = vpop.f32.mrf.mxu2  ;;  %v4629_v28 = vadd.f32 %v4628_v57, %v4580_v1  ;;  %v4540_v1 = vpop.f32.mrf.mxu1 }
 0xdf3   : > { %v4583_v3 = vadd.f32 %v4582_v4, %v4533_v14 }
 0xdf4   : > { %v4652_v17 = vadd.f32 %v4629_v28, %v13133_v62 }
 0xdf6   : > { %v4684_v46 = vmul.f32 0.01, %v4652_v17  ;;  %vm4668_vm11 = vcmp.gt.f32.partialorder %v4652_v17, 0.0 }
 0xdf8   : > { %v4700_v44 = vsel %vm4668_vm11, %v4652_v17, %v4684_v46  ;;  %v4876_v46 = vpop.f32.mrf.mxu0 }
 0xdf9   : > { %v4631_v43 = vpop.f32.mrf.mxu3  ;;  %v4710_v33 = vpack.c.bf16 %v4700_v44, %v4699_v22 }
 0xdfa   : > { %v4584_v25 = vpop.f32.mrf.mxu2  ;;  %v4632_v48 = vadd.f32 %v4631_v43, %v4583_v3 }
 0xdfb   : > { %4746 = vmatmul.bf16.gmra.mxu1 %v4710_v33  ;;  %4795 = vmatmul.bf16.gmra.mxu2 %v4710_v33  ;;  %v4585_v35 = vadd.f32 %v4584_v25, %v4535_v51  ;;  %v13134_v25 = vld [vmem:[#allocation125_spill] sm:$0xff] }
 0xdfc   : > { %4844 = vmatmul.bf16.gmra.mxu3 %v4710_v33  ;;  %v4653_v38 = vadd.f32 %v4632_v48, %v13133_v62  ;;  %v4870_v51 = vadd.f32 %v4869_v49, %v13134_v25 }
 0xdfe   : > { %v4685_v59 = vmul.f32 0.01, %v4653_v38  ;;  %vm4669_vm12 = vcmp.gt.f32.partialorder %v4653_v38, 0.0 }
 0xe00   : > { %v4701_v54 = vsel %vm4669_vm12, %v4653_v38, %v4685_v59  ;;  %v4879_v33 = vpop.f32.mrf.mxu0 }
 0xe01   : > { %v4633_v31 = vpop.f32.mrf.mxu3 }
 0xe02   : > { %v4634_v32 = vadd.f32 %v4633_v31, %v4585_v35  ;;  %v4587_v36 = vpop.f32.mrf.mxu2 }
 0xe03   : > { %v4588_v30 = vadd.f32 %v4587_v36, %v4538_v41 }
 0xe04   : > { %v4654_v55 = vadd.f32 %v4634_v32, %v13133_v62  ;;  %v4872_v32 = vadd.f32 %v4871_v50, %v13134_v25 }
 0xe06   : > { %v4686_v12 = vmul.f32 0.01, %v4654_v55  ;;  %vm4670_vm13 = vcmp.gt.f32.partialorder %v4654_v55, 0.0 }
 0xe08   : > { %v4702_v63 = vsel %vm4670_vm13, %v4654_v55, %v4686_v12  ;;  %v4881_v35 = vpop.f32.mrf.mxu0  ;;  %v4875_v12 = vadd.f32 %v4874_v6, %v13134_v25  ;;  %v4880_v6 = vadd.f32 %v4879_v33, %v13134_v25 }
 0xe09   : > { %v4636_v13 = vpop.f32.mrf.mxu3  ;;  %v4711_v47 = vpack.c.bf16 %v4702_v63, %v4701_v54 }
 0xe0a   : > { %v4637_v7 = vadd.f32 %v4636_v13, %v4588_v30  ;;  %v4589_v39 = vpop.f32.mrf.mxu2 }
 0xe0b   : > { %4751 = vmatmul.bf16.gmra.mxu1 %v4711_v47  ;;  %4800 = vmatmul.bf16.gmra.mxu2 %v4711_v47  ;;  %v4590_v20 = vadd.f32 %v4589_v39, %v4540_v1 }
 0xe0c   : > { %4849 = vmatmul.bf16.gmra.mxu3 %v4711_v47  ;;  %v4655_v14 = vadd.f32 %v4637_v7, %v13133_v62  ;;  %v4877_v47 = vadd.f32 %v4876_v46, %v13134_v25 }
 0xe0e   : > { %v4687_v28 = vmul.f32 0.01, %v4655_v14  ;;  %vm4671_vm14 = vcmp.gt.f32.partialorder %v4655_v14, 0.0 }
 0xe10   : > { %v4703_v22 = vsel %vm4671_vm14, %v4655_v14, %v4687_v28  ;;  %v4884_v55 = vpop.f32.mrf.mxu0 }
 0xe11   : > { %v4638_v57 = vpop.f32.mrf.mxu3  ;;  %v4885_v33 = vadd.f32 %v4884_v55, %v13134_v25 }
 0xe12   : > { %v4639_v4 = vadd.f32 %v4638_v57, %v4590_v20 }
 0xe14   : > { %v4656_v11 = vadd.f32 %v4639_v4, %v13133_v62 }
 0xe16   : > { %v4688_v17 = vmul.f32 0.01, %v4656_v11  ;;  %vm4672_vm15 = vcmp.gt.f32.partialorder %v4656_v11, 0.0 }
 0xe18   : > { %v4704_v44 = vsel %vm4672_vm15, %v4656_v11, %v4688_v17  ;;  %v4886_v13 = vpop.f32.mrf.mxu0  ;;  %v4882_v11 = vadd.f32 %v4881_v35, %v13134_v25 }
 0xe19   : > { %v4712_v43 = vpack.c.bf16 %v4704_v44, %v4703_v22 }
 0xe1b   : > { %4756 = vmatmul.bf16.gmra.mxu1 %v4712_v43  ;;  %4805 = vmatmul.bf16.gmra.mxu2 %v4712_v43 }
 0xe1c   : > { %4854 = vmatmul.bf16.gmra.mxu3 %v4712_v43 }
 0xe20   : > { %v4889_v20 = vpop.f32.mrf.mxu0 }
 0xe28   : > { %v4722_v3 = vpop.f32.mrf.mxu1  ;;  %v11186_v46 = vpop.f32.mrf.mxu0 }
 0xe29   : > { %v4723_v48 = vadd.f32 %v4722_v3, %v8349_v29  ;;  %v4892_v58 = vadd.f32 %v11186_v46, %v13134_v25 }
 0xe2b   : > { %v5007_v38 = vadd.f32 %v4870_v51, %v4723_v48  ;;  %4917 = vmatmul.bf16.vlgmr.msrb.gmra.mxu1 %v10500_v5  ;;  %4966 = vmatmul.bf16.vlgmr.msrb.gmra.mxu2 %v10500_v5 }
 0xe2e   : > { %v11160_v62 = vpop.f32.mrf.mxu2 }
 0xe2f   : > { %v11182_v4 = vpop.f32.mrf.mxu3 }
 0xe30   : > { %v4724_v31 = vpop.f32.mrf.mxu1  ;;  %v11196_v48 = vpop.f32.mrf.mxu0 }
 0xe31   : > { %v4725_v36 = vadd.f32 %v4724_v31, %v8349_v29 }
 0xe33   : > { %v5008_v59 = vadd.f32 %v4872_v32, %v4725_v36  ;;  %v4887_v32 = vadd.f32 %v4886_v13, %v13134_v25 }
 0xe36   : > { %v11164_v41 = vpop.f32.mrf.mxu2 }
 0xe37   : > { %v11191_v3 = vpop.f32.mrf.mxu3 }
 0xe38   : > { %v4727_v49 = vpop.f32.mrf.mxu1 }
 0xe39   : > { %v4728_v54 = vadd.f32 %v4727_v49, %v8349_v29 }
 0xe3b   : > { %v5009_v63 = vadd.f32 %v4875_v12, %v4728_v54  ;;  %4922 = vmatmul.bf16.gmra.mxu1 %v10607_v10  ;;  %4971 = vmatmul.bf16.gmra.mxu2 %v10607_v10  ;;  %v11208_v54 = vpop.f32.mrf.mxu0 }
 0xe3c   : > { %v11278_v8 = vadd.f32 %v11208_v54, %v13134_v25 }
 0xe3e   : > { %v11170_v5 = vpop.f32.mrf.mxu2 }
 0xe3f   : > { %v11202_v49 = vpop.f32.mrf.mxu3 }
 0xe40   : > { %v4729_v50 = vpop.f32.mrf.mxu1 }
 0xe41   : > { %v4730_v30 = vadd.f32 %v4729_v50, %v8349_v29 }
 0xe43   : > { %v5010_v7 = vadd.f32 %v4877_v47, %v4730_v30 }
 0xe46   : > { %v11174_v39 = vpop.f32.mrf.mxu2 }
 0xe47   : > { %v11216_v13 = vpop.f32.mrf.mxu3 }
 0xe48   : > { %v4732_v1 = vpop.f32.mrf.mxu1 }
 0xe49   : > { %v4733_v14 = vadd.f32 %v4732_v1, %v8349_v29 }
 0xe4b   : > { %v5011_v57 = vadd.f32 %v4880_v6, %v4733_v14  ;;  %4927 = vmatmul.bf16.gmra.mxu1 %v10684_v45  ;;  %4976 = vmatmul.bf16.gmra.mxu2 %v10684_v45  ;;  %v6403_v6 = vmul.f32 -1.442695, %v5007_v38  ;;  %v6406_v38 = vmul.f32 -1.442695, %v5010_v7 }
 0xe4d   : > { %6965 = vpow2.f32 %v6403_v6 }
 0xe4e   : > { %v11180_v10 = vpop.f32.mrf.mxu2 }
 0xe50   : > { %v4734_v28 = vpop.f32.mrf.mxu1 }
 0xe51   : > { %v4735_v17 = vadd.f32 %v4734_v28, %v8349_v29  ;;  %v4899_v28 = vpop.f32.mrf.mxu0 }
 0xe52   : > { %v11285_v18 = vadd.f32 %v4899_v28, %v13134_v25 }
 0xe53   : > { %v5012_v22 = vadd.f32 %v4882_v11, %v4735_v17  ;;  %v6404_v11 = vmul.f32 -1.442695, %v5008_v59 }
 0xe55   : > { %6967 = vpow2.f32 %v6404_v11 }
 0xe56   : > { %v11188_v44 = vpop.f32.mrf.mxu2 }
 0xe58   : > { %v4737_v43 = vpop.f32.mrf.mxu1 }
 0xe59   : > { %v4738_v45 = vadd.f32 %v4737_v43, %v8349_v29  ;;  %v11224_v43 = vpop.f32.mrf.mxu3 }
 0xe5b   : > { %v5013_v51 = vadd.f32 %v4885_v33, %v4738_v45  ;;  %4932 = vmatmul.bf16.gmra.mxu1 %v10762_v56  ;;  %4981 = vmatmul.bf16.gmra.mxu2 %v10762_v56  ;;  %v4890_v56 = vadd.f32 %v4889_v20, %v13134_v25  ;;  %v6405_v20 = vmul.f32 -1.442695, %v5009_v63  ;;  %v6966_v45 = vpop.eup %6965 }
 0xe5d   : > { %6969 = vpow2.f32 %v6405_v20 }
 0xe5e   : > { %v11198_v35 = vpop.f32.mrf.mxu2  ;;  %6971 = vpow2.f32 %v6406_v38 }
 0xe60   : > { %v4739_v31 = vpop.f32.mrf.mxu1 }
 0xe61   : > { %v4740_v36 = vadd.f32 %v4739_v31, %v8349_v29  ;;  %v4901_v31 = vpop.f32.mrf.mxu0 }
 0xe62   : > { %v11288_v46 = vadd.f32 %v4901_v31, %v13134_v25  ;;  %v11307_v31 = vadd.f32 %v11160_v62, %v8446_v2 }
 0xe63   : > { %v11204_v55 = vadd.f32 %v4887_v32, %v4740_v36  ;;  %v11230_v32 = vadd.f32 1.0, %v6966_v45  ;;  %v6407_v36 = vmul.f32 -1.442695, %v5011_v57 }
 0xe64   : > { %13135 = vst [vmem:[#allocation104_spill] sm:$0xff] %v11288_v46 }
 0xe65   : > { %6973 = vrcp.f32 %v11230_v32  ;;  %v6410_v16 = vmul.f32 -1.442695, %v11204_v55  ;;  %v5096_v28 = vand.u32 2147483647, %v11230_v32  ;;  %v5098_v24 = vand.u32 2147483648, %v11230_v32 }
 0xe66   : > { %v11206_v12 = vpop.f32.mrf.mxu2  ;;  %vm5092_vm0 = vweird.f32 %v11230_v32 }
 0xe67   : > { %vm11333_vm1 = vcmp.eq.f32.partialorder %v5096_v28, 8.507059e+37  ;;  %v5099_v28 = vor.u32 1.1754944e-38, %v5098_v24 }
 0xe68   : > { %v4742_v50 = vpop.f32.mrf.mxu1 }
 0xe69   : > { %v4743_v47 = vadd.f32 %v4742_v50, %v8349_v29  ;;  %v4904_v7 = vpop.f32.mrf.mxu0 }
 0xe6a   : > { %v11295_v54 = vadd.f32 %v4904_v7, %v13134_v25  ;;  %v11315_v7 = vadd.f32 %v11164_v41, %v8446_v2 }
 0xe6b   : > { %v11212_v30 = vadd.f32 %v4890_v56, %v4743_v47  ;;  %4937 = vmatmul.bf16.gmra.mxu1 %v10847_v27  ;;  %4986 = vmatmul.bf16.gmra.mxu2 %v10847_v27  ;;  %v6968_v27 = vpop.eup %6967  ;;  %v11239_v47 = vpop.f32.mrf.mxu3 }
 0xe6c   : > { %v11232_v59 = vadd.f32 1.0, %v6968_v27  ;;  %v6970_v50 = vpop.eup %6969  ;;  %13136 = vst [vmem:[#allocation128_spill] sm:$0xff] %v11295_v54 }
 0xe6d   : > { %v11242_v6 = vadd.f32 1.0, %v6970_v50  ;;  %v6972_v11 = vpop.eup %6971  ;;  %v6409_v50 = vmul.f32 -1.442695, %v5013_v51 }
 0xe6e   : > { %v11218_v1 = vpop.f32.mrf.mxu2  ;;  %6975 = vrcp.f32 %v11232_v59  ;;  %v11246_v45 = vpop.eup %6973  ;;  %v11253_v0 = vadd.f32 1.0, %v6972_v11  ;;  %vm5107_vm5 = vweird.f32 %v11232_v59 }
 0xe6f   : > { %6977 = vpow2.f32 %v6407_v36  ;;  %vm5093_vm2 = vweird.f32 %v11246_v45  ;;  %vm5122_vm9 = vweird.f32 %v11242_v6 }
 0xe70   : > { %v11220_v14 = vpop.f32.mrf.mxu1  ;;  %6979 = vrcp.f32 %v11242_v6  ;;  %vm11362_vm4 = vmor %vm5092_vm0, %vm5093_vm2  ;;  %vm5137_vm13 = vweird.f32 %v11253_v0 }
 0xe71   : > { %v4745_v55 = vadd.f32 %v11220_v14, %v8349_v29  ;;  %v11320_v14 = vadd.f32 %v11191_v3, %v12852_v53 }
 0xe73   : > { %v11255_v21 = vpop.f32.mrf.mxu3  ;;  %v5016_v37 = vadd.f32 %v4892_v58, %v4745_v55  ;;  %v11347_v58 = vadd.f32 %v11170_v5, %v8446_v2 }
 0xe74   : > { %v11249_v57 = vpop.eup %6975 }
 0xe75   : > { %v6978_v38 = vpop.eup %6977  ;;  %vm5108_vm3 = vweird.f32 %v11249_v57  ;;  %v6412_v5 = vmul.f32 -1.442695, %v5016_v37 }
 0xe76   : > { %v11222_v17 = vpop.f32.mrf.mxu2  ;;  %v11261_v36 = vadd.f32 1.0, %v6978_v38  ;;  %v11265_v42 = vpop.eup %6979  ;;  %vm11381_vm7 = vmor %vm5107_vm5, %vm5108_vm3 }
 0xe77   : > { %v4906_v38 = vpop.f32.mrf.mxu0  ;;  %vm5123_vm8 = vweird.f32 %v11265_v42 }
 0xe78   : > { %v11226_v33 = vpop.f32.mrf.mxu1  ;;  %v11298_v34 = vadd.f32 %v4906_v38, %v13134_v25  ;;  %vm11436_vm11 = vmor %vm5122_vm9, %vm5123_vm8  ;;  %vm5152_vm0 = vweird.f32 %v11261_v36 }
 0xe7a   : > { %13137 = vst [vmem:[#allocation138_spill] sm:$0xff] %v11298_v34  ;;  %v6411_v34 = vmul.f32 -1.442695, %v11212_v30 }
 0xe7b   : > { %4942 = vmatmul.bf16.gmra.mxu1 %v10905_v61  ;;  %4991 = vmatmul.bf16.gmra.mxu2 %v10905_v61  ;;  %v6408_v61 = vmul.f32 -1.442695, %v5012_v22  ;;  %v5088_v22 = vmul.f32 %v11246_v45, %v11230_v32 }
 0xe7d   : > { %6981 = vpow2.f32 %v6408_v61  ;;  %v5103_v61 = vmul.f32 %v11249_v57, %v11232_v59  ;;  %v5089_v15 = vsub.f32 1.0, %v5088_v22  ;;  %v5118_v22 = vmul.f32 %v11265_v42, %v11242_v6 }
 0xe7e   : > { %v11234_v63 = vpop.f32.mrf.mxu2  ;;  %6983 = vrcp.f32 %v11253_v0 }
 0xe7f   : > { %6985 = vpow2.f32 %v6409_v50  ;;  %v5104_v26 = vsub.f32 1.0, %v5103_v61  ;;  %v5119_v41 = vsub.f32 1.0, %v5118_v22  ;;  %v5113_v22 = vand.u32 2147483648, %v11232_v59 }
 0xe80   : > { %v11236_v56 = vpop.f32.mrf.mxu1  ;;  %6987 = vrcp.f32 %v11261_v36 }
 0xe81   : > { %6989 = vpow2.f32 %v6410_v16  ;;  %v5105_v62 = vmul.f32 %v11249_v57, %v5104_v26  ;;  %v5111_v26 = vand.u32 2147483647, %v11232_v59  ;;  %v5114_v59 = vor.u32 1.1754944e-38, %v5113_v22 }
 0xe82   : > { %v5143_v16 = vand.u32 2147483648, %v11253_v0 }
 0xe83   : > { %v6982_v11 = vpop.eup %6981  ;;  %vm11367_vm6 = vcmp.eq.f32.partialorder %v5111_v26, 8.507059e+37  ;;  %v11388_v26 = vadd.f32 %v11174_v39, %v8446_v2 }
 0xe84   : > { %v11303_v61 = vpop.eup %6983 }
 0xe85   : > { %v6986_v38 = vpop.eup %6985  ;;  %v5133_v3 = vmul.f32 %v11303_v61, %v11253_v0  ;;  %vm5138_vm12 = vweird.f32 %v11303_v61 }
 0xe86   : > { %v11244_v20 = vpop.f32.mrf.mxu2  ;;  %v11340_v23 = vadd.f32 1.0, %v6986_v38  ;;  %v11355_v38 = vadd.f32 %v11202_v49, %v12852_v53  ;;  %vm11476_vm15 = vmor %vm5137_vm13, %vm5138_vm12 }
 0xe88   : > { %v11251_v27 = vpop.f32.mrf.mxu1  ;;  %vm5182_vm8 = vweird.f32 %v11340_v23 }
 0xe8b   : > { %4947 = vmatmul.bf16.gmra.mxu1 %v10944_v52  ;;  %4996 = vmatmul.bf16.gmra.mxu2 %v10944_v52  ;;  %v11274_v52 = vadd.f32 %v11196_v48, %v13134_v25  ;;  %v11290_v48 = vadd.f32 1.0, %v6982_v11  ;;  %v11311_v11 = vadd.f32 %v11182_v4, %v12852_v53  ;;  %v5090_v25 = vmul.f32 %v11246_v45, %v5089_v15  ;;  %v11325_v4 = vpop.f32.mrf.mxu3  ;;  %v11329_v15 = vpop.eup %6987 }
 0xe8c   : > { %v5148_v46 = vmul.f32 %v11329_v15, %v11261_v36  ;;  %v6990_v60 = vpop.eup %6989 }
 0xe8d   : > { %6991 = vrcp.f32 %v11290_v48  ;;  %v5091_v30 = vadd.f32 %v11246_v45, %v5090_v25  ;;  %v5120_v25 = vmul.f32 %v11265_v42, %v5119_v41  ;;  %v5126_v41 = vand.u32 2147483647, %v11242_v6 }
 0xe8e   : > { %v11268_v51 = vpop.f32.mrf.mxu2  ;;  %6993 = vpow2.f32 %v6411_v34  ;;  %v5134_v34 = vsub.f32 1.0, %v5133_v3  ;;  %v5128_v3 = vand.u32 2147483648, %v11242_v6  ;;  %v5149_v24 = vsub.f32 1.0, %v5148_v46 }
 0xe8f   : > { %6995 = vrcp.f32 %v11340_v23  ;;  %v5095_v37 = vsel %vm11362_vm4, %v11246_v45, %v5091_v30  ;;  %v11398_v30 = vadd.f32 1.0, %v6990_v60  ;;  %v5121_v22 = vadd.f32 %v11265_v42, %v5120_v25 }
 0xe90   : > { %v11282_v50 = vpop.f32.mrf.mxu1  ;;  %6997 = vpow2.f32 %v6412_v5  ;;  %vm11414_vm10 = vcmp.eq.f32.partialorder %v5126_v41, 8.507059e+37  ;;  %v5141_v46 = vand.u32 2147483647, %v11253_v0  ;;  %v11426_v5 = vadd.f32 %v11224_v43, %v12852_v53 }
 0xe91   : > { %v5129_v32 = vor.u32 1.1754944e-38, %v5128_v3  ;;  %6999 = vrcp.f32 %v11398_v30  ;;  %v5150_v43 = vmul.f32 %v11329_v15, %v5149_v24  ;;  %v11460_v24 = vadd.f32 %v11188_v44, %v8446_v2 }
 0xe92   : > { %vm11453_vm14 = vcmp.eq.f32.partialorder %v5141_v46, 8.507059e+37  ;;  %vm5167_vm4 = vweird.f32 %v11290_v48  ;;  %vm5197_vm12 = vweird.f32 %v11398_v30  ;;  %v11611_v3 = vadd.f32 %v11222_v17, %v8446_v2 }
 0xe93   : > { %v11371_v49 = vpop.eup %6991  ;;  %v11411_v60 = vpop.f32.mrf.mxu3  ;;  %v5151_v44 = vadd.f32 %v11329_v15, %v5150_v43  ;;  %v5171_v43 = vand.u32 2147483647, %v11290_v48 }
 0xe94   : > { %vm5168_vm5 = vweird.f32 %v11371_v49 }
 0xe96   : > { %v11331_v54 = vpop.f32.mrf.mxu2 }
 0xe97   : > { %13138 = vst [vmem:[#allocation35_spill] sm:$0xff] %v11331_v54  ;;  %v5106_v54 = vadd.f32 %v11249_v57, %v5105_v62 }
 0xe98   : > { %v11349_v55 = vpop.f32.mrf.mxu1 }
 0xe99   : > { %13141 = vst [vmem:[#allocation130_spill] sm:$0xff] %v11349_v55  ;;  %v5110_v45 = vsel %vm11381_vm7, %v11249_v57, %v5106_v54  ;;  %v5135_v55 = vmul.f32 %v11303_v61, %v5134_v34  ;;  %v5163_v57 = vmul.f32 %v11371_v49, %v11290_v48  ;;  %v6994_v54 = vpop.eup %6993  ;;  %vm11558_vm7 = vmor %vm5167_vm4, %vm5168_vm5 }
 0xe9a   : > { %v11432_v6 = vsel %vm11367_vm6, %v5114_v59, %v5110_v45  ;;  %v11440_v41 = vpop.eup %6995  ;;  %v11448_v62 = vadd.f32 1.0, %v6994_v54  ;;  %v5156_v45 = vand.u32 2147483647, %v11261_v36  ;;  %vm11533_vm6 = vcmp.eq.f32.partialorder %v5171_v43, 8.507059e+37 }
 0xe9b   : > { %4952 = vmatmul.bf16.gmra.mxu1 %v10957_v9  ;;  %5001 = vmatmul.bf16.gmra.mxu2 %v10957_v9  ;;  %v11392_v9 = vadd.f32 %v11216_v13, %v12852_v53  ;;  %v11406_v13 = vsel %vm11333_vm1, %v5099_v28, %v5095_v37  ;;  %v11422_v28 = vadd.f32 %v11180_v10, %v8446_v2  ;;  %vm5153_vm1 = vweird.f32 %v11329_v15 }
 0xe9c   : > { %v5125_v10 = vsel %vm11436_vm11, %v11265_v42, %v5121_v22  ;;  %v5136_v59 = vadd.f32 %v11303_v61, %v5135_v55  ;;  %v5158_v42 = vand.u32 2147483648, %v11261_v36  ;;  %v6998_v22 = vpop.eup %6997  ;;  %v11464_v55 = vadd.f32 %v11239_v47, %v12852_v53  ;;  %vm11513_vm3 = vmor %vm5152_vm0, %vm5153_vm1 }
 0xe9d   : > { %v5178_v0 = vmul.f32 %v11440_v41, %v11340_v23  ;;  %v11472_v54 = vsel %vm11414_vm10, %v5129_v32, %v5125_v10  ;;  %7001 = vrcp.f32 %v11448_v62  ;;  %vm11489_vm2 = vcmp.eq.f32.partialorder %v5156_v45, 8.507059e+37  ;;  %v11494_v37 = vpop.eup %6999 }
 0xe9e   : > { %v11402_v39 = vpop.f32.mrf.mxu2  ;;  %13156 = vst [vmem:[#allocation36_spill] sm:$0xff] %v11464_v55  ;;  %v5140_v47 = vsel %vm11476_vm15, %v11303_v61, %v5136_v59  ;;  %v11496_v32 = vadd.f32 1.0, %v6998_v22  ;;  %v5159_v10 = vor.u32 1.1754944e-38, %v5158_v42  ;;  %v5173_v55 = vand.u32 2147483648, %v11290_v48  ;;  %v4842_v22 = vpop.f32.mrf.mxu3 }
 0xe9f   : > { %13148 = vst [vmem:[#allocation38_spill] sm:$0xff] %v11402_v39  ;;  %v5164_v39 = vsub.f32 1.0, %v5163_v57  ;;  %v4748_v57 = vadd.f32 %v11226_v33, %v8349_v29  ;;  %v11506_v61 = vadd.f32 %v11255_v21, %v12852_v53  ;;  %v5179_v42 = vsub.f32 1.0, %v5178_v0 }
 0xea0   : > { %v11428_v34 = vpop.f32.mrf.mxu1  ;;  %v5155_v21 = vsel %vm11513_vm3, %v11329_v15, %v5151_v44  ;;  %7003 = vrcp.f32 %v11496_v32  ;;  %v5174_v15 = vor.u32 1.1754944e-38, %v5173_v55  ;;  %v11541_v44 = vadd.f32 %v11206_v12, %v8446_v2 }
 0xea1   : > { %13151 = vst [vmem:[#allocation109_spill] sm:$0xff] %v11428_v34  ;;  %v5144_v34 = vor.u32 1.1754944e-38, %v5143_v16  ;;  %v5165_v16 = vmul.f32 %v11371_v49, %v5164_v39  ;;  %v5017_v59 = vadd.f32 %v11274_v52, %v4748_v57  ;;  %v5186_v52 = vand.u32 2147483647, %v11340_v23 }
 0xea2   : > { %v5193_v57 = vmul.f32 %v11494_v37, %v11398_v30  ;;  %v11552_v55 = vsel %vm11489_vm2, %v5159_v10, %v5155_v21  ;;  %vm5183_vm10 = vweird.f32 %v11440_v41  ;;  %v5203_v21 = vand.u32 2147483648, %v11398_v30 }
 0xea3   : > { %v11520_v46 = vsel %vm11453_vm14, %v5144_v34, %v5140_v47  ;;  %v5166_v36 = vadd.f32 %v11371_v49, %v5165_v16  ;;  %v11537_v0 = vpop.eup %7001  ;;  %v11545_v47 = vadd.f32 %v11325_v4, %v12852_v53  ;;  %v6413_v16 = vmul.f32 -1.442695, %v5017_v59  ;;  %vm11604_vm11 = vmor %vm5182_vm8, %vm5183_vm10 }
 0xea4   : > { %v5188_v4 = vand.u32 2147483648, %v11340_v23  ;;  %vm11567_vm9 = vcmp.eq.f32.partialorder %v5186_v52, 8.507059e+37  ;;  %v5194_v10 = vsub.f32 1.0, %v5193_v57  ;;  %v5208_v45 = vmul.f32 %v11537_v0, %v11448_v62 }
 0xea5   : > { %v11585_v12 = vadd.f32 %v11218_v1, %v8446_v2  ;;  %v5204_v23 = vor.u32 1.1754944e-38, %v5203_v21  ;;  %vm5198_vm14 = vweird.f32 %v11494_v37  ;;  %vm5212_vm15 = vweird.f32 %v11448_v62 }
 0xea6   : > { %v11484_v33 = vpop.f32.mrf.mxu2  ;;  %vm11649_vm0 = vmor %vm5197_vm12, %vm5198_vm14  ;;  %vm5213_vm2 = vweird.f32 %v11537_v0  ;;  %vm5227_vm4 = vweird.f32 %v11496_v32 }
 0xea7   : > { %13159 = vst [vmem:[#allocation28_spill] sm:$0xff] %v11484_v33  ;;  %v11502_v33 = vadd.f32 %v11198_v35, %v8446_v2  ;;  %vm11694_vm3 = vmor %vm5212_vm15, %vm5213_vm2 }
 0xea8   : > { %v4918_v39 = vpop.f32.mrf.mxu1 }
 0xea9   : > { %v4919_v35 = vadd.f32 %v4918_v39, %v8452_v40  ;;  %v5180_v39 = vmul.f32 %v11440_v41, %v5179_v42 }
 0xeab   : > { %v5327_v34 = vadd.f32 %v4919_v35, %v11307_v31  ;;  %v4750_v31 = vadd.f32 %v11236_v56, %v8349_v29  ;;  %v5170_v56 = vsel %vm11558_vm7, %v11371_v49, %v5166_v36  ;;  %v5181_v35 = vadd.f32 %v11440_v41, %v5180_v39  ;;  %v11578_v36 = vpop.eup %7003 }
 0xeac   : > { %v5201_v49 = vand.u32 2147483647, %v11398_v30  ;;  %v11593_v39 = vsel %vm11533_vm6, %v5174_v15, %v5170_v56  ;;  %v5223_v15 = vmul.f32 %v11578_v36, %v11496_v32  ;;  %v11623_v56 = vadd.f32 %v4842_v22, %v12852_v53 }
 0xead   : > { %v6419_v43 = vmul.f32 -1.442695, %v5327_v34  ;;  %v5018_v52 = vadd.f32 %v11278_v8, %v4750_v31  ;;  %v4845_v8 = vpop.f32.mrf.mxu3  ;;  %vm5228_vm5 = vweird.f32 %v11578_v36 }
 0xeae   : > { %v4967_v59 = vpop.f32.mrf.mxu2  ;;  %vm11616_vm13 = vcmp.eq.f32.partialorder %v5201_v49, 8.507059e+37  ;;  %v5218_v49 = vand.u32 2147483648, %v11448_v62  ;;  %vm11733_vm7 = vmor %vm5227_vm4, %vm5228_vm5 }
 0xeaf   : > { %7005 = vpow2.f32 %v6419_v43  ;;  %v4968_v48 = vadd.f32 %v4967_v59, %v8821_v19  ;;  %v5189_v43 = vor.u32 1.1754944e-38, %v5188_v4  ;;  %v5195_v59 = vmul.f32 %v11494_v37, %v5194_v10 }
 0xeb0   : > { %7007 = vpow2.f32 %v6413_v16  ;;  %v4920_v42 = vpop.f32.mrf.mxu1  ;;  %v11589_v16 = vadd.f32 %v11411_v60, %v12852_v53  ;;  %v5209_v60 = vsub.f32 1.0, %v5208_v45  ;;  %v6414_v10 = vmul.f32 -1.442695, %v5018_v52 }
 0xeb1   : > { %v5647_v57 = vmul.f32 %v11406_v13, %v4968_v48  ;;  %v4921_v34 = vadd.f32 %v4920_v42, %v8452_v40  ;;  %v5196_v42 = vadd.f32 %v11494_v37, %v5195_v59  ;;  %v5224_v59 = vsub.f32 1.0, %v5223_v15 }
 0xeb2   : > { %v5210_v52 = vmul.f32 %v11537_v0, %v5209_v60 }
 0xeb3   : > { %v11597_v13 = vadd.f32 %v5647_v57, %v11311_v11  ;;  %v5328_v31 = vadd.f32 %v4921_v34, %v11315_v7  ;;  %v5185_v11 = vsel %vm11604_vm11, %v11440_v41, %v5181_v35  ;;  %v5216_v35 = vand.u32 2147483647, %v11448_v62 }
 0xeb4   : > { %v11634_v22 = vsel %vm11567_vm9, %v5189_v43, %v5185_v11  ;;  %v4753_v57 = vadd.f32 %v11251_v27, %v8349_v29  ;;  %v5200_v27 = vsel %vm11649_vm0, %v11494_v37, %v5196_v42  ;;  %v5219_v11 = vor.u32 1.1754944e-38, %v5218_v49 }
 0xeb5   : > { %v7006_v4 = vpop.eup %7005  ;;  %v6420_v48 = vmul.f32 -1.442695, %v5328_v31  ;;  %vm11656_vm1 = vcmp.eq.f32.partialorder %v5216_v35, 8.507059e+37  ;;  %v11672_v37 = vadd.f32 %v4845_v8, %v12852_v53  ;;  %v11679_v42 = vsel %vm11616_vm13, %v5204_v23, %v5200_v27 }
 0xeb6   : > { %v7008_v17 = vpop.eup %7007  ;;  %v11626_v45 = vadd.f32 1.0, %v7006_v4  ;;  %v4969_v41 = vpop.f32.mrf.mxu2  ;;  %v5211_v4 = vadd.f32 %v11537_v0, %v5210_v52  ;;  %v5231_v35 = vand.u32 2147483647, %v11496_v32  ;;  %v11686_v8 = vadd.f32 %v11244_v20, %v8446_v2 }
 0xeb7   : > { %7009 = vpow2.f32 %v6420_v48  ;;  %v4970_v21 = vadd.f32 %v4969_v41, %v8821_v19  ;;  %v11641_v31 = vadd.f32 1.0, %v7008_v17  ;;  %v5019_v48 = vadd.f32 %v11285_v18, %v4753_v57 }
 0xeb8   : > { %7011 = vrcp.f32 %v11626_v45  ;;  %v4923_v34 = vpop.f32.mrf.mxu1  ;;  %v5225_v17 = vmul.f32 %v11578_v36, %v5224_v59  ;;  %v5215_v57 = vsel %vm11694_vm3, %v11537_v0, %v5211_v4  ;;  %vm11713_vm6 = vcmp.eq.f32.partialorder %v5231_v35, 8.507059e+37 }
 0xeb9   : > { %7013 = vpow2.f32 %v6414_v10  ;;  %v5648_v1 = vmul.f32 %v11432_v6, %v4970_v21  ;;  %v4924_v25 = vadd.f32 %v4923_v34, %v8452_v40  ;;  %v5233_v6 = vand.u32 2147483648, %v11496_v32 }
 0xeba   : > { %v11669_v10 = vadd.f32 %v11234_v63, %v8446_v2  ;;  %7015 = vrcp.f32 %v11641_v31  ;;  %v6415_v34 = vmul.f32 -1.442695, %v5019_v48  ;;  %v5226_v59 = vadd.f32 %v11578_v36, %v5225_v17 }
 0xebb   : > { %v11662_v15 = vadd.f32 %v5648_v1, %v11320_v14  ;;  %v5329_v30 = vadd.f32 %v4924_v25, %v11347_v58  ;;  %v4847_v14 = vpop.f32.mrf.mxu3  ;;  %v5234_v7 = vor.u32 1.1754944e-38, %v5233_v6  ;;  %v5246_v4 = vand.u32 2147483647, %v11641_v31  ;;  %v13186_v6 = vld [vmem:[#allocation43_spill] sm:$0xff] }
 0xebc   : > { %v11709_v1 = vadd.f32 %v4847_v14, %v12852_v53  ;;  %v5418_v48 = vand.u32 2147483648, %v11626_v45  ;;  %vm5412_vm9 = vweird.f32 %v11626_v45  ;;  %vm5242_vm15 = vweird.f32 %v11641_v31 }
 0xebd   : > { %v7010_v41 = vpop.eup %7009  ;;  %v6421_v58 = vmul.f32 -1.442695, %v5329_v30  ;;  %v11721_v30 = vsel %vm11656_vm1, %v5219_v11, %v5215_v57  ;;  %v5230_v11 = vsel %vm11733_vm7, %v11578_v36, %v5226_v59  ;;  %vm11887_vm7 = vcmp.eq.f32.partialorder %v5246_v4, 8.507059e+37 }
 0xebe   : > { %v11682_v63 = vpop.eup %7011  ;;  %v11688_v18 = vadd.f32 1.0, %v7010_v41  ;;  %v4972_v49 = vpop.f32.mrf.mxu2 }
 0xebf   : > { %v7014_v23 = vpop.eup %7013  ;;  %v5408_v52 = vmul.f32 %v11682_v63, %v11626_v45  ;;  %7017 = vpow2.f32 %v6421_v58  ;;  %v4973_v20 = vadd.f32 %v4972_v49, %v8821_v19  ;;  %vm5413_vm8 = vweird.f32 %v11682_v63 }
 0xec0   : > { %7019 = vrcp.f32 %v11688_v18  ;;  %v4925_v62 = vpop.f32.mrf.mxu1  ;;  %v11717_v0 = vadd.f32 1.0, %v7014_v23  ;;  %v11725_v17 = vpop.eup %7015  ;;  %v5416_v58 = vand.u32 2147483647, %v11626_v45  ;;  %vm11756_vm10 = vmor %vm5412_vm9, %vm5413_vm8  ;;  %vm5427_vm14 = vweird.f32 %v11688_v18 }
 0xec1   : > { %v5409_v25 = vsub.f32 1.0, %v5408_v52  ;;  %v5649_v43 = vmul.f32 %v11472_v54, %v4973_v20  ;;  %v4926_v27 = vadd.f32 %v4925_v62, %v8452_v40  ;;  %7021 = vpow2.f32 %v6415_v34 }
 0xec2   : > { %7023 = vtanh.f32 %v11597_v13  ;;  %v5238_v36 = vmul.f32 %v11725_v17, %v11641_v31  ;;  %v5419_v13 = vor.u32 1.1754944e-38, %v5418_v48  ;;  %v11768_v62 = vadd.f32 %v11268_v51, %v8446_v2 }
 0xec3   : > { %v11728_v54 = vadd.f32 %v5649_v43, %v11355_v38  ;;  %v5330_v41 = vadd.f32 %v4926_v27, %v11388_v26  ;;  %v5410_v60 = vmul.f32 %v11682_v63, %v5409_v25  ;;  %v5248_v38 = vand.u32 2147483648, %v11641_v31  ;;  %v4850_v20 = vpop.f32.mrf.mxu3 }
 0xec4   : > { %7025 = vrcp.f32 %v11717_v0  ;;  %vm5417_vm11 = vcmp.eq.f32.partialorder %v5416_v58, 8.507059e+37  ;;  %v4755_v51 = vadd.f32 %v11282_v50, %v8349_v29  ;;  %v5431_v52 = vand.u32 2147483647, %v11688_v18 }
 0xec5   : > { %v7018_v26 = vpop.eup %7017  ;;  %v6422_v32 = vmul.f32 -1.442695, %v5330_v41  ;;  %v5411_v35 = vadd.f32 %v11682_v63, %v5410_v60  ;;  %v11771_v25 = vor.u32 1.1754944e-38, %v5248_v38  ;;  %v11784_v60 = vsel %vm11713_vm6, %v5234_v7, %v5230_v11 }
 0xec6   : > { %v11747_v49 = vpop.eup %7019  ;;  %v11750_v21 = vadd.f32 1.0, %v7018_v26  ;;  %v4974_v23 = vpop.f32.mrf.mxu2  ;;  %v5433_v50 = vand.u32 2147483648, %v11688_v18  ;;  %vm5243_vm13 = vweird.f32 %v11725_v17  ;;  %vm5432_vm1 = vcmp.eq.f32.partialorder %v5431_v52, 8.507059e+37 }
 0xec7   : > { %v5423_v45 = vmul.f32 %v11747_v49, %v11688_v18  ;;  %7027 = vpow2.f32 %v6422_v32  ;;  %v4975_v57 = vadd.f32 %v4974_v23, %v8821_v19  ;;  %v5415_v34 = vsel %vm11756_vm10, %v11682_v63, %v5411_v35  ;;  %v11775_v14 = vpop.eup %7021  ;;  %vm11859_vm6 = vmor %vm5242_vm15, %vm5243_vm13 }
 0xec8   : > { %7029 = vrcp.f32 %v11750_v21  ;;  %v4928_v59 = vpop.f32.mrf.mxu1  ;;  %v5420_v41 = vsel %vm5417_vm11, %v5419_v13, %v5415_v34  ;;  %v11778_v63 = vadd.f32 %v4850_v20, %v12852_v53  ;;  %v7024_v58 = vpop.eup %7023  ;;  %v5239_v32 = vsub.f32 1.0, %v5238_v36  ;;  %v13187_v36 = vld [vmem:[#allocation104_spill] sm:$0xff] }
 0xec9   : > { %v5424_v43 = vsub.f32 1.0, %v5423_v45  ;;  %v5650_v27 = vmul.f32 %v11520_v46, %v4975_v57  ;;  %v4929_v48 = vadd.f32 %v4928_v59, %v8452_v40  ;;  %v5695_v38 = vsub.f32 1.0, %v5420_v41 }
 0xeca   : > { %v11791_v23 = vpop.eup %7025  ;;  %v5727_v7 = vmul.f32 %v5420_v41, %v13186_v6  ;;  %v5263_v45 = vand.u32 2147483648, %v11717_v0  ;;  %vm5428_vm12 = vweird.f32 %v11747_v49  ;;  %v5020_v57 = vadd.f32 %v13187_v36, %v4755_v51 }
 0xecb   : > { %v11787_v26 = vadd.f32 %v5650_v27, %v11392_v9  ;;  %v5331_v46 = vadd.f32 %v4929_v48, %v11422_v28  ;;  %v5425_v35 = vmul.f32 %v11747_v49, %v5424_v43  ;;  %v5711_v13 = vmul.f32 %v7024_v58, %v5695_v38  ;;  %vm5429_vm0 = vmor %vm5427_vm14, %vm5428_vm12 }
 0xecc   : > { %7031 = vtanh.f32 %v11662_v15  ;;  %v5240_v51 = vmul.f32 %v11725_v17, %v5239_v32  ;;  %v5434_v15 = vor.u32 1.1754944e-38, %v5433_v50  ;;  %v6416_v18 = vmul.f32 -1.442695, %v5020_v57 }
 0xecd   : > { %v7028_v11 = vpop.eup %7027  ;;  %v6423_v20 = vmul.f32 -1.442695, %v5331_v46  ;;  %v5426_v9 = vadd.f32 %v11747_v49, %v5425_v35  ;;  %v11804_v43 = vadd.f32 %v5727_v7, %v5711_v13  ;;  %v5448_v13 = vand.u32 2147483648, %v11750_v21 }
 0xece   : > { %v7030_v28 = vpop.eup %7029  ;;  %v11801_v34 = vadd.f32 1.0, %v7028_v11  ;;  %v4977_v59 = vpop.f32.mrf.mxu2  ;;  %vm5442_vm3 = vweird.f32 %v11750_v21  ;;  %vm5258_vm15 = vweird.f32 %v11791_v23 }
 0xecf   : > { %v5438_v27 = vmul.f32 %v7030_v28, %v11750_v21  ;;  %7033 = vpow2.f32 %v6423_v20  ;;  %v4978_v48 = vadd.f32 %v4977_v59, %v8821_v19  ;;  %v5430_v35 = vsel %vm5429_vm0, %v11747_v49, %v5426_v9 }
 0xed0   : > { %7035 = vrcp.f32 %v11801_v34  ;;  %v4930_v41 = vpop.f32.mrf.mxu1  ;;  %vm5443_vm2 = vweird.f32 %v7030_v28  ;;  %v5435_v6 = vsel %vm5432_vm1, %v5434_v15, %v5430_v35  ;;  %v11824_v20 = vor.u32 1.1754944e-38, %v5263_v45 }
 0xed1   : > { %v5439_v38 = vsub.f32 1.0, %v5438_v27  ;;  %v5651_v58 = vmul.f32 %v11552_v55, %v4978_v48  ;;  %v4931_v46 = vadd.f32 %v4930_v41, %v8452_v40  ;;  %v5696_v52 = vsub.f32 1.0, %v5435_v6  ;;  %vm11836_vm4 = vmor %vm5442_vm3, %vm5443_vm2 }
 0xed2   : > { %v7032_v50 = vpop.eup %7031  ;;  %7037 = vtanh.f32 %v11728_v54  ;;  %v5446_v49 = vand.u32 2147483647, %v11750_v21  ;;  %v11833_v54 = vadd.f32 %v11725_v17, %v5240_v51  ;;  %v5449_v48 = vor.u32 1.1754944e-38, %v5448_v13  ;;  %v13190_v51 = vld [vmem:[#allocation35_spill] sm:$0xff] }
 0xed3   : > { %v11819_v32 = vadd.f32 %v5651_v58, %v11426_v5  ;;  %v5332_v7 = vadd.f32 %v4931_v46, %v11460_v24  ;;  %v5440_v11 = vmul.f32 %v7030_v28, %v5439_v38  ;;  %v5712_v5 = vmul.f32 %v7032_v50, %v5696_v52  ;;  %v13193_v50 = vld [vmem:[#allocation20_spill] sm:$0xff] }
 0xed4   : > { %7039 = vpow2.f32 %v6416_v18  ;;  %v11846_v38 = vadd.f32 1.0, %v11775_v14  ;;  %v11850_v58 = vadd.f32 %v13190_v51, %v8446_v2  ;;  %vm5447_vm5 = vcmp.eq.f32.partialorder %v5446_v49, 8.507059e+37 }
 0xed5   : > { %v7034_v9 = vpop.eup %7033  ;;  %v6424_v36 = vmul.f32 -1.442695, %v5332_v7  ;;  %v5441_v57 = vadd.f32 %v7030_v28, %v5440_v11  ;;  %v5245_v11 = vsel %vm11859_vm6, %v11725_v17, %v11833_v54  ;;  %v5728_v49 = vmul.f32 %v5435_v6, %v13193_v50 }
 0xed6   : > { %v11828_v59 = vpop.eup %7035  ;;  %v11830_v24 = vadd.f32 1.0, %v7034_v9  ;;  %v4979_v27 = vpop.f32.mrf.mxu2  ;;  %v13194_v9 = vld [vmem:[#allocation36_spill] sm:$0xff]  ;;  %v5461_v45 = vand.u32 2147483647, %v11801_v34  ;;  %vm5457_vm9 = vweird.f32 %v11801_v34  ;;  %vm5257_vm1 = vweird.f32 %v11717_v0 }
 0xed7   : > { %v5453_v41 = vmul.f32 %v11828_v59, %v11801_v34  ;;  %7041 = vpow2.f32 %v6424_v36  ;;  %v4980_v21 = vadd.f32 %v4979_v27, %v8821_v19  ;;  %v5445_v15 = vsel %vm11836_vm4, %v7030_v28, %v5441_v57 }
 0xed8   : > { %7043 = vrcp.f32 %v11830_v24  ;;  %v4933_v46 = vpop.f32.mrf.mxu1  ;;  %v5450_v28 = vsel %vm5447_vm5, %v5449_v48, %v5445_v15  ;;  %v7038_v7 = vpop.eup %7037  ;;  %v13195_v15 = vld [vmem:[#allocation21_spill] sm:$0xff]  ;;  %vm5458_vm8 = vweird.f32 %v11828_v59  ;;  %vm5462_vm11 = vcmp.eq.f32.partialorder %v5461_v45, 8.507059e+37 }
 0xed9   : > { %v5454_v35 = vsub.f32 1.0, %v5453_v41  ;;  %v5652_v18 = vmul.f32 %v11593_v39, %v4980_v21  ;;  %v4934_v13 = vadd.f32 %v4933_v46, %v8452_v40  ;;  %v11869_v39 = vmul.f32 %v11791_v23, %v11717_v0  ;;  %vm5459_vm10 = vmor %vm5457_vm9, %vm5458_vm8 }
 0xeda   : > { %v5697_v52 = vsub.f32 1.0, %v5450_v28  ;;  %v11878_v48 = vpop.eup %7039  ;;  %v5463_v41 = vand.u32 2147483648, %v11801_v34  ;;  %v5729_v51 = vmul.f32 %v5450_v28, %v13195_v15  ;;  %v11882_v46 = vadd.f32 %v5728_v49, %v5712_v5  ;;  %v4852_v49 = vpop.f32.mrf.mxu3  ;;  %vm12011_vm8 = vmor %vm5257_vm1, %vm5258_vm15 }
 0xedb   : > { %v11873_v36 = vadd.f32 %v5652_v18, %v13194_v9  ;;  %v5333_v57 = vadd.f32 %v4934_v13, %v11502_v33  ;;  %v5455_v27 = vmul.f32 %v11828_v59, %v5454_v35  ;;  %7045 = vrcp.f32 %v11846_v38 }
 0xedc   : > { %v5713_v21 = vmul.f32 %v7038_v7, %v5697_v52  ;;  %7047 = vtanh.f32 %v11787_v26  ;;  %v5759_v7 = vpack.c.bf16 %v11882_v46, %v11804_v43  ;;  %v13198_v52 = vld [vmem:[#allocation130_spill] sm:$0xff]  ;;  %v5254_v15 = vsub.f32 1.0, %v11869_v39  ;;  %v6445_v46 = vld [vmem:[#allocation8 + $0xc4] sm:$0xf] }
 0xedd   : > { %v7042_v55 = vpop.eup %7041  ;;  %v6425_v6 = vmul.f32 -1.442695, %v5333_v57  ;;  %v5456_v35 = vadd.f32 %v11828_v59, %v5455_v27  ;;  %v4758_v50 = vadd.f32 %v13198_v52, %v8349_v29  ;;  %v5478_v34 = vand.u32 2147483648, %v11830_v24 }
 0xede   : > { %v7044_v18 = vpop.eup %7043  ;;  %v11894_v13 = vadd.f32 1.0, %v7042_v55  ;;  %v4982_v5 = vpop.f32.mrf.mxu2  ;;  %v11896_v28 = vadd.f32 %v5729_v51, %v5713_v21  ;;  %v5464_v55 = vor.u32 1.1754944e-38, %v5463_v41  ;;  %v5476_v39 = vand.u32 2147483647, %v11830_v24 }
 0xedf   : > { %v5468_v31 = vmul.f32 %v7044_v18, %v11830_v24  ;;  %7049 = vpow2.f32 %v6425_v6  ;;  %v4983_v4 = vadd.f32 %v4982_v5, %v8821_v19  ;;  %v5460_v21 = vsel %vm5459_vm10, %v11828_v59, %v5456_v35  ;;  %v13199_v59 = vld [vmem:[#allocation128_spill] sm:$0xff] }
 0xee0   : > { %7051 = vrcp.f32 %v11894_v13  ;;  %v4935_v26 = vpop.f32.mrf.mxu1  ;;  %vm5473_vm12 = vweird.f32 %v7044_v18  ;;  %v5465_v51 = vsel %vm5462_vm11, %v5464_v55, %v5460_v21  ;;  %v5021_v35 = vadd.f32 %v13199_v59, %v4758_v50 }
 0xee1   : > { %v5469_v9 = vsub.f32 1.0, %v5468_v31  ;;  %v5653_v57 = vmul.f32 %v11634_v22, %v4983_v4  ;;  %v4936_v27 = vadd.f32 %v4935_v26, %v8452_v40  ;;  %v11911_v6 = vpop.eup %7045  ;;  %v5698_v31 = vsub.f32 1.0, %v5465_v51 }
 0xee2   : > { %v7048_v22 = vpop.eup %7047  ;;  %v11918_v4 = vadd.f32 %v4852_v49, %v12852_v53  ;;  %7053 = vtanh.f32 %v11819_v32  ;;  %vm5472_vm13 = vweird.f32 %v11830_v24  ;;  %v11936_v32 = vsel %vm11887_vm7, %v11771_v25, %v5245_v11 }
 0xee3   : > { %v11914_v5 = vadd.f32 %v5653_v57, %v11506_v61  ;;  %v5334_v45 = vadd.f32 %v4936_v27, %v11541_v44  ;;  %v5470_v41 = vmul.f32 %v7044_v18, %v5469_v9  ;;  %v5714_v61 = vmul.f32 %v7048_v22, %v5698_v31  ;;  %vm11940_vm14 = vmor %vm5472_vm13, %vm5473_vm12  ;;  %v13202_v22 = vld [vmem:[#allocation22_spill] sm:$0xff] }
 0xee4   : > { %v5255_v50 = vmul.f32 %v11791_v23, %v5254_v15  ;;  %v5479_v49 = vor.u32 1.1754944e-38, %v5478_v34  ;;  %v6417_v54 = vmul.f32 -1.442695, %v5021_v35  ;;  %v5276_v11 = vand.u32 2147483647, %v11846_v38 }
 0xee5   : > { %v7050_v52 = vpop.eup %7049  ;;  %v6426_v26 = vmul.f32 -1.442695, %v5334_v45  ;;  %v5471_v55 = vadd.f32 %v7044_v18, %v5470_v41  ;;  %vm5477_vm0 = vcmp.eq.f32.partialorder %v5476_v39, 8.507059e+37  ;;  %v11955_v41 = vadd.f32 1.0, %v11878_v48 }
 0xee6   : > { %v11924_v57 = vpop.eup %7051  ;;  %v11926_v44 = vadd.f32 1.0, %v7050_v52  ;;  %v4984_v9 = vpop.f32.mrf.mxu2  ;;  %v5730_v59 = vmul.f32 %v5465_v51, %v13202_v22  ;;  %v5491_v52 = vand.u32 2147483647, %v11894_v13  ;;  %v5493_v48 = vand.u32 2147483648, %v11894_v13  ;;  %v13207_v22 = vld [vmem:[#allocation109_spill] sm:$0xff] }
 0xee7   : > { %v5483_v27 = vmul.f32 %v11924_v57, %v11894_v13  ;;  %7055 = vpow2.f32 %v6426_v26  ;;  %v4985_v14 = vadd.f32 %v4984_v9, %v8821_v19  ;;  %v5475_v17 = vsel %vm11940_vm14, %v7044_v18, %v5471_v55  ;;  %v13203_v55 = vld [vmem:[#allocation23_spill] sm:$0xff] }
 0xee8   : > { %7057 = vrcp.f32 %v11926_v44  ;;  %v4938_v25 = vpop.f32.mrf.mxu1  ;;  %v5480_v34 = vsel %vm5477_vm0, %v5479_v49, %v5475_v17  ;;  %v7054_v45 = vpop.eup %7053  ;;  %v11958_v18 = vadd.f32 %v11791_v23, %v5255_v50  ;;  %v11970_v50 = vadd.f32 %v5730_v59, %v5714_v61 }
 0xee9   : > { %v5484_v33 = vsub.f32 1.0, %v5483_v27  ;;  %v5654_v21 = vmul.f32 %v11679_v42, %v4985_v14  ;;  %v4939_v15 = vadd.f32 %v4938_v25, %v8452_v40  ;;  %v5699_v31 = vsub.f32 1.0, %v5480_v34 }
 0xeea   : > { %v5731_v9 = vmul.f32 %v5480_v34, %v13203_v55  ;;  %7059 = vpow2.f32 %v6417_v54  ;;  %vm5488_vm2 = vweird.f32 %v11924_v57  ;;  %v5760_v17 = vpack.c.bf16 %v11970_v50, %v11896_v28  ;;  %v6453_v50 = vld [vmem:[#allocation8 + $0x164] sm:$0xf] }
 0xeeb   : > { %v11963_v35 = vadd.f32 %v5654_v21, %v11545_v47  ;;  %v5335_v42 = vadd.f32 %v4939_v15, %v11585_v12  ;;  %v5485_v39 = vmul.f32 %v11924_v57, %v5484_v33  ;;  %v5715_v26 = vmul.f32 %v7054_v45, %v5699_v31 }
 0xeec   : > { %7061 = vtanh.f32 %v11873_v36  ;;  %vm5487_vm3 = vweird.f32 %v11894_v13  ;;  %v13204_v36 = vand.u32 2147483647, %v11717_v0  ;;  %v5268_v21 = vmul.f32 %v11911_v6, %v11846_v38 }
 0xeed   : > { %v7056_v24 = vpop.eup %7055  ;;  %v6427_v49 = vmul.f32 -1.442695, %v5335_v42  ;;  %v5486_v51 = vadd.f32 %v11924_v57, %v5485_v39  ;;  %v11977_v14 = vadd.f32 %v5731_v9, %v5715_v26  ;;  %vm5489_vm5 = vmor %vm5487_vm3, %vm5488_vm2  ;;  %vm5492_vm6 = vcmp.eq.f32.partialorder %v5491_v52, 8.507059e+37 }
 0xeee   : > { %v7058_v47 = vpop.eup %7057  ;;  %v11975_v12 = vadd.f32 1.0, %v7056_v24  ;;  %v4987_v27 = vpop.f32.mrf.mxu2  ;;  %vm11987_vm4 = vcmp.eq.f32.partialorder %v13204_v36, 8.507059e+37  ;;  %v5494_v15 = vor.u32 1.1754944e-38, %v5493_v48  ;;  %v4760_v59 = vadd.f32 %v13207_v22, %v8349_v29 }
 0xeef   : > { %v5498_v61 = vmul.f32 %v7058_v47, %v11926_v44  ;;  %7063 = vpow2.f32 %v6427_v49  ;;  %v4988_v54 = vadd.f32 %v4987_v27, %v8821_v19  ;;  %v5490_v31 = vsel %vm5489_vm5, %v11924_v57, %v5486_v51 }
 0xef0   : > { %7065 = vrcp.f32 %v11975_v12  ;;  %v4940_v25 = vpop.f32.mrf.mxu1  ;;  %vm5503_vm7 = vweird.f32 %v7058_v47  ;;  %v5508_v42 = vand.u32 2147483648, %v11926_v44  ;;  %v5495_v39 = vsel %vm5492_vm6, %v5494_v15, %v5490_v31  ;;  %v12001_v26 = vpop.eup %7059 }
 0xef1   : > { %v5499_v34 = vsub.f32 1.0, %v5498_v61  ;;  %v5655_v13 = vmul.f32 %v11721_v30, %v4988_v54  ;;  %v4941_v45 = vadd.f32 %v4940_v25, %v8452_v40  ;;  %v5700_v57 = vsub.f32 1.0, %v5495_v39  ;;  %v13212_v30 = vld [vmem:[#allocation24_spill] sm:$0xff] }
 0xef2   : > { %v7062_v48 = vpop.eup %7061  ;;  %7067 = vtanh.f32 %v11914_v5  ;;  %v5506_v9 = vand.u32 2147483647, %v11926_v44  ;;  %vm5502_vm9 = vweird.f32 %v11926_v44  ;;  %v13210_v5 = vld [vmem:[#allocation138_spill] sm:$0xff]  ;;  %v5509_v15 = vor.u32 1.1754944e-38, %v5508_v42 }
 0xef3   : > { %v12004_v55 = vadd.f32 %v5655_v13, %v11589_v16  ;;  %v5336_v52 = vadd.f32 %v4941_v45, %v11611_v3  ;;  %v5500_v29 = vmul.f32 %v7058_v47, %v5499_v34  ;;  %v5260_v16 = vsel %vm12011_vm8, %v11791_v23, %v11958_v18  ;;  %vm5504_vm10 = vmor %vm5502_vm9, %vm5503_vm7  ;;  %v13211_v44 = vld [vmem:[#allocation38_spill] sm:$0xff] }
 0xef4   : > { %v5278_v3 = vand.u32 2147483648, %v11846_v38  ;;  %v5716_v51 = vmul.f32 %v7062_v48, %v5700_v57  ;;  %7069 = vrcp.f32 %v11955_v41  ;;  %v5022_v61 = vadd.f32 %v13210_v5, %v4760_v59 }
 0xef5   : > { %v7064_v24 = vpop.eup %7063  ;;  %v6428_v0 = vmul.f32 -1.442695, %v5336_v52  ;;  %v5501_v49 = vadd.f32 %v7058_v47, %v5500_v29  ;;  %v5269_v23 = vsub.f32 1.0, %v5268_v21  ;;  %v12034_v34 = vadd.f32 %v13211_v44, %v8446_v2 }
 0xef6   : > { %v12023_v27 = vpop.eup %7065  ;;  %v12027_v54 = vadd.f32 1.0, %v7064_v24  ;;  %v4989_v25 = vpop.f32.mrf.mxu2  ;;  %v12037_v45 = vor.u32 1.1754944e-38, %v5278_v3  ;;  %vm5507_vm11 = vcmp.eq.f32.partialorder %v5506_v9, 8.507059e+37  ;;  %v12043_v22 = vsel %vm11987_vm4, %v11824_v20, %v5260_v16  ;;  %v13213_v24 = vld [vmem:[#allocation25_spill] sm:$0xff] }
 0xef7   : > { %v5513_v18 = vmul.f32 %v12023_v27, %v11975_v12  ;;  %7071 = vpow2.f32 %v6428_v0  ;;  %v5505_v36 = vsel %vm5504_vm10, %v7058_v47, %v5501_v49  ;;  %vm5272_vm12 = vweird.f32 %v11846_v38 }
 0xef8   : > { %7073 = vrcp.f32 %v12027_v54  ;;  %v4943_v13 = vpop.f32.mrf.mxu1  ;;  %v5510_v47 = vsel %vm5507_vm11, %v5509_v15, %v5505_v36  ;;  %v7068_v59 = vpop.eup %7067  ;;  %vm5273_vm13 = vweird.f32 %v11911_v6  ;;  %v5291_v42 = vand.u32 2147483647, %v11955_v41 }
 0xef9   : > { %v5514_v31 = vsub.f32 1.0, %v5513_v18  ;;  %v4944_v21 = vadd.f32 %v4943_v13, %v8452_v40  ;;  %v5701_v52 = vsub.f32 1.0, %v5510_v47  ;;  %v5732_v29 = vmul.f32 %v5495_v39, %v13212_v30  ;;  %vm12093_vm3 = vmor %vm5272_vm12, %vm5273_vm13 }
 0xefa   : > { %v6418_v57 = vmul.f32 -1.442695, %v5022_v61  ;;  %v5270_v3 = vmul.f32 %v11911_v6, %v5269_v23  ;;  %v12052_v20 = vpop.eup %7069  ;;  %v5523_v16 = vand.u32 2147483648, %v11975_v12  ;;  %v5733_v0 = vmul.f32 %v5510_v47, %v13213_v24 }
 0xefb   : > { %v5337_v48 = vadd.f32 %v4944_v21, %v11669_v10  ;;  %v5515_v33 = vmul.f32 %v12023_v27, %v5514_v31  ;;  %v5717_v9 = vmul.f32 %v7068_v59, %v5701_v52  ;;  %v12056_v49 = vadd.f32 %v5732_v29, %v5716_v51 }
 0xefc   : > { %vm5518_vm14 = vweird.f32 %v12023_v27  ;;  %v5521_v10 = vand.u32 2147483647, %v11975_v12  ;;  %7075 = vtanh.f32 %v11963_v35  ;;  %v5293_v13 = vand.u32 2147483648, %v11955_v41 }
 0xefd   : > { %v7072_v5 = vpop.eup %7071  ;;  %v6429_v18 = vmul.f32 -1.442695, %v5337_v48  ;;  %v5516_v39 = vadd.f32 %v12023_v27, %v5515_v33  ;;  %v12064_v15 = vadd.f32 %v5733_v0, %v5717_v9  ;;  %v5761_v51 = vpack.c.bf16 %v12056_v49, %v11977_v14  ;;  %v6457_v49 = vld [vmem:[#allocation8 + $0x1b4] sm:$0xf] }
 0xefe   : > { %v7074_v61 = vpop.eup %7073  ;;  %v12062_v23 = vadd.f32 1.0, %v7072_v5  ;;  %v4992_v36 = vpop.f32.mrf.mxu2  ;;  %vm5517_vm15 = vweird.f32 %v11975_v12  ;;  %v12072_v31 = vadd.f32 1.0, %v12001_v26  ;;  %v5271_v21 = vadd.f32 %v11911_v6, %v5270_v3  ;;  %v13219_v3 = vld [vmem:[#allocation26_spill] sm:$0xff] }
 0xeff   : > { %v5528_v44 = vmul.f32 %v7074_v61, %v12027_v54  ;;  %7077 = vpow2.f32 %v6429_v18  ;;  %vm12078_vm0 = vcmp.eq.f32.partialorder %v5276_v11, 8.507059e+37  ;;  %vm5519_vm1 = vmor %vm5517_vm15, %vm5518_vm14  ;;  %v5524_v59 = vor.u32 1.1754944e-38, %v5523_v16 }
 0xf00   : > { %7079 = vrcp.f32 %v12062_v23  ;;  %v4945_v35 = vpop.f32.mrf.mxu1  ;;  %v5520_v26 = vsel %vm5519_vm1, %v12023_v27, %v5516_v39  ;;  %vm5522_vm2 = vcmp.eq.f32.partialorder %v5521_v10, 8.507059e+37  ;;  %v4990_v30 = vadd.f32 %v4989_v25, %v8821_v19 }
 0xf01   : > { %v5529_v52 = vsub.f32 1.0, %v5528_v44  ;;  %v4946_v12 = vadd.f32 %v4945_v35, %v8452_v40  ;;  %7081 = vpow2.f32 %v6418_v57  ;;  %v5538_v29 = vand.u32 2147483648, %v12027_v54  ;;  %v13218_v35 = vld [vmem:[#allocation28_spill] sm:$0xff] }
 0xf02   : > { %v5525_v48 = vsel %vm5522_vm2, %v5524_v59, %v5520_v26  ;;  %vm5533_vm4 = vweird.f32 %v7074_v61  ;;  %v7076_v16 = vpop.eup %7075  ;;  %7083 = vtanh.f32 %v12004_v55  ;;  %v5275_v25 = vsel %vm12093_vm3, %v11911_v6, %v5271_v21 }
 0xf03   : > { %v5338_v11 = vadd.f32 %v4946_v12, %v11686_v8  ;;  %v5530_v33 = vmul.f32 %v7074_v61, %v5529_v52  ;;  %v5702_v27 = vsub.f32 1.0, %v5525_v48  ;;  %v12101_v57 = vor.u32 1.1754944e-38, %v5293_v13 }
 0xf04   : > { %v5536_v8 = vand.u32 2147483647, %v12027_v54  ;;  %vm5532_vm5 = vweird.f32 %v12027_v54  ;;  %7085 = vrcp.f32 %v12072_v31  ;;  %v5656_v55 = vmul.f32 %v11784_v60, %v4990_v30 }
 0xf05   : > { %v7078_v9 = vpop.eup %7077  ;;  %v6430_v38 = vmul.f32 -1.442695, %v5338_v11  ;;  %v5531_v24 = vadd.f32 %v7074_v61, %v5530_v33  ;;  %v5718_v0 = vmul.f32 %v7076_v16, %v5702_v27  ;;  %v5283_v6 = vmul.f32 %v12052_v20, %v11955_v41  ;;  %vm5534_vm6 = vmor %vm5532_vm5, %vm5533_vm4 }
 0xf06   : > { %v12105_v5 = vpop.eup %7079  ;;  %v12109_v18 = vadd.f32 1.0, %v7078_v9  ;;  %v4994_v39 = vpop.f32.mrf.mxu2  ;;  %v5539_v44 = vor.u32 1.1754944e-38, %v5538_v29  ;;  %v12118_v21 = vadd.f32 %v13218_v35, %v8446_v2  ;;  %v4993_v60 = vadd.f32 %v4992_v36, %v8821_v19 }
 0xf07   : > { %v5543_v10 = vmul.f32 %v12105_v5, %v12062_v23  ;;  %7087 = vpow2.f32 %v6430_v38  ;;  %v5535_v54 = vsel %vm5534_vm6, %v7074_v61, %v5531_v24  ;;  %v7082_v13 = vpop.eup %7081  ;;  %vm5537_vm7 = vcmp.eq.f32.partialorder %v5536_v8, 8.507059e+37 }
 0xf08   : > { %7089 = vrcp.f32 %v12109_v18  ;;  %v4948_v59 = vpop.f32.mrf.mxu1  ;;  %v12126_v26 = vsel %vm12078_vm0, %v12037_v45, %v5275_v25  ;;  %v5540_v61 = vsel %vm5537_vm7, %v5539_v44, %v5535_v54  ;;  %v7084_v30 = vpop.eup %7083  ;;  %v5672_v29 = vadd.f32 %v5656_v55, %v11623_v56  ;;  %v13220_v25 = vld [vmem:[#allocation27_spill] sm:$0xff] }
 0xf09   : > { %v5544_v52 = vsub.f32 1.0, %v5543_v10  ;;  %v4949_v12 = vadd.f32 %v4948_v59, %v8452_v40  ;;  %v5284_v2 = vsub.f32 1.0, %v5283_v6  ;;  %v5703_v11 = vsub.f32 1.0, %v5540_v61 }
 0xf0a   : > { %v5734_v33 = vmul.f32 %v5525_v48, %v13219_v3  ;;  %v12130_v27 = vadd.f32 1.0, %v7082_v13  ;;  %v5553_v8 = vand.u32 2147483648, %v12062_v23  ;;  %v12135_v9 = vpop.eup %7085  ;;  %v5657_v45 = vmul.f32 %v11936_v32, %v4993_v60 }
 0xf0b   : > { %v5339_v36 = vadd.f32 %v4949_v12, %v11768_v62  ;;  %v5545_v16 = vmul.f32 %v12105_v5, %v5544_v52  ;;  %v5719_v47 = vmul.f32 %v7084_v30, %v5703_v11  ;;  %v5735_v38 = vmul.f32 %v5540_v61, %v13220_v25 }
 0xf0c   : > { %v12139_v56 = vadd.f32 %v5734_v33, %v5718_v0  ;;  %vm5288_vm8 = vweird.f32 %v12052_v20  ;;  %vm5548_vm9 = vweird.f32 %v12105_v5  ;;  %v5551_v62 = vand.u32 2147483647, %v12062_v23 }
 0xf0d   : > { %v7088_v24 = vpop.eup %7087  ;;  %v6431_v55 = vmul.f32 -1.442695, %v5339_v36  ;;  %v5546_v48 = vadd.f32 %v12105_v5, %v5545_v16  ;;  %7091 = vtanh.f32 %v5672_v29  ;;  %v12147_v32 = vadd.f32 %v5735_v38, %v5719_v47 }
 0xf0e   : > { %v7090_v6 = vpop.eup %7089  ;;  %v12145_v10 = vadd.f32 1.0, %v7088_v24  ;;  %v5762_v0 = vpack.c.bf16 %v12139_v56, %v12064_v15  ;;  %v4997_v44 = vpop.f32.mrf.mxu2  ;;  %v5285_v13 = vmul.f32 %v12052_v20, %v5284_v2  ;;  %vm5287_vm10 = vweird.f32 %v11955_v41  ;;  %v6550_v15 = vld [vmem:[#allocation8 + $0x1d8] sm:$0xf0]  ;;  %v6449_v56 = vld [vmem:[#allocation8 + $0x114] sm:$0xf] }
 0xf0f   : > { %v5558_v54 = vmul.f32 %v7090_v6, %v12109_v18  ;;  %7093 = vpow2.f32 %v6431_v55  ;;  %vm5547_vm11 = vweird.f32 %v12062_v23  ;;  %v5673_v35 = vadd.f32 %v5657_v45, %v11672_v37  ;;  %vm12196_vm1 = vmor %vm5287_vm10, %vm5288_vm8 }
 0xf10   : > { %7095 = vrcp.f32 %v12145_v10  ;;  %v4950_v60 = vpop.f32.mrf.mxu1  ;;  %v5298_v59 = vmul.f32 %v12135_v9, %v12072_v31  ;;  %vm5549_vm12 = vmor %vm5547_vm11, %vm5548_vm9  ;;  %v5554_v52 = vor.u32 1.1754944e-38, %v5553_v8  ;;  %vm5552_vm13 = vcmp.eq.f32.partialorder %v5551_v62, 8.507059e+37 }
 0xf11   : > { %v5559_v12 = vsub.f32 1.0, %v5558_v54  ;;  %v4951_v61 = vadd.f32 %v4950_v60, %v8452_v40  ;;  %v5550_v30 = vsel %vm5549_vm12, %v12105_v5, %v5546_v48  ;;  %7097 = vrcp.f32 %v12130_v27 }
 0xf12   : > { %v4995_v37 = vadd.f32 %v4994_v39, %v8821_v19  ;;  %v5568_v23 = vand.u32 2147483648, %v12109_v18  ;;  %v5555_v29 = vsel %vm5552_vm13, %v5554_v52, %v5550_v30  ;;  %vm5563_vm14 = vweird.f32 %v7090_v6 }
 0xf13   : > { %v5340_v2 = vadd.f32 %v4951_v61, %v11850_v58  ;;  %v5560_v11 = vmul.f32 %v7090_v6, %v5559_v12  ;;  %v5704_v3 = vsub.f32 1.0, %v5555_v29  ;;  %v7092_v33 = vpop.eup %7091  ;;  %7099 = vtanh.f32 %v5673_v35 }
 0xf14   : > { %v12168_v36 = vadd.f32 %v12052_v20, %v5285_v13  ;;  %v5308_v5 = vand.u32 2147483648, %v12072_v31  ;;  %v5566_v16 = vand.u32 2147483647, %v12109_v18  ;;  %vm5562_vm15 = vweird.f32 %v12109_v18 }
 0xf15   : > { %v7094_v8 = vpop.eup %7093  ;;  %v6432_v45 = vmul.f32 -1.442695, %v5340_v2  ;;  %v5561_v39 = vadd.f32 %v7090_v6, %v5560_v11  ;;  %v5720_v47 = vmul.f32 %v7092_v33, %v5704_v3  ;;  %v5658_v58 = vmul.f32 %v12043_v22, %v4995_v37  ;;  %vm12180_vm0 = vmor %vm5562_vm15, %vm5563_vm14  ;;  %v13225_v11 = vld [vmem:[#allocation80_spill] sm:$0xff] }
 0xf16   : > { %v12173_v25 = vpop.eup %7095  ;;  %v12176_v38 = vadd.f32 1.0, %v7094_v8  ;;  %v5299_v24 = vsub.f32 1.0, %v5298_v59  ;;  %v5306_v55 = vand.u32 2147483647, %v12072_v31  ;;  %v5569_v54 = vor.u32 1.1754944e-38, %v5568_v23  ;;  %v4999_v52 = vpop.f32.mrf.mxu2 }
 0xf17   : > { %v5573_v62 = vmul.f32 %v12173_v25, %v12145_v10  ;;  %7101 = vpow2.f32 %v6432_v45  ;;  %v5565_v18 = vsel %vm12180_vm0, %v7090_v6, %v5561_v39  ;;  %v12188_v13 = vpop.eup %7097  ;;  %v4998_v22 = vadd.f32 %v4997_v44, %v8821_v19 }
 0xf18   : > { %7103 = vrcp.f32 %v12176_v38  ;;  %v4953_v60 = vpop.f32.mrf.mxu1  ;;  %v12200_v59 = vor.u32 1.1754944e-38, %v5308_v5  ;;  %vm5567_vm2 = vcmp.eq.f32.partialorder %v5566_v16, 8.507059e+37  ;;  %v5290_v12 = vsel %vm12196_vm1, %v12052_v20, %v12168_v36 }
 0xf19   : > { %v5574_v6 = vsub.f32 1.0, %v5573_v62  ;;  %v4954_v44 = vadd.f32 %v4953_v60, %v8452_v40  ;;  %v5570_v61 = vsel %vm5567_vm2, %v5569_v54, %v5565_v18  ;;  %v7100_v30 = vpop.eup %7099  ;;  %v5674_v37 = vadd.f32 %v5658_v58, %v11709_v1 }
 0xf1a   : > { %v5300_v23 = vmul.f32 %v12135_v9, %v5299_v24  ;;  %v5705_v2 = vsub.f32 1.0, %v5570_v61  ;;  %v5736_v3 = vmul.f32 %v5555_v29, %v13225_v11  ;;  %vm12212_vm3 = vcmp.eq.f32.partialorder %v5291_v42, 8.507059e+37  ;;  %v13228_v29 = vld [vmem:[#allocation83_spill] sm:$0xff] }
 0xf1b   : > { %v5341_v5 = vadd.f32 %v4954_v44, %v12034_v34  ;;  %v5575_v20 = vmul.f32 %v12173_v25, %v5574_v6  ;;  %v5581_v36 = vand.u32 2147483647, %v12145_v10  ;;  %v5583_v16 = vand.u32 2147483648, %v12145_v10 }
 0xf1c   : > { %v5659_v1 = vmul.f32 %v12126_v26, %v4998_v22  ;;  %vm5302_vm4 = vweird.f32 %v12072_v31  ;;  %v5721_v8 = vmul.f32 %v7100_v30, %v5705_v2  ;;  %v5737_v45 = vmul.f32 %v5570_v61, %v13228_v29 }
 0xf1d   : > { %v12223_v41 = vadd.f32 %v5736_v3, %v5720_v47  ;;  %v7102_v42 = vpop.eup %7101  ;;  %v6433_v39 = vmul.f32 -1.442695, %v5341_v5  ;;  %v5313_v34 = vmul.f32 %v12188_v13, %v12130_v27  ;;  %v5576_v58 = vadd.f32 %v12173_v25, %v5575_v20 }
 0xf1e   : > { %vm5578_vm5 = vweird.f32 %v12173_v25  ;;  %v7104_v24 = vpop.eup %7103  ;;  %7105 = vtanh.f32 %v5674_v37  ;;  %v12229_v48 = vadd.f32 1.0, %v7102_v42  ;;  %v12231_v26 = vadd.f32 %v5737_v45, %v5721_v8  ;;  %v5002_v2 = vpop.f32.mrf.mxu2 }
 0xf1f   : > { %v5763_v62 = vpack.c.bf16 %v12223_v41, %v12147_v32  ;;  %v5588_v47 = vmul.f32 %v7104_v24, %v12176_v38  ;;  %7107 = vpow2.f32 %v6433_v39  ;;  %vm5303_vm6 = vweird.f32 %v12135_v9  ;;  %v4855_v42 = vpop.f32.mrf.mxu3  ;;  %v6551_v32 = vld [vmem:[#allocation8 + $0x228] sm:$0xf0] }
 0xf20   : > { %vm5577_vm7 = vweird.f32 %v12145_v10  ;;  %v5675_v18 = vadd.f32 %v5659_v1, %v11778_v63  ;;  %7109 = vrcp.f32 %v12229_v48  ;;  %v4955_v54 = vpop.f32.mrf.mxu1  ;;  %vm5582_vm9 = vcmp.eq.f32.partialorder %v5581_v36, 8.507059e+37  ;;  %vm12259_vm13 = vmor %vm5302_vm4, %vm5303_vm6 }
 0xf21   : > { %vm5579_vm8 = vmor %vm5577_vm7, %vm5578_vm5  ;;  %v5584_v22 = vor.u32 1.1754944e-38, %v5583_v16  ;;  %v5589_v35 = vsub.f32 1.0, %v5588_v47  ;;  %v5000_v60 = vadd.f32 %v4999_v52, %v8821_v19  ;;  %vm12241_vm10 = vcmp.eq.f32.partialorder %v5306_v55, 8.507059e+37 }
 0xf22   : > { %v4956_v44 = vadd.f32 %v4955_v54, %v8452_v40  ;;  %v5580_v61 = vsel %vm5579_vm8, %v12173_v25, %v5576_v58  ;;  %v5301_v10 = vadd.f32 %v12135_v9, %v5300_v23  ;;  %v5314_v63 = vsub.f32 1.0, %v5313_v34  ;;  %v13233_v58 = vld [vmem:[#allocation87_spill] sm:$0xff] }
 0xf23   : > { %v5598_v30 = vand.u32 2147483648, %v12176_v38  ;;  %v5585_v37 = vsel %vm5582_vm9, %v5584_v22, %v5580_v61  ;;  %v5590_v3 = vmul.f32 %v7104_v24, %v5589_v35  ;;  %vm5593_vm11 = vweird.f32 %v7104_v24 }
 0xf24   : > { %v5342_v11 = vadd.f32 %v4956_v44, %v12118_v21  ;;  %v5706_v52 = vsub.f32 1.0, %v5585_v37  ;;  %v7106_v55 = vpop.eup %7105  ;;  %7111 = vtanh.f32 %v5675_v18  ;;  %v5295_v40 = vsel %vm12212_vm3, %v12101_v57, %v5290_v12 }
 0xf25   : > { %vm5592_vm12 = vweird.f32 %v12176_v38  ;;  %v5596_v25 = vand.u32 2147483647, %v12176_v38  ;;  %v7108_v23 = vpop.eup %7107  ;;  %v5660_v5 = vmul.f32 %v5295_v40, %v5000_v60  ;;  %v5591_v36 = vadd.f32 %v7104_v24, %v5590_v3 }
 0xf26   : > { %v6434_v20 = vmul.f32 -1.442695, %v5342_v11  ;;  %v5722_v16 = vmul.f32 %v7106_v55, %v5706_v52  ;;  %v7110_v1 = vpop.eup %7109  ;;  %v12263_v33 = vadd.f32 1.0, %v7108_v23  ;;  %v5305_v57 = vsel %vm12259_vm13, %v12135_v9, %v5301_v10  ;;  %vm5594_vm15 = vmor %vm5592_vm12, %vm5593_vm11 }
 0xf27   : > { %v5315_v38 = vmul.f32 %v12188_v13, %v5314_v63  ;;  %vm5317_vm14 = vweird.f32 %v12130_v27  ;;  %v5603_v31 = vmul.f32 %v7110_v1, %v12229_v48  ;;  %v5595_v12 = vsel %vm5594_vm15, %v7104_v24, %v5591_v36  ;;  %v13234_v63 = vld [vmem:[#allocation90_spill] sm:$0xff] }
 0xf28   : > { %7113 = vpow2.f32 %v6434_v20  ;;  %v5599_v8 = vor.u32 1.1754944e-38, %v5598_v30  ;;  %v5003_v29 = vadd.f32 %v5002_v2, %v8821_v19  ;;  %v5323_v45 = vand.u32 2147483648, %v12130_v27 }
 0xf29   : > { %7115 = vrcp.f32 %v12263_v33  ;;  %vm5597_vm0 = vcmp.eq.f32.partialorder %v5596_v25, 8.507059e+37  ;;  %v5604_v9 = vsub.f32 1.0, %v5603_v31  ;;  %v5676_v39 = vadd.f32 %v5660_v5, %v11918_v4 }
 0xf2a   : > { %v5600_v34 = vsel %vm5597_vm0, %v5599_v8, %v5595_v12  ;;  %v5738_v47 = vmul.f32 %v5585_v37, %v13233_v58  ;;  %v7112_v18 = vpop.eup %7111  ;;  %v5310_v24 = vsel %vm12241_vm10, %v12200_v59, %v5305_v57  ;;  %v5316_v54 = vadd.f32 %v12188_v13, %v5315_v38  ;;  %v5004_v59 = vpop.f32.mrf.mxu2 }
 0xf2b   : > { %vm5318_vm1 = vweird.f32 %v12188_v13  ;;  %v5707_v22 = vsub.f32 1.0, %v5600_v34  ;;  %v5605_v35 = vmul.f32 %v7110_v1, %v5604_v9  ;;  %vm5608_vm2 = vweird.f32 %v7110_v1  ;;  %v4857_v8 = vpop.f32.mrf.mxu3 }
 0xf2c   : > { %v5613_v60 = vand.u32 2147483648, %v12229_v48  ;;  %v12283_v44 = vadd.f32 %v5738_v47, %v5722_v16  ;;  %v5661_v4 = vmul.f32 %v5310_v24, %v5003_v29  ;;  %v5611_v61 = vand.u32 2147483647, %v12229_v48  ;;  %vm12289_vm3 = vmor %vm5317_vm14, %vm5318_vm1 }
 0xf2d   : > { %v5723_v10 = vmul.f32 %v7112_v18, %v5707_v22  ;;  %v5739_v30 = vmul.f32 %v5600_v34, %v13234_v63  ;;  %7117 = vtanh.f32 %v5676_v39  ;;  %v5606_v2 = vadd.f32 %v7110_v1, %v5605_v35  ;;  %v13237_v39 = vld [vmem:[#allocation94_spill] sm:$0xff] }
 0xf2e   : > { %v7114_v37 = vpop.eup %7113  ;;  %vm5607_vm4 = vweird.f32 %v12229_v48  ;;  %v5764_v11 = vpack.c.bf16 %v12283_v44, %v12231_v26  ;;  %v4856_v52 = vadd.f32 %v4855_v42, %v12852_v53  ;;  %v5321_v40 = vand.u32 2147483647, %v12130_v27  ;;  %v373_v26 = vld [vmem:[%s7682_s23 + $0x80] sm:$0xff]  ;;  %v374_v44 = vld [vmem:[%s7682_s23 + $0x88] sm:$0xff] }
 0xf2f   : > { %v7116_v3 = vpop.eup %7115  ;;  %v5406_v55 = vadd.f32 1.0, %v7114_v37  ;;  %vm5609_vm5 = vmor %vm5607_vm4, %vm5608_vm2  ;;  %v12299_v25 = vadd.f32 %v5739_v30, %v5723_v10  ;;  %v5320_v5 = vsel %vm12289_vm3, %v12188_v13, %v5316_v54  ;;  %v5614_v21 = vor.u32 1.1754944e-38, %v5613_v60 }
 0xf30   : > { %v5618_v23 = vmul.f32 %v7116_v3, %v12263_v33  ;;  %v5610_v48 = vsel %vm5609_vm5, %v7110_v1, %v5606_v2  ;;  %v5677_v20 = vadd.f32 %v5661_v4, %v4856_v52  ;;  %v5005_v36 = vadd.f32 %v5004_v59, %v8821_v19  ;;  %v13238_v59 = vld [vmem:[#allocation97_spill] sm:$0xff] }
 0xf31   : > { %7119 = vrcp.f32 %v5406_v55  ;;  %vm5612_vm6 = vcmp.eq.f32.partialorder %v5611_v61, 8.507059e+37  ;;  %v5324_v57 = vor.u32 1.1754944e-38, %v5323_v45  ;;  %vm5322_vm7 = vcmp.eq.f32.partialorder %v5321_v40, 8.507059e+37 }
 0xf32   : > { %v5619_v16 = vsub.f32 1.0, %v5618_v23  ;;  %v5615_v27 = vsel %vm5612_vm6, %v5614_v21, %v5610_v48  ;;  %v5628_v38 = vand.u32 2147483648, %v12263_v33  ;;  %vm5623_vm8 = vweird.f32 %v7116_v3  ;;  %v13239_v48 = vld [vmem:[#allocation101_spill] sm:$0xff] }
 0xf33   : > { %v5708_v31 = vsub.f32 1.0, %v5615_v27  ;;  %v7118_v12 = vpop.eup %7117  ;;  %v5325_v42 = vsel %vm5322_vm7, %v5324_v57, %v5320_v5  ;;  %v5626_v13 = vand.u32 2147483647, %v12263_v33  ;;  %7121 = vtanh.f32 %v5677_v20  ;;  %v6461_v57 = vld [vmem:[#allocation8 + $0x204] sm:$0xf] }
 0xf34   : > { %v5620_v29 = vmul.f32 %v7116_v3, %v5619_v16  ;;  %v5662_v1 = vmul.f32 %v5325_v42, %v5005_v36  ;;  %v5740_v19 = vmul.f32 %v5615_v27, %v13237_v39  ;;  %vm5622_vm9 = vweird.f32 %v12263_v33  ;;  %v6552_v16 = vld [vmem:[#allocation8 + $0x278] sm:$0xf0]  ;;  %v6437_v42 = vld [vmem:[#allocation8 + $0x24] sm:$0xf] }
 0xf35   : > { %v5724_v9 = vmul.f32 %v7118_v12, %v5708_v31  ;;  %v4858_v58 = vadd.f32 %v4857_v8, %v12852_v53  ;;  %vm5624_vm10 = vmor %vm5622_vm9, %vm5623_vm8  ;;  %v5629_v47 = vor.u32 1.1754944e-38, %v5628_v38  ;;  %vm5627_vm11 = vcmp.eq.f32.partialorder %v5626_v13, 8.507059e+37  ;;  %v376_v27 = vld [vmem:[%s7682_s23 + $0x98] sm:$0xff]  ;;  %v6441_v31 = vld [vmem:[#allocation8 + $0x74] sm:$0xf] }
 0xf36   : > { %v5621_v45 = vadd.f32 %v7116_v3, %v5620_v29  ;;  %v5641_v63 = vand.u32 2147483647, %v5406_v55  ;;  %v5643_v30 = vand.u32 2147483648, %v5406_v55  ;;  %vm5637_vm13 = vweird.f32 %v5406_v55  ;;  %v6546_v8 = vld [vmem:[#allocation8 + $0x98] sm:$0xf0] }
 0xf37   : > { %v7120_v34 = vpop.eup %7119  ;;  %v5756_v18 = vadd.f32 %v5740_v19, %v5724_v9  ;;  %v5678_v22 = vadd.f32 %v5662_v1, %v4858_v58  ;;  %v377_v41 = vpack.c.bf16 %v374_v44, %v373_v26  ;;  %v6462_v14 = vor.u32 %v6551_v32, %v6461_v57  ;;  %v6545_v13 = vld [vmem:[#allocation8 + $0x48] sm:$0xf0] }
 0xf38   : > { %v5633_v24 = vmul.f32 %v7120_v34, %v5406_v55  ;;  %v5625_v54 = vsel %vm5624_vm10, %v7116_v3, %v5621_v45  ;;  %vm5638_vm12 = vweird.f32 %v7120_v34  ;;  %v5644_v3 = vor.u32 1.1754944e-38, %v5643_v30  ;;  %v6465_v55 = vld [vmem:[#allocation8 + $0x254] sm:$0xf] }
 0xf39   : > { %v5630_v35 = vsel %vm5627_vm11, %v5629_v47, %v5625_v54  ;;  %v5765_v60 = vpack.c.bf16 %v5756_v18, %v12299_v25  ;;  %v7122_v10 = vpop.eup %7121  ;;  %7123 = vtanh.f32 %v5678_v22  ;;  %vm5639_vm14 = vmor %vm5637_vm13, %vm5638_vm12  ;;  %vm5642_vm15 = vcmp.eq.f32.partialorder %v5641_v63, 8.507059e+37  ;;  %v7256_v47 = vld [vmem:[#allocation10] sm:$0xff]  ;;  %v7257_v22 = vld [vmem:[#allocation10 + $0x8] sm:$0xff] }
 0xf3a   : > { %v5634_v4 = vsub.f32 1.0, %v5633_v24  ;;  %v5709_v61 = vsub.f32 1.0, %v5630_v35  ;;  %v5741_v53 = vmul.f32 %v5630_v35, %v13238_v59  ;;  %v6458_v28 = vor.u32 %v6550_v15, %v6457_v49 }
 0xf3b   : > { %v6442_v29 = vor.u32 %v6546_v8, %v6441_v31  ;;  %v6438_v1 = vor.u32 %v6545_v13, %v6437_v42  ;;  %v5788_v18 = vperm.slane %v7256_v47, 3  ;;  %v5868_v35 = vperm.slane %v7257_v22, 3 }
 0xf3c   : > { %v5635_v33 = vmul.f32 %v7120_v34, %v5634_v4  ;;  %v5725_v37 = vmul.f32 %v7122_v10, %v5709_v61 }
 0xf3e   : > { %v5636_v6 = vadd.f32 %v7120_v34, %v5635_v33  ;;  %v5757_v2 = vadd.f32 %v5741_v53, %v5725_v37 }
 0xf3f   : > { %v7124_v23 = vpop.eup %7123 }
 0xf40   : > { %v5640_v52 = vsel %vm5639_vm14, %v7120_v34, %v5636_v6 }
 0xf41   : > { %v5645_v40 = vsel %vm5642_vm15, %v5644_v3, %v5640_v52 }
 0xf42   : > { %v5710_v25 = vsub.f32 1.0, %v5645_v40  ;;  %v5742_v21 = vmul.f32 %v5645_v40, %v13239_v48 }
 0xf44   : > { %v5726_v5 = vmul.f32 %v7124_v23, %v5710_v25 }
 0xf46   : > { %v5758_v20 = vadd.f32 %v5742_v21, %v5726_v5 }
 0xf48   : > { %v5766_v36 = vpack.c.bf16 %v5758_v20, %v5757_v2 }
 0xf4a   : > { %5767 = vmatpush.bf16.msra.mxu3 %v5766_v36 }
 0xf4e   : > { %5768 = vmatpush.bf16.msra.mxu3 %v5765_v60 }
 0xf52   : > { %5769 = vmatpush.bf16.msra.mxu3 %v5764_v11  ;;  %v6466_v11 = vor.u32 %v6552_v16, %v6465_v55 }
 0xf56   : > { %5770 = vmatpush.bf16.msra.mxu3 %v5763_v62  ;;  %v375_v62 = vld [vmem:[%s7682_s23 + $0x90] sm:$0xff] }
 0xf57   : > { %v378_v43 = vpack.c.bf16 %v376_v27, %v375_v62 }
 0xf5a   : > { %5771 = vmatpush.bf16.msra.mxu3 %v5762_v0  ;;  %v6548_v0 = vld [vmem:[#allocation8 + $0x138] sm:$0xf0] }
 0xf5b   : > { %v6450_v38 = vor.u32 %v6548_v0, %v6449_v56 }
 0xf5e   : > { %5772 = vmatpush.bf16.msra.mxu3 %v5761_v51 }
 0xf62   : > { %5773 = vmatpush.bf16.msra.mxu3 %v5760_v17  ;;  %v6549_v17 = vld [vmem:[#allocation8 + $0x188] sm:$0xf0] }
 0xf63   : > { %v6454_v51 = vor.u32 %v6549_v17, %v6453_v50 }
 0xf66   : > { %5774 = vmatpush.bf16.msra.mxu3 %v5759_v7  ;;  %v6547_v7 = vld [vmem:[#allocation8 + $0xe8] sm:$0xf0] }
 0xf67   : > { %v6446_v12 = vor.u32 %v6547_v7, %v6445_v46 }
 0xf69   : > { %5775 = vmatmul.bf16.vlgmr.msra.gmra.mxu3 %v377_v41 }
 0xf6a   : > { %5837 = vmatpush.bf16.msrb.mxu3 %v6466_v11 }
 0xf6e   : > { %5838 = vmatpush.bf16.msrb.mxu3 %v6462_v14 }
 0xf72   : > { %5839 = vmatpush.bf16.msrb.mxu3 %v6458_v28 }
 0xf76   : > { %5840 = vmatpush.bf16.msrb.mxu3 %v6454_v51 }
 0xf79   : > { %5780 = vmatmul.bf16.gmra.mxu3 %v378_v43 }
 0xf7a   : > { %5841 = vmatpush.bf16.msrb.mxu3 %v6450_v38 }
 0xf7e   : > { %5842 = vmatpush.bf16.msrb.mxu3 %v6446_v12 }
 0xf82   : > { %5843 = vmatpush.bf16.msrb.mxu3 %v6442_v29 }
 0xf86   : > { %5844 = vmatpush.bf16.msrb.mxu3 %v6438_v1 }
 0xfec   : > { %v5776_v9 = vpop.f32.mrf.mxu3 }
 0xff4   : > { %v5778_v39 = vpop.f32.mrf.mxu3 }
 0xff5   : > { %v5786_v19 = vpack.c.bf16 %v5778_v39, %v5776_v9 }
 0xff7   : > { %5845 = vmatmul.bf16.vlgmr.msrb.gmra.mxu3 %v5786_v19 }
 0xffc   : > { %v5781_v45 = vpop.f32.mrf.mxu3 }
0x1004   : > { %v5783_v34 = vpop.f32.mrf.mxu3 }
0x1005   : > { %v5787_v58 = vpack.c.bf16 %v5783_v34, %v5781_v45 }
0x1007   : > { %5850 = vmatmul.bf16.gmra.mxu3 %v5787_v58 }
0x107a   : > { %v5846_v24 = vpop.f32.mrf.mxu3 }
0x107b   : > { %v5847_v54 = vadd.f32 %v5846_v24, %v5788_v18 }
0x107d   : > { %v5860_v60 = vmul.f32 0.01, %v5847_v54  ;;  %vm5856_vm0 = vcmp.gt.f32.partialorder %v5847_v54, 0.0 }
0x107f   : > { %v5864_v4 = vsel %vm5856_vm0, %v5847_v54, %v5860_v60 }
0x1080   : > { %v5869_v61 = vmul.f32 %v5868_v35, %v5864_v4 }
0x1082   : > { %v5848_v10 = vpop.f32.mrf.mxu3  ;;  %5873 = vadd.xlane.f32.xlu0 %v5869_v61 }
0x1083   : > { %v5849_v63 = vadd.f32 %v5848_v10, %v5788_v18 }
0x1085   : > { %v5861_v30 = vmul.f32 0.01, %v5849_v63  ;;  %vm5857_vm1 = vcmp.gt.f32.partialorder %v5849_v63, 0.0 }
0x1087   : > { %v5865_v33 = vsel %vm5857_vm1, %v5849_v63, %v5861_v30 }
0x1088   : > { %v5870_v37 = vmul.f32 %v5868_v35, %v5865_v33 }
0x108a   : > { %5875 = vadd.xlane.f32.xlu1 %v5870_v37  ;;  %v5851_v59 = vpop.f32.mrf.mxu3 }
0x108b   : > { %v5852_v53 = vadd.f32 %v5851_v59, %v5788_v18 }
0x108d   : > { %v5862_v6 = vmul.f32 0.01, %v5852_v53  ;;  %vm5858_vm2 = vcmp.gt.f32.partialorder %v5852_v53, 0.0 }
0x108f   : > { %v5866_v2 = vsel %vm5858_vm2, %v5852_v53, %v5862_v6 }
0x1090   : > { %v5871_v3 = vmul.f32 %v5868_v35, %v5866_v2 }
0x1092   : > { %v5853_v52 = vpop.f32.mrf.mxu3  ;;  %5877 = vadd.xlane.f32.xlu2 %v5871_v3 }
0x1093   : > { %v5854_v40 = vadd.f32 %v5853_v52, %v5788_v18 }
0x1095   : > { %v5863_v25 = vmul.f32 0.01, %v5854_v40  ;;  %vm5859_vm3 = vcmp.gt.f32.partialorder %v5854_v40, 0.0 }
0x1097   : > { %v5867_v23 = vsel %vm5859_vm3, %v5854_v40, %v5863_v25 }
0x1098   : > { %v5872_v5 = vmul.f32 %v5868_v35, %v5867_v23 }
0x109a   : > { %5879 = vadd.xlane.f32.xlu0 %v5872_v5 }
0x10f5   : > { %v5874_v48 = vpop.xlane.xlu0 %5873 }
0x10f6   : > { %5881 = vst [vmem:[%s356_s30] sm:$0xff] %v5874_v48 }
0x10fd   : > { %v5876_v21 = vpop.xlane.xlu1 %5875 }
0x10fe   : > { %5882 = vst [vmem:[%s356_s30 + $0x8] sm:$0xff] %v5876_v21 }
0x1105   : > { %v5878_v20 = vpop.xlane.xlu2 %5877 }
0x1106   : > { %5883 = vst [vmem:[%s356_s30 + $0x10] sm:$0xff] %v5878_v20 }
0x110d   : > { %v5880_v36 = vpop.xlane.xlu0 %5879 }
0x110e   : > { %5884 = vst [vmem:[%s356_s30 + $0x18] sm:$0xff] %v5880_v36 }
0x110f   : > { %7435 = shalt.err (!%p7432_p11)
}
0x1110   : > { %s7492_s26 = smov 128   ;;  %s7493_s23 = smov 8  }
0x1111   : > { %6574 = dma.vmem_to_hbm [thread:$0]  (%p7597_p7), %s5899_s9, 512, %s5901_s8, %s5886_s4, %s7492_s26, %s7492_s26, %s7493_s23  }
0x1112 PF: > { %s5915_s13 = sand.u32 1, %s7470_s18   ;;  %p13241_p2 = scmp.ge.s32.totalorder %s7482_s21, 2 }
0x1113   : > { %s5916_s16 = scalar_lea.sflag [#allocation4], %s5915_s13 }
0x1114   : > { %p6594_p13 = pnand %p13241_p2, %p7559_p6 }
0x1116   : > { %p6595_p0 = pneg %p6594_p13 }
0x1118   : > { %7465 = dma.done.wait (%p6595_p0), %s5916_s16, 512  }
0x1119   : > { %7467 = vsyncadd (%p6595_p0), %s5916_s16, 4294966784  ;;  %s13242_s21 = sld [smem:[#allocation18_spill]]  ;;  %s13245_s18 = smov %s7474_s19 }
0x111a   : > { %s13243_s1 = sld [smem:[#allocation16_spill]] }
0x111b   : > { %s13244_s20 = sld [smem:[#allocation19_spill]] }
0x111f   : > { %p22_p8 = scmp.ge.s32.totalorder %s13242_s21, 4  }
0x1120   : > { %s13246_s19 = smov %s13243_s1 }
0x1121   :  { %24 = sbr.rel (!%p22_p8) target bundleno = 12 (0xc), region = 117 }
0x1126   :  { %5922 = vsyncpa [#allocation3], 1 }
0x1127   :  { %5924 = vsyncpa [#allocation3 + $0x1], 1 }
0x1128   :  { %5925 = vsyncpa [#allocation6], 1 }
0x1129   :  { %5927 = vsyncpa [#allocation6 + $0x1], 1 }
0x112a   :  { %5928 = vsyncpa [#allocation9], 1 }
0x112b   :  { %5929 = vsyncpa [#allocation4], 1 }
0x112c   :  { %5931 = vsyncpa [#allocation4 + $0x1], 1 }

</bundles_post_ra>
